<compile_context>
chip_gen: v7x
topology: tpu7x:2x2x1
jax: 0.10.0
libtpu: 0.0.40
codegen_flags: <defaults>
</compile_context>

<pallas_src>
import numpy as np

import jax
import jax.numpy as jnp
from jax.experimental import pallas as pl
from jax.experimental.pallas import tpu as pltpu


# ----------------------------------------------------------------------------
# Tiling / compiler configuration
# ----------------------------------------------------------------------------
_TM_MAX = 1024                       # rows (H*W) per block; multiple of 8 and 128
_VMEM_LIMIT = 48 * 1024 * 1024       # explicit scoped-VMEM budget (safe on v5e/v6e/v7x)

_COMPILER_PARAMS = pltpu.CompilerParams(
    dimension_semantics=("parallel", "parallel"),   # (batch, M-tile) -> both TCs on v7x
    vmem_limit_bytes=_VMEM_LIMIT,
)


def _tile_m(M):
    """Choose the spatial row tile: full-M block when small, else 1024-row tiles."""
    if M <= _TM_MAX:
        return M, M
    Mp = (M + _TM_MAX - 1) // _TM_MAX * _TM_MAX
    return _TM_MAX, Mp


def _pad_rows(x, Mp):
    if x.shape[1] == Mp:
        return x
    return jnp.pad(x, ((0, 0), (0, Mp - x.shape[1]), (0, 0)))


# ----------------------------------------------------------------------------
# Pallas kernels
# ----------------------------------------------------------------------------
def _mm_bn_relu_kernel(p_ref, w_ref, s_ref, b_ref, o_ref):
    # patches (1,TM,K) bf16 @ W (K,Cout) bf16 -> f32, fused folded-BN + ReLU.
    y = jnp.dot(p_ref[0], w_ref[...], preferred_element_type=jnp.float32)
    y = jnp.maximum(y * s_ref[...] + b_ref[...], 0.0)
    o_ref[0] = y.astype(o_ref.dtype)


def _branch_kernel(p_ref, w1_ref, s1_ref, b1_ref, w2_ref, s2_ref, b2_ref, o_ref):
    # Fused 3x3 conv + BN + ReLU + 1x1 conv + BN + ReLU (GUB feature / guide branch).
    y = jnp.dot(p_ref[0], w1_ref[...], preferred_element_type=jnp.float32)
    y = jnp.maximum(y * s1_ref[...] + b1_ref[...], 0.0)
    z = jnp.dot(y.astype(jnp.bfloat16), w2_ref[...], preferred_element_type=jnp.float32)
    z = jnp.maximum(z * s2_ref[...] + b2_ref[...], 0.0)
    o_ref[0] = z.astype(o_ref.dtype)


def _comb_body(p_ref, g_ref, d_ref, w1_ref, s1_ref, b1_ref, w2_ref, s2_ref, b2_ref):
    # SE gate applied to the 3x3 patches (per-channel scaling commutes with im2col),
    # then comb1 3x3 + BN + ReLU, comb2 1x1 + BN + ReLU, residual add (f32).
    pat = (p_ref[0].astype(jnp.float32) * g_ref[0]).astype(jnp.bfloat16)
    y = jnp.dot(pat, w1_ref[...], preferred_element_type=jnp.float32)
    y = jnp.maximum(y * s1_ref[...] + b1_ref[...], 0.0)
    z = jnp.dot(y.astype(jnp.bfloat16), w2_ref[...], preferred_element_type=jnp.float32)
    z = jnp.maximum(z * s2_ref[...] + b2_ref[...], 0.0)
    return z + d_ref[0].astype(jnp.float32)


def _comb_kernel(p_ref, g_ref, d_ref, w1_ref, s1_ref, b1_ref,
                 w2_ref, s2_ref, b2_ref, wr_ref, br_ref, o_ref):
    # comb path + reduce 1x1 (Cout > 1) on the MXU.
    r = _comb_body(p_ref, g_ref, d_ref, w1_ref, s1_ref, b1_ref, w2_ref, s2_ref, b2_ref)
    out = jnp.dot(r.astype(jnp.bfloat16), wr_ref[...], preferred_element_type=jnp.float32)
    o_ref[0] = (out + br_ref[...]).astype(o_ref.dtype)


def _comb_reduce1_kernel(p_ref, g_ref, d_ref, w1_ref, s1_ref, b1_ref,
                         w2_ref, s2_ref, b2_ref, wr_ref, br_ref, o_ref):
    # comb path + Cout=1 reduce as VPU multiply + channel-sum; lane-dense (1, TM) store.
    r = _comb_body(p_ref, g_ref, d_ref, w1_ref, s1_ref, b1_ref, w2_ref, s2_ref, b2_ref)
    out = jnp.sum(r * wr_ref[...], axis=-1) + br_ref[...]     # (TM,) + (1,1) -> (1, TM)
    o_ref[0] = out


# ----------------------------------------------------------------------------
# Pallas wrappers
# ----------------------------------------------------------------------------
def _conv_mm(patches, p):
    # Single conv (as patches matmul) + folded BN + ReLU.  patches: (N, M, K) bf16.
    N, M, K = patches.shape
    Cout = p["w"].shape[1]
    TM, Mp = _tile_m(M)
    pat = _pad_rows(patches, Mp)
    out = pl.pallas_call(
        _mm_bn_relu_kernel,
        out_shape=jax.ShapeDtypeStruct((N, Mp, Cout), jnp.bfloat16),
        grid=(N, Mp // TM),
        in_specs=[
            pl.BlockSpec((1, TM, K), lambda n, t: (n, t, 0)),
            pl.BlockSpec((K, Cout), lambda n, t: (0, 0)),
            pl.BlockSpec((1, Cout), lambda n, t: (0, 0)),
            pl.BlockSpec((1, Cout), lambda n, t: (0, 0)),
        ],
        out_specs=pl.BlockSpec((1, TM, Cout), lambda n, t: (n, t, 0)),
        compiler_params=_COMPILER_PARAMS,
        cost_estimate=pl.CostEstimate(
            flops=2 * N * Mp * K * Cout,
            transcendentals=0,
            bytes_accessed=2 * N * Mp * (K + Cout) + 2 * K * Cout + 8 * Cout),
    )(pat, p["w"], p["scale"], p["bias"])
    return out[:, :M]


def _branch_conv(patches, p3, p1):
    # Fused 3x3+BN+ReLU -> 1x1+BN+ReLU.  patches: (N, M, K) bf16 -> (N, M, C2) bf16.
    N, M, K = patches.shape
    E = p3["w"].shape[1]
    C2 = p1["w"].shape[1]
    TM, Mp = _tile_m(M)
    pat = _pad_rows(patches, Mp)
    out = pl.pallas_call(
        _branch_kernel,
        out_shape=jax.ShapeDtypeStruct((N, Mp, C2), jnp.bfloat16),
        grid=(N, Mp // TM),
        in_specs=[
            pl.BlockSpec((1, TM, K), lambda n, t: (n, t, 0)),
            pl.BlockSpec((K, E), lambda n, t: (0, 0)),
            pl.BlockSpec((1, E), lambda n, t: (0, 0)),
            pl.BlockSpec((1, E), lambda n, t: (0, 0)),
            pl.BlockSpec((E, C2), lambda n, t: (0, 0)),
            pl.BlockSpec((1, C2), lambda n, t: (0, 0)),
            pl.BlockSpec((1, C2), lambda n, t: (0, 0)),
        ],
        out_specs=pl.BlockSpec((1, TM, C2), lambda n, t: (n, t, 0)),
        compiler_params=_COMPILER_PARAMS,
        cost_estimate=pl.CostEstimate(
            flops=2 * N * Mp * (K * E + E * C2),
            transcendentals=0,
            bytes_accessed=2 * N * Mp * (K + C2) + 2 * (K * E + E * C2) + 8 * (E + C2)),
    )(pat, p3["w"], p3["scale"], p3["bias"], p1["w"], p1["scale"], p1["bias"])
    return out[:, :M]


def _comb_conv(patches, gate, depth_flat, p):
    # SE-gated comb1 3x3 + comb2 1x1 + residual add + reduce 1x1, one kernel.
    N, M, K = patches.shape
    in_f = depth_flat.shape[-1]
    E = p["comb1"]["w"].shape[1]
    TM, Mp = _tile_m(M)
    pat = _pad_rows(patches, Mp)
    dep = _pad_rows(depth_flat, Mp)
    gate9 = jnp.tile(gate, (1, K // gate.shape[1])).reshape(N, 1, K)   # tap-major tiling

    common_specs = [
        pl.BlockSpec((1, TM, K), lambda n, t: (n, t, 0)),
        pl.BlockSpec((1, 1, K), lambda n, t: (n, 0, 0)),
        pl.BlockSpec((1, TM, in_f), lambda n, t: (n, t, 0)),
        pl.BlockSpec((K, E), lambda n, t: (0, 0)),
        pl.BlockSpec((1, E), lambda n, t: (0, 0)),
        pl.BlockSpec((1, E), lambda n, t: (0, 0)),
        pl.BlockSpec((E, in_f), lambda n, t: (0, 0)),
        pl.BlockSpec((1, in_f), lambda n, t: (0, 0)),
        pl.BlockSpec((1, in_f), lambda n, t: (0, 0)),
    ]
    args = (pat, gate9, dep,
            p["comb1"]["w"], p["comb1"]["scale"], p["comb1"]["bias"],
            p["comb2"]["w"], p["comb2"]["scale"], p["comb2"]["bias"])

    if "reduce_w_row" in p:                # final GUB: Cout == 1, lane-dense output
        out = pl.pallas_call(
            _comb_reduce1_kernel,
            out_shape=jax.ShapeDtypeStruct((N, 1, Mp), jnp.float32),
            grid=(N, Mp // TM),
            in_specs=common_specs + [
                pl.BlockSpec((1, in_f), lambda n, t: (0, 0)),
                pl.BlockSpec((1, 1), lambda n, t: (0, 0)),
            ],
            out_specs=pl.BlockSpec((1, 1, TM), lambda n, t: (n, 0, t)),
            compiler_params=_COMPILER_PARAMS,
            cost_estimate=pl.CostEstimate(
                flops=2 * N * Mp * (K * E + E * in_f + in_f) + N * Mp * K,
                transcendentals=0,
                bytes_accessed=2 * N * Mp * (K + in_f) + 4 * N * Mp
                               + 2 * (K * E + E * in_f)),
        )(*args, p["reduce_w_row"], p["reduce_b_scalar"])
        return out[:, 0, :M]               # (N, M) f32

    out_f = p["reduce_w"].shape[1]
    out = pl.pallas_call(
        _comb_kernel,
        out_shape=jax.ShapeDtypeStruct((N, Mp, out_f), jnp.bfloat16),
        grid=(N, Mp // TM),
        in_specs=common_specs + [
            pl.BlockSpec((in_f, out_f), lambda n, t: (0, 0)),
            pl.BlockSpec((1, out_f), lambda n, t: (0, 0)),
        ],
        out_specs=pl.BlockSpec((1, TM, out_f), lambda n, t: (n, t, 0)),
        compiler_params=_COMPILER_PARAMS,
        cost_estimate=pl.CostEstimate(
            flops=2 * N * Mp * (K * E + E * in_f + in_f * out_f) + N * Mp * K,
            transcendentals=0,
            bytes_accessed=2 * N * Mp * (K + in_f + out_f)
                           + 2 * (K * E + E * in_f + in_f * out_f)),
    )(*args, p["reduce_w"], p["reduce_b"])
    return out[:, :M]                      # (N, M, out_f) bf16


# ----------------------------------------------------------------------------
# Conv glue (im2col patches in bf16) + SE gate (tiny FCs in plain JAX)
# ----------------------------------------------------------------------------
def _im2col3x3(x, stride=1):
    # x: (N, H, W, C) bf16 -> patches (N, Ho*Wo, 9*C) bf16, 3x3 conv, padding=1.
    N, H, W, C = x.shape
    Ho = (H + 2 - 3) // stride + 1
    Wo = (W + 2 - 3) // stride + 1
    xp = jnp.pad(x, ((0, 0), (1, 1), (1, 1), (0, 0)))
    cols = []
    for ky in range(3):
        for kx in range(3):
            cols.append(xp[:,
                           ky:ky + stride * (Ho - 1) + 1:stride,
                           kx:kx + stride * (Wo - 1) + 1:stride, :])
    patches = jnp.concatenate(cols, axis=-1)          # (N, Ho, Wo, 9*C), tap-major
    return patches.reshape(N, Ho * Wo, 9 * C), Ho, Wo


def _se_gate(xy_flat, p):
    # SELayer(reduction=1): global avg pool -> FC -> ReLU -> FC -> sigmoid.
    m = jnp.mean(xy_flat.astype(jnp.float32), axis=1)             # (N, C)
    h = jax.nn.relu(m @ p["se_w1"] + p["se_b1"])
    return jax.nn.sigmoid(h @ p["se_w2"] + p["se_b2"])            # (N, C) gate


# ----------------------------------------------------------------------------
# Interpolation glue (exact PyTorch semantics)
# ----------------------------------------------------------------------------
def _up2_along(x, axis):
    # 2x bilinear upsample along `axis`, align_corners=False (half-pixel centers).
    n = x.shape[axis]
    idx = jnp.arange(n)
    x_prev = jnp.take(x, jnp.clip(idx - 1, 0, n - 1), axis=axis)
    x_next = jnp.take(x, jnp.clip(idx + 1, 0, n - 1), axis=axis)
    even = 0.25 * x_prev + 0.75 * x
    odd = 0.75 * x + 0.25 * x_next
    stacked = jnp.stack([even, odd], axis=axis + 1)
    new_shape = list(x.shape)
    new_shape[axis] = 2 * n
    return stacked.reshape(new_shape)


def upsample2x_bilinear(x):     # NHWC
    return _up2_along(_up2_along(x, 1), 2)


# ----------------------------------------------------------------------------
# Parameters (deterministic synthetic init; BN folded in eval mode)
# ----------------------------------------------------------------------------
def _conv_bn_params(key, cin, cout, ksize):
    k = jax.random.split(key, 6)
    fan_in = cin * ksize * ksize
    w = jax.random.normal(k[0], (ksize * ksize * cin, cout), jnp.float32) / np.sqrt(fan_in)
    b = 0.1 * jax.random.normal(k[1], (cout,), jnp.float32)
    gamma = 1.0 + 0.1 * jax.random.normal(k[2], (cout,), jnp.float32)
    beta = 0.05 * jax.random.normal(k[3], (cout,), jnp.float32)
    mean = 0.1 * jax.random.normal(k[4], (cout,), jnp.float32)
    var = 1.0 + 0.5 * jax.random.uniform(k[5], (cout,), jnp.float32)
    eps = 1e-5
    scale = gamma / jnp.sqrt(var + eps)
    bias = (b - mean) * scale + beta
    return {"w": w.astype(jnp.bfloat16),            # bf16 weights for the MXU
            "scale": scale.reshape(1, cout),        # f32 folded BN scale
            "bias": bias.reshape(1, cout)}          # f32 folded BN bias


def _gub_params(key, in_f, expand_f, out_f, guide_f=4):
    keys = jax.random.split(key, 12)
    half = expand_f // 2
    comb = 2 * half
    p = {
        "feat1": _conv_bn_params(keys[0], in_f, expand_f, 3),
        "feat2": _conv_bn_params(keys[1], expand_f, half, 1),
        "guide1": _conv_bn_params(keys[2], guide_f, expand_f, 3),
        "guide2": _conv_bn_params(keys[3], expand_f, half, 1),
        "se_w1": jax.random.normal(keys[4], (comb, comb), jnp.float32) / np.sqrt(comb),
        "se_b1": 0.05 * jax.random.normal(keys[5], (comb,), jnp.float32),
        "se_w2": jax.random.normal(keys[6], (comb, comb), jnp.float32) / np.sqrt(comb),
        "se_b2": 0.05 * jax.random.normal(keys[7], (comb,), jnp.float32),
        "comb1": _conv_bn_params(keys[8], comb, expand_f, 3),
        "comb2": _conv_bn_params(keys[9], expand_f, in_f, 1),
    }
    rw = jax.random.normal(keys[10], (in_f, out_f), jnp.float32) / np.sqrt(in_f)
    rb = 0.1 * jax.random.normal(keys[11], (out_f,), jnp.float32)
    if out_f == 1:
        p["reduce_w_row"] = rw.reshape(1, in_f)            # f32 row vector (VPU reduce)
        p["reduce_b_scalar"] = rb.reshape(1, 1)            # f32 scalar
    else:
        p["reduce_w"] = rw.astype(jnp.bfloat16)
        p["reduce_b"] = rb.reshape(1, out_f)
    return p


def init_params(key, up_features=(64, 32, 16), inner_features=(64, 32, 16)):
    k_bb, k1, k2, k3 = jax.random.split(key, 4)
    bb_channels = [(3, 16), (16, 32), (32, up_features[0])]
    bb_keys = jax.random.split(k_bb, len(bb_channels))
    backbone = [_conv_bn_params(bb_keys[i], cin, cout, 3)
                for i, (cin, cout) in enumerate(bb_channels)]
    return {
        "backbone": backbone,
        "up1": _gub_params(k1, up_features[0], inner_features[0], up_features[1]),
        "up2": _gub_params(k2, up_features[1], inner_features[1], up_features[2]),
        "up3": _gub_params(k3, up_features[2], inner_features[2], 1),
    }


# ----------------------------------------------------------------------------
# Module forward
# ----------------------------------------------------------------------------
def backbone_forward(p, x):
    # TODO(synk): stand-in for DualResNet_Backbone: 3 stride-2 3x3 conv+BN+ReLU stages
    # producing the expected 64-channel feature map at 1/8 resolution.
    for layer in p:
        N = x.shape[0]
        pat, Ho, Wo = _im2col3x3(x, stride=2)
        x = _conv_mm(pat, layer).reshape(N, Ho, Wo, -1)
    return x


def gub_forward(p, guide, depth_nhwc):
    # Guided_Upsampling_Block, guidance_type='full', channel_attention=True.
    N, H, W, in_f = depth_nhwc.shape
    M = H * W

    dpat, _, _ = _im2col3x3(depth_nhwc)
    x = _branch_conv(dpat, p["feat1"], p["feat2"])            # (N, M, half) bf16
    gpat, _, _ = _im2col3x3(guide)
    g = _branch_conv(gpat, p["guide1"], p["guide2"])          # (N, M, half) bf16

    xy = jnp.concatenate([x, g], axis=-1)                     # (N, M, comb) bf16
    gate = _se_gate(xy, p)                                    # (N, comb) f32

    cpat, _, _ = _im2col3x3(xy.reshape(N, H, W, -1))          # (N, M, 9*comb) bf16
    out = _comb_conv(cpat, gate, depth_nhwc.reshape(N, M, in_f), p)

    if out.ndim == 2:                                         # Cout == 1, lane-dense f32
        return out.reshape(N, H, W, 1)
    return out.reshape(N, H, W, -1)                           # bf16 intermediate


def sparse_and_rgb_guided_depth_forward(params, rgb, depth):
    # rgb: (N, 3, H, W), depth: (N, 1, H, W)  -> (N, 1, H, W)
    rgb_nhwc = jnp.transpose(rgb, (0, 2, 3, 1)).astype(jnp.bfloat16)
    depth_nhwc = jnp.transpose(depth, (0, 2, 3, 1)).astype(jnp.bfloat16)
    rgbd = jnp.concatenate([rgb_nhwc, depth_nhwc], axis=-1)       # (N, H, W, 4)

    x_half = rgbd[:, ::2, ::2, :]        # F.interpolate(scale=0.5, mode='nearest')
    x_quarter = rgbd[:, ::4, ::4, :]     # F.interpolate(scale=0.25, mode='nearest')

    y = backbone_forward(params["backbone"], rgb_nhwc)            # (N, H/8, W/8, 64)

    y = upsample2x_bilinear(y)
    y = gub_forward(params["up1"], x_quarter, y)                  # (N, H/4, W/4, 32)
    y = upsample2x_bilinear(y)
    y = gub_forward(params["up2"], x_half, y)                     # (N, H/2, W/2, 16)
    y = upsample2x_bilinear(y)
    y = gub_forward(params["up3"], rgbd, y)                       # (N, H, W, 1) f32

    return jnp.transpose(y, (0, 3, 1, 2)).astype(jnp.float32)     # NCHW


# ----------------------------------------------------------------------------
if __name__ == "__main__":
    key = jax.random.PRNGKey(0)
    k_params, k_rgb, k_depth = jax.random.split(key, 3)

    params = init_params(k_params)
    rgb = jax.random.normal(k_rgb, (2, 3, 16, 16), jnp.float32)
    depth = jax.random.uniform(k_depth, (2, 1, 16, 16), jnp.float32)

    fwd = jax.jit(sparse_and_rgb_guided_depth_forward)
    out = fwd(params, rgb, depth)
    out = jax.block_until_ready(out)

    assert out.shape == (2, 1, 16, 16), out.shape
    assert out.dtype == jnp.float32
    assert bool(jnp.all(jnp.isfinite(out)))
    print("KERNEL_OK")
</pallas_src>

<mosaic_0001>
module attributes {stable_mosaic.version = 11 : i64} {
  func.func @_mm_bn_relu_kernel(%arg0: i32, %arg1: i32, %arg2: memref<1x64x27xbf16, #tpu.memory_space<vmem>>, %arg3: memref<27x16xbf16, #tpu.memory_space<vmem>>, %arg4: memref<1x16xf32, #tpu.memory_space<vmem>>, %arg5: memref<1x16xf32, #tpu.memory_space<vmem>>, %arg6: memref<1x64x16xbf16, #tpu.memory_space<vmem>>) attributes {dimension_semantics = [#tpu.dimension_semantics<parallel>, #tpu.dimension_semantics<parallel>], iteration_bounds = array<i64: 2, 1>, scalar_prefetch = 0 : i64, scratch_operands = 0 : i64, tpu.core_type = #tpu.core_type<tc>, window_params = [{transform_indices = @transform_0, window_bounds = array<i64: 1, 64, 27>}, {pipeline_mode = #tpu.pipeline_mode<synchronous>, transform_indices = @transform_1, window_bounds = array<i64: 27, 16>}, {pipeline_mode = #tpu.pipeline_mode<synchronous>, transform_indices = @transform_2, window_bounds = array<i64: 1, 16>}, {pipeline_mode = #tpu.pipeline_mode<synchronous>, transform_indices = @transform_3, window_bounds = array<i64: 1, 16>}, {transform_indices = @transform_4, window_bounds = array<i64: 1, 64, 16>}]} {
    %c0 = arith.constant 0 : index
    %c0_0 = arith.constant 0 : index
    %c0_1 = arith.constant 0 : index
    %0 = vector.load %arg2[%c0, %c0_0, %c0_1] : memref<1x64x27xbf16, #tpu.memory_space<vmem>>, vector<1x64x27xbf16>
    %1 = vector.shape_cast %0 : vector<1x64x27xbf16> to vector<64x27xbf16>
    %c0_2 = arith.constant 0 : index
    %c0_3 = arith.constant 0 : index
    %2 = vector.load %arg3[%c0_2, %c0_3] : memref<27x16xbf16, #tpu.memory_space<vmem>>, vector<27x16xbf16>
    %cst = arith.constant dense<0.000000e+00> : vector<64x16xf32>
    %3 = tpu.matmul %1, %2, %cst {dimension_numbers = #tpu.dot_dimension_numbers<[1], [0], [0], [1], [0, 0, 1, 1], [], []>} : vector<64x27xbf16>, vector<27x16xbf16>, vector<64x16xf32> -> vector<64x16xf32>
    %c0_4 = arith.constant 0 : index
    %c0_5 = arith.constant 0 : index
    %4 = vector.load %arg4[%c0_4, %c0_5] : memref<1x16xf32, #tpu.memory_space<vmem>>, vector<1x16xf32>
    %5 = vector.broadcast %4 : vector<1x16xf32> to vector<64x16xf32>
    %6 = arith.mulf %3, %5 : vector<64x16xf32>
    %c0_6 = arith.constant 0 : index
    %c0_7 = arith.constant 0 : index
    %7 = vector.load %arg5[%c0_6, %c0_7] : memref<1x16xf32, #tpu.memory_space<vmem>>, vector<1x16xf32>
    %8 = vector.broadcast %7 : vector<1x16xf32> to vector<64x16xf32>
    %9 = arith.addf %6, %8 : vector<64x16xf32>
    %cst_8 = arith.constant 0.000000e+00 : f32
    %10 = vector.broadcast %cst_8 : f32 to vector<64x16xf32>
    %11 = arith.maximumf %9, %10 : vector<64x16xf32>
    %12 = arith.truncf %11 : vector<64x16xf32> to vector<64x16xbf16>
    %c0_9 = arith.constant 0 : index
    %c0_10 = arith.constant 0 : index
    %c0_11 = arith.constant 0 : index
    %13 = vector.load %arg6[%c0_9, %c0_10, %c0_11] : memref<1x64x16xbf16, #tpu.memory_space<vmem>>, vector<1x64x16xbf16>
    %14 = vector.shape_cast %13 : vector<1x64x16xbf16> to vector<64x16xbf16>
    %15 = vector.shape_cast %12 : vector<64x16xbf16> to vector<1x64x16xbf16>
    tpu.vector_store %arg6[%c0_9, %c0_10, %c0_11], %15 {strides = array<i32>} : memref<1x64x16xbf16, #tpu.memory_space<vmem>>, vector<1x64x16xbf16>,
    return
  }
  func.func @transform_0(%arg0: i32, %arg1: i32) -> (i32, i32, i32) {
    %c0_i32 = arith.constant 0 : i32
    %c0_i32_0 = arith.constant 0 : i32
    return %arg0, %arg1, %c0_i32 : i32, i32, i32
  }
  func.func @transform_1(%arg0: i32, %arg1: i32) -> (i32, i32) {
    %c0_i32 = arith.constant 0 : i32
    %c0_i32_0 = arith.constant 0 : i32
    %c0_i32_1 = arith.constant 0 : i32
    return %c0_i32, %c0_i32_0 : i32, i32
  }
  func.func @transform_2(%arg0: i32, %arg1: i32) -> (i32, i32) {
    %c0_i32 = arith.constant 0 : i32
    %c0_i32_0 = arith.constant 0 : i32
    %c0_i32_1 = arith.constant 0 : i32
    return %c0_i32, %c0_i32_0 : i32, i32
  }
  func.func @transform_3(%arg0: i32, %arg1: i32) -> (i32, i32) {
    %c0_i32 = arith.constant 0 : i32
    %c0_i32_0 = arith.constant 0 : i32
    %c0_i32_1 = arith.constant 0 : i32
    return %c0_i32, %c0_i32_0 : i32, i32
  }
  func.func @transform_4(%arg0: i32, %arg1: i32) -> (i32, i32, i32) {
    %c0_i32 = arith.constant 0 : i32
    %c0_i32_0 = arith.constant 0 : i32
    return %arg0, %arg1, %c0_i32 : i32, i32, i32
  }
}

module attributes {stable_mosaic.version = 11 : i64} {
  func.func @_mm_bn_relu_kernel(%arg0: i32, %arg1: i32, %arg2: memref<1x16x144xbf16, #tpu.memory_space<vmem>>, %arg3: memref<144x32xbf16, #tpu.memory_space<vmem>>, %arg4: memref<1x32xf32, #tpu.memory_space<vmem>>, %arg5: memref<1x32xf32, #tpu.memory_space<vmem>>, %arg6: memref<1x16x32xbf16, #tpu.memory_space<vmem>>) attributes {dimension_semantics = [#tpu.dimension_semantics<parallel>, #tpu.dimension_semantics<parallel>], iteration_bounds = array<i64: 2, 1>, scalar_prefetch = 0 : i64, scratch_operands = 0 : i64, tpu.core_type = #tpu.core_type<tc>, window_params = [{transform_indices = @transform_0, window_bounds = array<i64: 1, 16, 144>}, {pipeline_mode = #tpu.pipeline_mode<synchronous>, transform_indices = @transform_1, window_bounds = array<i64: 144, 32>}, {pipeline_mode = #tpu.pipeline_mode<synchronous>, transform_indices = @transform_2, window_bounds = array<i64: 1, 32>}, {pipeline_mode = #tpu.pipeline_mode<synchronous>, transform_indices = @transform_3, window_bounds = array<i64: 1, 32>}, {transform_indices = @transform_4, window_bounds = array<i64: 1, 16, 32>}]} {
    %c0 = arith.constant 0 : index
    %c0_0 = arith.constant 0 : index
    %c0_1 = arith.constant 0 : index
    %0 = vector.load %arg2[%c0, %c0_0, %c0_1] : memref<1x16x144xbf16, #tpu.memory_space<vmem>>, vector<1x16x144xbf16>
    %1 = vector.shape_cast %0 : vector<1x16x144xbf16> to vector<16x144xbf16>
    %c0_2 = arith.constant 0 : index
    %c0_3 = arith.constant 0 : index
    %2 = vector.load %arg3[%c0_2, %c0_3] : memref<144x32xbf16, #tpu.memory_space<vmem>>, vector<144x32xbf16>
    %cst = arith.constant dense<0.000000e+00> : vector<16x32xf32>
    %3 = tpu.matmul %1, %2, %cst {dimension_numbers = #tpu.dot_dimension_numbers<[1], [0], [0], [1], [0, 0, 1, 1], [], []>} : vector<16x144xbf16>, vector<144x32xbf16>, vector<16x32xf32> -> vector<16x32xf32>
    %c0_4 = arith.constant 0 : index
    %c0_5 = arith.constant 0 : index
    %4 = vector.load %arg4[%c0_4, %c0_5] : memref<1x32xf32, #tpu.memory_space<vmem>>, vector<1x32xf32>
    %5 = vector.broadcast %4 : vector<1x32xf32> to vector<16x32xf32>
    %6 = arith.mulf %3, %5 : vector<16x32xf32>
    %c0_6 = arith.constant 0 : index
    %c0_7 = arith.constant 0 : index
    %7 = vector.load %arg5[%c0_6, %c0_7] : memref<1x32xf32, #tpu.memory_space<vmem>>, vector<1x32xf32>
    %8 = vector.broadcast %7 : vector<1x32xf32> to vector<16x32xf32>
    %9 = arith.addf %6, %8 : vector<16x32xf32>
    %cst_8 = arith.constant 0.000000e+00 : f32
    %10 = vector.broadcast %cst_8 : f32 to vector<16x32xf32>
    %11 = arith.maximumf %9, %10 : vector<16x32xf32>
    %12 = arith.truncf %11 : vector<16x32xf32> to vector<16x32xbf16>
    %c0_9 = arith.constant 0 : index
    %c0_10 = arith.constant 0 : index
    %c0_11 = arith.constant 0 : index
    %13 = vector.load %arg6[%c0_9, %c0_10, %c0_11] : memref<1x16x32xbf16, #tpu.memory_space<vmem>>, vector<1x16x32xbf16>
    %14 = vector.shape_cast %13 : vector<1x16x32xbf16> to vector<16x32xbf16>
    %15 = vector.shape_cast %12 : vector<16x32xbf16> to vector<1x16x32xbf16>
    tpu.vector_store %arg6[%c0_9, %c0_10, %c0_11], %15 {strides = array<i32>} : memref<1x16x32xbf16, #tpu.memory_space<vmem>>, vector<1x16x32xbf16>,
    return
  }
  func.func @transform_0(%arg0: i32, %arg1: i32) -> (i32, i32, i32) {
    %c0_i32 = arith.constant 0 : i32
    %c0_i32_0 = arith.constant 0 : i32
    return %arg0, %arg1, %c0_i32 : i32, i32, i32
  }
  func.func @transform_1(%arg0: i32, %arg1: i32) -> (i32, i32) {
    %c0_i32 = arith.constant 0 : i32
    %c0_i32_0 = arith.constant 0 : i32
    %c0_i32_1 = arith.constant 0 : i32
    return %c0_i32, %c0_i32_0 : i32, i32
  }
  func.func @transform_2(%arg0: i32, %arg1: i32) -> (i32, i32) {
    %c0_i32 = arith.constant 0 : i32
    %c0_i32_0 = arith.constant 0 : i32
    %c0_i32_1 = arith.constant 0 : i32
    return %c0_i32, %c0_i32_0 : i32, i32
  }
  func.func @transform_3(%arg0: i32, %arg1: i32) -> (i32, i32) {
    %c0_i32 = arith.constant 0 : i32
    %c0_i32_0 = arith.constant 0 : i32
    %c0_i32_1 = arith.constant 0 : i32
    return %c0_i32, %c0_i32_0 : i32, i32
  }
  func.func @transform_4(%arg0: i32, %arg1: i32) -> (i32, i32, i32) {
    %c0_i32 = arith.constant 0 : i32
    %c0_i32_0 = arith.constant 0 : i32
    return %arg0, %arg1, %c0_i32 : i32, i32, i32
  }
}

module attributes {stable_mosaic.version = 11 : i64} {
  func.func @_mm_bn_relu_kernel(%arg0: i32, %arg1: i32, %arg2: memref<1x4x288xbf16, #tpu.memory_space<vmem>>, %arg3: memref<288x64xbf16, #tpu.memory_space<vmem>>, %arg4: memref<1x64xf32, #tpu.memory_space<vmem>>, %arg5: memref<1x64xf32, #tpu.memory_space<vmem>>, %arg6: memref<1x4x64xbf16, #tpu.memory_space<vmem>>) attributes {dimension_semantics = [#tpu.dimension_semantics<parallel>, #tpu.dimension_semantics<parallel>], iteration_bounds = array<i64: 2, 1>, scalar_prefetch = 0 : i64, scratch_operands = 0 : i64, tpu.core_type = #tpu.core_type<tc>, window_params = [{transform_indices = @transform_0, window_bounds = array<i64: 1, 4, 288>}, {pipeline_mode = #tpu.pipeline_mode<synchronous>, transform_indices = @transform_1, window_bounds = array<i64: 288, 64>}, {pipeline_mode = #tpu.pipeline_mode<synchronous>, transform_indices = @transform_2, window_bounds = array<i64: 1, 64>}, {pipeline_mode = #tpu.pipeline_mode<synchronous>, transform_indices = @transform_3, window_bounds = array<i64: 1, 64>}, {transform_indices = @transform_4, window_bounds = array<i64: 1, 4, 64>}]} {
    %c0 = arith.constant 0 : index
    %c0_0 = arith.constant 0 : index
    %c0_1 = arith.constant 0 : index
    %0 = vector.load %arg2[%c0, %c0_0, %c0_1] : memref<1x4x288xbf16, #tpu.memory_space<vmem>>, vector<1x4x288xbf16>
    %1 = vector.shape_cast %0 : vector<1x4x288xbf16> to vector<4x288xbf16>
    %c0_2 = arith.constant 0 : index
    %c0_3 = arith.constant 0 : index
    %2 = vector.load %arg3[%c0_2, %c0_3] : memref<288x64xbf16, #tpu.memory_space<vmem>>, vector<288x64xbf16>
    %cst = arith.constant dense<0.000000e+00> : vector<4x64xf32>
    %3 = tpu.matmul %1, %2, %cst {dimension_numbers = #tpu.dot_dimension_numbers<[1], [0], [0], [1], [0, 0, 1, 1], [], []>} : vector<4x288xbf16>, vector<288x64xbf16>, vector<4x64xf32> -> vector<4x64xf32>
    %c0_4 = arith.constant 0 : index
    %c0_5 = arith.constant 0 : index
    %4 = vector.load %arg4[%c0_4, %c0_5] : memref<1x64xf32, #tpu.memory_space<vmem>>, vector<1x64xf32>
    %5 = vector.broadcast %4 : vector<1x64xf32> to vector<4x64xf32>
    %6 = arith.mulf %3, %5 : vector<4x64xf32>
    %c0_6 = arith.constant 0 : index
    %c0_7 = arith.constant 0 : index
    %7 = vector.load %arg5[%c0_6, %c0_7] : memref<1x64xf32, #tpu.memory_space<vmem>>, vector<1x64xf32>
    %8 = vector.broadcast %7 : vector<1x64xf32> to vector<4x64xf32>
    %9 = arith.addf %6, %8 : vector<4x64xf32>
    %cst_8 = arith.constant 0.000000e+00 : f32
    %10 = vector.broadcast %cst_8 : f32 to vector<4x64xf32>
    %11 = arith.maximumf %9, %10 : vector<4x64xf32>
    %12 = arith.truncf %11 : vector<4x64xf32> to vector<4x64xbf16>
    %c0_9 = arith.constant 0 : index
    %c0_10 = arith.constant 0 : index
    %c0_11 = arith.constant 0 : index
    %13 = vector.load %arg6[%c0_9, %c0_10, %c0_11] : memref<1x4x64xbf16, #tpu.memory_space<vmem>>, vector<1x4x64xbf16>
    %14 = vector.shape_cast %13 : vector<1x4x64xbf16> to vector<4x64xbf16>
    %15 = vector.shape_cast %12 : vector<4x64xbf16> to vector<1x4x64xbf16>
    tpu.vector_store %arg6[%c0_9, %c0_10, %c0_11], %15 {strides = array<i32>} : memref<1x4x64xbf16, #tpu.memory_space<vmem>>, vector<1x4x64xbf16>,
    return
  }
  func.func @transform_0(%arg0: i32, %arg1: i32) -> (i32, i32, i32) {
    %c0_i32 = arith.constant 0 : i32
    %c0_i32_0 = arith.constant 0 : i32
    return %arg0, %arg1, %c0_i32 : i32, i32, i32
  }
  func.func @transform_1(%arg0: i32, %arg1: i32) -> (i32, i32) {
    %c0_i32 = arith.constant 0 : i32
    %c0_i32_0 = arith.constant 0 : i32
    %c0_i32_1 = arith.constant 0 : i32
    return %c0_i32, %c0_i32_0 : i32, i32
  }
  func.func @transform_2(%arg0: i32, %arg1: i32) -> (i32, i32) {
    %c0_i32 = arith.constant 0 : i32
    %c0_i32_0 = arith.constant 0 : i32
    %c0_i32_1 = arith.constant 0 : i32
    return %c0_i32, %c0_i32_0 : i32, i32
  }
  func.func @transform_3(%arg0: i32, %arg1: i32) -> (i32, i32) {
    %c0_i32 = arith.constant 0 : i32
    %c0_i32_0 = arith.constant 0 : i32
    %c0_i32_1 = arith.constant 0 : i32
    return %c0_i32, %c0_i32_0 : i32, i32
  }
  func.func @transform_4(%arg0: i32, %arg1: i32) -> (i32, i32, i32) {
    %c0_i32 = arith.constant 0 : i32
    %c0_i32_0 = arith.constant 0 : i32
    return %arg0, %arg1, %c0_i32 : i32, i32, i32
  }
}

module attributes {stable_mosaic.version = 11 : i64} {
  func.func @_branch_kernel(%arg0: i32, %arg1: i32, %arg2: memref<1x16x576xbf16, #tpu.memory_space<vmem>>, %arg3: memref<576x64xbf16, #tpu.memory_space<vmem>>, %arg4: memref<1x64xf32, #tpu.memory_space<vmem>>, %arg5: memref<1x64xf32, #tpu.memory_space<vmem>>, %arg6: memref<64x32xbf16, #tpu.memory_space<vmem>>, %arg7: memref<1x32xf32, #tpu.memory_space<vmem>>, %arg8: memref<1x32xf32, #tpu.memory_space<vmem>>, %arg9: memref<1x16x32xbf16, #tpu.memory_space<vmem>>) attributes {dimension_semantics = [#tpu.dimension_semantics<parallel>, #tpu.dimension_semantics<parallel>], iteration_bounds = array<i64: 2, 1>, scalar_prefetch = 0 : i64, scratch_operands = 0 : i64, tpu.core_type = #tpu.core_type<tc>, window_params = [{transform_indices = @transform_0, window_bounds = array<i64: 1, 16, 576>}, {pipeline_mode = #tpu.pipeline_mode<synchronous>, transform_indices = @transform_1, window_bounds = array<i64: 576, 64>}, {pipeline_mode = #tpu.pipeline_mode<synchronous>, transform_indices = @transform_2, window_bounds = array<i64: 1, 64>}, {pipeline_mode = #tpu.pipeline_mode<synchronous>, transform_indices = @transform_3, window_bounds = array<i64: 1, 64>}, {pipeline_mode = #tpu.pipeline_mode<synchronous>, transform_indices = @transform_4, window_bounds = array<i64: 64, 32>}, {pipeline_mode = #tpu.pipeline_mode<synchronous>, transform_indices = @transform_5, window_bounds = array<i64: 1, 32>}, {pipeline_mode = #tpu.pipeline_mode<synchronous>, transform_indices = @transform_6, window_bounds = array<i64: 1, 32>}, {transform_indices = @transform_7, window_bounds = array<i64: 1, 16, 32>}]} {
    %c0 = arith.constant 0 : index
    %c0_0 = arith.constant 0 : index
    %c0_1 = arith.constant 0 : index
    %0 = vector.load %arg2[%c0, %c0_0, %c0_1] : memref<1x16x576xbf16, #tpu.memory_space<vmem>>, vector<1x16x576xbf16>
    %1 = vector.shape_cast %0 : vector<1x16x576xbf16> to vector<16x576xbf16>
    %c0_2 = arith.constant 0 : index
    %c0_3 = arith.constant 0 : index
    %2 = vector.load %arg3[%c0_2, %c0_3] : memref<576x64xbf16, #tpu.memory_space<vmem>>, vector<576x64xbf16>
    %cst = arith.constant dense<0.000000e+00> : vector<16x64xf32>
    %3 = tpu.matmul %1, %2, %cst {dimension_numbers = #tpu.dot_dimension_numbers<[1], [0], [0], [1], [0, 0, 1, 1], [], []>} : vector<16x576xbf16>, vector<576x64xbf16>, vector<16x64xf32> -> vector<16x64xf32>
    %c0_4 = arith.constant 0 : index
    %c0_5 = arith.constant 0 : index
    %4 = vector.load %arg4[%c0_4, %c0_5] : memref<1x64xf32, #tpu.memory_space<vmem>>, vector<1x64xf32>
    %5 = vector.broadcast %4 : vector<1x64xf32> to vector<16x64xf32>
    %6 = arith.mulf %3, %5 : vector<16x64xf32>
    %c0_6 = arith.constant 0 : index
    %c0_7 = arith.constant 0 : index
    %7 = vector.load %arg5[%c0_6, %c0_7] : memref<1x64xf32, #tpu.memory_space<vmem>>, vector<1x64xf32>
    %8 = vector.broadcast %7 : vector<1x64xf32> to vector<16x64xf32>
    %9 = arith.addf %6, %8 : vector<16x64xf32>
    %cst_8 = arith.constant 0.000000e+00 : f32
    %10 = vector.broadcast %cst_8 : f32 to vector<16x64xf32>
    %11 = arith.maximumf %9, %10 : vector<16x64xf32>
    %12 = arith.truncf %11 : vector<16x64xf32> to vector<16x64xbf16>
    %c0_9 = arith.constant 0 : index
    %c0_10 = arith.constant 0 : index
    %13 = vector.load %arg6[%c0_9, %c0_10] : memref<64x32xbf16, #tpu.memory_space<vmem>>, vector<64x32xbf16>
    %cst_11 = arith.constant dense<0.000000e+00> : vector<16x32xf32>
    %14 = tpu.matmul %12, %13, %cst_11 {dimension_numbers = #tpu.dot_dimension_numbers<[1], [0], [0], [1], [0, 0, 1, 1], [], []>} : vector<16x64xbf16>, vector<64x32xbf16>, vector<16x32xf32> -> vector<16x32xf32>
    %c0_12 = arith.constant 0 : index
    %c0_13 = arith.constant 0 : index
    %15 = vector.load %arg7[%c0_12, %c0_13] : memref<1x32xf32, #tpu.memory_space<vmem>>, vector<1x32xf32>
    %16 = vector.broadcast %15 : vector<1x32xf32> to vector<16x32xf32>
    %17 = arith.mulf %14, %16 : vector<16x32xf32>
    %c0_14 = arith.constant 0 : index
    %c0_15 = arith.constant 0 : index
    %18 = vector.load %arg8[%c0_14, %c0_15] : memref<1x32xf32, #tpu.memory_space<vmem>>, vector<1x32xf32>
    %19 = vector.broadcast %18 : vector<1x32xf32> to vector<16x32xf32>
    %20 = arith.addf %17, %19 : vector<16x32xf32>
    %cst_16 = arith.constant 0.000000e+00 : f32
    %21 = vector.broadcast %cst_16 : f32 to vector<16x32xf32>
    %22 = arith.maximumf %20, %21 : vector<16x32xf32>
    %23 = arith.truncf %22 : vector<16x32xf32> to vector<16x32xbf16>
    %c0_17 = arith.constant 0 : index
    %c0_18 = arith.constant 0 : index
    %c0_19 = arith.constant 0 : index
    %24 = vector.load %arg9[%c0_17, %c0_18, %c0_19] : memref<1x16x32xbf16, #tpu.memory_space<vmem>>, vector<1x16x32xbf16>
    %25 = vector.shape_cast %24 : vector<1x16x32xbf16> to vector<16x32xbf16>
    %26 = vector.shape_cast %23 : vector<16x32xbf16> to vector<1x16x32xbf16>
    tpu.vector_store %arg9[%c0_17, %c0_18, %c0_19], %26 {strides = array<i32>} : memref<1x16x32xbf16, #tpu.memory_space<vmem>>, vector<1x16x32xbf16>,
    return
  }
  func.func @transform_0(%arg0: i32, %arg1: i32) -> (i32, i32, i32) {
    %c0_i32 = arith.constant 0 : i32
    %c0_i32_0 = arith.constant 0 : i32
    return %arg0, %arg1, %c0_i32 : i32, i32, i32
  }
  func.func @transform_1(%arg0: i32, %arg1: i32) -> (i32, i32) {
    %c0_i32 = arith.constant 0 : i32
    %c0_i32_0 = arith.constant 0 : i32
    %c0_i32_1 = arith.constant 0 : i32
    return %c0_i32, %c0_i32_0 : i32, i32
  }
  func.func @transform_2(%arg0: i32, %arg1: i32) -> (i32, i32) {
    %c0_i32 = arith.constant 0 : i32
    %c0_i32_0 = arith.constant 0 : i32
    %c0_i32_1 = arith.constant 0 : i32
    return %c0_i32, %c0_i32_0 : i32, i32
  }
  func.func @transform_3(%arg0: i32, %arg1: i32) -> (i32, i32) {
    %c0_i32 = arith.constant 0 : i32
    %c0_i32_0 = arith.constant 0 : i32
    %c0_i32_1 = arith.constant 0 : i32
    return %c0_i32, %c0_i32_0 : i32, i32
  }
  func.func @transform_4(%arg0: i32, %arg1: i32) -> (i32, i32) {
    %c0_i32 = arith.constant 0 : i32
    %c0_i32_0 = arith.constant 0 : i32
    %c0_i32_1 = arith.constant 0 : i32
    return %c0_i32, %c0_i32_0 : i32, i32
  }
  func.func @transform_5(%arg0: i32, %arg1: i32) -> (i32, i32) {
    %c0_i32 = arith.constant 0 : i32
    %c0_i32_0 = arith.constant 0 : i32
    %c0_i32_1 = arith.constant 0 : i32
    return %c0_i32, %c0_i32_0 : i32, i32
  }
  func.func @transform_6(%arg0: i32, %arg1: i32) -> (i32, i32) {
    %c0_i32 = arith.constant 0 : i32
    %c0_i32_0 = arith.constant 0 : i32
    %c0_i32_1 = arith.constant 0 : i32
    return %c0_i32, %c0_i32_0 : i32, i32
  }
  func.func @transform_7(%arg0: i32, %arg1: i32) -> (i32, i32, i32) {
    %c0_i32 = arith.constant 0 : i32
    %c0_i32_0 = arith.constant 0 : i32
    return %arg0, %arg1, %c0_i32 : i32, i32, i32
  }
}

module attributes {stable_mosaic.version = 11 : i64} {
  func.func @_branch_kernel(%arg0: i32, %arg1: i32, %arg2: memref<1x16x36xbf16, #tpu.memory_space<vmem>>, %arg3: memref<36x64xbf16, #tpu.memory_space<vmem>>, %arg4: memref<1x64xf32, #tpu.memory_space<vmem>>, %arg5: memref<1x64xf32, #tpu.memory_space<vmem>>, %arg6: memref<64x32xbf16, #tpu.memory_space<vmem>>, %arg7: memref<1x32xf32, #tpu.memory_space<vmem>>, %arg8: memref<1x32xf32, #tpu.memory_space<vmem>>, %arg9: memref<1x16x32xbf16, #tpu.memory_space<vmem>>) attributes {dimension_semantics = [#tpu.dimension_semantics<parallel>, #tpu.dimension_semantics<parallel>], iteration_bounds = array<i64: 2, 1>, scalar_prefetch = 0 : i64, scratch_operands = 0 : i64, tpu.core_type = #tpu.core_type<tc>, window_params = [{transform_indices = @transform_0, window_bounds = array<i64: 1, 16, 36>}, {pipeline_mode = #tpu.pipeline_mode<synchronous>, transform_indices = @transform_1, window_bounds = array<i64: 36, 64>}, {pipeline_mode = #tpu.pipeline_mode<synchronous>, transform_indices = @transform_2, window_bounds = array<i64: 1, 64>}, {pipeline_mode = #tpu.pipeline_mode<synchronous>, transform_indices = @transform_3, window_bounds = array<i64: 1, 64>}, {pipeline_mode = #tpu.pipeline_mode<synchronous>, transform_indices = @transform_4, window_bounds = array<i64: 64, 32>}, {pipeline_mode = #tpu.pipeline_mode<synchronous>, transform_indices = @transform_5, window_bounds = array<i64: 1, 32>}, {pipeline_mode = #tpu.pipeline_mode<synchronous>, transform_indices = @transform_6, window_bounds = array<i64: 1, 32>}, {transform_indices = @transform_7, window_bounds = array<i64: 1, 16, 32>}]} {
    %c0 = arith.constant 0 : index
    %c0_0 = arith.constant 0 : index
    %c0_1 = arith.constant 0 : index
    %0 = vector.load %arg2[%c0, %c0_0, %c0_1] : memref<1x16x36xbf16, #tpu.memory_space<vmem>>, vector<1x16x36xbf16>
    %1 = vector.shape_cast %0 : vector<1x16x36xbf16> to vector<16x36xbf16>
    %c0_2 = arith.constant 0 : index
    %c0_3 = arith.constant 0 : index
    %2 = vector.load %arg3[%c0_2, %c0_3] : memref<36x64xbf16, #tpu.memory_space<vmem>>, vector<36x64xbf16>
    %cst = arith.constant dense<0.000000e+00> : vector<16x64xf32>
    %3 = tpu.matmul %1, %2, %cst {dimension_numbers = #tpu.dot_dimension_numbers<[1], [0], [0], [1], [0, 0, 1, 1], [], []>} : vector<16x36xbf16>, vector<36x64xbf16>, vector<16x64xf32> -> vector<16x64xf32>
    %c0_4 = arith.constant 0 : index
    %c0_5 = arith.constant 0 : index
    %4 = vector.load %arg4[%c0_4, %c0_5] : memref<1x64xf32, #tpu.memory_space<vmem>>, vector<1x64xf32>
    %5 = vector.broadcast %4 : vector<1x64xf32> to vector<16x64xf32>
    %6 = arith.mulf %3, %5 : vector<16x64xf32>
    %c0_6 = arith.constant 0 : index
    %c0_7 = arith.constant 0 : index
    %7 = vector.load %arg5[%c0_6, %c0_7] : memref<1x64xf32, #tpu.memory_space<vmem>>, vector<1x64xf32>
    %8 = vector.broadcast %7 : vector<1x64xf32> to vector<16x64xf32>
    %9 = arith.addf %6, %8 : vector<16x64xf32>
    %cst_8 = arith.constant 0.000000e+00 : f32
    %10 = vector.broadcast %cst_8 : f32 to vector<16x64xf32>
    %11 = arith.maximumf %9, %10 : vector<16x64xf32>
    %12 = arith.truncf %11 : vector<16x64xf32> to vector<16x64xbf16>
    %c0_9 = arith.constant 0 : index
    %c0_10 = arith.constant 0 : index
    %13 = vector.load %arg6[%c0_9, %c0_10] : memref<64x32xbf16, #tpu.memory_space<vmem>>, vector<64x32xbf16>
    %cst_11 = arith.constant dense<0.000000e+00> : vector<16x32xf32>
    %14 = tpu.matmul %12, %13, %cst_11 {dimension_numbers = #tpu.dot_dimension_numbers<[1], [0], [0], [1], [0, 0, 1, 1], [], []>} : vector<16x64xbf16>, vector<64x32xbf16>, vector<16x32xf32> -> vector<16x32xf32>
    %c0_12 = arith.constant 0 : index
    %c0_13 = arith.constant 0 : index
    %15 = vector.load %arg7[%c0_12, %c0_13] : memref<1x32xf32, #tpu.memory_space<vmem>>, vector<1x32xf32>
    %16 = vector.broadcast %15 : vector<1x32xf32> to vector<16x32xf32>
    %17 = arith.mulf %14, %16 : vector<16x32xf32>
    %c0_14 = arith.constant 0 : index
    %c0_15 = arith.constant 0 : index
    %18 = vector.load %arg8[%c0_14, %c0_15] : memref<1x32xf32, #tpu.memory_space<vmem>>, vector<1x32xf32>
    %19 = vector.broadcast %18 : vector<1x32xf32> to vector<16x32xf32>
    %20 = arith.addf %17, %19 : vector<16x32xf32>
    %cst_16 = arith.constant 0.000000e+00 : f32
    %21 = vector.broadcast %cst_16 : f32 to vector<16x32xf32>
    %22 = arith.maximumf %20, %21 : vector<16x32xf32>
    %23 = arith.truncf %22 : vector<16x32xf32> to vector<16x32xbf16>
    %c0_17 = arith.constant 0 : index
    %c0_18 = arith.constant 0 : index
    %c0_19 = arith.constant 0 : index
    %24 = vector.load %arg9[%c0_17, %c0_18, %c0_19] : memref<1x16x32xbf16, #tpu.memory_space<vmem>>, vector<1x16x32xbf16>
    %25 = vector.shape_cast %24 : vector<1x16x32xbf16> to vector<16x32xbf16>
    %26 = vector.shape_cast %23 : vector<16x32xbf16> to vector<1x16x32xbf16>
    tpu.vector_store %arg9[%c0_17, %c0_18, %c0_19], %26 {strides = array<i32>} : memref<1x16x32xbf16, #tpu.memory_space<vmem>>, vector<1x16x32xbf16>,
    return
  }
  func.func @transform_0(%arg0: i32, %arg1: i32) -> (i32, i32, i32) {
    %c0_i32 = arith.constant 0 : i32
    %c0_i32_0 = arith.constant 0 : i32
    return %arg0, %arg1, %c0_i32 : i32, i32, i32
  }
  func.func @transform_1(%arg0: i32, %arg1: i32) -> (i32, i32) {
    %c0_i32 = arith.constant 0 : i32
    %c0_i32_0 = arith.constant 0 : i32
    %c0_i32_1 = arith.constant 0 : i32
    return %c0_i32, %c0_i32_0 : i32, i32
  }
  func.func @transform_2(%arg0: i32, %arg1: i32) -> (i32, i32) {
    %c0_i32 = arith.constant 0 : i32
    %c0_i32_0 = arith.constant 0 : i32
    %c0_i32_1 = arith.constant 0 : i32
    return %c0_i32, %c0_i32_0 : i32, i32
  }
  func.func @transform_3(%arg0: i32, %arg1: i32) -> (i32, i32) {
    %c0_i32 = arith.constant 0 : i32
    %c0_i32_0 = arith.constant 0 : i32
    %c0_i32_1 = arith.constant 0 : i32
    return %c0_i32, %c0_i32_0 : i32, i32
  }
  func.func @transform_4(%arg0: i32, %arg1: i32) -> (i32, i32) {
    %c0_i32 = arith.constant 0 : i32
    %c0_i32_0 = arith.constant 0 : i32
    %c0_i32_1 = arith.constant 0 : i32
    return %c0_i32, %c0_i32_0 : i32, i32
  }
  func.func @transform_5(%arg0: i32, %arg1: i32) -> (i32, i32) {
    %c0_i32 = arith.constant 0 : i32
    %c0_i32_0 = arith.constant 0 : i32
    %c0_i32_1 = arith.constant 0 : i32
    return %c0_i32, %c0_i32_0 : i32, i32
  }
  func.func @transform_6(%arg0: i32, %arg1: i32) -> (i32, i32) {
    %c0_i32 = arith.constant 0 : i32
    %c0_i32_0 = arith.constant 0 : i32
    %c0_i32_1 = arith.constant 0 : i32
    return %c0_i32, %c0_i32_0 : i32, i32
  }
  func.func @transform_7(%arg0: i32, %arg1: i32) -> (i32, i32, i32) {
    %c0_i32 = arith.constant 0 : i32
    %c0_i32_0 = arith.constant 0 : i32
    return %arg0, %arg1, %c0_i32 : i32, i32, i32
  }
}

module attributes {stable_mosaic.version = 11 : i64} {
  func.func @_comb_kernel(%arg0: i32, %arg1: i32, %arg2: memref<1x16x576xbf16, #tpu.memory_space<vmem>>, %arg3: memref<1x1x576xf32, #tpu.memory_space<vmem>>, %arg4: memref<1x16x64xbf16, #tpu.memory_space<vmem>>, %arg5: memref<576x64xbf16, #tpu.memory_space<vmem>>, %arg6: memref<1x64xf32, #tpu.memory_space<vmem>>, %arg7: memref<1x64xf32, #tpu.memory_space<vmem>>, %arg8: memref<64x64xbf16, #tpu.memory_space<vmem>>, %arg9: memref<1x64xf32, #tpu.memory_space<vmem>>, %arg10: memref<1x64xf32, #tpu.memory_space<vmem>>, %arg11: memref<64x32xbf16, #tpu.memory_space<vmem>>, %arg12: memref<1x32xf32, #tpu.memory_space<vmem>>, %arg13: memref<1x16x32xbf16, #tpu.memory_space<vmem>>) attributes {dimension_semantics = [#tpu.dimension_semantics<parallel>, #tpu.dimension_semantics<parallel>], iteration_bounds = array<i64: 2, 1>, scalar_prefetch = 0 : i64, scratch_operands = 0 : i64, tpu.core_type = #tpu.core_type<tc>, window_params = [{transform_indices = @transform_0, window_bounds = array<i64: 1, 16, 576>}, {transform_indices = @transform_1, window_bounds = array<i64: 1, 1, 576>}, {transform_indices = @transform_2, window_bounds = array<i64: 1, 16, 64>}, {pipeline_mode = #tpu.pipeline_mode<synchronous>, transform_indices = @transform_3, window_bounds = array<i64: 576, 64>}, {pipeline_mode = #tpu.pipeline_mode<synchronous>, transform_indices = @transform_4, window_bounds = array<i64: 1, 64>}, {pipeline_mode = #tpu.pipeline_mode<synchronous>, transform_indices = @transform_5, window_bounds = array<i64: 1, 64>}, {pipeline_mode = #tpu.pipeline_mode<synchronous>, transform_indices = @transform_6, window_bounds = array<i64: 64, 64>}, {pipeline_mode = #tpu.pipeline_mode<synchronous>, transform_indices = @transform_7, window_bounds = array<i64: 1, 64>}, {pipeline_mode = #tpu.pipeline_mode<synchronous>, transform_indices = @transform_8, window_bounds = array<i64: 1, 64>}, {pipeline_mode = #tpu.pipeline_mode<synchronous>, transform_indices = @transform_9, window_bounds = array<i64: 64, 32>}, {pipeline_mode = #tpu.pipeline_mode<synchronous>, transform_indices = @transform_10, window_bounds = array<i64: 1, 32>}, {transform_indices = @transform_11, window_bounds = array<i64: 1, 16, 32>}]} {
    %c0 = arith.constant 0 : index
    %c0_0 = arith.constant 0 : index
    %c0_1 = arith.constant 0 : index
    %0 = vector.load %arg2[%c0, %c0_0, %c0_1] : memref<1x16x576xbf16, #tpu.memory_space<vmem>>, vector<1x16x576xbf16>
    %1 = vector.shape_cast %0 : vector<1x16x576xbf16> to vector<16x576xbf16>
    %2 = arith.extf %1 : vector<16x576xbf16> to vector<16x576xf32>
    %c0_2 = arith.constant 0 : index
    %c0_3 = arith.constant 0 : index
    %c0_4 = arith.constant 0 : index
    %3 = vector.load %arg3[%c0_2, %c0_3, %c0_4] : memref<1x1x576xf32, #tpu.memory_space<vmem>>, vector<1x1x576xf32>
    %4 = vector.shape_cast %3 : vector<1x1x576xf32> to vector<1x576xf32>
    %5 = vector.broadcast %4 : vector<1x576xf32> to vector<16x576xf32>
    %6 = arith.mulf %2, %5 : vector<16x576xf32>
    %7 = arith.truncf %6 : vector<16x576xf32> to vector<16x576xbf16>
    %c0_5 = arith.constant 0 : index
    %c0_6 = arith.constant 0 : index
    %8 = vector.load %arg5[%c0_5, %c0_6] : memref<576x64xbf16, #tpu.memory_space<vmem>>, vector<576x64xbf16>
    %cst = arith.constant dense<0.000000e+00> : vector<16x64xf32>
    %9 = tpu.matmul %7, %8, %cst {dimension_numbers = #tpu.dot_dimension_numbers<[1], [0], [0], [1], [0, 0, 1, 1], [], []>} : vector<16x576xbf16>, vector<576x64xbf16>, vector<16x64xf32> -> vector<16x64xf32>
    %c0_7 = arith.constant 0 : index
    %c0_8 = arith.constant 0 : index
    %10 = vector.load %arg6[%c0_7, %c0_8] : memref<1x64xf32, #tpu.memory_space<vmem>>, vector<1x64xf32>
    %11 = vector.broadcast %10 : vector<1x64xf32> to vector<16x64xf32>
    %12 = arith.mulf %9, %11 : vector<16x64xf32>
    %c0_9 = arith.constant 0 : index
    %c0_10 = arith.constant 0 : index
    %13 = vector.load %arg7[%c0_9, %c0_10] : memref<1x64xf32, #tpu.memory_space<vmem>>, vector<1x64xf32>
    %14 = vector.broadcast %13 : vector<1x64xf32> to vector<16x64xf32>
    %15 = arith.addf %12, %14 : vector<16x64xf32>
    %cst_11 = arith.constant 0.000000e+00 : f32
    %16 = vector.broadcast %cst_11 : f32 to vector<16x64xf32>
    %17 = arith.maximumf %15, %16 : vector<16x64xf32>
    %18 = arith.truncf %17 : vector<16x64xf32> to vector<16x64xbf16>
    %c0_12 = arith.constant 0 : index
    %c0_13 = arith.constant 0 : index
    %19 = vector.load %arg8[%c0_12, %c0_13] : memref<64x64xbf16, #tpu.memory_space<vmem>>, vector<64x64xbf16>
    %cst_14 = arith.constant dense<0.000000e+00> : vector<16x64xf32>
    %20 = tpu.matmul %18, %19, %cst_14 {dimension_numbers = #tpu.dot_dimension_numbers<[1], [0], [0], [1], [0, 0, 1, 1], [], []>} : vector<16x64xbf16>, vector<64x64xbf16>, vector<16x64xf32> -> vector<16x64xf32>
    %c0_15 = arith.constant 0 : index
    %c0_16 = arith.constant 0 : index
    %21 = vector.load %arg9[%c0_15, %c0_16] : memref<1x64xf32, #tpu.memory_space<vmem>>, vector<1x64xf32>
    %22 = vector.broadcast %21 : vector<1x64xf32> to vector<16x64xf32>
    %23 = arith.mulf %20, %22 : vector<16x64xf32>
    %c0_17 = arith.constant 0 : index
    %c0_18 = arith.constant 0 : index
    %24 = vector.load %arg10[%c0_17, %c0_18] : memref<1x64xf32, #tpu.memory_space<vmem>>, vector<1x64xf32>
    %25 = vector.broadcast %24 : vector<1x64xf32> to vector<16x64xf32>
    %26 = arith.addf %23, %25 : vector<16x64xf32>
    %cst_19 = arith.constant 0.000000e+00 : f32
    %27 = vector.broadcast %cst_19 : f32 to vector<16x64xf32>
    %28 = arith.maximumf %26, %27 : vector<16x64xf32>
    %c0_20 = arith.constant 0 : index
    %c0_21 = arith.constant 0 : index
    %c0_22 = arith.constant 0 : index
    %29 = vector.load %arg4[%c0_20, %c0_21, %c0_22] : memref<1x16x64xbf16, #tpu.memory_space<vmem>>, vector<1x16x64xbf16>
    %30 = vector.shape_cast %29 : vector<1x16x64xbf16> to vector<16x64xbf16>
    %31 = arith.extf %30 : vector<16x64xbf16> to vector<16x64xf32>
    %32 = arith.addf %28, %31 : vector<16x64xf32>
    %33 = arith.truncf %32 : vector<16x64xf32> to vector<16x64xbf16>
    %c0_23 = arith.constant 0 : index
    %c0_24 = arith.constant 0 : index
    %34 = vector.load %arg11[%c0_23, %c0_24] : memref<64x32xbf16, #tpu.memory_space<vmem>>, vector<64x32xbf16>
    %cst_25 = arith.constant dense<0.000000e+00> : vector<16x32xf32>
    %35 = tpu.matmul %33, %34, %cst_25 {dimension_numbers = #tpu.dot_dimension_numbers<[1], [0], [0], [1], [0, 0, 1, 1], [], []>} : vector<16x64xbf16>, vector<64x32xbf16>, vector<16x32xf32> -> vector<16x32xf32>
    %c0_26 = arith.constant 0 : index
    %c0_27 = arith.constant 0 : index
    %36 = vector.load %arg12[%c0_26, %c0_27] : memref<1x32xf32, #tpu.memory_space<vmem>>, vector<1x32xf32>
    %37 = vector.broadcast %36 : vector<1x32xf32> to vector<16x32xf32>
    %38 = arith.addf %35, %37 : vector<16x32xf32>
    %39 = arith.truncf %38 : vector<16x32xf32> to vector<16x32xbf16>
    %c0_28 = arith.constant 0 : index
    %c0_29 = arith.constant 0 : index
    %c0_30 = arith.constant 0 : index
    %40 = vector.load %arg13[%c0_28, %c0_29, %c0_30] : memref<1x16x32xbf16, #tpu.memory_space<vmem>>, vector<1x16x32xbf16>
    %41 = vector.shape_cast %40 : vector<1x16x32xbf16> to vector<16x32xbf16>
    %42 = vector.shape_cast %39 : vector<16x32xbf16> to vector<1x16x32xbf16>
    tpu.vector_store %arg13[%c0_28, %c0_29, %c0_30], %42 {strides = array<i32>} : memref<1x16x32xbf16, #tpu.memory_space<vmem>>, vector<1x16x32xbf16>,
    return
  }
  func.func @transform_0(%arg0: i32, %arg1: i32) -> (i32, i32, i32) {
    %c0_i32 = arith.constant 0 : i32
    %c0_i32_0 = arith.constant 0 : i32
    return %arg0, %arg1, %c0_i32 : i32, i32, i32
  }
  func.func @transform_1(%arg0: i32, %arg1: i32) -> (i32, i32, i32) {
    %c0_i32 = arith.constant 0 : i32
    %c0_i32_0 = arith.constant 0 : i32
    %c0_i32_1 = arith.constant 0 : i32
    return %arg0, %c0_i32, %c0_i32_0 : i32, i32, i32
  }
  func.func @transform_2(%arg0: i32, %arg1: i32) -> (i32, i32, i32) {
    %c0_i32 = arith.constant 0 : i32
    %c0_i32_0 = arith.constant 0 : i32
    return %arg0, %arg1, %c0_i32 : i32, i32, i32
  }
  func.func @transform_3(%arg0: i32, %arg1: i32) -> (i32, i32) {
    %c0_i32 = arith.constant 0 : i32
    %c0_i32_0 = arith.constant 0 : i32
    %c0_i32_1 = arith.constant 0 : i32
    return %c0_i32, %c0_i32_0 : i32, i32
  }
  func.func @transform_4(%arg0: i32, %arg1: i32) -> (i32, i32) {
    %c0_i32 = arith.constant 0 : i32
    %c0_i32_0 = arith.constant 0 : i32
    %c0_i32_1 = arith.constant 0 : i32
    return %c0_i32, %c0_i32_0 : i32, i32
  }
  func.func @transform_5(%arg0: i32, %arg1: i32) -> (i32, i32) {
    %c0_i32 = arith.constant 0 : i32
    %c0_i32_0 = arith.constant 0 : i32
    %c0_i32_1 = arith.constant 0 : i32
    return %c0_i32, %c0_i32_0 : i32, i32
  }
  func.func @transform_6(%arg0: i32, %arg1: i32) -> (i32, i32) {
    %c0_i32 = arith.constant 0 : i32
    %c0_i32_0 = arith.constant 0 : i32
    %c0_i32_1 = arith.constant 0 : i32
    return %c0_i32, %c0_i32_0 : i32, i32
  }
  func.func @transform_7(%arg0: i32, %arg1: i32) -> (i32, i32) {
    %c0_i32 = arith.constant 0 : i32
    %c0_i32_0 = arith.constant 0 : i32
    %c0_i32_1 = arith.constant 0 : i32
    return %c0_i32, %c0_i32_0 : i32, i32
  }
  func.func @transform_8(%arg0: i32, %arg1: i32) -> (i32, i32) {
    %c0_i32 = arith.constant 0 : i32
    %c0_i32_0 = arith.constant 0 : i32
    %c0_i32_1 = arith.constant 0 : i32
    return %c0_i32, %c0_i32_0 : i32, i32
  }
  func.func @transform_9(%arg0: i32, %arg1: i32) -> (i32, i32) {
    %c0_i32 = arith.constant 0 : i32
    %c0_i32_0 = arith.constant 0 : i32
    %c0_i32_1 = arith.constant 0 : i32
    return %c0_i32, %c0_i32_0 : i32, i32
  }
  func.func @transform_10(%arg0: i32, %arg1: i32) -> (i32, i32) {
    %c0_i32 = arith.constant 0 : i32
    %c0_i32_0 = arith.constant 0 : i32
    %c0_i32_1 = arith.constant 0 : i32
    return %c0_i32, %c0_i32_0 : i32, i32
  }
  func.func @transform_11(%arg0: i32, %arg1: i32) -> (i32, i32, i32) {
    %c0_i32 = arith.constant 0 : i32
    %c0_i32_0 = arith.constant 0 : i32
    return %arg0, %arg1, %c0_i32 : i32, i32, i32
  }
}

module attributes {stable_mosaic.version = 11 : i64} {
  func.func @_branch_kernel(%arg0: i32, %arg1: i32, %arg2: memref<1x64x288xbf16, #tpu.memory_space<vmem>>, %arg3: memref<288x32xbf16, #tpu.memory_space<vmem>>, %arg4: memref<1x32xf32, #tpu.memory_space<vmem>>, %arg5: memref<1x32xf32, #tpu.memory_space<vmem>>, %arg6: memref<32x16xbf16, #tpu.memory_space<vmem>>, %arg7: memref<1x16xf32, #tpu.memory_space<vmem>>, %arg8: memref<1x16xf32, #tpu.memory_space<vmem>>, %arg9: memref<1x64x16xbf16, #tpu.memory_space<vmem>>) attributes {dimension_semantics = [#tpu.dimension_semantics<parallel>, #tpu.dimension_semantics<parallel>], iteration_bounds = array<i64: 2, 1>, scalar_prefetch = 0 : i64, scratch_operands = 0 : i64, tpu.core_type = #tpu.core_type<tc>, window_params = [{transform_indices = @transform_0, window_bounds = array<i64: 1, 64, 288>}, {pipeline_mode = #tpu.pipeline_mode<synchronous>, transform_indices = @transform_1, window_bounds = array<i64: 288, 32>}, {pipeline_mode = #tpu.pipeline_mode<synchronous>, transform_indices = @transform_2, window_bounds = array<i64: 1, 32>}, {pipeline_mode = #tpu.pipeline_mode<synchronous>, transform_indices = @transform_3, window_bounds = array<i64: 1, 32>}, {pipeline_mode = #tpu.pipeline_mode<synchronous>, transform_indices = @transform_4, window_bounds = array<i64: 32, 16>}, {pipeline_mode = #tpu.pipeline_mode<synchronous>, transform_indices = @transform_5, window_bounds = array<i64: 1, 16>}, {pipeline_mode = #tpu.pipeline_mode<synchronous>, transform_indices = @transform_6, window_bounds = array<i64: 1, 16>}, {transform_indices = @transform_7, window_bounds = array<i64: 1, 64, 16>}]} {
    %c0 = arith.constant 0 : index
    %c0_0 = arith.constant 0 : index
    %c0_1 = arith.constant 0 : index
    %0 = vector.load %arg2[%c0, %c0_0, %c0_1] : memref<1x64x288xbf16, #tpu.memory_space<vmem>>, vector<1x64x288xbf16>
    %1 = vector.shape_cast %0 : vector<1x64x288xbf16> to vector<64x288xbf16>
    %c0_2 = arith.constant 0 : index
    %c0_3 = arith.constant 0 : index
    %2 = vector.load %arg3[%c0_2, %c0_3] : memref<288x32xbf16, #tpu.memory_space<vmem>>, vector<288x32xbf16>
    %cst = arith.constant dense<0.000000e+00> : vector<64x32xf32>
    %3 = tpu.matmul %1, %2, %cst {dimension_numbers = #tpu.dot_dimension_numbers<[1], [0], [0], [1], [0, 0, 1, 1], [], []>} : vector<64x288xbf16>, vector<288x32xbf16>, vector<64x32xf32> -> vector<64x32xf32>
    %c0_4 = arith.constant 0 : index
    %c0_5 = arith.constant 0 : index
    %4 = vector.load %arg4[%c0_4, %c0_5] : memref<1x32xf32, #tpu.memory_space<vmem>>, vector<1x32xf32>
    %5 = vector.broadcast %4 : vector<1x32xf32> to vector<64x32xf32>
    %6 = arith.mulf %3, %5 : vector<64x32xf32>
    %c0_6 = arith.constant 0 : index
    %c0_7 = arith.constant 0 : index
    %7 = vector.load %arg5[%c0_6, %c0_7] : memref<1x32xf32, #tpu.memory_space<vmem>>, vector<1x32xf32>
    %8 = vector.broadcast %7 : vector<1x32xf32> to vector<64x32xf32>
    %9 = arith.addf %6, %8 : vector<64x32xf32>
    %cst_8 = arith.constant 0.000000e+00 : f32
    %10 = vector.broadcast %cst_8 : f32 to vector<64x32xf32>
    %11 = arith.maximumf %9, %10 : vector<64x32xf32>
    %12 = arith.truncf %11 : vector<64x32xf32> to vector<64x32xbf16>
    %c0_9 = arith.constant 0 : index
    %c0_10 = arith.constant 0 : index
    %13 = vector.load %arg6[%c0_9, %c0_10] : memref<32x16xbf16, #tpu.memory_space<vmem>>, vector<32x16xbf16>
    %cst_11 = arith.constant dense<0.000000e+00> : vector<64x16xf32>
    %14 = tpu.matmul %12, %13, %cst_11 {dimension_numbers = #tpu.dot_dimension_numbers<[1], [0], [0], [1], [0, 0, 1, 1], [], []>} : vector<64x32xbf16>, vector<32x16xbf16>, vector<64x16xf32> -> vector<64x16xf32>
    %c0_12 = arith.constant 0 : index
    %c0_13 = arith.constant 0 : index
    %15 = vector.load %arg7[%c0_12, %c0_13] : memref<1x16xf32, #tpu.memory_space<vmem>>, vector<1x16xf32>
    %16 = vector.broadcast %15 : vector<1x16xf32> to vector<64x16xf32>
    %17 = arith.mulf %14, %16 : vector<64x16xf32>
    %c0_14 = arith.constant 0 : index
    %c0_15 = arith.constant 0 : index
    %18 = vector.load %arg8[%c0_14, %c0_15] : memref<1x16xf32, #tpu.memory_space<vmem>>, vector<1x16xf32>
    %19 = vector.broadcast %18 : vector<1x16xf32> to vector<64x16xf32>
    %20 = arith.addf %17, %19 : vector<64x16xf32>
    %cst_16 = arith.constant 0.000000e+00 : f32
    %21 = vector.broadcast %cst_16 : f32 to vector<64x16xf32>
    %22 = arith.maximumf %20, %21 : vector<64x16xf32>
    %23 = arith.truncf %22 : vector<64x16xf32> to vector<64x16xbf16>
    %c0_17 = arith.constant 0 : index
    %c0_18 = arith.constant 0 : index
    %c0_19 = arith.constant 0 : index
    %24 = vector.load %arg9[%c0_17, %c0_18, %c0_19] : memref<1x64x16xbf16, #tpu.memory_space<vmem>>, vector<1x64x16xbf16>
    %25 = vector.shape_cast %24 : vector<1x64x16xbf16> to vector<64x16xbf16>
    %26 = vector.shape_cast %23 : vector<64x16xbf16> to vector<1x64x16xbf16>
    tpu.vector_store %arg9[%c0_17, %c0_18, %c0_19], %26 {strides = array<i32>} : memref<1x64x16xbf16, #tpu.memory_space<vmem>>, vector<1x64x16xbf16>,
    return
  }
  func.func @transform_0(%arg0: i32, %arg1: i32) -> (i32, i32, i32) {
    %c0_i32 = arith.constant 0 : i32
    %c0_i32_0 = arith.constant 0 : i32
    return %arg0, %arg1, %c0_i32 : i32, i32, i32
  }
  func.func @transform_1(%arg0: i32, %arg1: i32) -> (i32, i32) {
    %c0_i32 = arith.constant 0 : i32
    %c0_i32_0 = arith.constant 0 : i32
    %c0_i32_1 = arith.constant 0 : i32
    return %c0_i32, %c0_i32_0 : i32, i32
  }
  func.func @transform_2(%arg0: i32, %arg1: i32) -> (i32, i32) {
    %c0_i32 = arith.constant 0 : i32
    %c0_i32_0 = arith.constant 0 : i32
    %c0_i32_1 = arith.constant 0 : i32
    return %c0_i32, %c0_i32_0 : i32, i32
  }
  func.func @transform_3(%arg0: i32, %arg1: i32) -> (i32, i32) {
    %c0_i32 = arith.constant 0 : i32
    %c0_i32_0 = arith.constant 0 : i32
    %c0_i32_1 = arith.constant 0 : i32
    return %c0_i32, %c0_i32_0 : i32, i32
  }
  func.func @transform_4(%arg0: i32, %arg1: i32) -> (i32, i32) {
    %c0_i32 = arith.constant 0 : i32
    %c0_i32_0 = arith.constant 0 : i32
    %c0_i32_1 = arith.constant 0 : i32
    return %c0_i32, %c0_i32_0 : i32, i32
  }
  func.func @transform_5(%arg0: i32, %arg1: i32) -> (i32, i32) {
    %c0_i32 = arith.constant 0 : i32
    %c0_i32_0 = arith.constant 0 : i32
    %c0_i32_1 = arith.constant 0 : i32
    return %c0_i32, %c0_i32_0 : i32, i32
  }
  func.func @transform_6(%arg0: i32, %arg1: i32) -> (i32, i32) {
    %c0_i32 = arith.constant 0 : i32
    %c0_i32_0 = arith.constant 0 : i32
    %c0_i32_1 = arith.constant 0 : i32
    return %c0_i32, %c0_i32_0 : i32, i32
  }
  func.func @transform_7(%arg0: i32, %arg1: i32) -> (i32, i32, i32) {
    %c0_i32 = arith.constant 0 : i32
    %c0_i32_0 = arith.constant 0 : i32
    return %arg0, %arg1, %c0_i32 : i32, i32, i32
  }
}

module attributes {stable_mosaic.version = 11 : i64} {
  func.func @_branch_kernel(%arg0: i32, %arg1: i32, %arg2: memref<1x64x36xbf16, #tpu.memory_space<vmem>>, %arg3: memref<36x32xbf16, #tpu.memory_space<vmem>>, %arg4: memref<1x32xf32, #tpu.memory_space<vmem>>, %arg5: memref<1x32xf32, #tpu.memory_space<vmem>>, %arg6: memref<32x16xbf16, #tpu.memory_space<vmem>>, %arg7: memref<1x16xf32, #tpu.memory_space<vmem>>, %arg8: memref<1x16xf32, #tpu.memory_space<vmem>>, %arg9: memref<1x64x16xbf16, #tpu.memory_space<vmem>>) attributes {dimension_semantics = [#tpu.dimension_semantics<parallel>, #tpu.dimension_semantics<parallel>], iteration_bounds = array<i64: 2, 1>, scalar_prefetch = 0 : i64, scratch_operands = 0 : i64, tpu.core_type = #tpu.core_type<tc>, window_params = [{transform_indices = @transform_0, window_bounds = array<i64: 1, 64, 36>}, {pipeline_mode = #tpu.pipeline_mode<synchronous>, transform_indices = @transform_1, window_bounds = array<i64: 36, 32>}, {pipeline_mode = #tpu.pipeline_mode<synchronous>, transform_indices = @transform_2, window_bounds = array<i64: 1, 32>}, {pipeline_mode = #tpu.pipeline_mode<synchronous>, transform_indices = @transform_3, window_bounds = array<i64: 1, 32>}, {pipeline_mode = #tpu.pipeline_mode<synchronous>, transform_indices = @transform_4, window_bounds = array<i64: 32, 16>}, {pipeline_mode = #tpu.pipeline_mode<synchronous>, transform_indices = @transform_5, window_bounds = array<i64: 1, 16>}, {pipeline_mode = #tpu.pipeline_mode<synchronous>, transform_indices = @transform_6, window_bounds = array<i64: 1, 16>}, {transform_indices = @transform_7, window_bounds = array<i64: 1, 64, 16>}]} {
    %c0 = arith.constant 0 : index
    %c0_0 = arith.constant 0 : index
    %c0_1 = arith.constant 0 : index
    %0 = vector.load %arg2[%c0, %c0_0, %c0_1] : memref<1x64x36xbf16, #tpu.memory_space<vmem>>, vector<1x64x36xbf16>
    %1 = vector.shape_cast %0 : vector<1x64x36xbf16> to vector<64x36xbf16>
    %c0_2 = arith.constant 0 : index
    %c0_3 = arith.constant 0 : index
    %2 = vector.load %arg3[%c0_2, %c0_3] : memref<36x32xbf16, #tpu.memory_space<vmem>>, vector<36x32xbf16>
    %cst = arith.constant dense<0.000000e+00> : vector<64x32xf32>
    %3 = tpu.matmul %1, %2, %cst {dimension_numbers = #tpu.dot_dimension_numbers<[1], [0], [0], [1], [0, 0, 1, 1], [], []>} : vector<64x36xbf16>, vector<36x32xbf16>, vector<64x32xf32> -> vector<64x32xf32>
    %c0_4 = arith.constant 0 : index
    %c0_5 = arith.constant 0 : index
    %4 = vector.load %arg4[%c0_4, %c0_5] : memref<1x32xf32, #tpu.memory_space<vmem>>, vector<1x32xf32>
    %5 = vector.broadcast %4 : vector<1x32xf32> to vector<64x32xf32>
    %6 = arith.mulf %3, %5 : vector<64x32xf32>
    %c0_6 = arith.constant 0 : index
    %c0_7 = arith.constant 0 : index
    %7 = vector.load %arg5[%c0_6, %c0_7] : memref<1x32xf32, #tpu.memory_space<vmem>>, vector<1x32xf32>
    %8 = vector.broadcast %7 : vector<1x32xf32> to vector<64x32xf32>
    %9 = arith.addf %6, %8 : vector<64x32xf32>
    %cst_8 = arith.constant 0.000000e+00 : f32
    %10 = vector.broadcast %cst_8 : f32 to vector<64x32xf32>
    %11 = arith.maximumf %9, %10 : vector<64x32xf32>
    %12 = arith.truncf %11 : vector<64x32xf32> to vector<64x32xbf16>
    %c0_9 = arith.constant 0 : index
    %c0_10 = arith.constant 0 : index
    %13 = vector.load %arg6[%c0_9, %c0_10] : memref<32x16xbf16, #tpu.memory_space<vmem>>, vector<32x16xbf16>
    %cst_11 = arith.constant dense<0.000000e+00> : vector<64x16xf32>
    %14 = tpu.matmul %12, %13, %cst_11 {dimension_numbers = #tpu.dot_dimension_numbers<[1], [0], [0], [1], [0, 0, 1, 1], [], []>} : vector<64x32xbf16>, vector<32x16xbf16>, vector<64x16xf32> -> vector<64x16xf32>
    %c0_12 = arith.constant 0 : index
    %c0_13 = arith.constant 0 : index
    %15 = vector.load %arg7[%c0_12, %c0_13] : memref<1x16xf32, #tpu.memory_space<vmem>>, vector<1x16xf32>
    %16 = vector.broadcast %15 : vector<1x16xf32> to vector<64x16xf32>
    %17 = arith.mulf %14, %16 : vector<64x16xf32>
    %c0_14 = arith.constant 0 : index
    %c0_15 = arith.constant 0 : index
    %18 = vector.load %arg8[%c0_14, %c0_15] : memref<1x16xf32, #tpu.memory_space<vmem>>, vector<1x16xf32>
    %19 = vector.broadcast %18 : vector<1x16xf32> to vector<64x16xf32>
    %20 = arith.addf %17, %19 : vector<64x16xf32>
    %cst_16 = arith.constant 0.000000e+00 : f32
    %21 = vector.broadcast %cst_16 : f32 to vector<64x16xf32>
    %22 = arith.maximumf %20, %21 : vector<64x16xf32>
    %23 = arith.truncf %22 : vector<64x16xf32> to vector<64x16xbf16>
    %c0_17 = arith.constant 0 : index
    %c0_18 = arith.constant 0 : index
    %c0_19 = arith.constant 0 : index
    %24 = vector.load %arg9[%c0_17, %c0_18, %c0_19] : memref<1x64x16xbf16, #tpu.memory_space<vmem>>, vector<1x64x16xbf16>
    %25 = vector.shape_cast %24 : vector<1x64x16xbf16> to vector<64x16xbf16>
    %26 = vector.shape_cast %23 : vector<64x16xbf16> to vector<1x64x16xbf16>
    tpu.vector_store %arg9[%c0_17, %c0_18, %c0_19], %26 {strides = array<i32>} : memref<1x64x16xbf16, #tpu.memory_space<vmem>>, vector<1x64x16xbf16>,
    return
  }
  func.func @transform_0(%arg0: i32, %arg1: i32) -> (i32, i32, i32) {
    %c0_i32 = arith.constant 0 : i32
    %c0_i32_0 = arith.constant 0 : i32
    return %arg0, %arg1, %c0_i32 : i32, i32, i32
  }
  func.func @transform_1(%arg0: i32, %arg1: i32) -> (i32, i32) {
    %c0_i32 = arith.constant 0 : i32
    %c0_i32_0 = arith.constant 0 : i32
    %c0_i32_1 = arith.constant 0 : i32
    return %c0_i32, %c0_i32_0 : i32, i32
  }
  func.func @transform_2(%arg0: i32, %arg1: i32) -> (i32, i32) {
    %c0_i32 = arith.constant 0 : i32
    %c0_i32_0 = arith.constant 0 : i32
    %c0_i32_1 = arith.constant 0 : i32
    return %c0_i32, %c0_i32_0 : i32, i32
  }
  func.func @transform_3(%arg0: i32, %arg1: i32) -> (i32, i32) {
    %c0_i32 = arith.constant 0 : i32
    %c0_i32_0 = arith.constant 0 : i32
    %c0_i32_1 = arith.constant 0 : i32
    return %c0_i32, %c0_i32_0 : i32, i32
  }
  func.func @transform_4(%arg0: i32, %arg1: i32) -> (i32, i32) {
    %c0_i32 = arith.constant 0 : i32
    %c0_i32_0 = arith.constant 0 : i32
    %c0_i32_1 = arith.constant 0 : i32
    return %c0_i32, %c0_i32_0 : i32, i32
  }
  func.func @transform_5(%arg0: i32, %arg1: i32) -> (i32, i32) {
    %c0_i32 = arith.constant 0 : i32
    %c0_i32_0 = arith.constant 0 : i32
    %c0_i32_1 = arith.constant 0 : i32
    return %c0_i32, %c0_i32_0 : i32, i32
  }
  func.func @transform_6(%arg0: i32, %arg1: i32) -> (i32, i32) {
    %c0_i32 = arith.constant 0 : i32
    %c0_i32_0 = arith.constant 0 : i32
    %c0_i32_1 = arith.constant 0 : i32
    return %c0_i32, %c0_i32_0 : i32, i32
  }
  func.func @transform_7(%arg0: i32, %arg1: i32) -> (i32, i32, i32) {
    %c0_i32 = arith.constant 0 : i32
    %c0_i32_0 = arith.constant 0 : i32
    return %arg0, %arg1, %c0_i32 : i32, i32, i32
  }
}

module attributes {stable_mosaic.version = 11 : i64} {
  func.func @_comb_kernel(%arg0: i32, %arg1: i32, %arg2: memref<1x64x288xbf16, #tpu.memory_space<vmem>>, %arg3: memref<1x1x288xf32, #tpu.memory_space<vmem>>, %arg4: memref<1x64x32xbf16, #tpu.memory_space<vmem>>, %arg5: memref<288x32xbf16, #tpu.memory_space<vmem>>, %arg6: memref<1x32xf32, #tpu.memory_space<vmem>>, %arg7: memref<1x32xf32, #tpu.memory_space<vmem>>, %arg8: memref<32x32xbf16, #tpu.memory_space<vmem>>, %arg9: memref<1x32xf32, #tpu.memory_space<vmem>>, %arg10: memref<1x32xf32, #tpu.memory_space<vmem>>, %arg11: memref<32x16xbf16, #tpu.memory_space<vmem>>, %arg12: memref<1x16xf32, #tpu.memory_space<vmem>>, %arg13: memref<1x64x16xbf16, #tpu.memory_space<vmem>>) attributes {dimension_semantics = [#tpu.dimension_semantics<parallel>, #tpu.dimension_semantics<parallel>], iteration_bounds = array<i64: 2, 1>, scalar_prefetch = 0 : i64, scratch_operands = 0 : i64, tpu.core_type = #tpu.core_type<tc>, window_params = [{transform_indices = @transform_0, window_bounds = array<i64: 1, 64, 288>}, {transform_indices = @transform_1, window_bounds = array<i64: 1, 1, 288>}, {transform_indices = @transform_2, window_bounds = array<i64: 1, 64, 32>}, {pipeline_mode = #tpu.pipeline_mode<synchronous>, transform_indices = @transform_3, window_bounds = array<i64: 288, 32>}, {pipeline_mode = #tpu.pipeline_mode<synchronous>, transform_indices = @transform_4, window_bounds = array<i64: 1, 32>}, {pipeline_mode = #tpu.pipeline_mode<synchronous>, transform_indices = @transform_5, window_bounds = array<i64: 1, 32>}, {pipeline_mode = #tpu.pipeline_mode<synchronous>, transform_indices = @transform_6, window_bounds = array<i64: 32, 32>}, {pipeline_mode = #tpu.pipeline_mode<synchronous>, transform_indices = @transform_7, window_bounds = array<i64: 1, 32>}, {pipeline_mode = #tpu.pipeline_mode<synchronous>, transform_indices = @transform_8, window_bounds = array<i64: 1, 32>}, {pipeline_mode = #tpu.pipeline_mode<synchronous>, transform_indices = @transform_9, window_bounds = array<i64: 32, 16>}, {pipeline_mode = #tpu.pipeline_mode<synchronous>, transform_indices = @transform_10, window_bounds = array<i64: 1, 16>}, {transform_indices = @transform_11, window_bounds = array<i64: 1, 64, 16>}]} {
    %c0 = arith.constant 0 : index
    %c0_0 = arith.constant 0 : index
    %c0_1 = arith.constant 0 : index
    %0 = vector.load %arg2[%c0, %c0_0, %c0_1] : memref<1x64x288xbf16, #tpu.memory_space<vmem>>, vector<1x64x288xbf16>
    %1 = vector.shape_cast %0 : vector<1x64x288xbf16> to vector<64x288xbf16>
    %2 = arith.extf %1 : vector<64x288xbf16> to vector<64x288xf32>
    %c0_2 = arith.constant 0 : index
    %c0_3 = arith.constant 0 : index
    %c0_4 = arith.constant 0 : index
    %3 = vector.load %arg3[%c0_2, %c0_3, %c0_4] : memref<1x1x288xf32, #tpu.memory_space<vmem>>, vector<1x1x288xf32>
    %4 = vector.shape_cast %3 : vector<1x1x288xf32> to vector<1x288xf32>
    %5 = vector.broadcast %4 : vector<1x288xf32> to vector<64x288xf32>
    %6 = arith.mulf %2, %5 : vector<64x288xf32>
    %7 = arith.truncf %6 : vector<64x288xf32> to vector<64x288xbf16>
    %c0_5 = arith.constant 0 : index
    %c0_6 = arith.constant 0 : index
    %8 = vector.load %arg5[%c0_5, %c0_6] : memref<288x32xbf16, #tpu.memory_space<vmem>>, vector<288x32xbf16>
    %cst = arith.constant dense<0.000000e+00> : vector<64x32xf32>
    %9 = tpu.matmul %7, %8, %cst {dimension_numbers = #tpu.dot_dimension_numbers<[1], [0], [0], [1], [0, 0, 1, 1], [], []>} : vector<64x288xbf16>, vector<288x32xbf16>, vector<64x32xf32> -> vector<64x32xf32>
    %c0_7 = arith.constant 0 : index
    %c0_8 = arith.constant 0 : index
    %10 = vector.load %arg6[%c0_7, %c0_8] : memref<1x32xf32, #tpu.memory_space<vmem>>, vector<1x32xf32>
    %11 = vector.broadcast %10 : vector<1x32xf32> to vector<64x32xf32>
    %12 = arith.mulf %9, %11 : vector<64x32xf32>
    %c0_9 = arith.constant 0 : index
    %c0_10 = arith.constant 0 : index
    %13 = vector.load %arg7[%c0_9, %c0_10] : memref<1x32xf32, #tpu.memory_space<vmem>>, vector<1x32xf32>
    %14 = vector.broadcast %13 : vector<1x32xf32> to vector<64x32xf32>
    %15 = arith.addf %12, %14 : vector<64x32xf32>
    %cst_11 = arith.constant 0.000000e+00 : f32
    %16 = vector.broadcast %cst_11 : f32 to vector<64x32xf32>
    %17 = arith.maximumf %15, %16 : vector<64x32xf32>
    %18 = arith.truncf %17 : vector<64x32xf32> to vector<64x32xbf16>
    %c0_12 = arith.constant 0 : index
    %c0_13 = arith.constant 0 : index
    %19 = vector.load %arg8[%c0_12, %c0_13] : memref<32x32xbf16, #tpu.memory_space<vmem>>, vector<32x32xbf16>
    %cst_14 = arith.constant dense<0.000000e+00> : vector<64x32xf32>
    %20 = tpu.matmul %18, %19, %cst_14 {dimension_numbers = #tpu.dot_dimension_numbers<[1], [0], [0], [1], [0, 0, 1, 1], [], []>} : vector<64x32xbf16>, vector<32x32xbf16>, vector<64x32xf32> -> vector<64x32xf32>
    %c0_15 = arith.constant 0 : index
    %c0_16 = arith.constant 0 : index
    %21 = vector.load %arg9[%c0_15, %c0_16] : memref<1x32xf32, #tpu.memory_space<vmem>>, vector<1x32xf32>
    %22 = vector.broadcast %21 : vector<1x32xf32> to vector<64x32xf32>
    %23 = arith.mulf %20, %22 : vector<64x32xf32>
    %c0_17 = arith.constant 0 : index
    %c0_18 = arith.constant 0 : index
    %24 = vector.load %arg10[%c0_17, %c0_18] : memref<1x32xf32, #tpu.memory_space<vmem>>, vector<1x32xf32>
    %25 = vector.broadcast %24 : vector<1x32xf32> to vector<64x32xf32>
    %26 = arith.addf %23, %25 : vector<64x32xf32>
    %cst_19 = arith.constant 0.000000e+00 : f32
    %27 = vector.broadcast %cst_19 : f32 to vector<64x32xf32>
    %28 = arith.maximumf %26, %27 : vector<64x32xf32>
    %c0_20 = arith.constant 0 : index
    %c0_21 = arith.constant 0 : index
    %c0_22 = arith.constant 0 : index
    %29 = vector.load %arg4[%c0_20, %c0_21, %c0_22] : memref<1x64x32xbf16, #tpu.memory_space<vmem>>, vector<1x64x32xbf16>
    %30 = vector.shape_cast %29 : vector<1x64x32xbf16> to vector<64x32xbf16>
    %31 = arith.extf %30 : vector<64x32xbf16> to vector<64x32xf32>
    %32 = arith.addf %28, %31 : vector<64x32xf32>
    %33 = arith.truncf %32 : vector<64x32xf32> to vector<64x32xbf16>
    %c0_23 = arith.constant 0 : index
    %c0_24 = arith.constant 0 : index
    %34 = vector.load %arg11[%c0_23, %c0_24] : memref<32x16xbf16, #tpu.memory_space<vmem>>, vector<32x16xbf16>
    %cst_25 = arith.constant dense<0.000000e+00> : vector<64x16xf32>
    %35 = tpu.matmul %33, %34, %cst_25 {dimension_numbers = #tpu.dot_dimension_numbers<[1], [0], [0], [1], [0, 0, 1, 1], [], []>} : vector<64x32xbf16>, vector<32x16xbf16>, vector<64x16xf32> -> vector<64x16xf32>
    %c0_26 = arith.constant 0 : index
    %c0_27 = arith.constant 0 : index
    %36 = vector.load %arg12[%c0_26, %c0_27] : memref<1x16xf32, #tpu.memory_space<vmem>>, vector<1x16xf32>
    %37 = vector.broadcast %36 : vector<1x16xf32> to vector<64x16xf32>
    %38 = arith.addf %35, %37 : vector<64x16xf32>
    %39 = arith.truncf %38 : vector<64x16xf32> to vector<64x16xbf16>
    %c0_28 = arith.constant 0 : index
    %c0_29 = arith.constant 0 : index
    %c0_30 = arith.constant 0 : index
    %40 = vector.load %arg13[%c0_28, %c0_29, %c0_30] : memref<1x64x16xbf16, #tpu.memory_space<vmem>>, vector<1x64x16xbf16>
    %41 = vector.shape_cast %40 : vector<1x64x16xbf16> to vector<64x16xbf16>
    %42 = vector.shape_cast %39 : vector<64x16xbf16> to vector<1x64x16xbf16>
    tpu.vector_store %arg13[%c0_28, %c0_29, %c0_30], %42 {strides = array<i32>} : memref<1x64x16xbf16, #tpu.memory_space<vmem>>, vector<1x64x16xbf16>,
    return
  }
  func.func @transform_0(%arg0: i32, %arg1: i32) -> (i32, i32, i32) {
    %c0_i32 = arith.constant 0 : i32
    %c0_i32_0 = arith.constant 0 : i32
    return %arg0, %arg1, %c0_i32 : i32, i32, i32
  }
  func.func @transform_1(%arg0: i32, %arg1: i32) -> (i32, i32, i32) {
    %c0_i32 = arith.constant 0 : i32
    %c0_i32_0 = arith.constant 0 : i32
    %c0_i32_1 = arith.constant 0 : i32
    return %arg0, %c0_i32, %c0_i32_0 : i32, i32, i32
  }
  func.func @transform_2(%arg0: i32, %arg1: i32) -> (i32, i32, i32) {
    %c0_i32 = arith.constant 0 : i32
    %c0_i32_0 = arith.constant 0 : i32
    return %arg0, %arg1, %c0_i32 : i32, i32, i32
  }
  func.func @transform_3(%arg0: i32, %arg1: i32) -> (i32, i32) {
    %c0_i32 = arith.constant 0 : i32
    %c0_i32_0 = arith.constant 0 : i32
    %c0_i32_1 = arith.constant 0 : i32
    return %c0_i32, %c0_i32_0 : i32, i32
  }
  func.func @transform_4(%arg0: i32, %arg1: i32) -> (i32, i32) {
    %c0_i32 = arith.constant 0 : i32
    %c0_i32_0 = arith.constant 0 : i32
    %c0_i32_1 = arith.constant 0 : i32
    return %c0_i32, %c0_i32_0 : i32, i32
  }
  func.func @transform_5(%arg0: i32, %arg1: i32) -> (i32, i32) {
    %c0_i32 = arith.constant 0 : i32
    %c0_i32_0 = arith.constant 0 : i32
    %c0_i32_1 = arith.constant 0 : i32
    return %c0_i32, %c0_i32_0 : i32, i32
  }
  func.func @transform_6(%arg0: i32, %arg1: i32) -> (i32, i32) {
    %c0_i32 = arith.constant 0 : i32
    %c0_i32_0 = arith.constant 0 : i32
    %c0_i32_1 = arith.constant 0 : i32
    return %c0_i32, %c0_i32_0 : i32, i32
  }
  func.func @transform_7(%arg0: i32, %arg1: i32) -> (i32, i32) {
    %c0_i32 = arith.constant 0 : i32
    %c0_i32_0 = arith.constant 0 : i32
    %c0_i32_1 = arith.constant 0 : i32
    return %c0_i32, %c0_i32_0 : i32, i32
  }
  func.func @transform_8(%arg0: i32, %arg1: i32) -> (i32, i32) {
    %c0_i32 = arith.constant 0 : i32
    %c0_i32_0 = arith.constant 0 : i32
    %c0_i32_1 = arith.constant 0 : i32
    return %c0_i32, %c0_i32_0 : i32, i32
  }
  func.func @transform_9(%arg0: i32, %arg1: i32) -> (i32, i32) {
    %c0_i32 = arith.constant 0 : i32
    %c0_i32_0 = arith.constant 0 : i32
    %c0_i32_1 = arith.constant 0 : i32
    return %c0_i32, %c0_i32_0 : i32, i32
  }
  func.func @transform_10(%arg0: i32, %arg1: i32) -> (i32, i32) {
    %c0_i32 = arith.constant 0 : i32
    %c0_i32_0 = arith.constant 0 : i32
    %c0_i32_1 = arith.constant 0 : i32
    return %c0_i32, %c0_i32_0 : i32, i32
  }
  func.func @transform_11(%arg0: i32, %arg1: i32) -> (i32, i32, i32) {
    %c0_i32 = arith.constant 0 : i32
    %c0_i32_0 = arith.constant 0 : i32
    return %arg0, %arg1, %c0_i32 : i32, i32, i32
  }
}

module attributes {stable_mosaic.version = 11 : i64} {
  func.func @_branch_kernel(%arg0: i32, %arg1: i32, %arg2: memref<1x256x144xbf16, #tpu.memory_space<vmem>>, %arg3: memref<144x16xbf16, #tpu.memory_space<vmem>>, %arg4: memref<1x16xf32, #tpu.memory_space<vmem>>, %arg5: memref<1x16xf32, #tpu.memory_space<vmem>>, %arg6: memref<16x8xbf16, #tpu.memory_space<vmem>>, %arg7: memref<1x8xf32, #tpu.memory_space<vmem>>, %arg8: memref<1x8xf32, #tpu.memory_space<vmem>>, %arg9: memref<1x256x8xbf16, #tpu.memory_space<vmem>>) attributes {dimension_semantics = [#tpu.dimension_semantics<parallel>, #tpu.dimension_semantics<parallel>], iteration_bounds = array<i64: 2, 1>, scalar_prefetch = 0 : i64, scratch_operands = 0 : i64, tpu.core_type = #tpu.core_type<tc>, window_params = [{transform_indices = @transform_0, window_bounds = array<i64: 1, 256, 144>}, {pipeline_mode = #tpu.pipeline_mode<synchronous>, transform_indices = @transform_1, window_bounds = array<i64: 144, 16>}, {pipeline_mode = #tpu.pipeline_mode<synchronous>, transform_indices = @transform_2, window_bounds = array<i64: 1, 16>}, {pipeline_mode = #tpu.pipeline_mode<synchronous>, transform_indices = @transform_3, window_bounds = array<i64: 1, 16>}, {pipeline_mode = #tpu.pipeline_mode<synchronous>, transform_indices = @transform_4, window_bounds = array<i64: 16, 8>}, {pipeline_mode = #tpu.pipeline_mode<synchronous>, transform_indices = @transform_5, window_bounds = array<i64: 1, 8>}, {pipeline_mode = #tpu.pipeline_mode<synchronous>, transform_indices = @transform_6, window_bounds = array<i64: 1, 8>}, {transform_indices = @transform_7, window_bounds = array<i64: 1, 256, 8>}]} {
    %c0 = arith.constant 0 : index
    %c0_0 = arith.constant 0 : index
    %c0_1 = arith.constant 0 : index
    %0 = vector.load %arg2[%c0, %c0_0, %c0_1] : memref<1x256x144xbf16, #tpu.memory_space<vmem>>, vector<1x256x144xbf16>
    %1 = vector.shape_cast %0 : vector<1x256x144xbf16> to vector<256x144xbf16>
    %c0_2 = arith.constant 0 : index
    %c0_3 = arith.constant 0 : index
    %2 = vector.load %arg3[%c0_2, %c0_3] : memref<144x16xbf16, #tpu.memory_space<vmem>>, vector<144x16xbf16>
    %cst = arith.constant dense<0.000000e+00> : vector<256x16xf32>
    %3 = tpu.matmul %1, %2, %cst {dimension_numbers = #tpu.dot_dimension_numbers<[1], [0], [0], [1], [0, 0, 1, 1], [], []>} : vector<256x144xbf16>, vector<144x16xbf16>, vector<256x16xf32> -> vector<256x16xf32>
    %c0_4 = arith.constant 0 : index
    %c0_5 = arith.constant 0 : index
    %4 = vector.load %arg4[%c0_4, %c0_5] : memref<1x16xf32, #tpu.memory_space<vmem>>, vector<1x16xf32>
    %5 = vector.broadcast %4 : vector<1x16xf32> to vector<256x16xf32>
    %6 = arith.mulf %3, %5 : vector<256x16xf32>
    %c0_6 = arith.constant 0 : index
    %c0_7 = arith.constant 0 : index
    %7 = vector.load %arg5[%c0_6, %c0_7] : memref<1x16xf32, #tpu.memory_space<vmem>>, vector<1x16xf32>
    %8 = vector.broadcast %7 : vector<1x16xf32> to vector<256x16xf32>
    %9 = arith.addf %6, %8 : vector<256x16xf32>
    %cst_8 = arith.constant 0.000000e+00 : f32
    %10 = vector.broadcast %cst_8 : f32 to vector<256x16xf32>
    %11 = arith.maximumf %9, %10 : vector<256x16xf32>
    %12 = arith.truncf %11 : vector<256x16xf32> to vector<256x16xbf16>
    %c0_9 = arith.constant 0 : index
    %c0_10 = arith.constant 0 : index
    %13 = vector.load %arg6[%c0_9, %c0_10] : memref<16x8xbf16, #tpu.memory_space<vmem>>, vector<16x8xbf16>
    %cst_11 = arith.constant dense<0.000000e+00> : vector<256x8xf32>
    %14 = tpu.matmul %12, %13, %cst_11 {dimension_numbers = #tpu.dot_dimension_numbers<[1], [0], [0], [1], [0, 0, 1, 1], [], []>} : vector<256x16xbf16>, vector<16x8xbf16>, vector<256x8xf32> -> vector<256x8xf32>
    %c0_12 = arith.constant 0 : index
    %c0_13 = arith.constant 0 : index
    %15 = vector.load %arg7[%c0_12, %c0_13] : memref<1x8xf32, #tpu.memory_space<vmem>>, vector<1x8xf32>
    %16 = vector.broadcast %15 : vector<1x8xf32> to vector<256x8xf32>
    %17 = arith.mulf %14, %16 : vector<256x8xf32>
    %c0_14 = arith.constant 0 : index
    %c0_15 = arith.constant 0 : index
    %18 = vector.load %arg8[%c0_14, %c0_15] : memref<1x8xf32, #tpu.memory_space<vmem>>, vector<1x8xf32>
    %19 = vector.broadcast %18 : vector<1x8xf32> to vector<256x8xf32>
    %20 = arith.addf %17, %19 : vector<256x8xf32>
    %cst_16 = arith.constant 0.000000e+00 : f32
    %21 = vector.broadcast %cst_16 : f32 to vector<256x8xf32>
    %22 = arith.maximumf %20, %21 : vector<256x8xf32>
    %23 = arith.truncf %22 : vector<256x8xf32> to vector<256x8xbf16>
    %c0_17 = arith.constant 0 : index
    %c0_18 = arith.constant 0 : index
    %c0_19 = arith.constant 0 : index
    %24 = vector.load %arg9[%c0_17, %c0_18, %c0_19] : memref<1x256x8xbf16, #tpu.memory_space<vmem>>, vector<1x256x8xbf16>
    %25 = vector.shape_cast %24 : vector<1x256x8xbf16> to vector<256x8xbf16>
    %26 = vector.shape_cast %23 : vector<256x8xbf16> to vector<1x256x8xbf16>
    tpu.vector_store %arg9[%c0_17, %c0_18, %c0_19], %26 {strides = array<i32>} : memref<1x256x8xbf16, #tpu.memory_space<vmem>>, vector<1x256x8xbf16>,
    return
  }
  func.func @transform_0(%arg0: i32, %arg1: i32) -> (i32, i32, i32) {
    %c0_i32 = arith.constant 0 : i32
    %c0_i32_0 = arith.constant 0 : i32
    return %arg0, %arg1, %c0_i32 : i32, i32, i32
  }
  func.func @transform_1(%arg0: i32, %arg1: i32) -> (i32, i32) {
    %c0_i32 = arith.constant 0 : i32
    %c0_i32_0 = arith.constant 0 : i32
    %c0_i32_1 = arith.constant 0 : i32
    return %c0_i32, %c0_i32_0 : i32, i32
  }
  func.func @transform_2(%arg0: i32, %arg1: i32) -> (i32, i32) {
    %c0_i32 = arith.constant 0 : i32
    %c0_i32_0 = arith.constant 0 : i32
    %c0_i32_1 = arith.constant 0 : i32
    return %c0_i32, %c0_i32_0 : i32, i32
  }
  func.func @transform_3(%arg0: i32, %arg1: i32) -> (i32, i32) {
    %c0_i32 = arith.constant 0 : i32
    %c0_i32_0 = arith.constant 0 : i32
    %c0_i32_1 = arith.constant 0 : i32
    return %c0_i32, %c0_i32_0 : i32, i32
  }
  func.func @transform_4(%arg0: i32, %arg1: i32) -> (i32, i32) {
    %c0_i32 = arith.constant 0 : i32
    %c0_i32_0 = arith.constant 0 : i32
    %c0_i32_1 = arith.constant 0 : i32
    return %c0_i32, %c0_i32_0 : i32, i32
  }
  func.func @transform_5(%arg0: i32, %arg1: i32) -> (i32, i32) {
    %c0_i32 = arith.constant 0 : i32
    %c0_i32_0 = arith.constant 0 : i32
    %c0_i32_1 = arith.constant 0 : i32
    return %c0_i32, %c0_i32_0 : i32, i32
  }
  func.func @transform_6(%arg0: i32, %arg1: i32) -> (i32, i32) {
    %c0_i32 = arith.constant 0 : i32
    %c0_i32_0 = arith.constant 0 : i32
    %c0_i32_1 = arith.constant 0 : i32
    return %c0_i32, %c0_i32_0 : i32, i32
  }
  func.func @transform_7(%arg0: i32, %arg1: i32) -> (i32, i32, i32) {
    %c0_i32 = arith.constant 0 : i32
    %c0_i32_0 = arith.constant 0 : i32
    return %arg0, %arg1, %c0_i32 : i32, i32, i32
  }
}

module attributes {stable_mosaic.version = 11 : i64} {
  func.func @_branch_kernel(%arg0: i32, %arg1: i32, %arg2: memref<1x256x36xbf16, #tpu.memory_space<vmem>>, %arg3: memref<36x16xbf16, #tpu.memory_space<vmem>>, %arg4: memref<1x16xf32, #tpu.memory_space<vmem>>, %arg5: memref<1x16xf32, #tpu.memory_space<vmem>>, %arg6: memref<16x8xbf16, #tpu.memory_space<vmem>>, %arg7: memref<1x8xf32, #tpu.memory_space<vmem>>, %arg8: memref<1x8xf32, #tpu.memory_space<vmem>>, %arg9: memref<1x256x8xbf16, #tpu.memory_space<vmem>>) attributes {dimension_semantics = [#tpu.dimension_semantics<parallel>, #tpu.dimension_semantics<parallel>], iteration_bounds = array<i64: 2, 1>, scalar_prefetch = 0 : i64, scratch_operands = 0 : i64, tpu.core_type = #tpu.core_type<tc>, window_params = [{transform_indices = @transform_0, window_bounds = array<i64: 1, 256, 36>}, {pipeline_mode = #tpu.pipeline_mode<synchronous>, transform_indices = @transform_1, window_bounds = array<i64: 36, 16>}, {pipeline_mode = #tpu.pipeline_mode<synchronous>, transform_indices = @transform_2, window_bounds = array<i64: 1, 16>}, {pipeline_mode = #tpu.pipeline_mode<synchronous>, transform_indices = @transform_3, window_bounds = array<i64: 1, 16>}, {pipeline_mode = #tpu.pipeline_mode<synchronous>, transform_indices = @transform_4, window_bounds = array<i64: 16, 8>}, {pipeline_mode = #tpu.pipeline_mode<synchronous>, transform_indices = @transform_5, window_bounds = array<i64: 1, 8>}, {pipeline_mode = #tpu.pipeline_mode<synchronous>, transform_indices = @transform_6, window_bounds = array<i64: 1, 8>}, {transform_indices = @transform_7, window_bounds = array<i64: 1, 256, 8>}]} {
    %c0 = arith.constant 0 : index
    %c0_0 = arith.constant 0 : index
    %c0_1 = arith.constant 0 : index
    %0 = vector.load %arg2[%c0, %c0_0, %c0_1] : memref<1x256x36xbf16, #tpu.memory_space<vmem>>, vector<1x256x36xbf16>
    %1 = vector.shape_cast %0 : vector<1x256x36xbf16> to vector<256x36xbf16>
    %c0_2 = arith.constant 0 : index
    %c0_3 = arith.constant 0 : index
    %2 = vector.load %arg3[%c0_2, %c0_3] : memref<36x16xbf16, #tpu.memory_space<vmem>>, vector<36x16xbf16>
    %cst = arith.constant dense<0.000000e+00> : vector<256x16xf32>
    %3 = tpu.matmul %1, %2, %cst {dimension_numbers = #tpu.dot_dimension_numbers<[1], [0], [0], [1], [0, 0, 1, 1], [], []>} : vector<256x36xbf16>, vector<36x16xbf16>, vector<256x16xf32> -> vector<256x16xf32>
    %c0_4 = arith.constant 0 : index
    %c0_5 = arith.constant 0 : index
    %4 = vector.load %arg4[%c0_4, %c0_5] : memref<1x16xf32, #tpu.memory_space<vmem>>, vector<1x16xf32>
    %5 = vector.broadcast %4 : vector<1x16xf32> to vector<256x16xf32>
    %6 = arith.mulf %3, %5 : vector<256x16xf32>
    %c0_6 = arith.constant 0 : index
    %c0_7 = arith.constant 0 : index
    %7 = vector.load %arg5[%c0_6, %c0_7] : memref<1x16xf32, #tpu.memory_space<vmem>>, vector<1x16xf32>
    %8 = vector.broadcast %7 : vector<1x16xf32> to vector<256x16xf32>
    %9 = arith.addf %6, %8 : vector<256x16xf32>
    %cst_8 = arith.constant 0.000000e+00 : f32
    %10 = vector.broadcast %cst_8 : f32 to vector<256x16xf32>
    %11 = arith.maximumf %9, %10 : vector<256x16xf32>
    %12 = arith.truncf %11 : vector<256x16xf32> to vector<256x16xbf16>
    %c0_9 = arith.constant 0 : index
    %c0_10 = arith.constant 0 : index
    %13 = vector.load %arg6[%c0_9, %c0_10] : memref<16x8xbf16, #tpu.memory_space<vmem>>, vector<16x8xbf16>
    %cst_11 = arith.constant dense<0.000000e+00> : vector<256x8xf32>
    %14 = tpu.matmul %12, %13, %cst_11 {dimension_numbers = #tpu.dot_dimension_numbers<[1], [0], [0], [1], [0, 0, 1, 1], [], []>} : vector<256x16xbf16>, vector<16x8xbf16>, vector<256x8xf32> -> vector<256x8xf32>
    %c0_12 = arith.constant 0 : index
    %c0_13 = arith.constant 0 : index
    %15 = vector.load %arg7[%c0_12, %c0_13] : memref<1x8xf32, #tpu.memory_space<vmem>>, vector<1x8xf32>
    %16 = vector.broadcast %15 : vector<1x8xf32> to vector<256x8xf32>
    %17 = arith.mulf %14, %16 : vector<256x8xf32>
    %c0_14 = arith.constant 0 : index
    %c0_15 = arith.constant 0 : index
    %18 = vector.load %arg8[%c0_14, %c0_15] : memref<1x8xf32, #tpu.memory_space<vmem>>, vector<1x8xf32>
    %19 = vector.broadcast %18 : vector<1x8xf32> to vector<256x8xf32>
    %20 = arith.addf %17, %19 : vector<256x8xf32>
    %cst_16 = arith.constant 0.000000e+00 : f32
    %21 = vector.broadcast %cst_16 : f32 to vector<256x8xf32>
    %22 = arith.maximumf %20, %21 : vector<256x8xf32>
    %23 = arith.truncf %22 : vector<256x8xf32> to vector<256x8xbf16>
    %c0_17 = arith.constant 0 : index
    %c0_18 = arith.constant 0 : index
    %c0_19 = arith.constant 0 : index
    %24 = vector.load %arg9[%c0_17, %c0_18, %c0_19] : memref<1x256x8xbf16, #tpu.memory_space<vmem>>, vector<1x256x8xbf16>
    %25 = vector.shape_cast %24 : vector<1x256x8xbf16> to vector<256x8xbf16>
    %26 = vector.shape_cast %23 : vector<256x8xbf16> to vector<1x256x8xbf16>
    tpu.vector_store %arg9[%c0_17, %c0_18, %c0_19], %26 {strides = array<i32>} : memref<1x256x8xbf16, #tpu.memory_space<vmem>>, vector<1x256x8xbf16>,
    return
  }
  func.func @transform_0(%arg0: i32, %arg1: i32) -> (i32, i32, i32) {
    %c0_i32 = arith.constant 0 : i32
    %c0_i32_0 = arith.constant 0 : i32
    return %arg0, %arg1, %c0_i32 : i32, i32, i32
  }
  func.func @transform_1(%arg0: i32, %arg1: i32) -> (i32, i32) {
    %c0_i32 = arith.constant 0 : i32
    %c0_i32_0 = arith.constant 0 : i32
    %c0_i32_1 = arith.constant 0 : i32
    return %c0_i32, %c0_i32_0 : i32, i32
  }
  func.func @transform_2(%arg0: i32, %arg1: i32) -> (i32, i32) {
    %c0_i32 = arith.constant 0 : i32
    %c0_i32_0 = arith.constant 0 : i32
    %c0_i32_1 = arith.constant 0 : i32
    return %c0_i32, %c0_i32_0 : i32, i32
  }
  func.func @transform_3(%arg0: i32, %arg1: i32) -> (i32, i32) {
    %c0_i32 = arith.constant 0 : i32
    %c0_i32_0 = arith.constant 0 : i32
    %c0_i32_1 = arith.constant 0 : i32
    return %c0_i32, %c0_i32_0 : i32, i32
  }
  func.func @transform_4(%arg0: i32, %arg1: i32) -> (i32, i32) {
    %c0_i32 = arith.constant 0 : i32
    %c0_i32_0 = arith.constant 0 : i32
    %c0_i32_1 = arith.constant 0 : i32
    return %c0_i32, %c0_i32_0 : i32, i32
  }
  func.func @transform_5(%arg0: i32, %arg1: i32) -> (i32, i32) {
    %c0_i32 = arith.constant 0 : i32
    %c0_i32_0 = arith.constant 0 : i32
    %c0_i32_1 = arith.constant 0 : i32
    return %c0_i32, %c0_i32_0 : i32, i32
  }
  func.func @transform_6(%arg0: i32, %arg1: i32) -> (i32, i32) {
    %c0_i32 = arith.constant 0 : i32
    %c0_i32_0 = arith.constant 0 : i32
    %c0_i32_1 = arith.constant 0 : i32
    return %c0_i32, %c0_i32_0 : i32, i32
  }
  func.func @transform_7(%arg0: i32, %arg1: i32) -> (i32, i32, i32) {
    %c0_i32 = arith.constant 0 : i32
    %c0_i32_0 = arith.constant 0 : i32
    return %arg0, %arg1, %c0_i32 : i32, i32, i32
  }
}

module attributes {stable_mosaic.version = 11 : i64} {
  func.func @_comb_reduce1_kernel(%arg0: i32, %arg1: i32, %arg2: memref<1x256x144xbf16, #tpu.memory_space<vmem>>, %arg3: memref<1x1x144xf32, #tpu.memory_space<vmem>>, %arg4: memref<1x256x16xbf16, #tpu.memory_space<vmem>>, %arg5: memref<144x16xbf16, #tpu.memory_space<vmem>>, %arg6: memref<1x16xf32, #tpu.memory_space<vmem>>, %arg7: memref<1x16xf32, #tpu.memory_space<vmem>>, %arg8: memref<16x16xbf16, #tpu.memory_space<vmem>>, %arg9: memref<1x16xf32, #tpu.memory_space<vmem>>, %arg10: memref<1x16xf32, #tpu.memory_space<vmem>>, %arg11: memref<1x16xf32, #tpu.memory_space<vmem>>, %arg12: memref<1x1xf32, #tpu.memory_space<vmem>>, %arg13: memref<1x1x256xf32, #tpu.memory_space<vmem>>) attributes {dimension_semantics = [#tpu.dimension_semantics<parallel>, #tpu.dimension_semantics<parallel>], iteration_bounds = array<i64: 2, 1>, scalar_prefetch = 0 : i64, scratch_operands = 0 : i64, tpu.core_type = #tpu.core_type<tc>, window_params = [{transform_indices = @transform_0, window_bounds = array<i64: 1, 256, 144>}, {transform_indices = @transform_1, window_bounds = array<i64: 1, 1, 144>}, {transform_indices = @transform_2, window_bounds = array<i64: 1, 256, 16>}, {pipeline_mode = #tpu.pipeline_mode<synchronous>, transform_indices = @transform_3, window_bounds = array<i64: 144, 16>}, {pipeline_mode = #tpu.pipeline_mode<synchronous>, transform_indices = @transform_4, window_bounds = array<i64: 1, 16>}, {pipeline_mode = #tpu.pipeline_mode<synchronous>, transform_indices = @transform_5, window_bounds = array<i64: 1, 16>}, {pipeline_mode = #tpu.pipeline_mode<synchronous>, transform_indices = @transform_6, window_bounds = array<i64: 16, 16>}, {pipeline_mode = #tpu.pipeline_mode<synchronous>, transform_indices = @transform_7, window_bounds = array<i64: 1, 16>}, {pipeline_mode = #tpu.pipeline_mode<synchronous>, transform_indices = @transform_8, window_bounds = array<i64: 1, 16>}, {pipeline_mode = #tpu.pipeline_mode<synchronous>, transform_indices = @transform_9, window_bounds = array<i64: 1, 16>}, {pipeline_mode = #tpu.pipeline_mode<synchronous>, transform_indices = @transform_10, window_bounds = array<i64: 1, 1>}, {transform_indices = @transform_11, window_bounds = array<i64: 1, 1, 256>}]} {
    %c0 = arith.constant 0 : index
    %c0_0 = arith.constant 0 : index
    %c0_1 = arith.constant 0 : index
    %0 = vector.load %arg2[%c0, %c0_0, %c0_1] : memref<1x256x144xbf16, #tpu.memory_space<vmem>>, vector<1x256x144xbf16>
    %1 = vector.shape_cast %0 : vector<1x256x144xbf16> to vector<256x144xbf16>
    %2 = arith.extf %1 : vector<256x144xbf16> to vector<256x144xf32>
    %c0_2 = arith.constant 0 : index
    %c0_3 = arith.constant 0 : index
    %c0_4 = arith.constant 0 : index
    %3 = vector.load %arg3[%c0_2, %c0_3, %c0_4] : memref<1x1x144xf32, #tpu.memory_space<vmem>>, vector<1x1x144xf32>
    %4 = vector.shape_cast %3 : vector<1x1x144xf32> to vector<1x144xf32>
    %5 = vector.broadcast %4 : vector<1x144xf32> to vector<256x144xf32>
    %6 = arith.mulf %2, %5 : vector<256x144xf32>
    %7 = arith.truncf %6 : vector<256x144xf32> to vector<256x144xbf16>
    %c0_5 = arith.constant 0 : index
    %c0_6 = arith.constant 0 : index
    %8 = vector.load %arg5[%c0_5, %c0_6] : memref<144x16xbf16, #tpu.memory_space<vmem>>, vector<144x16xbf16>
    %cst = arith.constant dense<0.000000e+00> : vector<256x16xf32>
    %9 = tpu.matmul %7, %8, %cst {dimension_numbers = #tpu.dot_dimension_numbers<[1], [0], [0], [1], [0, 0, 1, 1], [], []>} : vector<256x144xbf16>, vector<144x16xbf16>, vector<256x16xf32> -> vector<256x16xf32>
    %c0_7 = arith.constant 0 : index
    %c0_8 = arith.constant 0 : index
    %10 = vector.load %arg6[%c0_7, %c0_8] : memref<1x16xf32, #tpu.memory_space<vmem>>, vector<1x16xf32>
    %11 = vector.broadcast %10 : vector<1x16xf32> to vector<256x16xf32>
    %12 = arith.mulf %9, %11 : vector<256x16xf32>
    %c0_9 = arith.constant 0 : index
    %c0_10 = arith.constant 0 : index
    %13 = vector.load %arg7[%c0_9, %c0_10] : memref<1x16xf32, #tpu.memory_space<vmem>>, vector<1x16xf32>
    %14 = vector.broadcast %13 : vector<1x16xf32> to vector<256x16xf32>
    %15 = arith.addf %12, %14 : vector<256x16xf32>
    %cst_11 = arith.constant 0.000000e+00 : f32
    %16 = vector.broadcast %cst_11 : f32 to vector<256x16xf32>
    %17 = arith.maximumf %15, %16 : vector<256x16xf32>
    %18 = arith.truncf %17 : vector<256x16xf32> to vector<256x16xbf16>
    %c0_12 = arith.constant 0 : index
    %c0_13 = arith.constant 0 : index
    %19 = vector.load %arg8[%c0_12, %c0_13] : memref<16x16xbf16, #tpu.memory_space<vmem>>, vector<16x16xbf16>
    %cst_14 = arith.constant dense<0.000000e+00> : vector<256x16xf32>
    %20 = tpu.matmul %18, %19, %cst_14 {dimension_numbers = #tpu.dot_dimension_numbers<[1], [0], [0], [1], [0, 0, 1, 1], [], []>} : vector<256x16xbf16>, vector<16x16xbf16>, vector<256x16xf32> -> vector<256x16xf32>
    %c0_15 = arith.constant 0 : index
    %c0_16 = arith.constant 0 : index
    %21 = vector.load %arg9[%c0_15, %c0_16] : memref<1x16xf32, #tpu.memory_space<vmem>>, vector<1x16xf32>
    %22 = vector.broadcast %21 : vector<1x16xf32> to vector<256x16xf32>
    %23 = arith.mulf %20, %22 : vector<256x16xf32>
    %c0_17 = arith.constant 0 : index
    %c0_18 = arith.constant 0 : index
    %24 = vector.load %arg10[%c0_17, %c0_18] : memref<1x16xf32, #tpu.memory_space<vmem>>, vector<1x16xf32>
    %25 = vector.broadcast %24 : vector<1x16xf32> to vector<256x16xf32>
    %26 = arith.addf %23, %25 : vector<256x16xf32>
    %cst_19 = arith.constant 0.000000e+00 : f32
    %27 = vector.broadcast %cst_19 : f32 to vector<256x16xf32>
    %28 = arith.maximumf %26, %27 : vector<256x16xf32>
    %c0_20 = arith.constant 0 : index
    %c0_21 = arith.constant 0 : index
    %c0_22 = arith.constant 0 : index
    %29 = vector.load %arg4[%c0_20, %c0_21, %c0_22] : memref<1x256x16xbf16, #tpu.memory_space<vmem>>, vector<1x256x16xbf16>
    %30 = vector.shape_cast %29 : vector<1x256x16xbf16> to vector<256x16xbf16>
    %31 = arith.extf %30 : vector<256x16xbf16> to vector<256x16xf32>
    %32 = arith.addf %28, %31 : vector<256x16xf32>
    %c0_23 = arith.constant 0 : index
    %c0_24 = arith.constant 0 : index
    %33 = vector.load %arg11[%c0_23, %c0_24] : memref<1x16xf32, #tpu.memory_space<vmem>>, vector<1x16xf32>
    %34 = vector.broadcast %33 : vector<1x16xf32> to vector<256x16xf32>
    %35 = arith.mulf %32, %34 : vector<256x16xf32>
    %cst_25 = arith.constant dense<0.000000e+00> : vector<256xf32>
    %36 = vector.multi_reduction <add>, %35, %cst_25 [1] : vector<256x16xf32> to vector<256xf32>
    %c0_26 = arith.constant 0 : index
    %c0_27 = arith.constant 0 : index
    %37 = vector.load %arg12[%c0_26, %c0_27] : memref<1x1xf32, #tpu.memory_space<vmem>>, vector<1x1xf32>
    %38 = vector.shape_cast %36 : vector<256xf32> to vector<1x256xf32>
    %39 = vector.broadcast %37 : vector<1x1xf32> to vector<1x256xf32>
    %40 = arith.addf %38, %39 : vector<1x256xf32>
    %c0_28 = arith.constant 0 : index
    %c0_29 = arith.constant 0 : index
    %c0_30 = arith.constant 0 : index
    %41 = vector.load %arg13[%c0_28, %c0_29, %c0_30] : memref<1x1x256xf32, #tpu.memory_space<vmem>>, vector<1x1x256xf32>
    %42 = vector.shape_cast %41 : vector<1x1x256xf32> to vector<1x256xf32>
    %43 = vector.shape_cast %40 : vector<1x256xf32> to vector<1x1x256xf32>
    tpu.vector_store %arg13[%c0_28, %c0_29, %c0_30], %43 {strides = array<i32>} : memref<1x1x256xf32, #tpu.memory_space<vmem>>, vector<1x1x256xf32>,
    return
  }
  func.func @transform_0(%arg0: i32, %arg1: i32) -> (i32, i32, i32) {
    %c0_i32 = arith.constant 0 : i32
    %c0_i32_0 = arith.constant 0 : i32
    return %arg0, %arg1, %c0_i32 : i32, i32, i32
  }
  func.func @transform_1(%arg0: i32, %arg1: i32) -> (i32, i32, i32) {
    %c0_i32 = arith.constant 0 : i32
    %c0_i32_0 = arith.constant 0 : i32
    %c0_i32_1 = arith.constant 0 : i32
    return %arg0, %c0_i32, %c0_i32_0 : i32, i32, i32
  }
  func.func @transform_2(%arg0: i32, %arg1: i32) -> (i32, i32, i32) {
    %c0_i32 = arith.constant 0 : i32
    %c0_i32_0 = arith.constant 0 : i32
    return %arg0, %arg1, %c0_i32 : i32, i32, i32
  }
  func.func @transform_3(%arg0: i32, %arg1: i32) -> (i32, i32) {
    %c0_i32 = arith.constant 0 : i32
    %c0_i32_0 = arith.constant 0 : i32
    %c0_i32_1 = arith.constant 0 : i32
    return %c0_i32, %c0_i32_0 : i32, i32
  }
  func.func @transform_4(%arg0: i32, %arg1: i32) -> (i32, i32) {
    %c0_i32 = arith.constant 0 : i32
    %c0_i32_0 = arith.constant 0 : i32
    %c0_i32_1 = arith.constant 0 : i32
    return %c0_i32, %c0_i32_0 : i32, i32
  }
  func.func @transform_5(%arg0: i32, %arg1: i32) -> (i32, i32) {
    %c0_i32 = arith.constant 0 : i32
    %c0_i32_0 = arith.constant 0 : i32
    %c0_i32_1 = arith.constant 0 : i32
    return %c0_i32, %c0_i32_0 : i32, i32
  }
  func.func @transform_6(%arg0: i32, %arg1: i32) -> (i32, i32) {
    %c0_i32 = arith.constant 0 : i32
    %c0_i32_0 = arith.constant 0 : i32
    %c0_i32_1 = arith.constant 0 : i32
    return %c0_i32, %c0_i32_0 : i32, i32
  }
  func.func @transform_7(%arg0: i32, %arg1: i32) -> (i32, i32) {
    %c0_i32 = arith.constant 0 : i32
    %c0_i32_0 = arith.constant 0 : i32
    %c0_i32_1 = arith.constant 0 : i32
    return %c0_i32, %c0_i32_0 : i32, i32
  }
  func.func @transform_8(%arg0: i32, %arg1: i32) -> (i32, i32) {
    %c0_i32 = arith.constant 0 : i32
    %c0_i32_0 = arith.constant 0 : i32
    %c0_i32_1 = arith.constant 0 : i32
    return %c0_i32, %c0_i32_0 : i32, i32
  }
  func.func @transform_9(%arg0: i32, %arg1: i32) -> (i32, i32) {
    %c0_i32 = arith.constant 0 : i32
    %c0_i32_0 = arith.constant 0 : i32
    %c0_i32_1 = arith.constant 0 : i32
    return %c0_i32, %c0_i32_0 : i32, i32
  }
  func.func @transform_10(%arg0: i32, %arg1: i32) -> (i32, i32) {
    %c0_i32 = arith.constant 0 : i32
    %c0_i32_0 = arith.constant 0 : i32
    %c0_i32_1 = arith.constant 0 : i32
    return %c0_i32, %c0_i32_0 : i32, i32
  }
  func.func @transform_11(%arg0: i32, %arg1: i32) -> (i32, i32, i32) {
    %c0_i32 = arith.constant 0 : i32
    %c0_i32_0 = arith.constant 0 : i32
    return %arg0, %c0_i32, %arg1 : i32, i32, i32
  }
}

</mosaic_0001>

<bundles_post_ra>
// kernel: sparse_and_rgb_guided_depth_forward.12
= control target key start
LH: loop header
LB: loop body
LE: loop exit
PB: predicated region body
PF: predicated region fallthrough
CT: control target
= control target key end

     0   :  { %s676_s15 = smov 0   ;;  %s678_s16 = smov 0   ;;  %s736_s0 = inlined_call_operand.vmem [shape: bf16[2,64,27], index: 0, kind: input, shape index: {}]   ;;  %s737_s1 = inlined_call_operand.vmem [shape: bf16[27,16], index: 1, kind: input, shape index: {}]   ;;  %s738_s2 = inlined_call_operand.vmem [shape: f32[1,16], index: 2, kind: input, shape index: {}]   ;;  %s739_s3 = inlined_call_operand.vmem [shape: f32[1,16], index: 3, kind: input, shape index: {}]   ;;  %s740_s4 = inlined_call_operand.vmem [shape: bf16[2,64,16], index: 4, kind: output, shape index: {}]  }
   0x1   :  { %s680_s17 = smov 0  }
   0x2 LB: > { %s26_s18 = sadd.s32 1, %s644_s16  ;;  %p536_p0 = scmp.ge.s32.totalorder %s648_s17, 1  ;;  %s648_s17 = sphi %s680_s17, %s14_s17   ;;  %s644_s16 = sphi %s678_s16, %s742_s16   ;;  %s640_s15 = sphi %s676_s15, %s741_s15  }
   0x3   : > { %p28_p1 = scmp.ge.s32.totalorder %s26_s18, 2  ;;  %p183_p2 = scmp.lt.s32.totalorder %s648_s17, 3 }
   0x5   : > { %s744_s18 = smov (%p28_p1, %s26_s18), 0  ;;  %p184_p3 = pnand %p536_p0, %p183_p2 }
   0x6   : > { %v620_v0 = vld [vmem:[%s737_s1] sm:$0xff] (!%p184_p3)   ;;  %vm294_vm0 = vcmask (!%p184_p3), 1044480   ;;  %v621_v1 = vld [vmem:[%s737_s1 + $0x8] sm:$0x3f] (!%p184_p3)   ;;  %vm295_vm1 = vcmask (!%p184_p3), 1045504   ;;  %p218_p4 = scmp.lt.s32.totalorder (!%p184_p3), %s640_s15, 1 }
   0x7   : > { %187 = sbr.rel (%p184_p3) target bundleno = 243 (0xf3), region = 36  ;;  %579 = vmatprep.subr.bf16.mxu0 (!%p184_p3), %v620_v0  ;;  %591 = vmatprep.subr.bf16.mxu1 (!%p184_p3), %v620_v0  ;;  %v650_v2 = vmov (!%p184_p3), 65535   ;;  %vm281_vm2 = vcmask (!%p184_p3), 220160   ;;  %v551_v10 = vld [vmem:[%s738_s2] ss:$0 sm:$0xff] (!%p184_p3)  ;;  %vm436_vm3 = vcmask (!%p184_p3), 125952  }
   0x8   : > { %580 = vmatpush3.bf16.msra.mxu0 (!%p184_p3), %v620_v0  ;;  %593 = vmatpush3.bf16.msra.mxu1 (!%p184_p3), %v620_v0  ;;  %v296_v3 = vsel (!%p184_p3), %vm294_vm0, 4294967295, %v650_v2  ;;  %v552_v12 = vld [vmem:[%s739_s3] ss:$0 sm:$0xff] (!%p184_p3) }
   0x9   : > { %v297_v4 = vsel (!%p184_p3), %vm295_vm1, %v296_v3, 0 }
   0xa   : > { %v299_v5 = vand.u32 (!%p184_p3), %v621_v1, %v297_v4 }
   0xc   : > { %581 = vmatprep.subr.bf16.mxu0 (!%p184_p3), %v299_v5  ;;  %592 = vmatprep.subr.bf16.mxu1 (!%p184_p3), %v299_v5 }
   0xd   : > { %582 = vmatpush3.bf16.msra.mxu0 (!%p184_p3), %v299_v5  ;;  %594 = vmatpush3.bf16.msra.mxu1 (!%p184_p3), %v299_v5 }
   0xe   : > { %s746_s15 = smov (!%p218_p4, %s640_s15), 1 }
   0xf   : > { %s563_s23 = sshll.u32 %s746_s15, 5 }
  0x10   : > { %s225_s26 = scalar_lea.vmem %s736_s0, %s563_s23  ;;  %s235_s7 = scalar_lea.vmem %s740_s4, %s563_s23 }
  0x11   : > { %v622_v6 = vld [vmem:[%s225_s26] sm:$0xff]   ;;  %v623_v7 = vld [vmem:[%s225_s26 + $0x10] sm:$0xff]   ;;  %v624_v8 = vld [vmem:[%s225_s26 + $0x8] sm:$0xff]  }
  0x12   : > { %583 = vmatprep.mubr.msk.bf16.mxu0 %vm281_vm2, %v622_v6  ;;  %587 = vmatprep.mubr.msk.bf16.mxu1 %vm281_vm2, %v623_v7  ;;  %v625_v9 = vld [vmem:[%s225_s26 + $0x18] sm:$0xff]  }
  0x13   : > { %584 = vmatmul.mubr.msk.bf16.vlgmr.msra.gmra.mrb[0].mxu0 %vm281_vm2, %v624_v8  ;;  %588 = vmatmul.mubr.msk.bf16.vlgmr.msra.gmra.mrb[0].mxu1 %vm281_vm2, %v625_v9 }
  0xe6   : > { %v585_v11 = vpop.f32.mrb[0].mxu0  ;;  %v589_v14 = vpop.f32.mrb[0].mxu1 }
  0xe7   : > { %v375_v13 = vmul.f32 %v585_v11, %v551_v10  ;;  %v335_v15 = vpop.f32.mrb[1].mxu0  ;;  %v379_v16 = vmul.f32 %v589_v14, %v551_v10  ;;  %v351_v18 = vpop.f32.mrb[1].mxu1 }
  0xe8   : > { %v373_v17 = vmul.f32 %v551_v10, %v335_v15  ;;  %v586_v19 = vpop.f32.mrb[2].mxu0  ;;  %v377_v21 = vmul.f32 %v551_v10, %v351_v18  ;;  %v590_v23 = vpop.f32.mrb[2].mxu1 }
  0xe9   : > { %v390_v20 = vadd.f32 %v552_v12, %v375_v13  ;;  %v376_v22 = vmul.f32 %v586_v19, %v551_v10  ;;  %v338_v24 = vpop.f32.mrb[3].mxu0  ;;  %v394_v25 = vadd.f32 %v552_v12, %v379_v16  ;;  %v380_v27 = vmul.f32 %v590_v23, %v551_v10  ;;  %v354_v29 = vpop.f32.mrb[3].mxu1 }
  0xea   : > { %v388_v26 = vadd.f32 %v552_v12, %v373_v17  ;;  %v374_v28 = vmul.f32 %v551_v10, %v338_v24  ;;  %v392_v31 = vadd.f32 %v552_v12, %v377_v21  ;;  %v378_v33 = vmul.f32 %v551_v10, %v354_v29 }
  0xeb   : > { %v398_v30 = vmax.f32 %v390_v20, 0.0  ;;  %v391_v32 = vadd.f32 %v552_v12, %v376_v22  ;;  %v402_v34 = vmax.f32 %v394_v25, 0.0  ;;  %v395_v36 = vadd.f32 %v552_v12, %v380_v27 }
  0xec   : > { %v396_v35 = vmax.f32 %v388_v26, 0.0  ;;  %v389_v37 = vadd.f32 %v552_v12, %v374_v28  ;;  %v400_v39 = vmax.f32 %v392_v31, 0.0  ;;  %v393_v41 = vadd.f32 %v552_v12, %v378_v33 }
  0xed   : > { %v567_v38 = vpack.c.bf16 %v398_v30, %v398_v30  ;;  %v399_v40 = vmax.f32 %v391_v32, 0.0  ;;  %v571_v42 = vpack.c.bf16 %v402_v34, %v402_v34  ;;  %v403_v44 = vmax.f32 %v395_v36, 0.0 }
  0xee   : > { %v565_v43 = vpack.c.bf16 %v396_v35, %v396_v35  ;;  %v397_v45 = vmax.f32 %v389_v37, 0.0  ;;  %v569_v46 = vpack.c.bf16 %v400_v39, %v400_v39  ;;  %v401_v48 = vmax.f32 %v393_v41, 0.0 }
  0xef   : > { %439 = vst.msk [vmem:[%s235_s7 + $0x8] sm:$0xf] %vm436_vm3, %v567_v38  ;;  %v568_v47 = vpack.c.bf16 %v399_v40, %v399_v40  ;;  %443 = vst.msk [vmem:[%s235_s7 + $0x18] sm:$0xf] %vm436_vm3, %v571_v42  ;;  %v572_v49 = vpack.c.bf16 %v403_v44, %v403_v44 }
  0xf0   : > { %437 = vst.msk [vmem:[%s235_s7] sm:$0xf] %vm436_vm3, %v565_v43  ;;  %v566_v50 = vpack.c.bf16 %v397_v45, %v397_v45  ;;  %441 = vst.msk [vmem:[%s235_s7 + $0x10] sm:$0xf] %vm436_vm3, %v569_v46  ;;  %v570_v51 = vpack.c.bf16 %v401_v48, %v401_v48 }
  0xf1   : > { %440 = vst.msk [vmem:[%s235_s7 + $0xc] sm:$0xf] %vm436_vm3, %v568_v47  ;;  %444 = vst.msk [vmem:[%s235_s7 + $0x1c] sm:$0xf] %vm436_vm3, %v572_v49 }
  0xf2   : > { %438 = vst.msk [vmem:[%s235_s7 + $0x4] sm:$0xf] %vm436_vm3, %v566_v50  ;;  %442 = vst.msk [vmem:[%s235_s7 + $0x14] sm:$0xf] %vm436_vm3, %v570_v51 }
  0xf3 PF: > { %s14_s17 = sadd.s32 1, %s648_s17   ;;  %s741_s15 = smov %s644_s16 }
  0xf4   : > { %p11_p5 = scmp.ge.s32.totalorder %s14_s17, 4   ;;  %s742_s16 = smov %s744_s18 }
  0xf6   :  { %13 = sbr.rel (!%p11_p5) target bundleno = 2 (0x2), region = 66 }

// kernel: sparse_and_rgb_guided_depth_forward.13
= control target key start
LH: loop header
LB: loop body
LE: loop exit
PB: predicated region body
PF: predicated region fallthrough
CT: control target
= control target key end

     0   :  { %s608_s15 = smov 0   ;;  %s610_s16 = smov 0   ;;  %s678_s0 = inlined_call_operand.vmem [shape: bf16[2,16,144], index: 0, kind: input, shape index: {}]   ;;  %s679_s1 = inlined_call_operand.vmem [shape: bf16[144,32], index: 1, kind: input, shape index: {}]   ;;  %s680_s2 = inlined_call_operand.vmem [shape: f32[1,32], index: 2, kind: input, shape index: {}]   ;;  %s681_s3 = inlined_call_operand.vmem [shape: f32[1,32], index: 3, kind: input, shape index: {}]   ;;  %s682_s4 = inlined_call_operand.vmem [shape: bf16[2,16,32], index: 4, kind: output, shape index: {}]  }
   0x1   :  { %s612_s17 = smov 0  }
   0x2 LB: > { %s26_s18 = sadd.s32 1, %s576_s16  ;;  %p494_p0 = scmp.ge.s32.totalorder %s580_s17, 1  ;;  %s580_s17 = sphi %s612_s17, %s14_s17   ;;  %s576_s16 = sphi %s610_s16, %s684_s16   ;;  %s572_s15 = sphi %s608_s15, %s683_s15  }
   0x3   : > { %p28_p1 = scmp.ge.s32.totalorder %s26_s18, 2  ;;  %p184_p2 = scmp.lt.s32.totalorder %s580_s17, 3 }
   0x5   : > { %s686_s18 = smov (%p28_p1, %s26_s18), 0  ;;  %p185_p3 = pnand %p494_p0, %p184_p2 }
   0x6   : > { %v546_v0 = vld [vmem:[%s679_s1] sm:$0xff] (!%p185_p3)   ;;  %v582_v1 = vmov (!%p185_p3), 0   ;;  %p220_p4 = scmp.lt.s32.totalorder (!%p185_p3), %s572_s15, 1  ;;  %v547_v2 = vld [vmem:[%s679_s1 + $0x8] sm:$0xff] (!%p185_p3)   ;;  %v548_v3 = vld [vmem:[%s679_s1 + $0x10] sm:$0xff] (!%p185_p3)   ;;  %vm324_vm0 = vcmask (!%p185_p3), 130048  }
   0x7   : > { %188 = sbr.rel (%p185_p3) target bundleno = 266 (0x10a), region = 36  ;;  %328 = vmatprep.subr.bf16.mxu0 (!%p185_p3), %v582_v1  ;;  %v549_v4 = vld [vmem:[%s679_s1 + $0x18] sm:$0xff] (!%p185_p3)   ;;  %v550_v6 = vld [vmem:[%s679_s1 + $0x20] sm:$0xff] (!%p185_p3)   ;;  %v551_v7 = vld [vmem:[%s679_s1 + $0x28] sm:$0xff] (!%p185_p3)   ;;  %vm397_vm1 = vcmask (!%p185_p3), 257024  }
   0x8   : > { %329 = vmatpush1.bf16.msra.mxu0 (!%p185_p3), %v546_v0  ;;  %v552_v8 = vld [vmem:[%s679_s1 + $0x30] sm:$0xff] (!%p185_p3)   ;;  %v553_v9 = vld [vmem:[%s679_s1 + $0x38] sm:$0xff] (!%p185_p3)   ;;  %v554_v10 = vld [vmem:[%s679_s1 + $0x40] sm:$0xff] (!%p185_p3)  }
   0x9   : > { %330 = vmatprep.subr.bf16.mxu0 (!%p185_p3), %v582_v1  ;;  %v511_v12 = vld [vmem:[%s680_s2] ss:$0 sm:$0xff] (!%p185_p3) }
   0xa   : > { %v512_v14 = vld [vmem:[%s681_s3] ss:$0 sm:$0xff] (!%p185_p3) }
   0xc   : > { %331 = vmatpush1.bf16.msra.mxu0 (!%p185_p3), %v547_v2 }
   0xd   : > { %332 = vmatprep.subr.bf16.mxu0 (!%p185_p3), %v582_v1 }
   0xe   : > { %s688_s15 = smov (!%p220_p4, %s572_s15), 1 }
   0xf   : > { %s517_s23 = sshll.u32 %s688_s15, 4 }
  0x10   : > { %s228_s28 = scalar_lea.vmem %s678_s0, %s517_s23  ;;  %333 = vmatpush1.bf16.msra.mxu0 %v548_v3  ;;  %s518_s23 = sshll.u32 %s688_s15, 3 }
  0x11   : > { %v557_v5 = vld [vmem:[%s228_s28 + $0x4] ss:$8 sps:$4 sm:$0xff]   ;;  %334 = vmatprep.subr.bf16.mxu0 %v582_v1  ;;  %v555_v11 = vld [vmem:[%s228_s28] ss:$8 sps:$4 sm:$0xff]   ;;  %s238_s26 = scalar_lea.vmem %s682_s4, %s518_s23 }
  0x12   : > { %510 = vmatprep.mubr.msk.bf16.mxu0 %vm324_vm0, %v557_v5 }
  0x14   : > { %335 = vmatpush1.bf16.msra.mxu0 %v549_v4 }
  0x15   : > { %336 = vmatprep.subr.bf16.mxu0 %v582_v1 }
  0x18   : > { %337 = vmatpush1.bf16.msra.mxu0 %v550_v6 }
  0x19   : > { %338 = vmatprep.subr.bf16.mxu0 %v582_v1 }
  0x1c   : > { %339 = vmatpush1.bf16.msra.mxu0 %v551_v7 }
  0x1d   : > { %340 = vmatprep.subr.bf16.mxu0 %v582_v1 }
  0x20   : > { %341 = vmatpush1.bf16.msra.mxu0 %v552_v8 }
  0x21   : > { %342 = vmatprep.subr.bf16.mxu0 %v582_v1 }
  0x24   : > { %343 = vmatpush1.bf16.msra.mxu0 %v553_v9 }
  0x25   : > { %344 = vmatprep.subr.bf16.mxu0 %v582_v1 }
  0x28   : > { %345 = vmatpush1.bf16.msra.mxu0 %v554_v10 }
  0x2b   : > { %361 = vmatmul.mubr.bf16.vlgmr.msra.gmra.mrb[0].mxu0 %v555_v11 }
  0xfe   : > { %v362_v13 = vpop.f32.mrb[0].mxu0 }
  0xff   : > { %v376_v15 = vmul.f32 %v511_v12, %v362_v13  ;;  %v364_v16 = vpop.f32.mrb[1].mxu0 }
 0x100   : > { %v365_v17 = vpop.f32.mrb[2].mxu0 }
 0x101   : > { %v385_v18 = vadd.f32 %v512_v14, %v376_v15  ;;  %v377_v19 = vmul.f32 %v511_v12, %v365_v17  ;;  %v367_v20 = vpop.f32.mrb[3].mxu0 }
 0x103   : > { %v387_v21 = vmax.f32 %v385_v18, 0.0  ;;  %v386_v22 = vadd.f32 %v512_v14, %v377_v19 }
 0x105   : > { %v519_v23 = vpack.c.bf16 %v387_v21, %v387_v21  ;;  %v388_v24 = vmax.f32 %v386_v22, 0.0 }
 0x107   : > { %398 = vst.msk [vmem:[%s238_s26] sm:$0xf] %vm397_vm1, %v519_v23  ;;  %v520_v25 = vpack.c.bf16 %v388_v24, %v388_v24 }
 0x109   : > { %399 = vst.msk [vmem:[%s238_s26 + $0x4] sm:$0xf] %vm397_vm1, %v520_v25 }
 0x10a PF: > { %s14_s17 = sadd.s32 1, %s580_s17   ;;  %s683_s15 = smov %s576_s16 }
 0x10b   : > { %p11_p5 = scmp.ge.s32.totalorder %s14_s17, 4   ;;  %s684_s16 = smov %s686_s18 }
 0x10d   :  { %13 = sbr.rel (!%p11_p5) target bundleno = 2 (0x2), region = 66 }

// kernel: sparse_and_rgb_guided_depth_forward.14
= control target key start
LH: loop header
LB: loop body
LE: loop exit
PB: predicated region body
PF: predicated region fallthrough
CT: control target
= control target key end

     0   :  { %s741_s15 = smov 0   ;;  %s743_s16 = smov 0   ;;  %s838_s0 = inlined_call_operand.vmem [shape: bf16[2,4,288], index: 0, kind: input, shape index: {}]   ;;  %s839_s1 = inlined_call_operand.vmem [shape: bf16[288,64], index: 1, kind: input, shape index: {}]   ;;  %s840_s2 = inlined_call_operand.vmem [shape: f32[1,64], index: 2, kind: input, shape index: {}]   ;;  %s841_s3 = inlined_call_operand.vmem [shape: f32[1,64], index: 3, kind: input, shape index: {}]   ;;  %s842_s4 = inlined_call_operand.vmem [shape: bf16[2,4,64], index: 4, kind: output, shape index: {}]  }
   0x1   :  { %s745_s17 = smov 0  }
   0x2 LB: > { %s26_s18 = sadd.s32 1, %s707_s16  ;;  %p583_p0 = scmp.ge.s32.totalorder %s711_s17, 1  ;;  %s711_s17 = sphi %s745_s17, %s14_s17   ;;  %s707_s16 = sphi %s743_s16, %s844_s16   ;;  %s703_s15 = sphi %s741_s15, %s843_s15  }
   0x3   : > { %p28_p1 = scmp.ge.s32.totalorder %s26_s18, 2  ;;  %p182_p2 = scmp.lt.s32.totalorder %s711_s17, 3 }
   0x5   : > { %s846_s18 = smov (%p28_p1, %s26_s18), 0  ;;  %p183_p3 = pnand %p583_p0, %p182_p2 }
   0x6   : > { %v670_v0 = vld [vmem:[%s839_s1 + $0x40] sm:$0xff] (!%p183_p3)   ;;  %v713_v2 = vmov (!%p183_p3), 0.0   ;;  %v672_v3 = vld [vmem:[%s839_s1 + $0x48] sm:$0xff] (!%p183_p3)   ;;  %p214_p4 = scmp.lt.s32.totalorder (!%p183_p3), %s703_s15, 1  ;;  %v674_v5 = vld [vmem:[%s839_s1 + $0x50] sm:$0xff] (!%p183_p3)   ;;  %vm714_vm0 = vmmov (!%p183_p3), 0   ;;  %v273_v12 = vlaneseq (!%p183_p3) }
   0x7   : > { %186 = sbr.rel (%p183_p3) target bundleno = 265 (0x109), region = 36  ;;  %v671_v1 = vld [vmem:[%s839_s1] sm:$0xff] (!%p183_p3)   ;;  %634 = vmatprep.subr.bf16.mxu1 (!%p183_p3), %v713_v2  ;;  %609 = vmatprep.subr.bf16.mxu0 (!%p183_p3), %v670_v0  ;;  %v673_v4 = vld [vmem:[%s839_s1 + $0x8] sm:$0xff] (!%p183_p3)   ;;  %v675_v6 = vld [vmem:[%s839_s1 + $0x10] sm:$0xff] (!%p183_p3)   ;;  %v715_v17 = vmov (!%p183_p3), 1983009808  }
   0x8   : > { %610 = vmatpush3.bf16.msra.mxu0 (!%p183_p3), %v671_v1  ;;  %638 = vmatprep.mubr.msk.bf16.mxu1 (!%p183_p3), %vm714_vm0, %v713_v2  ;;  %v676_v7 = vld [vmem:[%s839_s1 + $0x58] sm:$0xff] (!%p183_p3)   ;;  %v678_v9 = vld [vmem:[%s839_s1 + $0x60] sm:$0xff] (!%p183_p3)   ;;  %v680_v13 = vld [vmem:[%s839_s1 + $0x68] sm:$0xff] (!%p183_p3)   ;;  %v271_v18 = vunpack.c.l.s4 (!%p183_p3), %v715_v17  ;;  %v274_v19 = vshrl.u32 (!%p183_p3), %v273_v12, 7  ;;  %vm395_vm1 = vcmask (!%p183_p3), 261120   ;;  %vm497_vm2 = vcmask (!%p183_p3), 517120  }
   0x9   : > { %611 = vmatprep.subr.bf16.mxu0 (!%p183_p3), %v672_v3  ;;  %v677_v8 = vld [vmem:[%s839_s1 + $0x18] sm:$0xff] (!%p183_p3)   ;;  %v684_v10 = vld [vmem:[%s839_s1 + $0x80] sm:$0xff] (!%p183_p3)   ;;  %v687_v14 = vld [vmem:[%s839_s1 + $0x88] sm:$0xff] (!%p183_p3)  }
   0xa   : > { %v679_v11 = vld [vmem:[%s839_s1 + $0x20] sm:$0xff] (!%p183_p3)   ;;  %635 = vmatpush3.bf16.msra.mxu1 (!%p183_p3), %v684_v10  ;;  %v681_v16 = vld [vmem:[%s839_s1 + $0x28] sm:$0xff] (!%p183_p3)   ;;  %v682_v20 = vld [vmem:[%s839_s1 + $0x70] sm:$0xff] (!%p183_p3)   ;;  %v272_v22 = vunpack.c.0.s8 (!%p183_p3), %v271_v18 }
   0xb   : > { %636 = vmatprep.subr.bf16.mxu1 (!%p183_p3), %v713_v2  ;;  %v683_v23 = vld [vmem:[%s839_s1 + $0x30] sm:$0xff] (!%p183_p3)   ;;  %v685_v25 = vld [vmem:[%s839_s1 + $0x78] sm:$0xff] (!%p183_p3)   ;;  %v605_v38 = vld [vmem:[%s840_s2] ss:$0 sm:$0xff] (!%p183_p3) }
   0xc   : > { %612 = vmatpush3.bf16.msra.mxu0 (!%p183_p3), %v673_v4  ;;  %v275_v24 = vsub.s32 (!%p183_p3), %v272_v22, %v274_v19  ;;  %v686_v28 = vld [vmem:[%s839_s1 + $0x38] sm:$0xff] (!%p183_p3)   ;;  %v606_v41 = vld [vmem:[%s841_s3] ss:$0 sm:$0xff] (!%p183_p3) }
   0xd   : > { %613 = vmatprep.subr.bf16.mxu0 (!%p183_p3), %v674_v5 }
   0xe   : > { %s848_s15 = smov (!%p214_p4, %s703_s15), 1  ;;  %637 = vmatpush3.bf16.msra.mxu1 %v687_v14 }
   0xf   : > { %s642_s9 = smul.u32 6, %s848_s15  ;;  %s585_s19 = sshll.u32 %s848_s15, 1 }
  0x10   : > { %614 = vmatpush3.bf16.msra.mxu0 %v675_v6 }
  0x11   : > { %615 = vmatprep.subr.bf16.mxu0 %v676_v7  ;;  %s222_s22 = scalar_lea.vmem %s838_s0, %s642_s9 }
  0x12   : > { %v231_v15 = vld [vmem:[%s222_s22] sm:$0x3f]  ;;  %s229_s22 = scalar_lea.vmem %s842_s4, %s585_s19 }
  0x13   : > { %v269_v21 = vcombine.high %v231_v15, %v231_v15  ;;  %v276_v26 = vrot.slane %v231_v15, %v275_v24 }
  0x14   : > { %616 = vmatpush3.bf16.msra.mxu0 %v677_v8 }
  0x15   : > { %617 = vmatprep.subr.bf16.mxu0 %v678_v9  ;;  %v283_v27 = vrot.slane %v269_v21, %v275_v24  ;;  %v284_v29 = vcombine.high %v276_v26, %v276_v26 }
  0x17   : > { %639 = vmatmul.mubr.msk.bf16.vlgmr.msra.gmra.mrb[0].mxu1 %vm395_vm1, %v283_v27  ;;  %431 = vmatprep.mubr.bf16.mxu0 %v284_v29 }
  0x18   : > { %618 = vmatpush3.bf16.msra.mxu0 %v679_v11 }
  0x19   : > { %619 = vmatprep.subr.bf16.mxu0 %v680_v13 }
  0x1c   : > { %620 = vmatpush3.bf16.msra.mxu0 %v681_v16 }
  0x1d   : > { %621 = vmatprep.subr.bf16.mxu0 %v682_v20 }
  0x20   : > { %622 = vmatpush3.bf16.msra.mxu0 %v683_v23 }
  0x21   : > { %623 = vmatprep.subr.bf16.mxu0 %v685_v25 }
  0x24   : > { %624 = vmatpush3.bf16.msra.mxu0 %v686_v28 }
  0x27   : > { %432 = vmatmul.mubr.bf16.vlgmr.msra.gmra.mrb[0].mxu0 %v276_v26 }
  0xea   : > { %v473_v30 = vpop.f32.mrb[0].mxu1 }
  0xeb   : > { %v640_v31 = vpop.f32.mrb[1].mxu1 }
  0xec   : > { %v476_v32 = vpop.f32.mrb[2].mxu1 }
  0xed   : > { %v641_v33 = vpop.f32.mrb[3].mxu1 }
  0xfa   : > { %v625_v34 = vpop.f32.mrb[0].mxu0 }
  0xfb   : > { %v626_v35 = vpop.f32.mrb[1].mxu0 }
  0xfc   : > { %v627_v36 = vadd.f32 %v626_v35, %v625_v34  ;;  %v628_v37 = vpop.f32.mrb[2].mxu0 }
  0xfd   : > { %v629_v39 = vpop.f32.mrb[3].mxu0 }
  0xfe   : > { %v474_v40 = vadd.f32 %v627_v36, %v473_v30 }
 0x100   : > { %v486_v42 = vmul.f32 %v605_v38, %v474_v40 }
 0x102   : > { %v494_v43 = vadd.f32 %v606_v41, %v486_v42 }
 0x104   : > { %v495_v44 = vmax.f32 %v494_v43, 0.0 }
 0x106   : > { %v496_v45 = vpack.c.bf16 %v495_v44, %v495_v44 }
 0x108   : > { %498 = vst.msk [vmem:[%s229_s22] sm:$0x3] %vm497_vm2, %v496_v45 }
 0x109 PF: > { %s14_s17 = sadd.s32 1, %s711_s17   ;;  %s843_s15 = smov %s707_s16 }
 0x10a   : > { %p11_p5 = scmp.ge.s32.totalorder %s14_s17, 4   ;;  %s844_s16 = smov %s846_s18 }
 0x10c   :  { %13 = sbr.rel (!%p11_p5) target bundleno = 2 (0x2), region = 66 }

// kernel: sparse_and_rgb_guided_depth_forward.15
= control target key start
LH: loop header
LB: loop body
LE: loop exit
PB: predicated region body
PF: predicated region fallthrough
CT: control target
= control target key end

     0   :  { %s1270_s24 = smov 0   ;;  %s1272_s25 = smov 0   ;;  %s1452_s0 = inlined_call_operand.vmem [shape: bf16[2,16,576], index: 0, kind: input, shape index: {}]   ;;  %s1453_s1 = inlined_call_operand.vmem [shape: bf16[576,64], index: 1, kind: input, shape index: {}]   ;;  %s1454_s2 = inlined_call_operand.vmem [shape: f32[1,64], index: 2, kind: input, shape index: {}]   ;;  %s1455_s3 = inlined_call_operand.vmem [shape: f32[1,64], index: 3, kind: input, shape index: {}]   ;;  %s1456_s4 = inlined_call_operand.vmem [shape: bf16[64,32], index: 4, kind: input, shape index: {}]   ;;  %s1457_s5 = inlined_call_operand.vmem [shape: f32[1,32], index: 5, kind: input, shape index: {}]   ;;  %s1458_s6 = inlined_call_operand.vmem [shape: f32[1,32], index: 6, kind: input, shape index: {}]   ;;  %s1459_s7 = inlined_call_operand.vmem [shape: bf16[2,16,32], index: 7, kind: output, shape index: {}]  }
   0x1   :  { %s1274_s26 = smov 0  }
   0x2 LB: > { %s29_s27 = sadd.s32 1, %s1222_s25  ;;  %p990_p0 = scmp.ge.s32.totalorder %s1226_s26, 1  ;;  %s1226_s26 = sphi %s1274_s26, %s17_s26   ;;  %s1222_s25 = sphi %s1272_s25, %s1461_s25   ;;  %s1218_s24 = sphi %s1270_s24, %s1460_s24  }
   0x3   : > { %p31_p1 = scmp.ge.s32.totalorder %s29_s27, 2  ;;  %p259_p2 = scmp.lt.s32.totalorder %s1226_s26, 3 }
   0x5   : > { %s1463_s27 = smov (%p31_p1, %s29_s27), 0  ;;  %p260_p3 = pnand %p990_p0, %p259_p2 }
   0x6   : > { %v1157_v0 = vld [vmem:[%s1453_s1 + $0x40] sm:$0xff] (!%p260_p3)   ;;  %v1161_v4 = vld [vmem:[%s1453_s1 + $0x48] sm:$0xff] (!%p260_p3)   ;;  %v1165_v8 = vld [vmem:[%s1453_s1 + $0x50] sm:$0xff] (!%p260_p3)   ;;  %p301_p4 = scmp.lt.s32.totalorder (!%p260_p3), %s1218_s24, 1  ;;  %v1228_v34 = vmov (!%p260_p3), 0.0   ;;  %vm1229_vm0 = vmmov (!%p260_p3), 0  }
   0x7   : > { %263 = sbr.rel (%p260_p3) target bundleno = 503 (0x1f7), region = 48  ;;  %v1158_v1 = vld [vmem:[%s1453_s1 + $0xc0] sm:$0xff] (!%p260_p3)   ;;  %1052 = vmatprep.subr.bf16.mxu0 (!%p260_p3), %v1157_v0  ;;  %v1162_v5 = vld [vmem:[%s1453_s1 + $0xc8] sm:$0xff] (!%p260_p3)   ;;  %v1166_v9 = vld [vmem:[%s1453_s1 + $0xd0] sm:$0xff] (!%p260_p3)   ;;  %vm641_vm1 = vcmask (!%p260_p3), 523264   ;;  %vm893_vm2 = vcmask (!%p260_p3), 257024  }
   0x8   : > { %v1159_v2 = vld [vmem:[%s1453_s1] sm:$0xff] (!%p260_p3)   ;;  %1074 = vmatprep.subr.bf16.mxu1 (!%p260_p3), %v1158_v1  ;;  %v1163_v6 = vld [vmem:[%s1453_s1 + $0x8] sm:$0xff] (!%p260_p3)   ;;  %v1167_v10 = vld [vmem:[%s1453_s1 + $0x10] sm:$0xff] (!%p260_p3)  }
   0x9   : > { %v1160_v3 = vld [vmem:[%s1453_s1 + $0x80] sm:$0xff] (!%p260_p3)   ;;  %1053 = vmatpush3.bf16.msra.mxu0 (!%p260_p3), %v1159_v2  ;;  %v1164_v7 = vld [vmem:[%s1453_s1 + $0x88] sm:$0xff] (!%p260_p3)   ;;  %v1168_v11 = vld [vmem:[%s1453_s1 + $0x90] sm:$0xff] (!%p260_p3)  }
   0xa   : > { %1075 = vmatpush3.bf16.msra.mxu1 (!%p260_p3), %v1160_v3  ;;  %1054 = vmatprep.subr.bf16.mxu0 (!%p260_p3), %v1161_v4  ;;  %v1169_v12 = vld [vmem:[%s1453_s1 + $0x58] sm:$0xff] (!%p260_p3)   ;;  %v1173_v16 = vld [vmem:[%s1453_s1 + $0x60] sm:$0xff] (!%p260_p3)   ;;  %v1177_v20 = vld [vmem:[%s1453_s1 + $0x68] sm:$0xff] (!%p260_p3)  }
   0xb   : > { %1076 = vmatprep.subr.bf16.mxu1 (!%p260_p3), %v1162_v5  ;;  %v1170_v13 = vld [vmem:[%s1453_s1 + $0xd8] sm:$0xff] (!%p260_p3)   ;;  %v1174_v17 = vld [vmem:[%s1453_s1 + $0xe0] sm:$0xff] (!%p260_p3)   ;;  %v1178_v21 = vld [vmem:[%s1453_s1 + $0xe8] sm:$0xff] (!%p260_p3)  }
   0xc   : > { %v1171_v14 = vld [vmem:[%s1453_s1 + $0x18] sm:$0xff] (!%p260_p3)   ;;  %v1175_v18 = vld [vmem:[%s1453_s1 + $0x20] sm:$0xff] (!%p260_p3)   ;;  %v1179_v22 = vld [vmem:[%s1453_s1 + $0x28] sm:$0xff] (!%p260_p3)  }
   0xd   : > { %1055 = vmatpush3.bf16.msra.mxu0 (!%p260_p3), %v1163_v6  ;;  %v1172_v15 = vld [vmem:[%s1453_s1 + $0x98] sm:$0xff] (!%p260_p3)   ;;  %v1176_v19 = vld [vmem:[%s1453_s1 + $0xa0] sm:$0xff] (!%p260_p3)   ;;  %v1180_v23 = vld [vmem:[%s1453_s1 + $0xa8] sm:$0xff] (!%p260_p3)  }
   0xe   : > { %1077 = vmatpush3.bf16.msra.mxu1 %v1164_v7  ;;  %1056 = vmatprep.subr.bf16.mxu0 %v1165_v8  ;;  %s1465_s24 = smov (!%p301_p4, %s1218_s24), 1  ;;  %v1181_v24 = vld [vmem:[%s1453_s1 + $0x70] sm:$0xff]   ;;  %v1185_v28 = vld [vmem:[%s1453_s1 + $0x78] sm:$0xff]   ;;  %v1195_v37 = vld [vmem:[%s1453_s1 + $0x100] sm:$0xff]  }
   0xf   : > { %1078 = vmatprep.subr.bf16.mxu1 %v1166_v9  ;;  %v1182_v25 = vld [vmem:[%s1453_s1 + $0xf0] sm:$0xff]   ;;  %s1130_s19 = smul.u32 40, %s1465_s24  ;;  %v1186_v29 = vld [vmem:[%s1453_s1 + $0xf8] sm:$0xff]   ;;  %v1196_v38 = vld [vmem:[%s1453_s1 + $0x108] sm:$0xff]   ;;  %s1049_s21 = sshll.u32 %s1465_s24, 3 }
  0x10   : > { %v1183_v26 = vld [vmem:[%s1453_s1 + $0x30] sm:$0xff]   ;;  %v1187_v30 = vld [vmem:[%s1453_s1 + $0x38] sm:$0xff]   ;;  %v1200_v42 = vld [vmem:[%s1456_s4] sm:$0xff]   ;;  %s319_s28 = scalar_lea.vmem %s1459_s7, %s1049_s21 }
  0x11   : > { %1057 = vmatpush3.bf16.msra.mxu0 %v1167_v10  ;;  %v1184_v27 = vld [vmem:[%s1453_s1 + $0xb0] sm:$0xff]   ;;  %s1388_s11 = scalar_lea.vmem %s1452_s0, %s1130_s19  ;;  %v1188_v31 = vld [vmem:[%s1453_s1 + $0xb8] sm:$0xff]   ;;  %v1201_v43 = vld [vmem:[%s1456_s4 + $0x8] sm:$0xff]  }
  0x12   : > { %1079 = vmatpush3.bf16.msra.mxu1 %v1168_v11  ;;  %1058 = vmatprep.subr.bf16.mxu0 %v1169_v12  ;;  %v1189_v32 = vld [vmem:[%s1388_s11] ss:$20 sps:$4 sm:$0xff]   ;;  %v1191_v33 = vld [vmem:[%s1388_s11 + $0x4] ss:$20 sps:$4 sm:$0xff]   ;;  %v1192_v35 = vld [vmem:[%s1388_s11 + $0x8] ss:$20 sps:$4 sm:$0xff]  }
  0x13   : > { %1080 = vmatprep.subr.bf16.mxu1 %v1170_v13  ;;  %v1194_v36 = vld [vmem:[%s1388_s11 + $0xc] ss:$20 sps:$4 sm:$0xff]   ;;  %677 = vmatprep.mubr.bf16.mxu0 %v1191_v33  ;;  %v1197_v39 = vld [vmem:[%s1453_s1 + $0x110] sm:$0xff]   ;;  %v1198_v40 = vld [vmem:[%s1453_s1 + $0x118] sm:$0xff]  }
  0x14   : > { %718 = vmatprep.mubr.bf16.mxu1 %v1194_v36  ;;  %v1199_v41 = vld [vmem:[%s1388_s11 + $0x10] ss:$20 sps:$4 sm:$0xff]   ;;  %v1203_v45 = vld [vmem:[%s1456_s4 + $0x18] sm:$0xff]   ;;  %v1036_v61 = vld [vmem:[%s1454_s2] ss:$0 sm:$0xff] }
  0x15   : > { %1059 = vmatpush3.bf16.msra.mxu0 %v1171_v14  ;;  %v1202_v44 = vld [vmem:[%s1456_s4 + $0x10] sm:$0xff]   ;;  %v1037_v0 = vld [vmem:[%s1455_s3] ss:$0 sm:$0xff] }
  0x16   : > { %1081 = vmatpush3.bf16.msra.mxu1 %v1172_v15  ;;  %1060 = vmatprep.subr.bf16.mxu0 %v1173_v16  ;;  %v1043_v11 = vld [vmem:[%s1457_s5] ss:$0 sm:$0xff] }
  0x17   : > { %1082 = vmatprep.subr.bf16.mxu1 %v1174_v17  ;;  %v1044_v13 = vld [vmem:[%s1458_s6] ss:$0 sm:$0xff] }
  0x19   : > { %1061 = vmatpush3.bf16.msra.mxu0 %v1175_v18 }
  0x1a   : > { %1083 = vmatpush3.bf16.msra.mxu1 %v1176_v19  ;;  %1062 = vmatprep.subr.bf16.mxu0 %v1177_v20 }
  0x1b   : > { %1084 = vmatprep.subr.bf16.mxu1 %v1178_v21 }
  0x1d   : > { %1063 = vmatpush3.bf16.msra.mxu0 %v1179_v22 }
  0x1e   : > { %1085 = vmatpush3.bf16.msra.mxu1 %v1180_v23  ;;  %1064 = vmatprep.subr.bf16.mxu0 %v1181_v24 }
  0x1f   : > { %1086 = vmatprep.subr.bf16.mxu1 %v1182_v25 }
  0x21   : > { %1065 = vmatpush3.bf16.msra.mxu0 %v1183_v26 }
  0x22   : > { %1087 = vmatpush3.bf16.msra.mxu1 %v1184_v27  ;;  %1066 = vmatprep.subr.bf16.mxu0 %v1185_v28 }
  0x23   : > { %1088 = vmatprep.subr.bf16.mxu1 %v1186_v29 }
  0x25   : > { %1067 = vmatpush3.bf16.msra.mxu0 %v1187_v30 }
  0x26   : > { %1089 = vmatpush3.bf16.msra.mxu1 %v1188_v31  ;;  %1106 = vmatprep.subr.bf16.mxu0 %v1228_v34 }
  0x27   : > { %1118 = vmatprep.subr.bf16.mxu1 %v1228_v34 }
  0x28   : > { %678 = vmatmul.mubr.bf16.vlgmr.msra.gmra.mrb[0].mxu0 %v1189_v32 }
  0x29   : > { %719 = vmatmul.mubr.bf16.vlgmr.msra.gmra.mrb[0].mxu1 %v1192_v35  ;;  %1107 = vmatpush3.bf16.msra.mxu0 %v1195_v37 }
  0x2a   : > { %1108 = vmatprep.subr.bf16.mxu0 %v1228_v34  ;;  %1114 = vmatprep.mubr.msk.bf16.mxu0 %vm1229_vm0, %v1228_v34 }
  0x2b   : > { %1126 = vmatprep.mubr.msk.bf16.mxu1 %vm1229_vm0, %v1228_v34  ;;  %1119 = vmatpush3.bf16.msra.mxu1 %v1200_v42 }
  0x2c   : > { %1120 = vmatprep.subr.bf16.mxu1 %v1228_v34 }
  0x2d   : > { %1109 = vmatpush3.bf16.msra.mxu0 %v1196_v38 }
  0x2e   : > { %1110 = vmatprep.subr.bf16.mxu0 %v1228_v34 }
  0x2f   : > { %1121 = vmatpush3.bf16.msra.mxu1 %v1201_v43 }
  0x30   : > { %1122 = vmatprep.subr.bf16.mxu1 %v1228_v34 }
  0x31   : > { %1111 = vmatpush3.bf16.msra.mxu0 %v1197_v39 }
  0x32   : > { %1112 = vmatprep.subr.bf16.mxu0 %v1228_v34 }
  0x33   : > { %1123 = vmatpush3.bf16.msra.mxu1 %v1202_v44 }
  0x34   : > { %1124 = vmatprep.subr.bf16.mxu1 %v1228_v34 }
  0x35   : > { %1113 = vmatpush3.bf16.msra.mxu0 %v1198_v40 }
  0x37   : > { %1125 = vmatpush3.bf16.msra.mxu1 %v1203_v45 }
  0x38   : > { %1115 = vmatmul.mubr.msk.bf16.vlgmr.msra.gmra.mrb[4].mxu0 %vm641_vm1, %v1199_v41 }
  0xfb   : > { %v1068_v46 = vpop.f32.mrb[0].mxu0 }
  0xfc   : > { %v1090_v47 = vpop.f32.mrb[0].mxu1  ;;  %v1069_v48 = vpop.f32.mrb[1].mxu0 }
  0xfd   : > { %v1070_v49 = vadd.f32 %v1069_v48, %v1068_v46  ;;  %v1091_v50 = vpop.f32.mrb[1].mxu1  ;;  %v1071_v51 = vpop.f32.mrb[2].mxu0 }
  0xfe   : > { %v1092_v52 = vadd.f32 %v1091_v50, %v1090_v47  ;;  %v1093_v53 = vpop.f32.mrb[2].mxu1  ;;  %v1072_v54 = vpop.f32.mrb[3].mxu0 }
  0xff   : > { %v1073_v55 = vadd.f32 %v1072_v54, %v1071_v51  ;;  %v1094_v56 = vpop.f32.mrb[3].mxu1 }
 0x100   : > { %v1095_v57 = vadd.f32 %v1094_v56, %v1093_v53  ;;  %v721_v58 = vadd.f32 %v1092_v52, %v1070_v49 }
 0x102   : > { %v724_v59 = vadd.f32 %v1095_v57, %v1073_v55 }
 0x10b   : > { %v761_v60 = vpop.f32.mrb[4].mxu0 }
 0x10c   : > { %v762_v62 = vadd.f32 %v761_v60, %v721_v58  ;;  %v1116_v63 = vpop.f32.mrb[5].mxu0 }
 0x10d   : > { %v764_v1 = vpop.f32.mrb[6].mxu0 }
 0x10e   : > { %v775_v2 = vmul.f32 %v1036_v61, %v762_v62  ;;  %v765_v3 = vadd.f32 %v764_v1, %v724_v59  ;;  %v1117_v4 = vpop.f32.mrb[7].mxu0 }
 0x110   : > { %v784_v5 = vadd.f32 %v1037_v0, %v775_v2  ;;  %v776_v6 = vmul.f32 %v1036_v61, %v765_v3 }
 0x112   : > { %v785_v7 = vadd.f32 %v1037_v0, %v776_v6  ;;  %v786_v8 = vmax.f32 %v784_v5, 0.0 }
 0x114   : > { %v787_v9 = vmax.f32 %v785_v7, 0.0 }
 0x116   : > { %v788_v10 = vpack.c.bf16 %v787_v9, %v786_v8 }
 0x118   : > { %1127 = vmatmul.mubr.msk.bf16.vlgmr.msra.gmra.mrb[4].mxu1 %vm641_vm1, %v788_v10 }
 0x1eb   : > { %v858_v12 = vpop.f32.mrb[4].mxu1 }
 0x1ec   : > { %v872_v14 = vmul.f32 %v1043_v11, %v858_v12  ;;  %v1128_v15 = vpop.f32.mrb[5].mxu1 }
 0x1ed   : > { %v861_v16 = vpop.f32.mrb[6].mxu1 }
 0x1ee   : > { %v881_v17 = vadd.f32 %v1044_v13, %v872_v14  ;;  %v873_v18 = vmul.f32 %v1043_v11, %v861_v16  ;;  %v1129_v19 = vpop.f32.mrb[7].mxu1 }
 0x1f0   : > { %v883_v20 = vmax.f32 %v881_v17, 0.0  ;;  %v882_v21 = vadd.f32 %v1044_v13, %v873_v18 }
 0x1f2   : > { %v1050_v22 = vpack.c.bf16 %v883_v20, %v883_v20  ;;  %v884_v23 = vmax.f32 %v882_v21, 0.0 }
 0x1f4   : > { %894 = vst.msk [vmem:[%s319_s28] sm:$0xf] %vm893_vm2, %v1050_v22  ;;  %v1051_v24 = vpack.c.bf16 %v884_v23, %v884_v23 }
 0x1f6   : > { %895 = vst.msk [vmem:[%s319_s28 + $0x4] sm:$0xf] %vm893_vm2, %v1051_v24 }
 0x1f7 PF: > { %s17_s26 = sadd.s32 1, %s1226_s26   ;;  %s1460_s24 = smov %s1222_s25 }
 0x1f8   : > { %p14_p5 = scmp.ge.s32.totalorder %s17_s26, 4   ;;  %s1461_s25 = smov %s1463_s27 }
 0x1fa   :  { %16 = sbr.rel (!%p14_p5) target bundleno = 2 (0x2), region = 78 }

// kernel: sparse_and_rgb_guided_depth_forward.16
= control target key start
LH: loop header
LB: loop body
LE: loop exit
PB: predicated region body
PF: predicated region fallthrough
CT: control target
= control target key end

     0   :  { %s773_s24 = smov 0   ;;  %s775_s25 = smov 0   ;;  %s846_s0 = inlined_call_operand.vmem [shape: bf16[2,16,36], index: 0, kind: input, shape index: {}]   ;;  %s847_s1 = inlined_call_operand.vmem [shape: bf16[36,64], index: 1, kind: input, shape index: {}]   ;;  %s848_s2 = inlined_call_operand.vmem [shape: f32[1,64], index: 2, kind: input, shape index: {}]   ;;  %s849_s3 = inlined_call_operand.vmem [shape: f32[1,64], index: 3, kind: input, shape index: {}]   ;;  %s850_s4 = inlined_call_operand.vmem [shape: bf16[64,32], index: 4, kind: input, shape index: {}]   ;;  %s851_s5 = inlined_call_operand.vmem [shape: f32[1,32], index: 5, kind: input, shape index: {}]   ;;  %s852_s6 = inlined_call_operand.vmem [shape: f32[1,32], index: 6, kind: input, shape index: {}]   ;;  %s853_s7 = inlined_call_operand.vmem [shape: bf16[2,16,32], index: 7, kind: output, shape index: {}]  }
   0x1   :  { %s777_s26 = smov 0  }
   0x2 LB: > { %s29_s27 = sadd.s32 1, %s725_s25  ;;  %p615_p0 = scmp.ge.s32.totalorder %s729_s26, 1  ;;  %s729_s26 = sphi %s777_s26, %s17_s26   ;;  %s725_s25 = sphi %s775_s25, %s855_s25   ;;  %s721_s24 = sphi %s773_s24, %s854_s24  }
   0x3   : > { %p31_p1 = scmp.ge.s32.totalorder %s29_s27, 2  ;;  %p258_p2 = scmp.lt.s32.totalorder %s729_s26, 3 }
   0x5   : > { %s857_s27 = smov (%p31_p1, %s29_s27), 0  ;;  %p259_p3 = pnand %p615_p0, %p258_p2 }
   0x6   : > { %v699_v0 = vld [vmem:[%s847_s1] sm:$0xff] (!%p259_p3)   ;;  %v731_v1 = vmov (!%p259_p3), 0.0   ;;  %v700_v2 = vld [vmem:[%s847_s1 + $0x8] sm:$0xff] (!%p259_p3)   ;;  %v701_v3 = vld [vmem:[%s847_s1 + $0x10] ss:$0 sps:$4 sm:$0x33] (!%p259_p3)  }
   0x7   : > { %262 = sbr.rel (%p259_p3) target bundleno = 464 (0x1d0), region = 48  ;;  %651 = vmatprep.subr.bf16.mxu0 (!%p259_p3), %v731_v1  ;;  %661 = vmatprep.subr.bf16.mxu1 (!%p259_p3), %v731_v1  ;;  %vm732_vm0 = vmmov (!%p259_p3), 0   ;;  %p299_p4 = scmp.lt.s32.totalorder (!%p259_p3), %s721_s24, 1  ;;  %vm350_vm1 = vcmask (!%p259_p3), 1041408   ;;  %v703_v4 = vld [vmem:[%s850_s4] sm:$0xff] (!%p259_p3)   ;;  %vm346_vm2 = vcmask (!%p259_p3), 293888  }
   0x8   : > { %652 = vmatpush3.bf16.msra.mxu0 (!%p259_p3), %v699_v0  ;;  %657 = vmatprep.mubr.msk.bf16.mxu0 (!%p259_p3), %vm732_vm0, %v731_v1  ;;  %v352_v5 = vsel (!%p259_p3), %vm350_vm1, %v701_v3, 0  ;;  %v704_v7 = vld [vmem:[%s850_s4 + $0x8] sm:$0xff] (!%p259_p3)   ;;  %v705_v8 = vld [vmem:[%s850_s4 + $0x10] sm:$0xff] (!%p259_p3)   ;;  %v706_v9 = vld [vmem:[%s850_s4 + $0x18] sm:$0xff] (!%p259_p3)   ;;  %vm448_vm3 = vcmask (!%p259_p3), 523264   ;;  %vm521_vm4 = vcmask (!%p259_p3), 257024  }
   0x9   : > { %653 = vmatprep.subr.bf16.mxu0 (!%p259_p3), %v731_v1  ;;  %669 = vmatprep.mubr.msk.bf16.mxu1 (!%p259_p3), %vm732_vm0, %v731_v1  ;;  %v625_v10 = vld [vmem:[%s848_s2] ss:$0 sm:$0xff] (!%p259_p3) }
   0xa   : > { %662 = vmatpush3.bf16.msra.mxu1 (!%p259_p3), %v703_v4  ;;  %v626_v12 = vld [vmem:[%s849_s3] ss:$0 sm:$0xff] (!%p259_p3) }
   0xb   : > { %663 = vmatprep.subr.bf16.mxu1 (!%p259_p3), %v731_v1  ;;  %v632_v23 = vld [vmem:[%s851_s5] ss:$0 sm:$0xff] (!%p259_p3) }
   0xc   : > { %654 = vmatpush3.bf16.msra.mxu0 (!%p259_p3), %v700_v2  ;;  %v633_v25 = vld [vmem:[%s852_s6] ss:$0 sm:$0xff] (!%p259_p3) }
   0xd   : > { %655 = vmatprep.subr.bf16.mxu0 (!%p259_p3), %v731_v1 }
   0xe   : > { %s859_s24 = smov (!%p299_p4, %s721_s24), 1  ;;  %664 = vmatpush3.bf16.msra.mxu1 %v704_v7 }
   0xf   : > { %s638_s13 = sshll.u32 %s859_s24, 3  ;;  %665 = vmatprep.subr.bf16.mxu1 %v731_v1 }
  0x10   : > { %s306_s16 = scalar_lea.vmem %s846_s0, %s638_s13  ;;  %656 = vmatpush3.bf16.msra.mxu0 %v352_v5  ;;  %s316_s15 = scalar_lea.vmem %s853_s7, %s638_s13 }
  0x11   : > { %v702_v6 = vld [vmem:[%s306_s16] sm:$0xff]  }
  0x12   : > { %666 = vmatpush3.bf16.msra.mxu1 %v705_v8 }
  0x13   : > { %658 = vmatmul.mubr.msk.bf16.vlgmr.msra.gmra.mrb[0].mxu0 %vm346_vm2, %v702_v6  ;;  %667 = vmatprep.subr.bf16.mxu1 %v731_v1 }
  0x16   : > { %668 = vmatpush3.bf16.msra.mxu1 %v706_v9 }
  0xe6   : > { %v388_v11 = vpop.f32.mrb[0].mxu0 }
  0xe7   : > { %v402_v13 = vmul.f32 %v625_v10, %v388_v11  ;;  %v659_v14 = vpop.f32.mrb[1].mxu0 }
  0xe8   : > { %v391_v15 = vpop.f32.mrb[2].mxu0 }
  0xe9   : > { %v411_v16 = vadd.f32 %v626_v12, %v402_v13  ;;  %v403_v17 = vmul.f32 %v625_v10, %v391_v15  ;;  %v660_v18 = vpop.f32.mrb[3].mxu0 }
  0xeb   : > { %v412_v19 = vadd.f32 %v626_v12, %v403_v17  ;;  %v413_v20 = vmax.f32 %v411_v16, 0.0 }
  0xed   : > { %v414_v21 = vmax.f32 %v412_v19, 0.0 }
  0xef   : > { %v415_v22 = vpack.c.bf16 %v414_v21, %v413_v20 }
  0xf1   : > { %670 = vmatmul.mubr.msk.bf16.vlgmr.msra.gmra.mrb[0].mxu1 %vm448_vm3, %v415_v22 }
 0x1c4   : > { %v486_v24 = vpop.f32.mrb[0].mxu1 }
 0x1c5   : > { %v500_v26 = vmul.f32 %v632_v23, %v486_v24  ;;  %v671_v27 = vpop.f32.mrb[1].mxu1 }
 0x1c6   : > { %v489_v28 = vpop.f32.mrb[2].mxu1 }
 0x1c7   : > { %v509_v29 = vadd.f32 %v633_v25, %v500_v26  ;;  %v501_v30 = vmul.f32 %v632_v23, %v489_v28  ;;  %v672_v31 = vpop.f32.mrb[3].mxu1 }
 0x1c9   : > { %v511_v32 = vmax.f32 %v509_v29, 0.0  ;;  %v510_v33 = vadd.f32 %v633_v25, %v501_v30 }
 0x1cb   : > { %v640_v34 = vpack.c.bf16 %v511_v32, %v511_v32  ;;  %v512_v35 = vmax.f32 %v510_v33, 0.0 }
 0x1cd   : > { %522 = vst.msk [vmem:[%s316_s15] sm:$0xf] %vm521_vm4, %v640_v34  ;;  %v641_v36 = vpack.c.bf16 %v512_v35, %v512_v35 }
 0x1cf   : > { %523 = vst.msk [vmem:[%s316_s15 + $0x4] sm:$0xf] %vm521_vm4, %v641_v36 }
 0x1d0 PF: > { %s17_s26 = sadd.s32 1, %s729_s26   ;;  %s854_s24 = smov %s725_s25 }
 0x1d1   : > { %p14_p5 = scmp.ge.s32.totalorder %s17_s26, 4   ;;  %s855_s25 = smov %s857_s27 }
 0x1d3   :  { %16 = sbr.rel (!%p14_p5) target bundleno = 2 (0x2), region = 78 }

// kernel: sparse_and_rgb_guided_depth_forward.17
= control target key start
LH: loop header
LB: loop body
LE: loop exit
PB: predicated region body
PF: predicated region fallthrough
CT: control target
= control target key end

     0   :  { %s1621_s17 = smov 0   ;;  %s1623_s18 = smov 0   ;;  %s1851_s0 = inlined_call_operand.vmem [shape: bf16[2,16,576], index: 0, kind: input, shape index: {}]   ;;  %s1852_s1 = inlined_call_operand.vmem [shape: f32[2,1,576], index: 1, kind: input, shape index: {}]   ;;  %s1853_s2 = inlined_call_operand.vmem [shape: bf16[2,16,64], index: 2, kind: input, shape index: {}]   ;;  %s1854_s3 = inlined_call_operand.vmem [shape: bf16[576,64], index: 3, kind: input, shape index: {}]   ;;  %s1855_s4 = inlined_call_operand.vmem [shape: f32[1,64], index: 4, kind: input, shape index: {}]   ;;  %s1856_s5 = inlined_call_operand.vmem [shape: f32[1,64], index: 5, kind: input, shape index: {}]   ;;  %s1857_s6 = inlined_call_operand.vmem [shape: bf16[64,64], index: 6, kind: input, shape index: {}]   ;;  %s1858_s7 = inlined_call_operand.vmem [shape: f32[1,64], index: 7, kind: input, shape index: {}]   ;;  %s1859_s8 = inlined_call_operand.vmem [shape: f32[1,64], index: 8, kind: input, shape index: {}]   ;;  %s1860_s9 = inlined_call_operand.vmem [shape: bf16[64,32], index: 9, kind: input, shape index: {}]   ;;  %s1861_s10 = inlined_call_operand.vmem [shape: f32[1,32], index: 10, kind: input, shape index: {}]   ;;  %s1862_s11 = inlined_call_operand.vmem [shape: bf16[2,16,32], index: 11, kind: output, shape index: {}]  }
   0x1   :  { %s1625_s19 = smov 0  }
   0x2 LB: > { %s33_s20 = sadd.s32 1, %s1553_s18  ;;  %p1298_p0 = scmp.ge.s32.totalorder %s1557_s19, 1  ;;  %s1557_s19 = sphi %s1625_s19, %s21_s19   ;;  %s1553_s18 = sphi %s1623_s18, %s1864_s18   ;;  %s1549_s17 = sphi %s1621_s17, %s1863_s17  }
   0x3   : > { %p35_p1 = scmp.ge.s32.totalorder %s33_s20, 2  ;;  %p385_p2 = scmp.lt.s32.totalorder %s1557_s19, 3 }
   0x5   : > { %s1866_s20 = smov (%p35_p1, %s33_s20), 0  ;;  %p386_p3 = pnand %p1298_p0, %p385_p2 }
   0x6   : > { %v1491_v0 = vld [vmem:[%s1854_s3 + $0x40] sm:$0xff] (!%p386_p3)   ;;  %v1495_v4 = vld [vmem:[%s1854_s3 + $0x48] sm:$0xff] (!%p386_p3)   ;;  %v1499_v8 = vld [vmem:[%s1854_s3 + $0x50] sm:$0xff] (!%p386_p3)   ;;  %p448_p4 = scmp.lt.s32.totalorder (!%p386_p3), %s1549_s17, 1  ;;  %v501_v20 = vlaneseq (!%p386_p3)  ;;  %v1559_v47 = vmov (!%p386_p3), 0.0   ;;  %vm1560_vm0 = vmmov (!%p386_p3), 0  }
   0x7   : > { %389 = sbr.rel (%p386_p3) target bundleno = 723 (0x2d3), region = 64  ;;  %v1492_v1 = vld [vmem:[%s1854_s3 + $0xc0] sm:$0xff] (!%p386_p3)   ;;  %1368 = vmatprep.subr.bf16.mxu0 (!%p386_p3), %v1491_v0  ;;  %v1496_v5 = vld [vmem:[%s1854_s3 + $0xc8] sm:$0xff] (!%p386_p3)   ;;  %v1500_v9 = vld [vmem:[%s1854_s3 + $0xd0] sm:$0xff] (!%p386_p3)   ;;  %vm829_vm1 = vcmask (!%p386_p3), 523264   ;;  %vm1171_vm2 = vcmask (!%p386_p3), 257024  }
   0x8   : > { %v1493_v2 = vld [vmem:[%s1854_s3] sm:$0xff] (!%p386_p3)   ;;  %1390 = vmatprep.subr.bf16.mxu1 (!%p386_p3), %v1492_v1  ;;  %v1497_v6 = vld [vmem:[%s1854_s3 + $0x8] sm:$0xff] (!%p386_p3)   ;;  %v1501_v10 = vld [vmem:[%s1854_s3 + $0x10] sm:$0xff] (!%p386_p3)   ;;  %v1717_v25 = vshrl.u32 (!%p386_p3), %v501_v20, 7 }
   0x9   : > { %v1494_v3 = vld [vmem:[%s1854_s3 + $0x80] sm:$0xff] (!%p386_p3)   ;;  %1369 = vmatpush3.bf16.msra.mxu0 (!%p386_p3), %v1493_v2  ;;  %v1498_v7 = vld [vmem:[%s1854_s3 + $0x88] sm:$0xff] (!%p386_p3)   ;;  %v1502_v11 = vld [vmem:[%s1854_s3 + $0x90] sm:$0xff] (!%p386_p3)  }
   0xa   : > { %1391 = vmatpush3.bf16.msra.mxu1 (!%p386_p3), %v1494_v3  ;;  %1370 = vmatprep.subr.bf16.mxu0 (!%p386_p3), %v1495_v4  ;;  %v1503_v12 = vld [vmem:[%s1854_s3 + $0x58] sm:$0xff] (!%p386_p3)   ;;  %v1507_v16 = vld [vmem:[%s1854_s3 + $0x60] sm:$0xff] (!%p386_p3)   ;;  %v1511_v21 = vld [vmem:[%s1854_s3 + $0x68] sm:$0xff] (!%p386_p3)   ;;  %v507_v31 = vsub.s32 (!%p386_p3), 1, %v1717_v25  ;;  %v515_v33 = vsub.s32 (!%p386_p3), 3, %v1717_v25  ;;  %v503_v35 = vsub.s32 (!%p386_p3), 0, %v1717_v25 }
   0xb   : > { %1392 = vmatprep.subr.bf16.mxu1 (!%p386_p3), %v1496_v5  ;;  %v1504_v13 = vld [vmem:[%s1854_s3 + $0xd8] sm:$0xff] (!%p386_p3)   ;;  %v1508_v17 = vld [vmem:[%s1854_s3 + $0xe0] sm:$0xff] (!%p386_p3)   ;;  %v1512_v22 = vld [vmem:[%s1854_s3 + $0xe8] sm:$0xff] (!%p386_p3)   ;;  %v511_v37 = vsub.s32 (!%p386_p3), 2, %v1717_v25  ;;  %v519_v58 = vsub.s32 (!%p386_p3), 4, %v1717_v25 }
   0xc   : > { %v1505_v14 = vld [vmem:[%s1854_s3 + $0x18] sm:$0xff] (!%p386_p3)   ;;  %v1509_v18 = vld [vmem:[%s1854_s3 + $0x20] sm:$0xff] (!%p386_p3)   ;;  %v1513_v23 = vld [vmem:[%s1854_s3 + $0x28] sm:$0xff] (!%p386_p3)  }
   0xd   : > { %1371 = vmatpush3.bf16.msra.mxu0 (!%p386_p3), %v1497_v6  ;;  %v1506_v15 = vld [vmem:[%s1854_s3 + $0x98] sm:$0xff] (!%p386_p3)   ;;  %v1510_v19 = vld [vmem:[%s1854_s3 + $0xa0] sm:$0xff] (!%p386_p3)   ;;  %v1514_v24 = vld [vmem:[%s1854_s3 + $0xa8] sm:$0xff] (!%p386_p3)  }
   0xe   : > { %1393 = vmatpush3.bf16.msra.mxu1 %v1498_v7  ;;  %1372 = vmatprep.subr.bf16.mxu0 %v1499_v8  ;;  %s1868_s17 = smov (!%p448_p4, %s1549_s17), 1  ;;  %v1515_v26 = vld [vmem:[%s1854_s3 + $0x70] sm:$0xff]   ;;  %v1519_v30 = vld [vmem:[%s1854_s3 + $0x78] sm:$0xff]   ;;  %v1523_v63 = vld [vmem:[%s1854_s3 + $0x100] sm:$0xff]  }
   0xf   : > { %1394 = vmatprep.subr.bf16.mxu1 %v1500_v9  ;;  %s1463_s26 = smul.u32 40, %s1868_s17  ;;  %v1516_v27 = vld [vmem:[%s1854_s3 + $0xf0] sm:$0xff]   ;;  %v1520_v32 = vld [vmem:[%s1854_s3 + $0xf8] sm:$0xff]   ;;  %v1524_v6 = vld [vmem:[%s1854_s3 + $0x108] sm:$0xff]  }
  0x10   : > { %s1464_s29 = smul.u32 5, %s1868_s17  ;;  %v1517_v28 = vld [vmem:[%s1854_s3 + $0x30] sm:$0xff]   ;;  %v1521_v34 = vld [vmem:[%s1854_s3 + $0x38] sm:$0xff]   ;;  %v1531_v20 = vld [vmem:[%s1860_s9] sm:$0xff]  }
  0x11   : > { %1373 = vmatpush3.bf16.msra.mxu0 %v1501_v10  ;;  %v1518_v29 = vld [vmem:[%s1854_s3 + $0xb0] sm:$0xff]   ;;  %s1743_s25 = scalar_lea.vmem %s1851_s0, %s1463_s26  ;;  %v1522_v36 = vld [vmem:[%s1854_s3 + $0xb8] sm:$0xff]   ;;  %s1360_s26 = sshll.u32 %s1868_s17, 3 }
  0x12   : > { %1395 = vmatpush3.bf16.msra.mxu1 %v1502_v11  ;;  %1374 = vmatprep.subr.bf16.mxu0 %v1503_v12  ;;  %s461_s30 = scalar_lea.vmem %s1852_s1, %s1464_s29  ;;  %v483_v38 = vld [vmem:[%s1743_s25] sm:$0xff]  ;;  %v486_v39 = vld [vmem:[%s1743_s25 + $0x14] sm:$0xff]  ;;  %v484_v45 = vld [vmem:[%s1743_s25 + $0x8] sm:$0xff]  ;;  %s470_s21 = scalar_lea.vmem %s1853_s2, %s1360_s26 }
  0x13   : > { %1396 = vmatprep.subr.bf16.mxu1 %v1504_v13  ;;  %v499_v40 = vld [vmem:[%s461_s30] sm:$0x1f]  ;;  %v489_v41 = vunpack.c.l.bf16 %v483_v38  ;;  %v490_v42 = vunpack.c.h.bf16 %v483_v38  ;;  %v494_v43 = vunpack.c.l.bf16 %v486_v39  ;;  %v495_v44 = vunpack.c.h.bf16 %v486_v39  ;;  %v1525_v11 = vld [vmem:[%s1854_s3 + $0x110] sm:$0xff]   ;;  %s480_s28 = scalar_lea.vmem %s1862_s11, %s1360_s26 }
  0x14   : > { %v487_v46 = vld [vmem:[%s1743_s25 + $0x1c] sm:$0xff]  ;;  %v508_v48 = vrot.slane %v499_v40, %v507_v31  ;;  %v491_v49 = vunpack.c.l.bf16 %v484_v45  ;;  %v492_v50 = vunpack.c.h.bf16 %v484_v45  ;;  %v516_v53 = vrot.slane %v499_v40, %v515_v33  ;;  %v485_v7 = vld [vmem:[%s1743_s25 + $0x10] ss:$20 sps:$4 sm:$0xff]  }
  0x15   : > { %1375 = vmatpush3.bf16.msra.mxu0 %v1505_v14  ;;  %v496_v51 = vunpack.c.l.bf16 %v487_v46  ;;  %v497_v52 = vunpack.c.h.bf16 %v487_v46  ;;  %v504_v54 = vrot.slane %v499_v40, %v503_v35  ;;  %v512_v55 = vrot.slane %v499_v40, %v511_v37  ;;  %v1526_v14 = vld [vmem:[%s1854_s3 + $0x118] sm:$0xff]   ;;  %v1342_v39 = vld [vmem:[%s1856_s5] ss:$0 sm:$0xff] }
  0x16   : > { %1397 = vmatpush3.bf16.msra.mxu1 %v1506_v15  ;;  %1376 = vmatprep.subr.bf16.mxu0 %v1507_v16  ;;  %v527_v56 = vmul.f32 %v508_v48, %v490_v42  ;;  %v532_v57 = vmul.f32 %v508_v48, %v495_v44  ;;  %v529_v59 = vmul.f32 %v516_v53, %v492_v50  ;;  %v493_v8 = vunpack.c.l.bf16 %v485_v7  ;;  %v1527_v16 = vld [vmem:[%s1857_s6] sm:$0xff]  }
  0x17   : > { %1398 = vmatprep.subr.bf16.mxu1 %v1508_v17  ;;  %v534_v60 = vmul.f32 %v516_v53, %v497_v52  ;;  %v526_v61 = vmul.f32 %v504_v54, %v489_v41  ;;  %v531_v62 = vmul.f32 %v504_v54, %v494_v43  ;;  %v528_v1 = vmul.f32 %v512_v55, %v491_v49  ;;  %v1528_v17 = vld [vmem:[%s1857_s6 + $0x8] sm:$0xff]   ;;  %v1533_v52 = vld [vmem:[%s1860_s9 + $0x10] sm:$0xff]   ;;  %v1534_v53 = vld [vmem:[%s1860_s9 + $0x18] sm:$0xff]  }
  0x18   : > { %v537_v0 = vpack.c.bf16 %v532_v57, %v527_v56  ;;  %v533_v2 = vmul.f32 %v512_v55, %v496_v51  ;;  %v498_v9 = vunpack.c.h.bf16 %v485_v7  ;;  %v520_v10 = vrot.slane %v499_v40, %v519_v58  ;;  %v1532_v51 = vld [vmem:[%s1860_s9 + $0x8] sm:$0xff]   ;;  %v1348_v54 = vld [vmem:[%s1858_s7] ss:$0 sm:$0xff] }
  0x19   : > { %1377 = vmatpush3.bf16.msra.mxu0 %v1509_v18  ;;  %v539_v3 = vpack.c.bf16 %v534_v60, %v529_v59  ;;  %v536_v4 = vpack.c.bf16 %v531_v62, %v526_v61  ;;  %v1529_v18 = vld [vmem:[%s1857_s6 + $0x10] sm:$0xff]   ;;  %v1349_v56 = vld [vmem:[%s1859_s8] ss:$0 sm:$0xff] }
  0x1a   : > { %1399 = vmatpush3.bf16.msra.mxu1 %v1510_v19  ;;  %1378 = vmatprep.subr.bf16.mxu0 %v1511_v21  ;;  %v538_v5 = vpack.c.bf16 %v533_v2, %v528_v1  ;;  %v530_v12 = vmul.f32 %v520_v10, %v493_v8  ;;  %v535_v13 = vmul.f32 %v520_v10, %v498_v9  ;;  %v1530_v19 = vld [vmem:[%s1857_s6 + $0x18] sm:$0xff]   ;;  %v1365_v58 = vld [vmem:[%s470_s21] sm:$0xff]  }
  0x1b   : > { %1400 = vmatprep.subr.bf16.mxu1 %v1512_v22  ;;  %865 = vmatprep.mubr.bf16.mxu0 %v537_v0  ;;  %v1366_v0 = vunpack.c.l.bf16 %v1365_v58  ;;  %v1367_v2 = vunpack.c.h.bf16 %v1365_v58  ;;  %v1350_v7 = vld [vmem:[%s1861_s10] ss:$0 sm:$0xff] }
  0x1c   : > { %906 = vmatprep.mubr.bf16.mxu1 %v539_v3  ;;  %v540_v15 = vpack.c.bf16 %v535_v13, %v530_v12 }
  0x1d   : > { %1379 = vmatpush3.bf16.msra.mxu0 %v1513_v23 }
  0x1e   : > { %1401 = vmatpush3.bf16.msra.mxu1 %v1514_v24  ;;  %1380 = vmatprep.subr.bf16.mxu0 %v1515_v26 }
  0x1f   : > { %1402 = vmatprep.subr.bf16.mxu1 %v1516_v27 }
  0x21   : > { %1381 = vmatpush3.bf16.msra.mxu0 %v1517_v28 }
  0x22   : > { %1403 = vmatpush3.bf16.msra.mxu1 %v1518_v29  ;;  %1382 = vmatprep.subr.bf16.mxu0 %v1519_v30 }
  0x23   : > { %1404 = vmatprep.subr.bf16.mxu1 %v1520_v32 }
  0x25   : > { %1383 = vmatpush3.bf16.msra.mxu0 %v1521_v34 }
  0x26   : > { %1405 = vmatpush3.bf16.msra.mxu1 %v1522_v36  ;;  %1427 = vmatprep.subr.bf16.mxu0 %v1559_v47  ;;  %v1341_v36 = vld [vmem:[%s1855_s4] ss:$0 sm:$0xff] }
  0x27   : > { %1439 = vmatprep.subr.bf16.mxu1 %v1559_v47 }
  0x28   : > { %866 = vmatmul.mubr.bf16.vlgmr.msra.gmra.mrb[0].mxu0 %v536_v4 }
  0x29   : > { %907 = vmatmul.mubr.bf16.vlgmr.msra.gmra.mrb[0].mxu1 %v538_v5  ;;  %1428 = vmatpush3.bf16.msra.mxu0 %v1523_v63 }
  0x2a   : > { %1429 = vmatprep.subr.bf16.mxu0 %v1559_v47  ;;  %1435 = vmatprep.mubr.msk.bf16.mxu0 %vm1560_vm0, %v1559_v47 }
  0x2b   : > { %1447 = vmatprep.mubr.msk.bf16.mxu1 %vm1560_vm0, %v1559_v47  ;;  %1440 = vmatpush3.bf16.msra.mxu1 %v1527_v16 }
  0x2c   : > { %1441 = vmatprep.subr.bf16.mxu1 %v1559_v47 }
  0x2d   : > { %1430 = vmatpush3.bf16.msra.mxu0 %v1524_v6 }
  0x2e   : > { %1431 = vmatprep.subr.bf16.mxu0 %v1559_v47 }
  0x2f   : > { %1442 = vmatpush3.bf16.msra.mxu1 %v1528_v17 }
  0x30   : > { %1443 = vmatprep.subr.bf16.mxu1 %v1559_v47 }
  0x31   : > { %1432 = vmatpush3.bf16.msra.mxu0 %v1525_v11 }
  0x32   : > { %1433 = vmatprep.subr.bf16.mxu0 %v1559_v47 }
  0x33   : > { %1444 = vmatpush3.bf16.msra.mxu1 %v1529_v18 }
  0x34   : > { %1445 = vmatprep.subr.bf16.mxu1 %v1559_v47 }
  0x35   : > { %1434 = vmatpush3.bf16.msra.mxu0 %v1526_v14 }
  0x36   : > { %1451 = vmatprep.subr.bf16.mxu0 %v1559_v47 }
  0x37   : > { %1446 = vmatpush3.bf16.msra.mxu1 %v1530_v19 }
  0x38   : > { %1436 = vmatmul.mubr.msk.bf16.vlgmr.msra.gmra.mrb[4].mxu0 %vm829_vm1, %v540_v15 }
  0x39   : > { %1459 = vmatprep.mubr.msk.bf16.mxu0 %vm1560_vm0, %v1559_v47  ;;  %1452 = vmatpush3.bf16.msra.mxu0 %v1531_v20 }
  0x3a   : > { %1453 = vmatprep.subr.bf16.mxu0 %v1559_v47 }
  0x3d   : > { %1454 = vmatpush3.bf16.msra.mxu0 %v1532_v51 }
  0x3e   : > { %1455 = vmatprep.subr.bf16.mxu0 %v1559_v47 }
  0x41   : > { %1456 = vmatpush3.bf16.msra.mxu0 %v1533_v52 }
  0x42   : > { %1457 = vmatprep.subr.bf16.mxu0 %v1559_v47 }
  0x45   : > { %1458 = vmatpush3.bf16.msra.mxu0 %v1534_v53 }
  0xfb   : > { %v1384_v21 = vpop.f32.mrb[0].mxu0 }
  0xfc   : > { %v1406_v22 = vpop.f32.mrb[0].mxu1  ;;  %v1385_v23 = vpop.f32.mrb[1].mxu0 }
  0xfd   : > { %v1386_v24 = vadd.f32 %v1385_v23, %v1384_v21  ;;  %v1407_v25 = vpop.f32.mrb[1].mxu1  ;;  %v1387_v26 = vpop.f32.mrb[2].mxu0 }
  0xfe   : > { %v1408_v27 = vadd.f32 %v1407_v25, %v1406_v22  ;;  %v1409_v28 = vpop.f32.mrb[2].mxu1  ;;  %v1388_v29 = vpop.f32.mrb[3].mxu0 }
  0xff   : > { %v1389_v30 = vadd.f32 %v1388_v29, %v1387_v26  ;;  %v1410_v31 = vpop.f32.mrb[3].mxu1 }
 0x100   : > { %v1411_v32 = vadd.f32 %v1410_v31, %v1409_v28  ;;  %v909_v33 = vadd.f32 %v1408_v27, %v1386_v24 }
 0x102   : > { %v912_v34 = vadd.f32 %v1411_v32, %v1389_v30 }
 0x10b   : > { %v949_v35 = vpop.f32.mrb[4].mxu0 }
 0x10c   : > { %v950_v37 = vadd.f32 %v949_v35, %v909_v33  ;;  %v1437_v38 = vpop.f32.mrb[5].mxu0 }
 0x10d   : > { %v952_v40 = vpop.f32.mrb[6].mxu0 }
 0x10e   : > { %v963_v41 = vmul.f32 %v1341_v36, %v950_v37  ;;  %v953_v42 = vadd.f32 %v952_v40, %v912_v34  ;;  %v1438_v43 = vpop.f32.mrb[7].mxu0 }
 0x110   : > { %v972_v44 = vadd.f32 %v1342_v39, %v963_v41  ;;  %v964_v45 = vmul.f32 %v1341_v36, %v953_v42 }
 0x112   : > { %v973_v46 = vadd.f32 %v1342_v39, %v964_v45  ;;  %v974_v48 = vmax.f32 %v972_v44, 0.0 }
 0x114   : > { %v975_v49 = vmax.f32 %v973_v46, 0.0 }
 0x116   : > { %v976_v50 = vpack.c.bf16 %v975_v49, %v974_v48 }
 0x118   : > { %1448 = vmatmul.mubr.msk.bf16.vlgmr.msra.gmra.mrb[4].mxu1 %vm829_vm1, %v976_v50 }
 0x1eb   : > { %v1046_v55 = vpop.f32.mrb[4].mxu1 }
 0x1ec   : > { %v1060_v47 = vmul.f32 %v1348_v54, %v1046_v55  ;;  %v1449_v57 = vpop.f32.mrb[5].mxu1 }
 0x1ed   : > { %v1049_v59 = vpop.f32.mrb[6].mxu1 }
 0x1ee   : > { %v1069_v60 = vadd.f32 %v1349_v56, %v1060_v47  ;;  %v1061_v61 = vmul.f32 %v1348_v54, %v1049_v59  ;;  %v1450_v62 = vpop.f32.mrb[7].mxu1 }
 0x1f0   : > { %v1071_v63 = vmax.f32 %v1069_v60, 0.0  ;;  %v1070_v1 = vadd.f32 %v1349_v56, %v1061_v61 }
 0x1f2   : > { %v1072_v3 = vmax.f32 %v1070_v1, 0.0  ;;  %v1077_v4 = vadd.f32 %v1366_v0, %v1071_v63 }
 0x1f4   : > { %v1078_v5 = vadd.f32 %v1367_v2, %v1072_v3 }
 0x1f6   : > { %v1079_v6 = vpack.c.bf16 %v1078_v5, %v1077_v4 }
 0x1f8   : > { %1460 = vmatmul.mubr.msk.bf16.vlgmr.msra.gmra.mrb[8].mxu0 %vm829_vm1, %v1079_v6 }
 0x2cb   : > { %v1156_v8 = vpop.f32.mrb[8].mxu0 }
 0x2cc   : > { %v1157_v9 = vadd.f32 %v1350_v7, %v1156_v8  ;;  %v1461_v10 = vpop.f32.mrb[9].mxu0 }
 0x2cd   : > { %v1159_v11 = vpop.f32.mrb[10].mxu0 }
 0x2ce   : > { %v1362_v12 = vpack.c.bf16 %v1157_v9, %v1157_v9  ;;  %v1160_v13 = vadd.f32 %v1350_v7, %v1159_v11  ;;  %v1462_v14 = vpop.f32.mrb[11].mxu0 }
 0x2d0   : > { %1172 = vst.msk [vmem:[%s480_s28] sm:$0xf] %vm1171_vm2, %v1362_v12  ;;  %v1363_v15 = vpack.c.bf16 %v1160_v13, %v1160_v13 }
 0x2d2   : > { %1173 = vst.msk [vmem:[%s480_s28 + $0x4] sm:$0xf] %vm1171_vm2, %v1363_v15 }
 0x2d3 PF: > { %s21_s19 = sadd.s32 1, %s1557_s19   ;;  %s1863_s17 = smov %s1553_s18 }
 0x2d4   : > { %p18_p5 = scmp.ge.s32.totalorder %s21_s19, 4   ;;  %s1864_s18 = smov %s1866_s20 }
 0x2d6   :  { %20 = sbr.rel (!%p18_p5) target bundleno = 2 (0x2), region = 100 }

// kernel: sparse_and_rgb_guided_depth_forward.18
= control target key start
LH: loop header
LB: loop body
LE: loop exit
PB: predicated region body
PF: predicated region fallthrough
CT: control target
= control target key end

     0   :  { %s1261_s24 = smov 0   ;;  %s1263_s25 = smov 0   ;;  %s1410_s0 = inlined_call_operand.vmem [shape: bf16[2,64,288], index: 0, kind: input, shape index: {}]   ;;  %s1411_s1 = inlined_call_operand.vmem [shape: bf16[288,32], index: 1, kind: input, shape index: {}]   ;;  %s1412_s2 = inlined_call_operand.vmem [shape: f32[1,32], index: 2, kind: input, shape index: {}]   ;;  %s1413_s3 = inlined_call_operand.vmem [shape: f32[1,32], index: 3, kind: input, shape index: {}]   ;;  %s1414_s4 = inlined_call_operand.vmem [shape: bf16[32,16], index: 4, kind: input, shape index: {}]   ;;  %s1415_s5 = inlined_call_operand.vmem [shape: f32[1,16], index: 5, kind: input, shape index: {}]   ;;  %s1416_s6 = inlined_call_operand.vmem [shape: f32[1,16], index: 6, kind: input, shape index: {}]   ;;  %s1417_s7 = inlined_call_operand.vmem [shape: bf16[2,64,16], index: 7, kind: output, shape index: {}]  }
   0x1   :  { %s1265_s26 = smov 0  }
   0x2 LB: > { %s29_s27 = sadd.s32 1, %s1215_s25  ;;  %p993_p0 = scmp.ge.s32.totalorder %s1219_s26, 1  ;;  %s1219_s26 = sphi %s1265_s26, %s17_s26   ;;  %s1215_s25 = sphi %s1263_s25, %s1419_s25   ;;  %s1211_s24 = sphi %s1261_s24, %s1418_s24  }
   0x3   : > { %p31_p1 = scmp.ge.s32.totalorder %s29_s27, 2  ;;  %p259_p2 = scmp.lt.s32.totalorder %s1219_s26, 3 }
   0x5   : > { %s1421_s27 = smov (%p31_p1, %s29_s27), 0  ;;  %p260_p3 = pnand %p993_p0, %p259_p2 }
   0x6   : > { %v1161_v0 = vld [vmem:[%s1411_s1 + $0x40] sm:$0xff] (!%p260_p3)   ;;  %v1163_v2 = vld [vmem:[%s1411_s1 + $0x48] sm:$0xff] (!%p260_p3)   ;;  %v1165_v4 = vld [vmem:[%s1411_s1 + $0x50] sm:$0xff] (!%p260_p3)   ;;  %p301_p4 = scmp.lt.s32.totalorder (!%p260_p3), %s1211_s24, 1  ;;  %vm542_vm0 = vcmask (!%p260_p3), 261120   ;;  %vm890_vm1 = vcmask (!%p260_p3), 125952  }
   0x7   : > { %263 = sbr.rel (%p260_p3) target bundleno = 514 (0x202), region = 48  ;;  %v1162_v1 = vld [vmem:[%s1411_s1] sm:$0xff] (!%p260_p3)   ;;  %1060 = vmatprep.subr.bf16.mxu0 (!%p260_p3), %v1161_v0  ;;  %v1164_v3 = vld [vmem:[%s1411_s1 + $0x8] sm:$0xff] (!%p260_p3)   ;;  %v1166_v5 = vld [vmem:[%s1411_s1 + $0x10] sm:$0xff] (!%p260_p3)  }
   0x8   : > { %1061 = vmatpush3.bf16.msra.mxu0 (!%p260_p3), %v1162_v1  ;;  %v1167_v6 = vld [vmem:[%s1411_s1 + $0x58] sm:$0xff] (!%p260_p3)   ;;  %v1169_v8 = vld [vmem:[%s1411_s1 + $0x60] sm:$0xff] (!%p260_p3)   ;;  %v1171_v11 = vld [vmem:[%s1411_s1 + $0x68] sm:$0xff] (!%p260_p3)  }
   0x9   : > { %1062 = vmatprep.subr.bf16.mxu0 (!%p260_p3), %v1163_v2  ;;  %v1168_v7 = vld [vmem:[%s1411_s1 + $0x18] sm:$0xff] (!%p260_p3)   ;;  %v1175_v9 = vld [vmem:[%s1411_s1 + $0x80] sm:$0xff] (!%p260_p3)   ;;  %v1172_v12 = vld [vmem:[%s1411_s1 + $0x28] sm:$0xff] (!%p260_p3)  }
   0xa   : > { %v1170_v10 = vld [vmem:[%s1411_s1 + $0x20] sm:$0xff] (!%p260_p3)   ;;  %1112 = vmatprep.subr.bf16.mxu1 (!%p260_p3), %v1175_v9  ;;  %v1178_v13 = vld [vmem:[%s1411_s1 + $0x88] sm:$0xff] (!%p260_p3)   ;;  %v1173_v14 = vld [vmem:[%s1411_s1 + $0x70] sm:$0xff] (!%p260_p3)  }
   0xb   : > { %1113 = vmatpush3.bf16.msra.mxu1 (!%p260_p3), %v1175_v9  ;;  %v1174_v18 = vld [vmem:[%s1411_s1 + $0x30] sm:$0xff] (!%p260_p3)   ;;  %v1176_v19 = vld [vmem:[%s1411_s1 + $0x78] sm:$0xff] (!%p260_p3)   ;;  %v1195_v30 = vld [vmem:[%s1414_s4] sm:$0xff] (!%p260_p3)  }
   0xc   : > { %1063 = vmatpush3.bf16.msra.mxu0 (!%p260_p3), %v1164_v3  ;;  %1114 = vmatprep.subr.bf16.mxu1 (!%p260_p3), %v1178_v13  ;;  %v1177_v21 = vld [vmem:[%s1411_s1 + $0x38] sm:$0xff] (!%p260_p3)   ;;  %v1196_v31 = vld [vmem:[%s1414_s4 + $0x8] sm:$0xff] (!%p260_p3)   ;;  %v1031_v45 = vld [vmem:[%s1412_s2] ss:$0 sm:$0xff] (!%p260_p3) }
   0xd   : > { %1064 = vmatprep.subr.bf16.mxu0 (!%p260_p3), %v1165_v4  ;;  %v1032_v48 = vld [vmem:[%s1413_s3] ss:$0 sm:$0xff] (!%p260_p3) }
   0xe   : > { %s1423_s24 = smov (!%p301_p4, %s1211_s24), 1 }
   0xf   : > { %s1136_s23 = smul.u32 96, %s1423_s24  ;;  %1115 = vmatpush3.bf16.msra.mxu1 %v1178_v13  ;;  %s1051_s19 = sshll.u32 %s1423_s24, 5 }
  0x10   : > { %1065 = vmatpush3.bf16.msra.mxu0 %v1166_v5  ;;  %1124 = vmatprep.subr.bf16.mxu1 %v1195_v30  ;;  %s1383_s22 = scalar_lea.vmem %s1417_s7, %s1051_s19 }
  0x11   : > { %1066 = vmatprep.subr.bf16.mxu0 %v1167_v6  ;;  %s1321_s13 = scalar_lea.vmem %s1410_s0, %s1136_s23 }
  0x12   : > { %v1181_v15 = vld [vmem:[%s1321_s13 + $0x4] ss:$12 sps:$4 sm:$0xff]   ;;  %v1182_v16 = vld [vmem:[%s1321_s13 + $0x8] ss:$12 sps:$4 sm:$0xff]   ;;  %v1183_v17 = vld [vmem:[%s1321_s13 + $0x20] ss:$12 sps:$4 sm:$0xff]  }
  0x13   : > { %587 = vmatprep.mubr.bf16.mxu0 %v1181_v15  ;;  %1116 = vmatprep.mubr.msk.bf16.mxu1 %vm542_vm0, %v1182_v16  ;;  %v1190_v20 = vld [vmem:[%s1321_s13 + $0x38] ss:$12 sps:$4 sm:$0xff]   ;;  %v1191_v22 = vld [vmem:[%s1321_s13 + $0x50] ss:$12 sps:$4 sm:$0xff]   ;;  %v1179_v23 = vld [vmem:[%s1321_s13] ss:$12 sps:$4 sm:$0xff]  }
  0x14   : > { %1067 = vmatpush3.bf16.msra.mxu0 %v1168_v7  ;;  %1117 = vmatmul.mubr.msk.bf16.vlgmr.msra.gmra.mrb[0].mxu1 %vm542_vm0, %v1183_v17  ;;  %v1184_v24 = vld [vmem:[%s1321_s13 + $0x1c] ss:$12 sps:$4 sm:$0xff]   ;;  %v1186_v25 = vld [vmem:[%s1321_s13 + $0x18] ss:$12 sps:$4 sm:$0xff]   ;;  %v1187_v26 = vld [vmem:[%s1321_s13 + $0x34] ss:$12 sps:$4 sm:$0xff]  }
  0x15   : > { %1068 = vmatprep.subr.bf16.mxu0 %v1169_v8  ;;  %1120 = vmatprep.mubr.msk.bf16.mxu1 %vm542_vm0, %v1190_v20  ;;  %v1189_v27 = vld [vmem:[%s1321_s13 + $0x30] ss:$12 sps:$4 sm:$0xff]   ;;  %v1192_v28 = vld [vmem:[%s1321_s13 + $0x4c] ss:$12 sps:$4 sm:$0xff]   ;;  %v1194_v29 = vld [vmem:[%s1321_s13 + $0x48] ss:$12 sps:$4 sm:$0xff]  }
  0x16   : > { %1125 = vmatpush3.bf16.msra.mxu1 %v1195_v30 }
  0x17   : > { %1126 = vmatprep.subr.bf16.mxu1 %v1196_v31 }
  0x18   : > { %1069 = vmatpush3.bf16.msra.mxu0 %v1170_v10 }
  0x19   : > { %1070 = vmatprep.subr.bf16.mxu0 %v1171_v11 }
  0x1a   : > { %1127 = vmatpush3.bf16.msra.mxu1 %v1196_v31 }
  0x1c   : > { %1071 = vmatpush3.bf16.msra.mxu0 %v1172_v12  ;;  %1121 = vmatmul.mubr.msk.bf16.gmra.mrb[4].mxu1 %vm542_vm0, %v1191_v22 }
  0x1d   : > { %1072 = vmatprep.subr.bf16.mxu0 %v1173_v14 }
  0x20   : > { %1073 = vmatpush3.bf16.msra.mxu0 %v1174_v18 }
  0x21   : > { %1074 = vmatprep.subr.bf16.mxu0 %v1176_v19 }
  0x24   : > { %1075 = vmatpush3.bf16.msra.mxu0 %v1177_v21 }
  0x27   : > { %588 = vmatmul.mubr.bf16.vlgmr.msra.gmra.mrb[0].mxu0 %v1179_v23 }
  0x28   : > { %595 = vmatprep.mubr.bf16.mxu0 %v1184_v24 }
  0x2f   : > { %596 = vmatmul.mubr.bf16.gmra.mrb[4].mxu0 %v1186_v25 }
  0x30   : > { %603 = vmatprep.mubr.bf16.mxu0 %v1187_v26 }
  0x37   : > { %604 = vmatmul.mubr.bf16.gmra.mrb[8].mxu0 %v1189_v27 }
  0x38   : > { %611 = vmatprep.mubr.bf16.mxu0 %v1192_v28 }
  0x3f   : > { %612 = vmatmul.mubr.bf16.gmra.mrb[12].mxu0 %v1194_v29 }
  0xe7   : > { %v1118_v32 = vpop.f32.mrb[0].mxu1 }
  0xe8   : > { %v654_v33 = vpop.f32.mrb[1].mxu1 }
  0xe9   : > { %v1119_v34 = vpop.f32.mrb[2].mxu1 }
  0xea   : > { %v657_v35 = vpop.f32.mrb[3].mxu1 }
  0xef   : > { %v1122_v36 = vpop.f32.mrb[4].mxu1 }
  0xf0   : > { %v670_v37 = vpop.f32.mrb[5].mxu1 }
  0xf1   : > { %v1123_v39 = vpop.f32.mrb[6].mxu1 }
  0xf2   : > { %v673_v41 = vpop.f32.mrb[7].mxu1 }
  0xfa   : > { %v1076_v38 = vpop.f32.mrb[0].mxu0 }
  0xfb   : > { %v1077_v40 = vpop.f32.mrb[1].mxu0 }
  0xfc   : > { %v1078_v42 = vadd.f32 %v1077_v40, %v1076_v38  ;;  %v1079_v43 = vpop.f32.mrb[2].mxu0  ;;  %v1039_v40 = vld [vmem:[%s1415_s5] ss:$0 sm:$0xff] }
  0xfd   : > { %v1080_v44 = vpop.f32.mrb[3].mxu0 }
  0xfe   : > { %v1081_v46 = vadd.f32 %v1080_v44, %v1079_v43  ;;  %v655_v47 = vadd.f32 %v1078_v42, %v654_v33 }
 0x100   : > { %v692_v49 = vmul.f32 %v1031_v45, %v655_v47  ;;  %v658_v50 = vadd.f32 %v1081_v46, %v657_v35 }
 0x102   : > { %v707_v51 = vadd.f32 %v1032_v48, %v692_v49  ;;  %v693_v52 = vmul.f32 %v1031_v45, %v658_v50  ;;  %v1082_v53 = vpop.f32.mrb[4].mxu0 }
 0x103   : > { %v1083_v54 = vpop.f32.mrb[5].mxu0 }
 0x104   : > { %v708_v55 = vadd.f32 %v1032_v48, %v693_v52  ;;  %v1084_v56 = vadd.f32 %v1083_v54, %v1082_v53  ;;  %v1085_v57 = vpop.f32.mrb[6].mxu0  ;;  %v715_v59 = vmax.f32 %v707_v51, 0.0 }
 0x105   : > { %v1086_v58 = vpop.f32.mrb[7].mxu0 }
 0x106   : > { %v716_v60 = vmax.f32 %v708_v55, 0.0  ;;  %v663_v61 = vadd.f32 %v1118_v32, %v1084_v56  ;;  %v1087_v62 = vadd.f32 %v1086_v58, %v1085_v57 }
 0x108   : > { %v723_v63 = vpack.c.bf16 %v716_v60, %v715_v59  ;;  %v694_v0 = vmul.f32 %v1031_v45, %v663_v61  ;;  %v666_v1 = vadd.f32 %v1119_v34, %v1087_v62 }
 0x10a   : > { %v709_v2 = vadd.f32 %v1032_v48, %v694_v0  ;;  %v695_v3 = vmul.f32 %v1031_v45, %v666_v1  ;;  %v1088_v4 = vpop.f32.mrb[8].mxu0  ;;  %1128 = vmatprep.mubr.msk.bf16.mxu1 %vm542_vm0, %v723_v63 }
 0x10b   : > { %v1089_v5 = vpop.f32.mrb[9].mxu0 }
 0x10c   : > { %v710_v6 = vadd.f32 %v1032_v48, %v695_v3  ;;  %v1090_v7 = vadd.f32 %v1089_v5, %v1088_v4  ;;  %v1091_v8 = vpop.f32.mrb[10].mxu0  ;;  %v717_v10 = vmax.f32 %v709_v2, 0.0 }
 0x10d   : > { %v1092_v9 = vpop.f32.mrb[11].mxu0 }
 0x10e   : > { %v718_v11 = vmax.f32 %v710_v6, 0.0  ;;  %v1093_v12 = vadd.f32 %v1092_v9, %v1091_v8  ;;  %v671_v13 = vadd.f32 %v1090_v7, %v670_v37 }
 0x110   : > { %v724_v14 = vpack.c.bf16 %v718_v11, %v717_v10  ;;  %v696_v15 = vmul.f32 %v1031_v45, %v671_v13  ;;  %v674_v16 = vadd.f32 %v1093_v12, %v673_v41 }
 0x112   : > { %v711_v17 = vadd.f32 %v1032_v48, %v696_v15  ;;  %v697_v18 = vmul.f32 %v1031_v45, %v674_v16  ;;  %v1094_v19 = vpop.f32.mrb[12].mxu0  ;;  %1129 = vmatmul.mubr.msk.bf16.vlgmr.msra.gmra.mrb[8].mxu1 %vm542_vm0, %v724_v14 }
 0x113   : > { %v1095_v20 = vpop.f32.mrb[13].mxu0 }
 0x114   : > { %v712_v21 = vadd.f32 %v1032_v48, %v697_v18  ;;  %v1096_v22 = vadd.f32 %v1095_v20, %v1094_v19  ;;  %v1097_v23 = vpop.f32.mrb[14].mxu0  ;;  %v719_v25 = vmax.f32 %v711_v17, 0.0 }
 0x115   : > { %v1098_v24 = vpop.f32.mrb[15].mxu0 }
 0x116   : > { %v720_v26 = vmax.f32 %v712_v21, 0.0  ;;  %v679_v27 = vadd.f32 %v1122_v36, %v1096_v22  ;;  %v1099_v28 = vadd.f32 %v1098_v24, %v1097_v23 }
 0x118   : > { %v725_v29 = vpack.c.bf16 %v720_v26, %v719_v25  ;;  %v698_v30 = vmul.f32 %v1031_v45, %v679_v27  ;;  %v682_v31 = vadd.f32 %v1123_v39, %v1099_v28  ;;  %v1040_v39 = vld [vmem:[%s1416_s6] ss:$0 sm:$0xff] }
 0x11a   : > { %v713_v32 = vadd.f32 %v1032_v48, %v698_v30  ;;  %v699_v33 = vmul.f32 %v1031_v45, %v682_v31  ;;  %1132 = vmatprep.mubr.msk.bf16.mxu1 %vm542_vm0, %v725_v29 }
 0x11c   : > { %v714_v34 = vadd.f32 %v1032_v48, %v699_v33  ;;  %v721_v35 = vmax.f32 %v713_v32, 0.0 }
 0x11e   : > { %v722_v37 = vmax.f32 %v714_v34, 0.0 }
 0x120   : > { %v726_v38 = vpack.c.bf16 %v722_v37, %v721_v35 }
 0x122   : > { %1133 = vmatmul.mubr.msk.bf16.gmra.mrb[12].mxu1 %vm542_vm0, %v726_v38 }
 0x1e5   : > { %v1130_v36 = vpop.f32.mrb[8].mxu1 }
 0x1e6   : > { %v829_v41 = vmul.f32 %v1130_v36, %v1039_v40  ;;  %v789_v42 = vpop.f32.mrb[9].mxu1 }
 0x1e7   : > { %v827_v43 = vmul.f32 %v1039_v40, %v789_v42  ;;  %v1131_v44 = vpop.f32.mrb[10].mxu1 }
 0x1e8   : > { %v844_v45 = vadd.f32 %v1040_v39, %v829_v41  ;;  %v830_v46 = vmul.f32 %v1131_v44, %v1039_v40  ;;  %v792_v47 = vpop.f32.mrb[11].mxu1 }
 0x1e9   : > { %v842_v48 = vadd.f32 %v1040_v39, %v827_v43  ;;  %v828_v49 = vmul.f32 %v1039_v40, %v792_v47 }
 0x1ea   : > { %v852_v50 = vmax.f32 %v844_v45, 0.0  ;;  %v845_v51 = vadd.f32 %v1040_v39, %v830_v46 }
 0x1eb   : > { %v850_v52 = vmax.f32 %v842_v48, 0.0  ;;  %v843_v53 = vadd.f32 %v1040_v39, %v828_v49 }
 0x1ec   : > { %v1054_v54 = vpack.c.bf16 %v852_v50, %v852_v50  ;;  %v853_v55 = vmax.f32 %v845_v51, 0.0 }
 0x1ed   : > { %v1052_v56 = vpack.c.bf16 %v850_v52, %v850_v52  ;;  %v851_v57 = vmax.f32 %v843_v53, 0.0 }
 0x1ee   : > { %893 = vst.msk [vmem:[%s1383_s22 + $0x8] sm:$0xf] %vm890_vm1, %v1054_v54  ;;  %v1055_v58 = vpack.c.bf16 %v853_v55, %v853_v55 }
 0x1ef   : > { %891 = vst.msk [vmem:[%s1383_s22] sm:$0xf] %vm890_vm1, %v1052_v56  ;;  %v1053_v59 = vpack.c.bf16 %v851_v57, %v851_v57 }
 0x1f0   : > { %894 = vst.msk [vmem:[%s1383_s22 + $0xc] sm:$0xf] %vm890_vm1, %v1055_v58 }
 0x1f1   : > { %892 = vst.msk [vmem:[%s1383_s22 + $0x4] sm:$0xf] %vm890_vm1, %v1053_v59 }
 0x1f5   : > { %v1134_v60 = vpop.f32.mrb[12].mxu1 }
 0x1f6   : > { %v833_v61 = vmul.f32 %v1134_v60, %v1039_v40  ;;  %v805_v62 = vpop.f32.mrb[13].mxu1 }
 0x1f7   : > { %v831_v63 = vmul.f32 %v1039_v40, %v805_v62  ;;  %v1135_v0 = vpop.f32.mrb[14].mxu1 }
 0x1f8   : > { %v848_v1 = vadd.f32 %v1040_v39, %v833_v61  ;;  %v834_v2 = vmul.f32 %v1135_v0, %v1039_v40  ;;  %v808_v3 = vpop.f32.mrb[15].mxu1 }
 0x1f9   : > { %v846_v4 = vadd.f32 %v1040_v39, %v831_v63  ;;  %v832_v5 = vmul.f32 %v1039_v40, %v808_v3 }
 0x1fa   : > { %v856_v6 = vmax.f32 %v848_v1, 0.0  ;;  %v849_v7 = vadd.f32 %v1040_v39, %v834_v2 }
 0x1fb   : > { %v854_v8 = vmax.f32 %v846_v4, 0.0  ;;  %v847_v9 = vadd.f32 %v1040_v39, %v832_v5 }
 0x1fc   : > { %v1058_v10 = vpack.c.bf16 %v856_v6, %v856_v6  ;;  %v857_v11 = vmax.f32 %v849_v7, 0.0 }
 0x1fd   : > { %v1056_v12 = vpack.c.bf16 %v854_v8, %v854_v8  ;;  %v855_v13 = vmax.f32 %v847_v9, 0.0 }
 0x1fe   : > { %897 = vst.msk [vmem:[%s1383_s22 + $0x18] sm:$0xf] %vm890_vm1, %v1058_v10  ;;  %v1059_v14 = vpack.c.bf16 %v857_v11, %v857_v11 }
 0x1ff   : > { %895 = vst.msk [vmem:[%s1383_s22 + $0x10] sm:$0xf] %vm890_vm1, %v1056_v12  ;;  %v1057_v15 = vpack.c.bf16 %v855_v13, %v855_v13 }
 0x200   : > { %898 = vst.msk [vmem:[%s1383_s22 + $0x1c] sm:$0xf] %vm890_vm1, %v1059_v14 }
 0x201   : > { %896 = vst.msk [vmem:[%s1383_s22 + $0x14] sm:$0xf] %vm890_vm1, %v1057_v15 }
 0x202 PF: > { %s17_s26 = sadd.s32 1, %s1219_s26   ;;  %s1418_s24 = smov %s1215_s25 }
 0x203   : > { %p14_p5 = scmp.ge.s32.totalorder %s17_s26, 4   ;;  %s1419_s25 = smov %s1421_s27 }
 0x205   :  { %16 = sbr.rel (!%p14_p5) target bundleno = 2 (0x2), region = 78 }

// kernel: sparse_and_rgb_guided_depth_forward.19
= control target key start
LH: loop header
LB: loop body
LE: loop exit
PB: predicated region body
PF: predicated region fallthrough
CT: control target
= control target key end

     0   :  { %s938_s24 = smov 0   ;;  %s940_s25 = smov 0   ;;  %s1027_s0 = inlined_call_operand.vmem [shape: bf16[2,64,36], index: 0, kind: input, shape index: {}]   ;;  %s1028_s1 = inlined_call_operand.vmem [shape: bf16[36,32], index: 1, kind: input, shape index: {}]   ;;  %s1029_s2 = inlined_call_operand.vmem [shape: f32[1,32], index: 2, kind: input, shape index: {}]   ;;  %s1030_s3 = inlined_call_operand.vmem [shape: f32[1,32], index: 3, kind: input, shape index: {}]   ;;  %s1031_s4 = inlined_call_operand.vmem [shape: bf16[32,16], index: 4, kind: input, shape index: {}]   ;;  %s1032_s5 = inlined_call_operand.vmem [shape: f32[1,16], index: 5, kind: input, shape index: {}]   ;;  %s1033_s6 = inlined_call_operand.vmem [shape: f32[1,16], index: 6, kind: input, shape index: {}]   ;;  %s1034_s7 = inlined_call_operand.vmem [shape: bf16[2,64,16], index: 7, kind: output, shape index: {}]  }
   0x1   :  { %s942_s26 = smov 0  }
   0x2 LB: > { %s29_s27 = sadd.s32 1, %s892_s25  ;;  %p755_p0 = scmp.ge.s32.totalorder %s896_s26, 1  ;;  %s896_s26 = sphi %s942_s26, %s17_s26   ;;  %s892_s25 = sphi %s940_s25, %s1036_s25   ;;  %s888_s24 = sphi %s938_s24, %s1035_s24  }
   0x3   : > { %p31_p1 = scmp.ge.s32.totalorder %s29_s27, 2  ;;  %p258_p2 = scmp.lt.s32.totalorder %s896_s26, 3 }
   0x5   : > { %s1038_s27 = smov (%p31_p1, %s29_s27), 0  ;;  %p259_p3 = pnand %p755_p0, %p258_p2 }
   0x6   : > { %v865_v0 = vld [vmem:[%s1028_s1] sm:$0xff] (!%p259_p3)   ;;  %v866_v1 = vld [vmem:[%s1028_s1 + $0x8] sm:$0xff] (!%p259_p3)   ;;  %p299_p4 = scmp.lt.s32.totalorder (!%p259_p3), %s888_s24, 1  ;;  %v867_v2 = vld [vmem:[%s1028_s1 + $0x10] ss:$0 sps:$4 sm:$0x33] (!%p259_p3)  }
   0x7   : > { %262 = sbr.rel (%p259_p3) target bundleno = 475 (0x1db), region = 48  ;;  %814 = vmatprep.subr.bf16.mxu0 (!%p259_p3), %v865_v0  ;;  %vm380_vm0 = vcmask (!%p259_p3), 1041408   ;;  %vm367_vm1 = vcmask (!%p259_p3), 293888   ;;  %v872_v8 = vld [vmem:[%s1031_s4] sm:$0xff] (!%p259_p3)   ;;  %v873_v9 = vld [vmem:[%s1031_s4 + $0x8] sm:$0xff] (!%p259_p3)   ;;  %vm507_vm2 = vcmask (!%p259_p3), 261120  }
   0x8   : > { %815 = vmatpush3.bf16.msra.mxu0 (!%p259_p3), %v865_v0  ;;  %v382_v4 = vsel (!%p259_p3), %vm380_vm0, %v867_v2, 0  ;;  %828 = vmatprep.subr.bf16.mxu1 (!%p259_p3), %v872_v8  ;;  %v771_v10 = vld [vmem:[%s1029_s2] ss:$0 sm:$0xff] (!%p259_p3)  ;;  %vm655_vm3 = vcmask (!%p259_p3), 125952  }
   0x9   : > { %816 = vmatprep.subr.bf16.mxu0 (!%p259_p3), %v866_v1  ;;  %829 = vmatpush3.bf16.msra.mxu1 (!%p259_p3), %v872_v8  ;;  %v772_v12 = vld [vmem:[%s1030_s3] ss:$0 sm:$0xff] (!%p259_p3) }
   0xa   : > { %830 = vmatprep.subr.bf16.mxu1 (!%p259_p3), %v873_v9  ;;  %v779_v48 = vld [vmem:[%s1032_s5] ss:$0 sm:$0xff] (!%p259_p3) }
   0xb   : > { %v780_v50 = vld [vmem:[%s1033_s6] ss:$0 sm:$0xff] (!%p259_p3) }
   0xc   : > { %817 = vmatpush3.bf16.msra.mxu0 (!%p259_p3), %v866_v1 }
   0xd   : > { %840 = vmatprep.subr.msk.bf16.mxu0 (!%p259_p3), %vm380_vm0, %v867_v2  ;;  %831 = vmatpush3.bf16.msra.mxu1 (!%p259_p3), %v873_v9 }
   0xe   : > { %s1040_s24 = smov (!%p299_p4, %s888_s24), 1 }
   0xf   : > { %s791_s11 = sshll.u32 %s1040_s24, 5 }
  0x10   : > { %s306_s14 = scalar_lea.vmem %s1027_s0, %s791_s11  ;;  %819 = vmatpush3.bf16.msra.mxu0 %v382_v4  ;;  %s1000_s10 = scalar_lea.vmem %s1034_s7, %s791_s11 }
  0x11   : > { %v868_v3 = vld [vmem:[%s306_s14] sm:$0xff]   ;;  %v869_v5 = vld [vmem:[%s306_s14 + $0x8] sm:$0xff]   ;;  %v870_v6 = vld [vmem:[%s306_s14 + $0x10] sm:$0xff]  }
  0x12   : > { %820 = vmatprep.mubr.msk.bf16.mxu0 %vm367_vm1, %v868_v3  ;;  %v871_v7 = vld [vmem:[%s306_s14 + $0x18] sm:$0xff]  }
  0x13   : > { %821 = vmatmul.mubr.msk.bf16.vlgmr.msra.gmra.mrb[0].mxu0 %vm367_vm1, %v869_v5 }
  0x14   : > { %824 = vmatprep.mubr.msk.bf16.mxu0 %vm367_vm1, %v870_v6 }
  0x1b   : > { %825 = vmatmul.mubr.msk.bf16.gmra.mrb[4].mxu0 %vm367_vm1, %v871_v7 }
  0xe6   : > { %v822_v11 = vpop.f32.mrb[0].mxu0 }
  0xe7   : > { %v458_v13 = vmul.f32 %v822_v11, %v771_v10  ;;  %v418_v14 = vpop.f32.mrb[1].mxu0 }
  0xe8   : > { %v456_v15 = vmul.f32 %v771_v10, %v418_v14  ;;  %v823_v16 = vpop.f32.mrb[2].mxu0 }
  0xe9   : > { %v473_v17 = vadd.f32 %v772_v12, %v458_v13  ;;  %v459_v18 = vmul.f32 %v823_v16, %v771_v10  ;;  %v421_v19 = vpop.f32.mrb[3].mxu0 }
  0xea   : > { %v471_v20 = vadd.f32 %v772_v12, %v456_v15  ;;  %v457_v21 = vmul.f32 %v771_v10, %v421_v19 }
  0xeb   : > { %v474_v22 = vadd.f32 %v772_v12, %v459_v18  ;;  %v481_v24 = vmax.f32 %v473_v17, 0.0 }
  0xec   : > { %v472_v23 = vadd.f32 %v772_v12, %v457_v21  ;;  %v479_v26 = vmax.f32 %v471_v20, 0.0 }
  0xed   : > { %v482_v25 = vmax.f32 %v474_v22, 0.0 }
  0xee   : > { %v480_v27 = vmax.f32 %v472_v23, 0.0  ;;  %v826_v28 = vpop.f32.mrb[4].mxu0 }
  0xef   : > { %v488_v29 = vpack.c.bf16 %v482_v25, %v481_v24  ;;  %v462_v30 = vmul.f32 %v826_v28, %v771_v10  ;;  %v434_v31 = vpop.f32.mrb[5].mxu0 }
  0xf0   : > { %v460_v32 = vmul.f32 %v771_v10, %v434_v31  ;;  %v827_v33 = vpop.f32.mrb[6].mxu0  ;;  %v487_v34 = vpack.c.bf16 %v480_v27, %v479_v26 }
  0xf1   : > { %v477_v35 = vadd.f32 %v772_v12, %v462_v30  ;;  %v463_v36 = vmul.f32 %v827_v33, %v771_v10  ;;  %v437_v37 = vpop.f32.mrb[7].mxu0 }
  0xf2   : > { %v475_v38 = vadd.f32 %v772_v12, %v460_v32  ;;  %v461_v39 = vmul.f32 %v771_v10, %v437_v37  ;;  %832 = vmatprep.mubr.msk.bf16.mxu1 %vm507_vm2, %v487_v34 }
  0xf3   : > { %v478_v40 = vadd.f32 %v772_v12, %v463_v36  ;;  %833 = vmatmul.mubr.msk.bf16.vlgmr.msra.gmra.mrb[0].mxu1 %vm507_vm2, %v488_v29  ;;  %v485_v42 = vmax.f32 %v477_v35, 0.0 }
  0xf4   : > { %v476_v41 = vadd.f32 %v772_v12, %v461_v39  ;;  %v483_v44 = vmax.f32 %v475_v38, 0.0 }
  0xf5   : > { %v486_v43 = vmax.f32 %v478_v40, 0.0 }
  0xf6   : > { %v484_v45 = vmax.f32 %v476_v41, 0.0 }
  0xf7   : > { %v490_v46 = vpack.c.bf16 %v486_v43, %v485_v42 }
  0xf8   : > { %v489_v47 = vpack.c.bf16 %v484_v45, %v483_v44 }
  0xfa   : > { %836 = vmatprep.mubr.msk.bf16.mxu1 %vm507_vm2, %v489_v47 }
  0xfb   : > { %837 = vmatmul.mubr.msk.bf16.gmra.mrb[4].mxu1 %vm507_vm2, %v490_v46 }
 0x1c6   : > { %v834_v49 = vpop.f32.mrb[0].mxu1 }
 0x1c7   : > { %v594_v51 = vmul.f32 %v834_v49, %v779_v48  ;;  %v554_v52 = vpop.f32.mrb[1].mxu1 }
 0x1c8   : > { %v592_v53 = vmul.f32 %v779_v48, %v554_v52  ;;  %v835_v54 = vpop.f32.mrb[2].mxu1 }
 0x1c9   : > { %v609_v55 = vadd.f32 %v780_v50, %v594_v51  ;;  %v595_v56 = vmul.f32 %v835_v54, %v779_v48  ;;  %v557_v57 = vpop.f32.mrb[3].mxu1 }
 0x1ca   : > { %v607_v58 = vadd.f32 %v780_v50, %v592_v53  ;;  %v593_v59 = vmul.f32 %v779_v48, %v557_v57 }
 0x1cb   : > { %v617_v60 = vmax.f32 %v609_v55, 0.0  ;;  %v610_v61 = vadd.f32 %v780_v50, %v595_v56 }
 0x1cc   : > { %v615_v62 = vmax.f32 %v607_v58, 0.0  ;;  %v608_v63 = vadd.f32 %v780_v50, %v593_v59 }
 0x1cd   : > { %v795_v0 = vpack.c.bf16 %v617_v60, %v617_v60  ;;  %v618_v1 = vmax.f32 %v610_v61, 0.0 }
 0x1ce   : > { %v793_v2 = vpack.c.bf16 %v615_v62, %v615_v62  ;;  %v616_v3 = vmax.f32 %v608_v63, 0.0  ;;  %v838_v4 = vpop.f32.mrb[4].mxu1 }
 0x1cf   : > { %658 = vst.msk [vmem:[%s1000_s10 + $0x8] sm:$0xf] %vm655_vm3, %v795_v0  ;;  %v796_v5 = vpack.c.bf16 %v618_v1, %v618_v1  ;;  %v598_v6 = vmul.f32 %v838_v4, %v779_v48  ;;  %v570_v7 = vpop.f32.mrb[5].mxu1 }
 0x1d0   : > { %656 = vst.msk [vmem:[%s1000_s10] sm:$0xf] %vm655_vm3, %v793_v2  ;;  %v794_v8 = vpack.c.bf16 %v616_v3, %v616_v3  ;;  %v596_v9 = vmul.f32 %v779_v48, %v570_v7  ;;  %v839_v10 = vpop.f32.mrb[6].mxu1 }
 0x1d1   : > { %659 = vst.msk [vmem:[%s1000_s10 + $0xc] sm:$0xf] %vm655_vm3, %v796_v5  ;;  %v613_v11 = vadd.f32 %v780_v50, %v598_v6  ;;  %v599_v12 = vmul.f32 %v839_v10, %v779_v48  ;;  %v573_v13 = vpop.f32.mrb[7].mxu1 }
 0x1d2   : > { %657 = vst.msk [vmem:[%s1000_s10 + $0x4] sm:$0xf] %vm655_vm3, %v794_v8  ;;  %v611_v14 = vadd.f32 %v780_v50, %v596_v9  ;;  %v597_v15 = vmul.f32 %v779_v48, %v573_v13 }
 0x1d3   : > { %v621_v16 = vmax.f32 %v613_v11, 0.0  ;;  %v614_v17 = vadd.f32 %v780_v50, %v599_v12 }
 0x1d4   : > { %v619_v18 = vmax.f32 %v611_v14, 0.0  ;;  %v612_v19 = vadd.f32 %v780_v50, %v597_v15 }
 0x1d5   : > { %v799_v20 = vpack.c.bf16 %v621_v16, %v621_v16  ;;  %v622_v21 = vmax.f32 %v614_v17, 0.0 }
 0x1d6   : > { %v797_v22 = vpack.c.bf16 %v619_v18, %v619_v18  ;;  %v620_v23 = vmax.f32 %v612_v19, 0.0 }
 0x1d7   : > { %662 = vst.msk [vmem:[%s1000_s10 + $0x18] sm:$0xf] %vm655_vm3, %v799_v20  ;;  %v800_v24 = vpack.c.bf16 %v622_v21, %v622_v21 }
 0x1d8   : > { %660 = vst.msk [vmem:[%s1000_s10 + $0x10] sm:$0xf] %vm655_vm3, %v797_v22  ;;  %v798_v25 = vpack.c.bf16 %v620_v23, %v620_v23 }
 0x1d9   : > { %663 = vst.msk [vmem:[%s1000_s10 + $0x1c] sm:$0xf] %vm655_vm3, %v800_v24 }
 0x1da   : > { %661 = vst.msk [vmem:[%s1000_s10 + $0x14] sm:$0xf] %vm655_vm3, %v798_v25 }
 0x1db PF: > { %s17_s26 = sadd.s32 1, %s896_s26   ;;  %s1035_s24 = smov %s892_s25 }
 0x1dc   : > { %p14_p5 = scmp.ge.s32.totalorder %s17_s26, 4   ;;  %s1036_s25 = smov %s1038_s27 }
 0x1de   :  { %16 = sbr.rel (!%p14_p5) target bundleno = 2 (0x2), region = 78 }

// kernel: sparse_and_rgb_guided_depth_forward.20
= control target key start
LH: loop header
LB: loop body
LE: loop exit
PB: predicated region body
PF: predicated region fallthrough
CT: control target
= control target key end

     0   :  { %s1639_s17 = smov 0   ;;  %s1641_s18 = smov 0   ;;  %s1828_s0 = inlined_call_operand.vmem [shape: bf16[2,64,288], index: 0, kind: input, shape index: {}]   ;;  %s1829_s1 = inlined_call_operand.vmem [shape: f32[2,1,288], index: 1, kind: input, shape index: {}]   ;;  %s1830_s2 = inlined_call_operand.vmem [shape: bf16[2,64,32], index: 2, kind: input, shape index: {}]   ;;  %s1831_s3 = inlined_call_operand.vmem [shape: bf16[288,32], index: 3, kind: input, shape index: {}]   ;;  %s1832_s4 = inlined_call_operand.vmem [shape: f32[1,32], index: 4, kind: input, shape index: {}]   ;;  %s1833_s5 = inlined_call_operand.vmem [shape: f32[1,32], index: 5, kind: input, shape index: {}]   ;;  %s1834_s6 = inlined_call_operand.vmem [shape: bf16[32,32], index: 6, kind: input, shape index: {}]   ;;  %s1835_s7 = inlined_call_operand.vmem [shape: f32[1,32], index: 7, kind: input, shape index: {}]   ;;  %s1836_s8 = inlined_call_operand.vmem [shape: f32[1,32], index: 8, kind: input, shape index: {}]   ;;  %s1837_s9 = inlined_call_operand.vmem [shape: bf16[32,16], index: 9, kind: input, shape index: {}]   ;;  %s1838_s10 = inlined_call_operand.vmem [shape: f32[1,16], index: 10, kind: input, shape index: {}]   ;;  %s1839_s11 = inlined_call_operand.vmem [shape: bf16[2,64,16], index: 11, kind: output, shape index: {}]  }
   0x1   :  { %s1643_s19 = smov 0  }
   0x2 LB: > { %s33_s20 = sadd.s32 1, %s1573_s18  ;;  %p1329_p0 = scmp.ge.s32.totalorder %s1577_s19, 1  ;;  %s1577_s19 = sphi %s1643_s19, %s21_s19   ;;  %s1573_s18 = sphi %s1641_s18, %s1841_s18   ;;  %s1569_s17 = sphi %s1639_s17, %s1840_s17  }
   0x3   : > { %p35_p1 = scmp.ge.s32.totalorder %s33_s20, 2  ;;  %p385_p2 = scmp.lt.s32.totalorder %s1577_s19, 3 }
   0x5   : > { %s1843_s20 = smov (%p35_p1, %s33_s20), 0  ;;  %p386_p3 = pnand %p1329_p0, %p385_p2 }
   0x6   : > { %v1533_v0 = vld [vmem:[%s1831_s3 + $0x40] sm:$0xff] (!%p386_p3)   ;;  %v1535_v2 = vld [vmem:[%s1831_s3 + $0x48] sm:$0xff] (!%p386_p3)   ;;  %p448_p4 = scmp.lt.s32.totalorder (!%p386_p3), %s1569_s17, 1  ;;  %v1537_v4 = vld [vmem:[%s1831_s3 + $0x50] sm:$0xff] (!%p386_p3)   ;;  %v525_v5 = vlaneseq (!%p386_p3)  ;;  %vm720_vm0 = vcmask (!%p386_p3), 261120   ;;  %vm1196_vm1 = vcmask (!%p386_p3), 125952  }
   0x7   : > { %389 = sbr.rel (%p386_p3) target bundleno = 736 (0x2e0), region = 64  ;;  %v1534_v1 = vld [vmem:[%s1831_s3] sm:$0xff] (!%p386_p3)   ;;  %1413 = vmatprep.subr.bf16.mxu0 (!%p386_p3), %v1533_v0  ;;  %v1536_v3 = vld [vmem:[%s1831_s3 + $0x8] sm:$0xff] (!%p386_p3)   ;;  %v1538_v6 = vld [vmem:[%s1831_s3 + $0x10] sm:$0xff] (!%p386_p3)  }
   0x8   : > { %1414 = vmatpush3.bf16.msra.mxu0 (!%p386_p3), %v1534_v1  ;;  %v1539_v7 = vld [vmem:[%s1831_s3 + $0x58] sm:$0xff] (!%p386_p3)   ;;  %v526_v8 = vshrl.u32 (!%p386_p3), %v525_v5, 7  ;;  %v1541_v10 = vld [vmem:[%s1831_s3 + $0x60] sm:$0xff] (!%p386_p3)   ;;  %v1543_v14 = vld [vmem:[%s1831_s3 + $0x68] sm:$0xff] (!%p386_p3)  }
   0x9   : > { %1415 = vmatprep.subr.bf16.mxu0 (!%p386_p3), %v1535_v2  ;;  %v1540_v9 = vld [vmem:[%s1831_s3 + $0x18] sm:$0xff] (!%p386_p3)   ;;  %v1547_v11 = vld [vmem:[%s1831_s3 + $0x80] sm:$0xff] (!%p386_p3)   ;;  %v1544_v16 = vld [vmem:[%s1831_s3 + $0x28] sm:$0xff] (!%p386_p3)  }
   0xa   : > { %v1542_v12 = vld [vmem:[%s1831_s3 + $0x20] sm:$0xff] (!%p386_p3)   ;;  %v531_v13 = vsub.s32 (!%p386_p3), 1, %v526_v8  ;;  %1471 = vmatprep.subr.bf16.mxu1 (!%p386_p3), %v1547_v11  ;;  %v527_v15 = vsub.s32 (!%p386_p3), 0, %v526_v8  ;;  %v1550_v17 = vld [vmem:[%s1831_s3 + $0x88] sm:$0xff] (!%p386_p3)   ;;  %v535_v18 = vsub.s32 (!%p386_p3), 2, %v526_v8  ;;  %v1545_v28 = vld [vmem:[%s1831_s3 + $0x70] sm:$0xff] (!%p386_p3)  }
   0xb   : > { %1472 = vmatpush3.bf16.msra.mxu1 (!%p386_p3), %v1547_v11  ;;  %v1546_v33 = vld [vmem:[%s1831_s3 + $0x30] sm:$0xff] (!%p386_p3)   ;;  %v1548_v39 = vld [vmem:[%s1831_s3 + $0x78] sm:$0xff] (!%p386_p3)  }
   0xc   : > { %1416 = vmatpush3.bf16.msra.mxu0 (!%p386_p3), %v1536_v3  ;;  %1473 = vmatprep.subr.bf16.mxu1 (!%p386_p3), %v1550_v17  ;;  %v1549_v54 = vld [vmem:[%s1831_s3 + $0x38] sm:$0xff] (!%p386_p3)  }
   0xd   : > { %1417 = vmatprep.subr.bf16.mxu0 (!%p386_p3), %v1537_v4 }
   0xe   : > { %s1845_s17 = smov (!%p448_p4, %s1569_s17), 1 }
   0xf   : > { %s1507_s16 = smul.u32 96, %s1845_s17  ;;  %1474 = vmatpush3.bf16.msra.mxu1 %v1550_v17  ;;  %s1384_s14 = sshll.u32 %s1845_s17, 5 }
  0x10   : > { %1418 = vmatpush3.bf16.msra.mxu0 %v1538_v6  ;;  %s1508_s23 = smul.u32 3, %s1845_s17  ;;  %s1790_s24 = scalar_lea.vmem %s1830_s2, %s1384_s14 }
  0x11   : > { %1419 = vmatprep.subr.bf16.mxu0 %v1539_v7  ;;  %s1697_s13 = scalar_lea.vmem %s1828_s0, %s1507_s16  ;;  %s480_s29 = scalar_lea.vmem %s1839_s11, %s1384_s14 }
  0x12   : > { %s461_s21 = scalar_lea.vmem %s1829_s1, %s1508_s23  ;;  %v483_v19 = vld [vmem:[%s1697_s13] sm:$0xff]  ;;  %v485_v20 = vld [vmem:[%s1697_s13 + $0xc] sm:$0xff]  ;;  %v484_v25 = vld [vmem:[%s1697_s13 + $0x8] ss:$12 sps:$4 sm:$0xff]  }
  0x13   : > { %v523_v21 = vld [vmem:[%s461_s21] sm:$0x7]  ;;  %v499_v22 = vunpack.c.l.bf16 %v483_v19  ;;  %v500_v23 = vunpack.c.h.bf16 %v483_v19  ;;  %v503_v24 = vunpack.c.h.bf16 %v485_v20  ;;  %v487_v27 = vld [vmem:[%s1697_s13 + $0x18] sm:$0xff]  ;;  %v502_v29 = vunpack.c.l.bf16 %v485_v20  ;;  %v489_v38 = vld [vmem:[%s1697_s13 + $0x24] sm:$0xff] }
  0x14   : > { %1420 = vmatpush3.bf16.msra.mxu0 %v1540_v9  ;;  %v488_v26 = vld [vmem:[%s1697_s13 + $0x20] ss:$12 sps:$4 sm:$0xff]   ;;  %v1719_v30 = vrot.slane %v523_v21, %v531_v13  ;;  %v501_v31 = vunpack.c.l.bf16 %v484_v25  ;;  %v504_v32 = vunpack.c.h.bf16 %v484_v25  ;;  %v1724_v34 = vrot.slane %v523_v21, %v527_v15  ;;  %v492_v43 = vld [vmem:[%s1697_s13 + $0x38] ss:$12 sps:$4 sm:$0xff]   ;;  %v496_v58 = vld [vmem:[%s1697_s13 + $0x50] ss:$12 sps:$4 sm:$0xff]  }
  0x15   : > { %1421 = vmatprep.subr.bf16.mxu0 %v1541_v10  ;;  %v536_v35 = vrot.slane %v523_v21, %v535_v18  ;;  %v507_v36 = vunpack.c.l.bf16 %v488_v26  ;;  %v510_v37 = vunpack.c.h.bf16 %v488_v26  ;;  %v506_v42 = vunpack.c.h.bf16 %v487_v27  ;;  %v491_v59 = vld [vmem:[%s1697_s13 + $0x30] sm:$0xff]  ;;  %v493_v60 = vld [vmem:[%s1697_s13 + $0x3c] sm:$0xff] }
  0x16   : > { %v541_v40 = vmul.f32 %v1719_v30, %v500_v23  ;;  %v544_v41 = vmul.f32 %v1719_v30, %v503_v24  ;;  %v509_v49 = vunpack.c.h.bf16 %v489_v38  ;;  %v540_v50 = vmul.f32 %v1724_v34, %v499_v22  ;;  %v497_v17 = vld [vmem:[%s1697_s13 + $0x54] sm:$0xff] }
  0x17   : > { %v542_v44 = vmul.f32 %v536_v35, %v501_v31  ;;  %v545_v45 = vmul.f32 %v536_v35, %v504_v32  ;;  %v548_v46 = vmul.f32 %v536_v35, %v507_v36  ;;  %v551_v47 = vmul.f32 %v536_v35, %v510_v37  ;;  %v1551_v37 = vld [vmem:[%s1834_s6] sm:$0xff]  }
  0x18   : > { %1422 = vmatpush3.bf16.msra.mxu0 %v1542_v12  ;;  %v565_v48 = vpack.c.bf16 %v544_v41, %v541_v40  ;;  %v543_v51 = vmul.f32 %v1724_v34, %v502_v29  ;;  %v547_v55 = vmul.f32 %v1719_v30, %v506_v42  ;;  %v550_v56 = vmul.f32 %v1719_v30, %v509_v49 }
  0x19   : > { %1423 = vmatprep.subr.bf16.mxu0 %v1543_v14  ;;  %v566_v52 = vpack.c.bf16 %v545_v45, %v542_v44  ;;  %v569_v53 = vpack.c.bf16 %v551_v47, %v548_v46  ;;  %v513_v57 = vunpack.c.l.bf16 %v492_v43  ;;  %v516_v61 = vunpack.c.h.bf16 %v492_v43  ;;  %1483 = vmatprep.subr.bf16.mxu1 %v1551_v37  ;;  %v1357_v47 = vld [vmem:[%s1832_s4] ss:$0 sm:$0xff] }
  0x1a   : > { %765 = vmatprep.mubr.bf16.mxu0 %v565_v48  ;;  %v564_v62 = vpack.c.bf16 %v543_v51, %v540_v50  ;;  %v505_v63 = vunpack.c.l.bf16 %v487_v27  ;;  %v508_v1 = vunpack.c.l.bf16 %v489_v38  ;;  %v519_v3 = vunpack.c.l.bf16 %v496_v58 }
  0x1b   : > { %1475 = vmatprep.mubr.msk.bf16.mxu1 %vm720_vm0, %v566_v52  ;;  %v554_v0 = vmul.f32 %v536_v35, %v513_v57  ;;  %v557_v2 = vmul.f32 %v536_v35, %v516_v61  ;;  %v522_v4 = vunpack.c.h.bf16 %v496_v58  ;;  %v568_v5 = vpack.c.bf16 %v550_v56, %v547_v55  ;;  %v1358_v52 = vld [vmem:[%s1833_s5] ss:$0 sm:$0xff] }
  0x1c   : > { %1424 = vmatpush3.bf16.msra.mxu0 %v1544_v16  ;;  %1476 = vmatmul.mubr.msk.bf16.vlgmr.msra.gmra.mrb[0].mxu1 %vm720_vm0, %v569_v53  ;;  %v512_v6 = vunpack.c.h.bf16 %v491_v59  ;;  %v515_v7 = vunpack.c.h.bf16 %v493_v60  ;;  %v560_v9 = vmul.f32 %v536_v35, %v519_v3  ;;  %v546_v11 = vmul.f32 %v1724_v34, %v505_v63  ;;  %v495_v16 = vld [vmem:[%s1697_s13 + $0x48] sm:$0xff] }
  0x1d   : > { %1425 = vmatprep.subr.bf16.mxu0 %v1545_v28  ;;  %v572_v8 = vpack.c.bf16 %v557_v2, %v554_v0  ;;  %v563_v10 = vmul.f32 %v536_v35, %v522_v4  ;;  %v549_v12 = vmul.f32 %v1724_v34, %v508_v1  ;;  %v511_v19 = vunpack.c.l.bf16 %v491_v59  ;;  %1484 = vmatpush3.bf16.msra.mxu1 %v1551_v37 }
  0x1e   : > { %v553_v14 = vmul.f32 %v1719_v30, %v512_v6  ;;  %v556_v15 = vmul.f32 %v1719_v30, %v515_v7  ;;  %v514_v20 = vunpack.c.l.bf16 %v493_v60  ;;  %v518_v22 = vunpack.c.h.bf16 %v495_v16 }
  0x1f   : > { %1479 = vmatprep.mubr.msk.bf16.mxu1 %vm720_vm0, %v572_v8  ;;  %v575_v13 = vpack.c.bf16 %v563_v10, %v560_v9  ;;  %v567_v18 = vpack.c.bf16 %v549_v12, %v546_v11  ;;  %v521_v23 = vunpack.c.h.bf16 %v497_v17  ;;  %v552_v24 = vmul.f32 %v1724_v34, %v511_v19 }
  0x20   : > { %1426 = vmatpush3.bf16.msra.mxu0 %v1546_v33  ;;  %v571_v21 = vpack.c.bf16 %v556_v15, %v553_v14  ;;  %v555_v25 = vmul.f32 %v1724_v34, %v514_v20  ;;  %v559_v26 = vmul.f32 %v1719_v30, %v518_v22  ;;  %v517_v29 = vunpack.c.l.bf16 %v495_v16 }
  0x21   : > { %1427 = vmatprep.subr.bf16.mxu0 %v1548_v39  ;;  %v562_v27 = vmul.f32 %v1719_v30, %v521_v23  ;;  %v520_v31 = vunpack.c.l.bf16 %v497_v17  ;;  %v1552_v30 = vld [vmem:[%s1834_s6 + $0x8] sm:$0xff]  }
  0x22   : > { %v570_v28 = vpack.c.bf16 %v555_v25, %v552_v24  ;;  %v558_v33 = vmul.f32 %v1724_v34, %v517_v29  ;;  %1485 = vmatprep.subr.bf16.mxu1 %v1552_v30 }
  0x23   : > { %v574_v32 = vpack.c.bf16 %v562_v27, %v559_v26  ;;  %v561_v35 = vmul.f32 %v1724_v34, %v520_v31  ;;  %1486 = vmatpush3.bf16.msra.mxu1 %v1552_v30 }
  0x24   : > { %1428 = vmatpush3.bf16.msra.mxu0 %v1549_v54  ;;  %1480 = vmatmul.mubr.msk.bf16.gmra.mrb[4].mxu1 %vm720_vm0, %v575_v13 }
  0x25   : > { %v573_v36 = vpack.c.bf16 %v561_v35, %v558_v33 }
  0x27   : > { %766 = vmatmul.mubr.bf16.vlgmr.msra.gmra.mrb[0].mxu0 %v564_v62 }
  0x28   : > { %773 = vmatprep.mubr.bf16.mxu0 %v568_v5 }
  0x2f   : > { %774 = vmatmul.mubr.bf16.gmra.mrb[4].mxu0 %v567_v18 }
  0x30   : > { %781 = vmatprep.mubr.bf16.mxu0 %v571_v21 }
  0x37   : > { %782 = vmatmul.mubr.bf16.gmra.mrb[8].mxu0 %v570_v28 }
  0x38   : > { %789 = vmatprep.mubr.bf16.mxu0 %v574_v32 }
  0x3f   : > { %790 = vmatmul.mubr.bf16.gmra.mrb[12].mxu0 %v573_v36 }
  0xef   : > { %v1477_v38 = vpop.f32.mrb[0].mxu1 }
  0xf0   : > { %v832_v39 = vpop.f32.mrb[1].mxu1 }
  0xf1   : > { %v1478_v40 = vpop.f32.mrb[2].mxu1 }
  0xf2   : > { %v835_v41 = vpop.f32.mrb[3].mxu1 }
  0xf7   : > { %v1481_v45 = vpop.f32.mrb[4].mxu1 }
  0xf8   : > { %v848_v48 = vpop.f32.mrb[5].mxu1 }
  0xf9   : > { %v1482_v51 = vpop.f32.mrb[6].mxu1 }
  0xfa   : > { %v1429_v34 = vpop.f32.mrb[0].mxu0  ;;  %v851_v53 = vpop.f32.mrb[7].mxu1 }
  0xfb   : > { %v1430_v42 = vpop.f32.mrb[1].mxu0 }
  0xfc   : > { %v1431_v43 = vadd.f32 %v1430_v42, %v1429_v34  ;;  %v1432_v44 = vpop.f32.mrb[2].mxu0 }
  0xfd   : > { %v1433_v46 = vpop.f32.mrb[3].mxu0 }
  0xfe   : > { %v1434_v49 = vadd.f32 %v1433_v46, %v1432_v44  ;;  %v833_v50 = vadd.f32 %v1431_v43, %v832_v39  ;;  %v1553_v43 = vld [vmem:[%s1837_s9] sm:$0xff]   ;;  %v1554_v44 = vld [vmem:[%s1837_s9 + $0x8] sm:$0xff]  }
  0xff   : > { %1495 = vmatprep.subr.bf16.mxu1 %v1553_v43 }
 0x100   : > { %v870_v54 = vmul.f32 %v1357_v47, %v833_v50  ;;  %v836_v55 = vadd.f32 %v1434_v49, %v835_v41  ;;  %v1410_v50 = vld [vmem:[%s1790_s24 + $0x8] sm:$0xff]  }
 0x102   : > { %v885_v56 = vadd.f32 %v1358_v52, %v870_v54  ;;  %v871_v57 = vmul.f32 %v1357_v47, %v836_v55  ;;  %v1435_v58 = vpop.f32.mrb[4].mxu0  ;;  %v1395_v54 = vld [vmem:[%s1790_s24] sm:$0xff]  }
 0x103   : > { %v1436_v59 = vpop.f32.mrb[5].mxu0 }
 0x104   : > { %v886_v60 = vadd.f32 %v1358_v52, %v871_v57  ;;  %v1437_v61 = vadd.f32 %v1436_v59, %v1435_v58  ;;  %v1438_v62 = vpop.f32.mrb[6].mxu0  ;;  %v893_v0 = vmax.f32 %v885_v56, 0.0 }
 0x105   : > { %v1439_v63 = vpop.f32.mrb[7].mxu0 }
 0x106   : > { %v894_v1 = vmax.f32 %v886_v60, 0.0  ;;  %v841_v2 = vadd.f32 %v1477_v38, %v1437_v61  ;;  %v1440_v3 = vadd.f32 %v1439_v63, %v1438_v62  ;;  %v1400_v60 = vunpack.c.l.bf16 %v1410_v50 }
 0x107   : > { %v1401_v62 = vunpack.c.h.bf16 %v1410_v50 }
 0x108   : > { %v901_v4 = vpack.c.bf16 %v894_v1, %v893_v0  ;;  %v872_v5 = vmul.f32 %v1357_v47, %v841_v2  ;;  %v844_v6 = vadd.f32 %v1478_v40, %v1440_v3  ;;  %v1396_v0 = vunpack.c.l.bf16 %v1395_v54 }
 0x109   : > { %v1397_v2 = vunpack.c.h.bf16 %v1395_v54 }
 0x10a   : > { %v887_v7 = vadd.f32 %v1358_v52, %v872_v5  ;;  %v873_v8 = vmul.f32 %v1357_v47, %v844_v6  ;;  %v1441_v9 = vpop.f32.mrb[8].mxu0  ;;  %1487 = vmatprep.mubr.msk.bf16.mxu1 %vm720_vm0, %v901_v4 }
 0x10b   : > { %v1442_v10 = vpop.f32.mrb[9].mxu0 }
 0x10c   : > { %v888_v11 = vadd.f32 %v1358_v52, %v873_v8  ;;  %v1443_v12 = vadd.f32 %v1442_v10, %v1441_v9  ;;  %v1444_v13 = vpop.f32.mrb[10].mxu0  ;;  %v895_v15 = vmax.f32 %v887_v7, 0.0 }
 0x10d   : > { %v1445_v14 = vpop.f32.mrb[11].mxu0 }
 0x10e   : > { %v896_v16 = vmax.f32 %v888_v11, 0.0  ;;  %v1446_v17 = vadd.f32 %v1445_v14, %v1444_v13  ;;  %v849_v18 = vadd.f32 %v1443_v12, %v848_v48  ;;  %v1412_v14 = vld [vmem:[%s1790_s24 + $0x18] sm:$0xff]  }
 0x110   : > { %v902_v19 = vpack.c.bf16 %v896_v16, %v895_v15  ;;  %v874_v20 = vmul.f32 %v1357_v47, %v849_v18  ;;  %v852_v21 = vadd.f32 %v1446_v17, %v851_v53  ;;  %v1411_v18 = vld [vmem:[%s1790_s24 + $0x10] sm:$0xff]  }
 0x112   : > { %v889_v22 = vadd.f32 %v1358_v52, %v874_v20  ;;  %v875_v23 = vmul.f32 %v1357_v47, %v852_v21  ;;  %v1447_v24 = vpop.f32.mrb[12].mxu0  ;;  %1488 = vmatmul.mubr.msk.bf16.vlgmr.msra.gmra.mrb[8].mxu1 %vm720_vm0, %v902_v19 }
 0x113   : > { %v1448_v25 = vpop.f32.mrb[13].mxu0  ;;  %1496 = vmatpush3.bf16.msra.mxu1 %v1553_v43 }
 0x114   : > { %v890_v26 = vadd.f32 %v1358_v52, %v875_v23  ;;  %v1449_v27 = vadd.f32 %v1448_v25, %v1447_v24  ;;  %v1450_v28 = vpop.f32.mrb[14].mxu0  ;;  %v897_v31 = vmax.f32 %v889_v22, 0.0  ;;  %1497 = vmatprep.subr.bf16.mxu1 %v1554_v44  ;;  %v1408_v24 = vunpack.c.l.bf16 %v1412_v14 }
 0x115   : > { %v1451_v29 = vpop.f32.mrb[15].mxu0 }
 0x116   : > { %v898_v32 = vmax.f32 %v890_v26, 0.0  ;;  %v857_v33 = vadd.f32 %v1481_v45, %v1449_v27  ;;  %v1452_v35 = vadd.f32 %v1451_v29, %v1450_v28  ;;  %v1365_v45 = vld [vmem:[%s1835_s7] ss:$0 sm:$0xff]  ;;  %v1409_v26 = vunpack.c.h.bf16 %v1412_v14 }
 0x117   : > { %1498 = vmatpush3.bf16.msra.mxu1 %v1554_v44  ;;  %v1404_v28 = vunpack.c.l.bf16 %v1411_v18 }
 0x118   : > { %v903_v36 = vpack.c.bf16 %v898_v32, %v897_v31  ;;  %v876_v37 = vmul.f32 %v1357_v47, %v857_v33  ;;  %v860_v30 = vadd.f32 %v1482_v51, %v1452_v35  ;;  %v1405_v31 = vunpack.c.h.bf16 %v1411_v18 }
 0x11a   : > { %v891_v38 = vadd.f32 %v1358_v52, %v876_v37  ;;  %v877_v39 = vmul.f32 %v1357_v47, %v860_v30  ;;  %1491 = vmatprep.mubr.msk.bf16.mxu1 %vm720_vm0, %v903_v36  ;;  %v1366_v47 = vld [vmem:[%s1836_s8] ss:$0 sm:$0xff] }
 0x11c   : > { %v892_v40 = vadd.f32 %v1358_v52, %v877_v39  ;;  %v899_v41 = vmax.f32 %v891_v38, 0.0 }
 0x11e   : > { %v900_v34 = vmax.f32 %v892_v40, 0.0  ;;  %v1367_v40 = vld [vmem:[%s1838_s10] ss:$0 sm:$0xff] }
 0x120   : > { %v904_v42 = vpack.c.bf16 %v900_v34, %v899_v41 }
 0x122   : > { %1492 = vmatmul.mubr.msk.bf16.gmra.mrb[12].mxu1 %vm720_vm0, %v904_v42 }
 0x1e5   : > { %v1489_v46 = vpop.f32.mrb[8].mxu1 }
 0x1e6   : > { %v1007_v48 = vmul.f32 %v1489_v46, %v1365_v45  ;;  %v967_v49 = vpop.f32.mrb[9].mxu1 }
 0x1e7   : > { %v1005_v51 = vmul.f32 %v1365_v45, %v967_v49  ;;  %v1490_v52 = vpop.f32.mrb[10].mxu1 }
 0x1e8   : > { %v1022_v53 = vadd.f32 %v1366_v47, %v1007_v48  ;;  %v1008_v55 = vmul.f32 %v1490_v52, %v1365_v45  ;;  %v970_v56 = vpop.f32.mrb[11].mxu1 }
 0x1e9   : > { %v1020_v57 = vadd.f32 %v1366_v47, %v1005_v51  ;;  %v1006_v58 = vmul.f32 %v1365_v45, %v970_v56 }
 0x1ea   : > { %v1030_v59 = vmax.f32 %v1022_v53, 0.0  ;;  %v1023_v61 = vadd.f32 %v1366_v47, %v1008_v55 }
 0x1eb   : > { %v1028_v63 = vmax.f32 %v1020_v57, 0.0  ;;  %v1021_v1 = vadd.f32 %v1366_v47, %v1006_v58 }
 0x1ec   : > { %v1031_v3 = vmax.f32 %v1023_v61, 0.0  ;;  %v1054_v5 = vadd.f32 %v1400_v60, %v1030_v59 }
 0x1ed   : > { %v1029_v4 = vmax.f32 %v1021_v1, 0.0  ;;  %v1052_v7 = vadd.f32 %v1396_v0, %v1028_v63 }
 0x1ee   : > { %v1055_v6 = vadd.f32 %v1401_v62, %v1031_v3 }
 0x1ef   : > { %v1053_v8 = vadd.f32 %v1397_v2, %v1029_v4 }
 0x1f0   : > { %v1061_v9 = vpack.c.bf16 %v1055_v6, %v1054_v5 }
 0x1f1   : > { %v1060_v10 = vpack.c.bf16 %v1053_v8, %v1052_v7 }
 0x1f3   : > { %1499 = vmatprep.mubr.msk.bf16.mxu1 %vm720_vm0, %v1060_v10 }
 0x1f4   : > { %1500 = vmatmul.mubr.msk.bf16.vlgmr.msra.gmra.mrb[16].mxu1 %vm720_vm0, %v1061_v9 }
 0x1f5   : > { %v1493_v11 = vpop.f32.mrb[12].mxu1 }
 0x1f6   : > { %v1011_v12 = vmul.f32 %v1493_v11, %v1365_v45  ;;  %v983_v13 = vpop.f32.mrb[13].mxu1 }
 0x1f7   : > { %v1009_v15 = vmul.f32 %v1365_v45, %v983_v13  ;;  %v1494_v16 = vpop.f32.mrb[14].mxu1 }
 0x1f8   : > { %v1026_v17 = vadd.f32 %v1366_v47, %v1011_v12  ;;  %v1012_v19 = vmul.f32 %v1494_v16, %v1365_v45  ;;  %v986_v20 = vpop.f32.mrb[15].mxu1 }
 0x1f9   : > { %v1024_v21 = vadd.f32 %v1366_v47, %v1009_v15  ;;  %v1010_v22 = vmul.f32 %v1365_v45, %v986_v20 }
 0x1fa   : > { %v1034_v23 = vmax.f32 %v1026_v17, 0.0  ;;  %v1027_v25 = vadd.f32 %v1366_v47, %v1012_v19 }
 0x1fb   : > { %v1032_v27 = vmax.f32 %v1024_v21, 0.0  ;;  %v1025_v29 = vadd.f32 %v1366_v47, %v1010_v22 }
 0x1fc   : > { %v1035_v32 = vmax.f32 %v1027_v25, 0.0  ;;  %v1058_v35 = vadd.f32 %v1408_v24, %v1034_v23 }
 0x1fd   : > { %v1033_v33 = vmax.f32 %v1025_v29, 0.0  ;;  %v1056_v37 = vadd.f32 %v1404_v28, %v1032_v27 }
 0x1fe   : > { %v1059_v36 = vadd.f32 %v1409_v26, %v1035_v32 }
 0x1ff   : > { %v1057_v30 = vadd.f32 %v1405_v31, %v1033_v33 }
 0x200   : > { %v1063_v38 = vpack.c.bf16 %v1059_v36, %v1058_v35 }
 0x201   : > { %v1062_v39 = vpack.c.bf16 %v1057_v30, %v1056_v37 }
 0x203   : > { %1503 = vmatprep.mubr.msk.bf16.mxu1 %vm720_vm0, %v1062_v39 }
 0x204   : > { %1504 = vmatmul.mubr.msk.bf16.gmra.mrb[20].mxu1 %vm720_vm0, %v1063_v38 }
 0x2c7   : > { %v1501_v41 = vpop.f32.mrb[16].mxu1 }
 0x2c8   : > { %v1142_v34 = vadd.f32 %v1501_v41, %v1367_v40  ;;  %v1133_v42 = vpop.f32.mrb[17].mxu1 }
 0x2c9   : > { %v1134_v43 = vadd.f32 %v1367_v40, %v1133_v42  ;;  %v1502_v44 = vpop.f32.mrb[18].mxu1 }
 0x2ca   : > { %v1388_v45 = vpack.c.bf16 %v1142_v34, %v1142_v34  ;;  %v1145_v46 = vadd.f32 %v1502_v44, %v1367_v40  ;;  %v1136_v47 = vpop.f32.mrb[19].mxu1 }
 0x2cb   : > { %v1386_v48 = vpack.c.bf16 %v1134_v43, %v1134_v43  ;;  %v1137_v49 = vadd.f32 %v1367_v40, %v1136_v47 }
 0x2cc   : > { %1199 = vst.msk [vmem:[%s480_s29 + $0x8] sm:$0xf] %vm1196_vm1, %v1388_v45  ;;  %v1389_v50 = vpack.c.bf16 %v1145_v46, %v1145_v46 }
 0x2cd   : > { %1197 = vst.msk [vmem:[%s480_s29] sm:$0xf] %vm1196_vm1, %v1386_v48  ;;  %v1387_v51 = vpack.c.bf16 %v1137_v49, %v1137_v49 }
 0x2ce   : > { %1200 = vst.msk [vmem:[%s480_s29 + $0xc] sm:$0xf] %vm1196_vm1, %v1389_v50 }
 0x2cf   : > { %1198 = vst.msk [vmem:[%s480_s29 + $0x4] sm:$0xf] %vm1196_vm1, %v1387_v51 }
 0x2d7   : > { %v1505_v52 = vpop.f32.mrb[20].mxu1 }
 0x2d8   : > { %v1158_v53 = vadd.f32 %v1505_v52, %v1367_v40  ;;  %v1149_v54 = vpop.f32.mrb[21].mxu1 }
 0x2d9   : > { %v1150_v55 = vadd.f32 %v1367_v40, %v1149_v54  ;;  %v1506_v56 = vpop.f32.mrb[22].mxu1 }
 0x2da   : > { %v1392_v57 = vpack.c.bf16 %v1158_v53, %v1158_v53  ;;  %v1161_v58 = vadd.f32 %v1506_v56, %v1367_v40  ;;  %v1152_v59 = vpop.f32.mrb[23].mxu1 }
 0x2db   : > { %v1390_v60 = vpack.c.bf16 %v1150_v55, %v1150_v55  ;;  %v1153_v61 = vadd.f32 %v1367_v40, %v1152_v59 }
 0x2dc   : > { %1203 = vst.msk [vmem:[%s480_s29 + $0x18] sm:$0xf] %vm1196_vm1, %v1392_v57  ;;  %v1393_v62 = vpack.c.bf16 %v1161_v58, %v1161_v58 }
 0x2dd   : > { %1201 = vst.msk [vmem:[%s480_s29 + $0x10] sm:$0xf] %vm1196_vm1, %v1390_v60  ;;  %v1391_v63 = vpack.c.bf16 %v1153_v61, %v1153_v61 }
 0x2de   : > { %1204 = vst.msk [vmem:[%s480_s29 + $0x1c] sm:$0xf] %vm1196_vm1, %v1393_v62 }
 0x2df   : > { %1202 = vst.msk [vmem:[%s480_s29 + $0x14] sm:$0xf] %vm1196_vm1, %v1391_v63 }
 0x2e0 PF: > { %s21_s19 = sadd.s32 1, %s1577_s19   ;;  %s1840_s17 = smov %s1573_s18 }
 0x2e1   : > { %p18_p5 = scmp.ge.s32.totalorder %s21_s19, 4   ;;  %s1841_s18 = smov %s1843_s20 }
 0x2e3   :  { %20 = sbr.rel (!%p18_p5) target bundleno = 2 (0x2), region = 100 }

// kernel: sparse_and_rgb_guided_depth_forward.21
= control target key start
LH: loop header
LB: loop body
LE: loop exit
PB: predicated region body
PF: predicated region fallthrough
CT: control target
= control target key end

     0   :  { %s1856_s24 = smov 0   ;;  %s1858_s25 = smov 0   ;;  %s2215_s0 = inlined_call_operand.vmem [shape: bf16[2,256,144], index: 0, kind: input, shape index: {}]   ;;  %s2216_s1 = inlined_call_operand.vmem [shape: bf16[144,16], index: 1, kind: input, shape index: {}]   ;;  %s2217_s2 = inlined_call_operand.vmem [shape: f32[1,16], index: 2, kind: input, shape index: {}]   ;;  %s2218_s3 = inlined_call_operand.vmem [shape: f32[1,16], index: 3, kind: input, shape index: {}]   ;;  %s2219_s4 = inlined_call_operand.vmem [shape: bf16[16,8], index: 4, kind: input, shape index: {}]   ;;  %s2220_s5 = inlined_call_operand.vmem [shape: f32[1,8], index: 5, kind: input, shape index: {}]   ;;  %s2221_s6 = inlined_call_operand.vmem [shape: f32[1,8], index: 6, kind: input, shape index: {}]   ;;  %s2222_s7 = inlined_call_operand.vmem [shape: bf16[2,256,8], index: 7, kind: output, shape index: {}]  }
   0x1   :  { %s1860_s26 = smov 0  }
   0x2 LB: > { %s29_s27 = sadd.s32 1, %s1809_s25  ;;  %p1488_p0 = scmp.ge.s32.totalorder %s1813_s26, 1  ;;  %s1813_s26 = sphi %s1860_s26, %s17_s26   ;;  %s1809_s25 = sphi %s1858_s25, %s2224_s25   ;;  %s1805_s24 = sphi %s1856_s24, %s2223_s24  }
   0x3   : > { %p31_p1 = scmp.ge.s32.totalorder %s29_s27, 2  ;;  %p259_p2 = scmp.lt.s32.totalorder %s1813_s26, 3 }
   0x5   : > { %s2226_s27 = smov (%p31_p1, %s29_s27), 0  ;;  %p260_p3 = pnand %p1488_p0, %p259_p2 }
   0x6   : > { %v1733_v0 = vld [vmem:[%s2216_s1] sm:$0xff] (!%p260_p3)   ;;  %v1815_v1 = vmov (!%p260_p3), 0   ;;  %p301_p4 = scmp.lt.s32.totalorder (!%p260_p3), %s1805_s24, 1  ;;  %v1734_v2 = vld [vmem:[%s2216_s1 + $0x8] sm:$0xff] (!%p260_p3)   ;;  %v1735_v3 = vld [vmem:[%s2216_s1 + $0x10] sm:$0xff] (!%p260_p3)   ;;  %vm570_vm0 = vcmask (!%p260_p3), 130048  }
   0x7   : > { %263 = sbr.rel (%p260_p3) target bundleno = 593 (0x251), region = 48  ;;  %619 = vmatprep.subr.bf16.mxu0 (!%p260_p3), %v1815_v1  ;;  %1690 = vmatprep.subr.bf16.mxu1 (!%p260_p3), %v1815_v1  ;;  %v1736_v4 = vld [vmem:[%s2216_s1 + $0x18] sm:$0xff] (!%p260_p3)   ;;  %v1737_v6 = vld [vmem:[%s2216_s1 + $0x20] sm:$0xff] (!%p260_p3)   ;;  %v1738_v7 = vld [vmem:[%s2216_s1 + $0x28] sm:$0xff] (!%p260_p3)   ;;  %vm1361_vm1 = vcmask (!%p260_p3), 60416  }
   0x8   : > { %620 = vmatpush1.bf16.msra.mxu0 (!%p260_p3), %v1733_v0  ;;  %1699 = vmatpush1.bf16.msra.mxu1 (!%p260_p3), %v1733_v0  ;;  %v1739_v8 = vld [vmem:[%s2216_s1 + $0x30] sm:$0xff] (!%p260_p3)   ;;  %v1740_v10 = vld [vmem:[%s2216_s1 + $0x38] sm:$0xff] (!%p260_p3)   ;;  %v1741_v11 = vld [vmem:[%s2216_s1 + $0x40] sm:$0xff] (!%p260_p3)  }
   0x9   : > { %621 = vmatprep.subr.bf16.mxu0 (!%p260_p3), %v1815_v1  ;;  %1691 = vmatprep.subr.bf16.mxu1 (!%p260_p3), %v1815_v1  ;;  %v1790_v42 = vld [vmem:[%s2219_s4] sm:$0xff] (!%p260_p3)  }
   0xa   : > { %v1963_v43 = vld [vmem:[%s2217_s2] ss:$0 sm:$0xff] (!%p260_p3) }
   0xb   : > { %v1968_v45 = vld [vmem:[%s2218_s3] ss:$0 sm:$0xff] (!%p260_p3) }
   0xc   : > { %622 = vmatpush1.bf16.msra.mxu0 (!%p260_p3), %v1734_v2  ;;  %1700 = vmatpush1.bf16.msra.mxu1 (!%p260_p3), %v1734_v2 }
   0xd   : > { %623 = vmatprep.subr.bf16.mxu0 (!%p260_p3), %v1815_v1  ;;  %1692 = vmatprep.subr.bf16.mxu1 (!%p260_p3), %v1815_v1 }
   0xe   : > { %s2228_s24 = smov (!%p301_p4, %s1805_s24), 1 }
   0xf   : > { %s1605_s9 = sshll.u32 %s2228_s24, 8  ;;  %s1606_s18 = sshll.u32 %s2228_s24, 7 }
  0x10   : > { %s1889_s14 = scalar_lea.vmem %s2215_s0, %s1605_s9  ;;  %624 = vmatpush1.bf16.msra.mxu0 %v1735_v3  ;;  %1701 = vmatpush1.bf16.msra.mxu1 %v1735_v3  ;;  %s2083_s21 = scalar_lea.vmem %s2222_s7, %s1606_s18 }
  0x11   : > { %v1744_v5 = vld [vmem:[%s1889_s14 + $0x4] ss:$8 sps:$4 sm:$0xff]   ;;  %625 = vmatprep.subr.bf16.mxu0 %v1815_v1  ;;  %1693 = vmatprep.subr.bf16.mxu1 %v1815_v1  ;;  %v1742_v12 = vld [vmem:[%s1889_s14] ss:$8 sps:$4 sm:$0xff]   ;;  %v1745_v14 = vld [vmem:[%s1889_s14 + $0x14] ss:$8 sps:$4 sm:$0xff]  }
  0x12   : > { %1534 = vmatprep.mubr.msk.bf16.mxu0 %vm570_vm0, %v1744_v5  ;;  %v1774_v9 = vld [vmem:[%s1889_s14 + $0xc4] ss:$8 sps:$4 sm:$0xff]   ;;  %v1772_v13 = vld [vmem:[%s1889_s14 + $0xc0] ss:$8 sps:$4 sm:$0xff]   ;;  %v1778_v15 = vld [vmem:[%s1889_s14 + $0xd4] ss:$8 sps:$4 sm:$0xff]  }
  0x13   : > { %1546 = vmatprep.mubr.msk.bf16.mxu1 %vm570_vm0, %v1774_v9  ;;  %v1747_v16 = vld [vmem:[%s1889_s14 + $0x10] ss:$8 sps:$4 sm:$0xff]   ;;  %v1748_v18 = vld [vmem:[%s1889_s14 + $0x24] ss:$8 sps:$4 sm:$0xff]   ;;  %v1750_v20 = vld [vmem:[%s1889_s14 + $0x20] ss:$8 sps:$4 sm:$0xff]  }
  0x14   : > { %626 = vmatpush1.bf16.msra.mxu0 %v1736_v4  ;;  %1702 = vmatpush1.bf16.msra.mxu1 %v1736_v4  ;;  %v1780_v17 = vld [vmem:[%s1889_s14 + $0xd0] ss:$8 sps:$4 sm:$0xff]   ;;  %v1784_v19 = vld [vmem:[%s1889_s14 + $0xe4] ss:$8 sps:$4 sm:$0xff]   ;;  %v1786_v21 = vld [vmem:[%s1889_s14 + $0xe0] ss:$8 sps:$4 sm:$0xff]  }
  0x15   : > { %627 = vmatprep.subr.bf16.mxu0 %v1815_v1  ;;  %1694 = vmatprep.subr.bf16.mxu1 %v1815_v1  ;;  %v1751_v22 = vld [vmem:[%s1889_s14 + $0x34] ss:$8 sps:$4 sm:$0xff]   ;;  %v1753_v24 = vld [vmem:[%s1889_s14 + $0x30] ss:$8 sps:$4 sm:$0xff]   ;;  %v1754_v26 = vld [vmem:[%s1889_s14 + $0x44] ss:$8 sps:$4 sm:$0xff]  }
  0x16   : > { %v1787_v23 = vld [vmem:[%s1889_s14 + $0xf4] ss:$8 sps:$4 sm:$0xff]   ;;  %v1789_v25 = vld [vmem:[%s1889_s14 + $0xf0] ss:$8 sps:$4 sm:$0xff]   ;;  %v1756_v27 = vld [vmem:[%s1889_s14 + $0x40] ss:$8 sps:$4 sm:$0xff]  }
  0x17   : > { %v1757_v28 = vld [vmem:[%s1889_s14 + $0x54] ss:$8 sps:$4 sm:$0xff]   ;;  %v1759_v29 = vld [vmem:[%s1889_s14 + $0x50] ss:$8 sps:$4 sm:$0xff]   ;;  %v1760_v30 = vld [vmem:[%s1889_s14 + $0x64] ss:$8 sps:$4 sm:$0xff]  }
  0x18   : > { %628 = vmatpush1.bf16.msra.mxu0 %v1737_v6  ;;  %1703 = vmatpush1.bf16.msra.mxu1 %v1737_v6  ;;  %v1762_v31 = vld [vmem:[%s1889_s14 + $0x60] ss:$8 sps:$4 sm:$0xff]   ;;  %v1763_v32 = vld [vmem:[%s1889_s14 + $0x74] ss:$8 sps:$4 sm:$0xff]   ;;  %v1765_v33 = vld [vmem:[%s1889_s14 + $0x70] ss:$8 sps:$4 sm:$0xff]  }
  0x19   : > { %629 = vmatprep.subr.bf16.mxu0 %v1815_v1  ;;  %1695 = vmatprep.subr.bf16.mxu1 %v1815_v1  ;;  %v1766_v34 = vld [vmem:[%s1889_s14 + $0x84] ss:$8 sps:$4 sm:$0xff]   ;;  %v1768_v35 = vld [vmem:[%s1889_s14 + $0x80] ss:$8 sps:$4 sm:$0xff]   ;;  %v1769_v36 = vld [vmem:[%s1889_s14 + $0x94] ss:$8 sps:$4 sm:$0xff]  }
  0x1a   : > { %v1771_v37 = vld [vmem:[%s1889_s14 + $0x90] ss:$8 sps:$4 sm:$0xff]   ;;  %v1775_v38 = vld [vmem:[%s1889_s14 + $0xa4] ss:$8 sps:$4 sm:$0xff]   ;;  %v1777_v39 = vld [vmem:[%s1889_s14 + $0xa0] ss:$8 sps:$4 sm:$0xff]  }
  0x1b   : > { %v1781_v40 = vld [vmem:[%s1889_s14 + $0xb4] ss:$8 sps:$4 sm:$0xff]   ;;  %v1783_v41 = vld [vmem:[%s1889_s14 + $0xb0] ss:$8 sps:$4 sm:$0xff]  }
  0x1c   : > { %630 = vmatpush1.bf16.msra.mxu0 %v1738_v7  ;;  %1704 = vmatpush1.bf16.msra.mxu1 %v1738_v7 }
  0x1d   : > { %631 = vmatprep.subr.bf16.mxu0 %v1815_v1  ;;  %1696 = vmatprep.subr.bf16.mxu1 %v1815_v1 }
  0x20   : > { %632 = vmatpush1.bf16.msra.mxu0 %v1739_v8  ;;  %1705 = vmatpush1.bf16.msra.mxu1 %v1739_v8 }
  0x21   : > { %633 = vmatprep.subr.bf16.mxu0 %v1815_v1  ;;  %1697 = vmatprep.subr.bf16.mxu1 %v1815_v1 }
  0x24   : > { %634 = vmatpush1.bf16.msra.mxu0 %v1740_v10  ;;  %1706 = vmatpush1.bf16.msra.mxu1 %v1740_v10 }
  0x25   : > { %635 = vmatprep.subr.bf16.mxu0 %v1815_v1  ;;  %1698 = vmatprep.subr.bf16.mxu1 %v1815_v1 }
  0x28   : > { %636 = vmatpush1.bf16.msra.mxu0 %v1741_v11  ;;  %1707 = vmatpush1.bf16.msra.mxu1 %v1741_v11 }
  0x29   : > { %1656 = vmatprep.subr.bf16.mxu1 %v1790_v42 }
  0x2b   : > { %652 = vmatmul.mubr.bf16.vlgmr.msra.gmra.mrb[0].mxu0 %v1742_v12  ;;  %748 = vmatmul.mubr.bf16.vlgmr.msra.gmra.mrb[0].mxu1 %v1772_v13 }
  0x2c   : > { %1535 = vmatprep.mubr.msk.bf16.mxu0 %vm570_vm0, %v1745_v14  ;;  %1547 = vmatprep.mubr.msk.bf16.mxu1 %vm570_vm0, %v1778_v15 }
  0x2d   : > { %1657 = vmatpush3.bf16.msra.mxu1 %v1790_v42 }
  0x33   : > { %660 = vmatmul.mubr.bf16.gmra.mrb[4].mxu0 %v1747_v16  ;;  %756 = vmatmul.mubr.bf16.gmra.mrb[4].mxu1 %v1780_v17 }
  0x34   : > { %1536 = vmatprep.mubr.msk.bf16.mxu0 %vm570_vm0, %v1748_v18  ;;  %1548 = vmatprep.mubr.msk.bf16.mxu1 %vm570_vm0, %v1784_v19 }
  0x3b   : > { %668 = vmatmul.mubr.bf16.gmra.mrb[8].mxu0 %v1750_v20  ;;  %764 = vmatmul.mubr.bf16.gmra.mrb[8].mxu1 %v1786_v21 }
  0x3c   : > { %1537 = vmatprep.mubr.msk.bf16.mxu0 %vm570_vm0, %v1751_v22  ;;  %1549 = vmatprep.mubr.msk.bf16.mxu1 %vm570_vm0, %v1787_v23 }
  0x43   : > { %676 = vmatmul.mubr.bf16.gmra.mrb[12].mxu0 %v1753_v24  ;;  %772 = vmatmul.mubr.bf16.gmra.mrb[12].mxu1 %v1789_v25 }
  0x44   : > { %1538 = vmatprep.mubr.msk.bf16.mxu0 %vm570_vm0, %v1754_v26 }
  0x4b   : > { %684 = vmatmul.mubr.bf16.gmra.mrb[16].mxu0 %v1756_v27 }
  0x4c   : > { %1539 = vmatprep.mubr.msk.bf16.mxu0 %vm570_vm0, %v1757_v28 }
  0x53   : > { %692 = vmatmul.mubr.bf16.gmra.mrb[20].mxu0 %v1759_v29 }
  0x54   : > { %1540 = vmatprep.mubr.msk.bf16.mxu0 %vm570_vm0, %v1760_v30 }
  0x5b   : > { %700 = vmatmul.mubr.bf16.gmra.mrb[24].mxu0 %v1762_v31 }
  0x5c   : > { %1541 = vmatprep.mubr.msk.bf16.mxu0 %vm570_vm0, %v1763_v32 }
  0x63   : > { %708 = vmatmul.mubr.bf16.gmra.mrb[28].mxu0 %v1765_v33 }
  0x64   : > { %1542 = vmatprep.mubr.msk.bf16.mxu0 %vm570_vm0, %v1766_v34 }
  0x6b   : > { %716 = vmatmul.mubr.bf16.gmra.mrb[32].mxu0 %v1768_v35 }
  0x6c   : > { %1543 = vmatprep.mubr.msk.bf16.mxu0 %vm570_vm0, %v1769_v36 }
  0x73   : > { %724 = vmatmul.mubr.bf16.gmra.mrb[36].mxu0 %v1771_v37 }
  0x74   : > { %1544 = vmatprep.mubr.msk.bf16.mxu0 %vm570_vm0, %v1775_v38 }
  0x7b   : > { %732 = vmatmul.mubr.bf16.gmra.mrb[40].mxu0 %v1777_v39 }
  0x7c   : > { %1545 = vmatprep.mubr.msk.bf16.mxu0 %vm570_vm0, %v1781_v40 }
  0x83   : > { %740 = vmatmul.mubr.bf16.gmra.mrb[44].mxu0 %v1783_v41 }
  0xfe   : > { %v653_v44 = vpop.f32.mrb[0].mxu0  ;;  %v749_v46 = vpop.f32.mrb[0].mxu1 }
  0xff   : > { %v787_v47 = vmul.f32 %v1963_v43, %v653_v44  ;;  %v655_v48 = vpop.f32.mrb[1].mxu0  ;;  %v811_v49 = vmul.f32 %v1963_v43, %v749_v46  ;;  %v751_v50 = vpop.f32.mrb[1].mxu1 }
 0x100   : > { %v656_v51 = vpop.f32.mrb[2].mxu0  ;;  %v752_v52 = vpop.f32.mrb[2].mxu1 }
 0x101   : > { %v826_v53 = vadd.f32 %v1968_v45, %v787_v47  ;;  %v788_v54 = vmul.f32 %v1963_v43, %v656_v51  ;;  %v658_v55 = vpop.f32.mrb[3].mxu0  ;;  %v850_v56 = vadd.f32 %v1968_v45, %v811_v49  ;;  %v812_v57 = vmul.f32 %v1963_v43, %v752_v52  ;;  %v754_v58 = vpop.f32.mrb[3].mxu1 }
 0x103   : > { %v827_v59 = vadd.f32 %v1968_v45, %v788_v54  ;;  %v882_v60 = vmax.f32 %v850_v56, 0.0  ;;  %v851_v61 = vadd.f32 %v1968_v45, %v812_v57  ;;  %v858_v62 = vmax.f32 %v826_v53, 0.0 }
 0x105   : > { %v859_v63 = vmax.f32 %v827_v59, 0.0  ;;  %v883_v0 = vmax.f32 %v851_v61, 0.0 }
 0x106   : > { %v661_v1 = vpop.f32.mrb[4].mxu0  ;;  %v757_v2 = vpop.f32.mrb[4].mxu1 }
 0x107   : > { %v890_v3 = vpack.c.bf16 %v859_v63, %v858_v62  ;;  %v789_v4 = vmul.f32 %v1963_v43, %v661_v1  ;;  %v663_v5 = vpop.f32.mrb[5].mxu0  ;;  %v1979_v6 = vpack.c.bf16 %v883_v0, %v882_v60  ;;  %v813_v7 = vmul.f32 %v1963_v43, %v757_v2  ;;  %v759_v8 = vpop.f32.mrb[5].mxu1 }
 0x108   : > { %v664_v9 = vpop.f32.mrb[6].mxu0  ;;  %v760_v10 = vpop.f32.mrb[6].mxu1 }
 0x109   : > { %v828_v11 = vadd.f32 %v1968_v45, %v789_v4  ;;  %v790_v12 = vmul.f32 %v1963_v43, %v664_v9  ;;  %v666_v13 = vpop.f32.mrb[7].mxu0  ;;  %1658 = vmatprep.mubr.msk.bf16.mxu1 %vm570_vm0, %v890_v3  ;;  %v852_v14 = vadd.f32 %v1968_v45, %v813_v7  ;;  %v814_v15 = vmul.f32 %v1963_v43, %v760_v10  ;;  %v762_v16 = vpop.f32.mrb[7].mxu1 }
 0x10b   : > { %v829_v17 = vadd.f32 %v1968_v45, %v790_v12  ;;  %v884_v18 = vmax.f32 %v852_v14, 0.0  ;;  %v853_v19 = vadd.f32 %v1968_v45, %v814_v15  ;;  %v860_v20 = vmax.f32 %v828_v11, 0.0 }
 0x10d   : > { %v861_v21 = vmax.f32 %v829_v17, 0.0  ;;  %v885_v22 = vmax.f32 %v853_v19, 0.0 }
 0x10e   : > { %v669_v23 = vpop.f32.mrb[8].mxu0  ;;  %v765_v24 = vpop.f32.mrb[8].mxu1 }
 0x10f   : > { %v891_v25 = vpack.c.bf16 %v861_v21, %v860_v20  ;;  %v791_v26 = vmul.f32 %v1963_v43, %v669_v23  ;;  %v671_v27 = vpop.f32.mrb[9].mxu0  ;;  %v1990_v28 = vpack.c.bf16 %v885_v22, %v884_v18  ;;  %v815_v29 = vmul.f32 %v1963_v43, %v765_v24  ;;  %v767_v30 = vpop.f32.mrb[9].mxu1 }
 0x110   : > { %v672_v31 = vpop.f32.mrb[10].mxu0  ;;  %v768_v32 = vpop.f32.mrb[10].mxu1 }
 0x111   : > { %v830_v33 = vadd.f32 %v1968_v45, %v791_v26  ;;  %v792_v34 = vmul.f32 %v1963_v43, %v672_v31  ;;  %v674_v35 = vpop.f32.mrb[11].mxu0  ;;  %1659 = vmatmul.mubr.msk.bf16.vlgmr.msra.gmra.mrb[16].mxu1 %vm570_vm0, %v891_v25  ;;  %v854_v36 = vadd.f32 %v1968_v45, %v815_v29  ;;  %v816_v37 = vmul.f32 %v1963_v43, %v768_v32  ;;  %v770_v38 = vpop.f32.mrb[11].mxu1 }
 0x113   : > { %v831_v39 = vadd.f32 %v1968_v45, %v792_v34  ;;  %v886_v40 = vmax.f32 %v854_v36, 0.0  ;;  %v855_v41 = vadd.f32 %v1968_v45, %v816_v37  ;;  %v862_v42 = vmax.f32 %v830_v33, 0.0 }
 0x115   : > { %v863_v44 = vmax.f32 %v831_v39, 0.0  ;;  %v887_v46 = vmax.f32 %v855_v41, 0.0 }
 0x116   : > { %v677_v47 = vpop.f32.mrb[12].mxu0  ;;  %v773_v48 = vpop.f32.mrb[12].mxu1 }
 0x117   : > { %v892_v49 = vpack.c.bf16 %v863_v44, %v862_v42  ;;  %v793_v50 = vmul.f32 %v1963_v43, %v677_v47  ;;  %v679_v51 = vpop.f32.mrb[13].mxu0  ;;  %v2001_v52 = vpack.c.bf16 %v887_v46, %v886_v40  ;;  %v817_v53 = vmul.f32 %v1963_v43, %v773_v48  ;;  %v775_v54 = vpop.f32.mrb[13].mxu1 }
 0x118   : > { %v680_v55 = vpop.f32.mrb[14].mxu0  ;;  %v776_v56 = vpop.f32.mrb[14].mxu1 }
 0x119   : > { %v832_v57 = vadd.f32 %v1968_v45, %v793_v50  ;;  %v794_v58 = vmul.f32 %v1963_v43, %v680_v55  ;;  %v682_v59 = vpop.f32.mrb[15].mxu0  ;;  %1662 = vmatprep.mubr.msk.bf16.mxu1 %vm570_vm0, %v892_v49  ;;  %v856_v60 = vadd.f32 %v1968_v45, %v817_v53  ;;  %v818_v61 = vmul.f32 %v1963_v43, %v776_v56  ;;  %v778_v62 = vpop.f32.mrb[15].mxu1 }
 0x11b   : > { %v833_v63 = vadd.f32 %v1968_v45, %v794_v58  ;;  %v888_v0 = vmax.f32 %v856_v60, 0.0  ;;  %v857_v1 = vadd.f32 %v1968_v45, %v818_v61  ;;  %v864_v2 = vmax.f32 %v832_v57, 0.0 }
 0x11d   : > { %v865_v3 = vmax.f32 %v833_v63, 0.0  ;;  %v889_v4 = vmax.f32 %v857_v1, 0.0 }
 0x11e   : > { %v685_v5 = vpop.f32.mrb[16].mxu0 }
 0x11f   : > { %v893_v7 = vpack.c.bf16 %v865_v3, %v864_v2  ;;  %v795_v8 = vmul.f32 %v1963_v43, %v685_v5  ;;  %v687_v9 = vpop.f32.mrb[17].mxu0  ;;  %v2012_v10 = vpack.c.bf16 %v889_v4, %v888_v0 }
 0x120   : > { %v688_v11 = vpop.f32.mrb[18].mxu0 }
 0x121   : > { %v834_v12 = vadd.f32 %v1968_v45, %v795_v8  ;;  %v796_v13 = vmul.f32 %v1963_v43, %v688_v11  ;;  %v690_v14 = vpop.f32.mrb[19].mxu0  ;;  %1663 = vmatmul.mubr.msk.bf16.gmra.mrb[20].mxu1 %vm570_vm0, %v893_v7 }
 0x123   : > { %v835_v15 = vadd.f32 %v1968_v45, %v796_v13  ;;  %v866_v16 = vmax.f32 %v834_v12, 0.0 }
 0x125   : > { %v867_v17 = vmax.f32 %v835_v15, 0.0 }
 0x126   : > { %v693_v18 = vpop.f32.mrb[20].mxu0 }
 0x127   : > { %v894_v19 = vpack.c.bf16 %v867_v17, %v866_v16  ;;  %v797_v20 = vmul.f32 %v1963_v43, %v693_v18  ;;  %v695_v21 = vpop.f32.mrb[21].mxu0 }
 0x128   : > { %v696_v22 = vpop.f32.mrb[22].mxu0 }
 0x129   : > { %v836_v23 = vadd.f32 %v1968_v45, %v797_v20  ;;  %v798_v24 = vmul.f32 %v1963_v43, %v696_v22  ;;  %v698_v25 = vpop.f32.mrb[23].mxu0  ;;  %1666 = vmatprep.mubr.msk.bf16.mxu1 %vm570_vm0, %v894_v19 }
 0x12b   : > { %v837_v26 = vadd.f32 %v1968_v45, %v798_v24  ;;  %v868_v27 = vmax.f32 %v836_v23, 0.0 }
 0x12d   : > { %v869_v29 = vmax.f32 %v837_v26, 0.0 }
 0x12e   : > { %v701_v30 = vpop.f32.mrb[24].mxu0 }
 0x12f   : > { %v895_v31 = vpack.c.bf16 %v869_v29, %v868_v27  ;;  %v799_v32 = vmul.f32 %v1963_v43, %v701_v30  ;;  %v703_v33 = vpop.f32.mrb[25].mxu0 }
 0x130   : > { %v704_v34 = vpop.f32.mrb[26].mxu0 }
 0x131   : > { %v838_v35 = vadd.f32 %v1968_v45, %v799_v32  ;;  %v800_v36 = vmul.f32 %v1963_v43, %v704_v34  ;;  %v706_v37 = vpop.f32.mrb[27].mxu0  ;;  %1667 = vmatmul.mubr.msk.bf16.gmra.mrb[24].mxu1 %vm570_vm0, %v895_v31 }
 0x133   : > { %v839_v38 = vadd.f32 %v1968_v45, %v800_v36  ;;  %v870_v39 = vmax.f32 %v838_v35, 0.0 }
 0x135   : > { %v871_v40 = vmax.f32 %v839_v38, 0.0 }
 0x136   : > { %v709_v41 = vpop.f32.mrb[28].mxu0 }
 0x137   : > { %v896_v42 = vpack.c.bf16 %v871_v40, %v870_v39  ;;  %v801_v44 = vmul.f32 %v1963_v43, %v709_v41  ;;  %v711_v46 = vpop.f32.mrb[29].mxu0  ;;  %v2070_v39 = vld [vmem:[%s2221_s6] ss:$0 sm:$0xff] }
 0x138   : > { %v712_v47 = vpop.f32.mrb[30].mxu0 }
 0x139   : > { %v840_v48 = vadd.f32 %v1968_v45, %v801_v44  ;;  %v802_v49 = vmul.f32 %v1963_v43, %v712_v47  ;;  %v714_v50 = vpop.f32.mrb[31].mxu0  ;;  %1670 = vmatprep.mubr.msk.bf16.mxu1 %vm570_vm0, %v896_v42 }
 0x13b   : > { %v841_v51 = vadd.f32 %v1968_v45, %v802_v49  ;;  %v872_v53 = vmax.f32 %v840_v48, 0.0 }
 0x13d   : > { %v873_v54 = vmax.f32 %v841_v51, 0.0 }
 0x13e   : > { %v717_v55 = vpop.f32.mrb[32].mxu0 }
 0x13f   : > { %v897_v56 = vpack.c.bf16 %v873_v54, %v872_v53  ;;  %v803_v57 = vmul.f32 %v1963_v43, %v717_v55  ;;  %v719_v58 = vpop.f32.mrb[33].mxu0 }
 0x140   : > { %v720_v59 = vpop.f32.mrb[34].mxu0 }
 0x141   : > { %v842_v60 = vadd.f32 %v1968_v45, %v803_v57  ;;  %v804_v61 = vmul.f32 %v1963_v43, %v720_v59  ;;  %v722_v62 = vpop.f32.mrb[35].mxu0  ;;  %1671 = vmatmul.mubr.msk.bf16.gmra.mrb[28].mxu1 %vm570_vm0, %v897_v56 }
 0x143   : > { %v843_v63 = vadd.f32 %v1968_v45, %v804_v61  ;;  %v874_v0 = vmax.f32 %v842_v60, 0.0 }
 0x145   : > { %v875_v1 = vmax.f32 %v843_v63, 0.0 }
 0x146   : > { %v725_v2 = vpop.f32.mrb[36].mxu0 }
 0x147   : > { %v898_v3 = vpack.c.bf16 %v875_v1, %v874_v0  ;;  %v805_v4 = vmul.f32 %v1963_v43, %v725_v2  ;;  %v727_v5 = vpop.f32.mrb[37].mxu0 }
 0x148   : > { %v728_v7 = vpop.f32.mrb[38].mxu0 }
 0x149   : > { %v844_v8 = vadd.f32 %v1968_v45, %v805_v4  ;;  %v806_v9 = vmul.f32 %v1963_v43, %v728_v7  ;;  %v730_v11 = vpop.f32.mrb[39].mxu0  ;;  %1674 = vmatprep.mubr.msk.bf16.mxu1 %vm570_vm0, %v898_v3 }
 0x14b   : > { %v845_v12 = vadd.f32 %v1968_v45, %v806_v9  ;;  %v876_v13 = vmax.f32 %v844_v8, 0.0 }
 0x14d   : > { %v877_v14 = vmax.f32 %v845_v12, 0.0 }
 0x14e   : > { %v733_v15 = vpop.f32.mrb[40].mxu0 }
 0x14f   : > { %v899_v16 = vpack.c.bf16 %v877_v14, %v876_v13  ;;  %v807_v17 = vmul.f32 %v1963_v43, %v733_v15  ;;  %v735_v18 = vpop.f32.mrb[41].mxu0 }
 0x150   : > { %v736_v19 = vpop.f32.mrb[42].mxu0 }
 0x151   : > { %v846_v20 = vadd.f32 %v1968_v45, %v807_v17  ;;  %v808_v21 = vmul.f32 %v1963_v43, %v736_v19  ;;  %v738_v22 = vpop.f32.mrb[43].mxu0  ;;  %1675 = vmatmul.mubr.msk.bf16.gmra.mrb[32].mxu1 %vm570_vm0, %v899_v16 }
 0x153   : > { %v847_v23 = vadd.f32 %v1968_v45, %v808_v21  ;;  %v878_v24 = vmax.f32 %v846_v20, 0.0 }
 0x155   : > { %v879_v25 = vmax.f32 %v847_v23, 0.0 }
 0x156   : > { %v741_v26 = vpop.f32.mrb[44].mxu0 }
 0x157   : > { %v900_v27 = vpack.c.bf16 %v879_v25, %v878_v24  ;;  %v809_v29 = vmul.f32 %v1963_v43, %v741_v26  ;;  %v743_v30 = vpop.f32.mrb[45].mxu0 }
 0x158   : > { %v744_v31 = vpop.f32.mrb[46].mxu0 }
 0x159   : > { %v848_v32 = vadd.f32 %v1968_v45, %v809_v29  ;;  %v810_v33 = vmul.f32 %v1963_v43, %v744_v31  ;;  %v746_v34 = vpop.f32.mrb[47].mxu0  ;;  %1678 = vmatprep.mubr.msk.bf16.mxu1 %vm570_vm0, %v900_v27  ;;  %v2065_v43 = vld [vmem:[%s2220_s5] ss:$0 sm:$0xff] }
 0x15b   : > { %v849_v35 = vadd.f32 %v1968_v45, %v810_v33  ;;  %v880_v36 = vmax.f32 %v848_v32, 0.0 }
 0x15d   : > { %v881_v37 = vmax.f32 %v849_v35, 0.0 }
 0x15f   : > { %v901_v38 = vpack.c.bf16 %v881_v37, %v880_v36 }
 0x161   : > { %1679 = vmatmul.mubr.msk.bf16.gmra.mrb[36].mxu1 %vm570_vm0, %v901_v38 }
 0x162   : > { %1682 = vmatprep.mubr.msk.bf16.mxu1 %vm570_vm0, %v1979_v6 }
 0x169   : > { %1683 = vmatmul.mubr.msk.bf16.gmra.mrb[40].mxu1 %vm570_vm0, %v1990_v28 }
 0x16a   : > { %1686 = vmatprep.mubr.msk.bf16.mxu1 %vm570_vm0, %v2001_v52 }
 0x171   : > { %1687 = vmatmul.mubr.msk.bf16.gmra.mrb[44].mxu1 %vm570_vm0, %v2012_v10 }
 0x1e4   : > { %v1660_v45 = vpop.f32.mrb[16].mxu1 }
 0x1e5   : > { %v1132_v6 = vmul.f32 %v1660_v45, %v2065_v43  ;;  %v996_v28 = vpop.f32.mrb[17].mxu1 }
 0x1e6   : > { %v1130_v40 = vmul.f32 %v2065_v43, %v996_v28  ;;  %v1661_v52 = vpop.f32.mrb[18].mxu1 }
 0x1e7   : > { %v1171_v10 = vadd.f32 %v2070_v39, %v1132_v6  ;;  %v1133_v41 = vmul.f32 %v1661_v52, %v2065_v43  ;;  %v999_v42 = vpop.f32.mrb[19].mxu1 }
 0x1e8   : > { %v1169_v44 = vadd.f32 %v2070_v39, %v1130_v40  ;;  %v1131_v46 = vmul.f32 %v2065_v43, %v999_v42 }
 0x1e9   : > { %v1203_v47 = vmax.f32 %v1171_v10, 0.0  ;;  %v1172_v48 = vadd.f32 %v2070_v39, %v1133_v41 }
 0x1ea   : > { %v1201_v49 = vmax.f32 %v1169_v44, 0.0  ;;  %v1170_v50 = vadd.f32 %v2070_v39, %v1131_v46 }
 0x1eb   : > { %v1609_v51 = vpack.c.bf16 %v1203_v47, %v1203_v47  ;;  %v1204_v53 = vmax.f32 %v1172_v48, 0.0 }
 0x1ec   : > { %v1607_v54 = vpack.c.bf16 %v1201_v49, %v1201_v49  ;;  %v1202_v55 = vmax.f32 %v1170_v50, 0.0 }
 0x1ed   : > { %1364 = vst.msk [vmem:[%s2083_s21 + $0x8] sm:$0xf] %vm1361_vm1, %v1609_v51  ;;  %v1610_v56 = vpack.c.bf16 %v1204_v53, %v1204_v53 }
 0x1ee   : > { %1362 = vst.msk [vmem:[%s2083_s21] sm:$0xf] %vm1361_vm1, %v1607_v54  ;;  %v1608_v57 = vpack.c.bf16 %v1202_v55, %v1202_v55 }
 0x1ef   : > { %1365 = vst.msk [vmem:[%s2083_s21 + $0xc] sm:$0xf] %vm1361_vm1, %v1610_v56 }
 0x1f0   : > { %1363 = vst.msk [vmem:[%s2083_s21 + $0x4] sm:$0xf] %vm1361_vm1, %v1608_v57 }
 0x1f4   : > { %v1664_v58 = vpop.f32.mrb[20].mxu1 }
 0x1f5   : > { %v1136_v59 = vmul.f32 %v1664_v58, %v2065_v43  ;;  %v1012_v60 = vpop.f32.mrb[21].mxu1 }
 0x1f6   : > { %v1134_v61 = vmul.f32 %v2065_v43, %v1012_v60  ;;  %v1665_v62 = vpop.f32.mrb[22].mxu1 }
 0x1f7   : > { %v1175_v63 = vadd.f32 %v2070_v39, %v1136_v59  ;;  %v1137_v0 = vmul.f32 %v1665_v62, %v2065_v43  ;;  %v1015_v1 = vpop.f32.mrb[23].mxu1 }
 0x1f8   : > { %v1173_v2 = vadd.f32 %v2070_v39, %v1134_v61  ;;  %v1135_v3 = vmul.f32 %v2065_v43, %v1015_v1 }
 0x1f9   : > { %v1207_v4 = vmax.f32 %v1175_v63, 0.0  ;;  %v1176_v5 = vadd.f32 %v2070_v39, %v1137_v0 }
 0x1fa   : > { %v1205_v7 = vmax.f32 %v1173_v2, 0.0  ;;  %v1174_v8 = vadd.f32 %v2070_v39, %v1135_v3 }
 0x1fb   : > { %v1613_v9 = vpack.c.bf16 %v1207_v4, %v1207_v4  ;;  %v1208_v11 = vmax.f32 %v1176_v5, 0.0 }
 0x1fc   : > { %v1611_v12 = vpack.c.bf16 %v1205_v7, %v1205_v7  ;;  %v1206_v13 = vmax.f32 %v1174_v8, 0.0 }
 0x1fd   : > { %1368 = vst.msk [vmem:[%s2083_s21 + $0x18] sm:$0xf] %vm1361_vm1, %v1613_v9  ;;  %v1614_v14 = vpack.c.bf16 %v1208_v11, %v1208_v11 }
 0x1fe   : > { %1366 = vst.msk [vmem:[%s2083_s21 + $0x10] sm:$0xf] %vm1361_vm1, %v1611_v12  ;;  %v1612_v15 = vpack.c.bf16 %v1206_v13, %v1206_v13 }
 0x1ff   : > { %1369 = vst.msk [vmem:[%s2083_s21 + $0x1c] sm:$0xf] %vm1361_vm1, %v1614_v14 }
 0x200   : > { %1367 = vst.msk [vmem:[%s2083_s21 + $0x14] sm:$0xf] %vm1361_vm1, %v1612_v15 }
 0x204   : > { %v1668_v16 = vpop.f32.mrb[24].mxu1 }
 0x205   : > { %v1140_v17 = vmul.f32 %v1668_v16, %v2065_v43  ;;  %v1028_v18 = vpop.f32.mrb[25].mxu1 }
 0x206   : > { %v1138_v19 = vmul.f32 %v2065_v43, %v1028_v18  ;;  %v1669_v20 = vpop.f32.mrb[26].mxu1 }
 0x207   : > { %v1179_v21 = vadd.f32 %v2070_v39, %v1140_v17  ;;  %v1141_v22 = vmul.f32 %v1669_v20, %v2065_v43  ;;  %v1031_v23 = vpop.f32.mrb[27].mxu1 }
 0x208   : > { %v1177_v24 = vadd.f32 %v2070_v39, %v1138_v19  ;;  %v1139_v25 = vmul.f32 %v2065_v43, %v1031_v23 }
 0x209   : > { %v1211_v26 = vmax.f32 %v1179_v21, 0.0  ;;  %v1180_v27 = vadd.f32 %v2070_v39, %v1141_v22 }
 0x20a   : > { %v1209_v29 = vmax.f32 %v1177_v24, 0.0  ;;  %v1178_v30 = vadd.f32 %v2070_v39, %v1139_v25 }
 0x20b   : > { %v1617_v31 = vpack.c.bf16 %v1211_v26, %v1211_v26  ;;  %v1212_v32 = vmax.f32 %v1180_v27, 0.0 }
 0x20c   : > { %v1615_v33 = vpack.c.bf16 %v1209_v29, %v1209_v29  ;;  %v1210_v34 = vmax.f32 %v1178_v30, 0.0 }
 0x20d   : > { %1372 = vst.msk [vmem:[%s2083_s21 + $0x28] sm:$0xf] %vm1361_vm1, %v1617_v31  ;;  %v1618_v35 = vpack.c.bf16 %v1212_v32, %v1212_v32 }
 0x20e   : > { %1370 = vst.msk [vmem:[%s2083_s21 + $0x20] sm:$0xf] %vm1361_vm1, %v1615_v33  ;;  %v1616_v36 = vpack.c.bf16 %v1210_v34, %v1210_v34 }
 0x20f   : > { %1373 = vst.msk [vmem:[%s2083_s21 + $0x2c] sm:$0xf] %vm1361_vm1, %v1618_v35 }
 0x210   : > { %1371 = vst.msk [vmem:[%s2083_s21 + $0x24] sm:$0xf] %vm1361_vm1, %v1616_v36 }
 0x214   : > { %v1672_v37 = vpop.f32.mrb[28].mxu1 }
 0x215   : > { %v1144_v38 = vmul.f32 %v1672_v37, %v2065_v43  ;;  %v1044_v45 = vpop.f32.mrb[29].mxu1 }
 0x216   : > { %v1142_v6 = vmul.f32 %v2065_v43, %v1044_v45  ;;  %v1673_v28 = vpop.f32.mrb[30].mxu1 }
 0x217   : > { %v1183_v40 = vadd.f32 %v2070_v39, %v1144_v38  ;;  %v1145_v52 = vmul.f32 %v1673_v28, %v2065_v43  ;;  %v1047_v10 = vpop.f32.mrb[31].mxu1 }
 0x218   : > { %v1181_v41 = vadd.f32 %v2070_v39, %v1142_v6  ;;  %v1143_v42 = vmul.f32 %v2065_v43, %v1047_v10 }
 0x219   : > { %v1215_v44 = vmax.f32 %v1183_v40, 0.0  ;;  %v1184_v46 = vadd.f32 %v2070_v39, %v1145_v52 }
 0x21a   : > { %v1213_v47 = vmax.f32 %v1181_v41, 0.0  ;;  %v1182_v48 = vadd.f32 %v2070_v39, %v1143_v42 }
 0x21b   : > { %v1621_v49 = vpack.c.bf16 %v1215_v44, %v1215_v44  ;;  %v1216_v50 = vmax.f32 %v1184_v46, 0.0 }
 0x21c   : > { %v1619_v51 = vpack.c.bf16 %v1213_v47, %v1213_v47  ;;  %v1214_v53 = vmax.f32 %v1182_v48, 0.0 }
 0x21d   : > { %1376 = vst.msk [vmem:[%s2083_s21 + $0x38] sm:$0xf] %vm1361_vm1, %v1621_v49  ;;  %v1622_v54 = vpack.c.bf16 %v1216_v50, %v1216_v50 }
 0x21e   : > { %1374 = vst.msk [vmem:[%s2083_s21 + $0x30] sm:$0xf] %vm1361_vm1, %v1619_v51  ;;  %v1620_v55 = vpack.c.bf16 %v1214_v53, %v1214_v53 }
 0x21f   : > { %1377 = vst.msk [vmem:[%s2083_s21 + $0x3c] sm:$0xf] %vm1361_vm1, %v1622_v54 }
 0x220   : > { %1375 = vst.msk [vmem:[%s2083_s21 + $0x34] sm:$0xf] %vm1361_vm1, %v1620_v55 }
 0x224   : > { %v1676_v56 = vpop.f32.mrb[32].mxu1 }
 0x225   : > { %v1148_v57 = vmul.f32 %v1676_v56, %v2065_v43  ;;  %v1060_v58 = vpop.f32.mrb[33].mxu1 }
 0x226   : > { %v1146_v59 = vmul.f32 %v2065_v43, %v1060_v58  ;;  %v1677_v60 = vpop.f32.mrb[34].mxu1 }
 0x227   : > { %v1187_v61 = vadd.f32 %v2070_v39, %v1148_v57  ;;  %v1149_v62 = vmul.f32 %v1677_v60, %v2065_v43  ;;  %v1063_v63 = vpop.f32.mrb[35].mxu1 }
 0x228   : > { %v1185_v0 = vadd.f32 %v2070_v39, %v1146_v59  ;;  %v1147_v1 = vmul.f32 %v2065_v43, %v1063_v63 }
 0x229   : > { %v1219_v2 = vmax.f32 %v1187_v61, 0.0  ;;  %v1188_v3 = vadd.f32 %v2070_v39, %v1149_v62 }
 0x22a   : > { %v1217_v4 = vmax.f32 %v1185_v0, 0.0  ;;  %v1186_v5 = vadd.f32 %v2070_v39, %v1147_v1 }
 0x22b   : > { %v1625_v7 = vpack.c.bf16 %v1219_v2, %v1219_v2  ;;  %v1220_v8 = vmax.f32 %v1188_v3, 0.0 }
 0x22c   : > { %v1623_v9 = vpack.c.bf16 %v1217_v4, %v1217_v4  ;;  %v1218_v11 = vmax.f32 %v1186_v5, 0.0 }
 0x22d   : > { %1380 = vst.msk [vmem:[%s2083_s21 + $0x48] sm:$0xf] %vm1361_vm1, %v1625_v7  ;;  %v1626_v12 = vpack.c.bf16 %v1220_v8, %v1220_v8 }
 0x22e   : > { %1378 = vst.msk [vmem:[%s2083_s21 + $0x40] sm:$0xf] %vm1361_vm1, %v1623_v9  ;;  %v1624_v13 = vpack.c.bf16 %v1218_v11, %v1218_v11 }
 0x22f   : > { %1381 = vst.msk [vmem:[%s2083_s21 + $0x4c] sm:$0xf] %vm1361_vm1, %v1626_v12 }
 0x230   : > { %1379 = vst.msk [vmem:[%s2083_s21 + $0x44] sm:$0xf] %vm1361_vm1, %v1624_v13 }
 0x234   : > { %v1680_v14 = vpop.f32.mrb[36].mxu1 }
 0x235   : > { %v1152_v15 = vmul.f32 %v1680_v14, %v2065_v43  ;;  %v1076_v16 = vpop.f32.mrb[37].mxu1 }
 0x236   : > { %v1150_v17 = vmul.f32 %v2065_v43, %v1076_v16  ;;  %v1681_v18 = vpop.f32.mrb[38].mxu1 }
 0x237   : > { %v1191_v19 = vadd.f32 %v2070_v39, %v1152_v15  ;;  %v1153_v20 = vmul.f32 %v1681_v18, %v2065_v43  ;;  %v1079_v21 = vpop.f32.mrb[39].mxu1 }
 0x238   : > { %v1189_v22 = vadd.f32 %v2070_v39, %v1150_v17  ;;  %v1151_v23 = vmul.f32 %v2065_v43, %v1079_v21 }
 0x239   : > { %v1223_v24 = vmax.f32 %v1191_v19, 0.0  ;;  %v1192_v25 = vadd.f32 %v2070_v39, %v1153_v20 }
 0x23a   : > { %v1221_v26 = vmax.f32 %v1189_v22, 0.0  ;;  %v1190_v27 = vadd.f32 %v2070_v39, %v1151_v23 }
 0x23b   : > { %v1629_v29 = vpack.c.bf16 %v1223_v24, %v1223_v24  ;;  %v1224_v30 = vmax.f32 %v1192_v25, 0.0 }
 0x23c   : > { %v1627_v31 = vpack.c.bf16 %v1221_v26, %v1221_v26  ;;  %v1222_v32 = vmax.f32 %v1190_v27, 0.0  ;;  %v1684_v33 = vpop.f32.mrb[40].mxu1 }
 0x23d   : > { %1384 = vst.msk [vmem:[%s2083_s21 + $0x58] sm:$0xf] %vm1361_vm1, %v1629_v29  ;;  %v1630_v34 = vpack.c.bf16 %v1224_v30, %v1224_v30  ;;  %v1156_v35 = vmul.f32 %v1684_v33, %v2065_v43  ;;  %v1092_v36 = vpop.f32.mrb[41].mxu1 }
 0x23e   : > { %1382 = vst.msk [vmem:[%s2083_s21 + $0x50] sm:$0xf] %vm1361_vm1, %v1627_v31  ;;  %v1628_v37 = vpack.c.bf16 %v1222_v32, %v1222_v32  ;;  %v1154_v38 = vmul.f32 %v2065_v43, %v1092_v36  ;;  %v1685_v45 = vpop.f32.mrb[42].mxu1 }
 0x23f   : > { %1385 = vst.msk [vmem:[%s2083_s21 + $0x5c] sm:$0xf] %vm1361_vm1, %v1630_v34  ;;  %v1195_v6 = vadd.f32 %v2070_v39, %v1156_v35  ;;  %v1157_v28 = vmul.f32 %v1685_v45, %v2065_v43  ;;  %v1095_v40 = vpop.f32.mrb[43].mxu1 }
 0x240   : > { %1383 = vst.msk [vmem:[%s2083_s21 + $0x54] sm:$0xf] %vm1361_vm1, %v1628_v37  ;;  %v1193_v52 = vadd.f32 %v2070_v39, %v1154_v38  ;;  %v1155_v10 = vmul.f32 %v2065_v43, %v1095_v40 }
 0x241   : > { %v1227_v41 = vmax.f32 %v1195_v6, 0.0  ;;  %v1196_v42 = vadd.f32 %v2070_v39, %v1157_v28 }
 0x242   : > { %v1225_v44 = vmax.f32 %v1193_v52, 0.0  ;;  %v1194_v46 = vadd.f32 %v2070_v39, %v1155_v10 }
 0x243   : > { %v1633_v47 = vpack.c.bf16 %v1227_v41, %v1227_v41  ;;  %v1228_v48 = vmax.f32 %v1196_v42, 0.0 }
 0x244   : > { %v1631_v49 = vpack.c.bf16 %v1225_v44, %v1225_v44  ;;  %v1226_v50 = vmax.f32 %v1194_v46, 0.0  ;;  %v1688_v51 = vpop.f32.mrb[44].mxu1 }
 0x245   : > { %1388 = vst.msk [vmem:[%s2083_s21 + $0x68] sm:$0xf] %vm1361_vm1, %v1633_v47  ;;  %v1634_v53 = vpack.c.bf16 %v1228_v48, %v1228_v48  ;;  %v1160_v54 = vmul.f32 %v1688_v51, %v2065_v43  ;;  %v1108_v55 = vpop.f32.mrb[45].mxu1 }
 0x246   : > { %1386 = vst.msk [vmem:[%s2083_s21 + $0x60] sm:$0xf] %vm1361_vm1, %v1631_v49  ;;  %v1632_v56 = vpack.c.bf16 %v1226_v50, %v1226_v50  ;;  %v1158_v57 = vmul.f32 %v2065_v43, %v1108_v55  ;;  %v1689_v58 = vpop.f32.mrb[46].mxu1 }
 0x247   : > { %1389 = vst.msk [vmem:[%s2083_s21 + $0x6c] sm:$0xf] %vm1361_vm1, %v1634_v53  ;;  %v1199_v59 = vadd.f32 %v2070_v39, %v1160_v54  ;;  %v1161_v60 = vmul.f32 %v1689_v58, %v2065_v43  ;;  %v1111_v61 = vpop.f32.mrb[47].mxu1 }
 0x248   : > { %1387 = vst.msk [vmem:[%s2083_s21 + $0x64] sm:$0xf] %vm1361_vm1, %v1632_v56  ;;  %v1197_v62 = vadd.f32 %v2070_v39, %v1158_v57  ;;  %v1159_v63 = vmul.f32 %v2065_v43, %v1111_v61 }
 0x249   : > { %v1231_v0 = vmax.f32 %v1199_v59, 0.0  ;;  %v1200_v1 = vadd.f32 %v2070_v39, %v1161_v60 }
 0x24a   : > { %v1229_v2 = vmax.f32 %v1197_v62, 0.0  ;;  %v1198_v3 = vadd.f32 %v2070_v39, %v1159_v63 }
 0x24b   : > { %v1637_v4 = vpack.c.bf16 %v1231_v0, %v1231_v0  ;;  %v1232_v5 = vmax.f32 %v1200_v1, 0.0 }
 0x24c   : > { %v1635_v7 = vpack.c.bf16 %v1229_v2, %v1229_v2  ;;  %v1230_v8 = vmax.f32 %v1198_v3, 0.0 }
 0x24d   : > { %1392 = vst.msk [vmem:[%s2083_s21 + $0x78] sm:$0xf] %vm1361_vm1, %v1637_v4  ;;  %v1638_v9 = vpack.c.bf16 %v1232_v5, %v1232_v5 }
 0x24e   : > { %1390 = vst.msk [vmem:[%s2083_s21 + $0x70] sm:$0xf] %vm1361_vm1, %v1635_v7  ;;  %v1636_v11 = vpack.c.bf16 %v1230_v8, %v1230_v8 }
 0x24f   : > { %1393 = vst.msk [vmem:[%s2083_s21 + $0x7c] sm:$0xf] %vm1361_vm1, %v1638_v9 }
 0x250   : > { %1391 = vst.msk [vmem:[%s2083_s21 + $0x74] sm:$0xf] %vm1361_vm1, %v1636_v11 }
 0x251 PF: > { %s17_s26 = sadd.s32 1, %s1813_s26   ;;  %s2223_s24 = smov %s1809_s25 }
 0x252   : > { %p14_p5 = scmp.ge.s32.totalorder %s17_s26, 4   ;;  %s2224_s25 = smov %s2226_s27 }
 0x254   :  { %16 = sbr.rel (!%p14_p5) target bundleno = 2 (0x2), region = 78 }

// kernel: sparse_and_rgb_guided_depth_forward.22
= control target key start
LH: loop header
LB: loop body
LE: loop exit
PB: predicated region body
PF: predicated region fallthrough
CT: control target
= control target key end

     0   :  { %s1717_s24 = smov 0   ;;  %s1719_s25 = smov 0   ;;  %s2033_s0 = inlined_call_operand.vmem [shape: bf16[2,256,36], index: 0, kind: input, shape index: {}]   ;;  %s2034_s1 = inlined_call_operand.vmem [shape: bf16[36,16], index: 1, kind: input, shape index: {}]   ;;  %s2035_s2 = inlined_call_operand.vmem [shape: f32[1,16], index: 2, kind: input, shape index: {}]   ;;  %s2036_s3 = inlined_call_operand.vmem [shape: f32[1,16], index: 3, kind: input, shape index: {}]   ;;  %s2037_s4 = inlined_call_operand.vmem [shape: bf16[16,8], index: 4, kind: input, shape index: {}]   ;;  %s2038_s5 = inlined_call_operand.vmem [shape: f32[1,8], index: 5, kind: input, shape index: {}]   ;;  %s2039_s6 = inlined_call_operand.vmem [shape: f32[1,8], index: 6, kind: input, shape index: {}]   ;;  %s2040_s7 = inlined_call_operand.vmem [shape: bf16[2,256,8], index: 7, kind: output, shape index: {}]  }
   0x1   :  { %s1721_s26 = smov 0  }
   0x2 LB: > { %s29_s27 = sadd.s32 1, %s1671_s25  ;;  %p1371_p0 = scmp.ge.s32.totalorder %s1675_s26, 1  ;;  %s1675_s26 = sphi %s1721_s26, %s17_s26   ;;  %s1671_s25 = sphi %s1719_s25, %s2042_s25   ;;  %s1667_s24 = sphi %s1717_s24, %s2041_s24  }
   0x3   : > { %p31_p1 = scmp.ge.s32.totalorder %s29_s27, 2  ;;  %p258_p2 = scmp.lt.s32.totalorder %s1675_s26, 3 }
   0x5   : > { %s2044_s27 = smov (%p31_p1, %s29_s27), 0  ;;  %p259_p3 = pnand %p1371_p0, %p258_p2 }
   0x6   : > { %v1633_v0 = vld [vmem:[%s2034_s1] sm:$0xff] (!%p259_p3)   ;;  %v1634_v1 = vld [vmem:[%s2034_s1 + $0x8] sm:$0xff] (!%p259_p3)   ;;  %p299_p4 = scmp.lt.s32.totalorder (!%p259_p3), %s1667_s24, 1  ;;  %v1635_v2 = vld [vmem:[%s2034_s1 + $0x10] ss:$0 sps:$4 sm:$0x33] (!%p259_p3)  }
   0x7   : > { %262 = sbr.rel (%p259_p3) target bundleno = 523 (0x20b), region = 48  ;;  %1536 = vmatprep.subr.bf16.mxu0 (!%p259_p3), %v1633_v0  ;;  %vm500_vm0 = vcmask (!%p259_p3), 1041408   ;;  %vm451_vm1 = vcmask (!%p259_p3), 293888   ;;  %v1652_v20 = vld [vmem:[%s2037_s4] sm:$0xff] (!%p259_p3)   ;;  %vm799_vm2 = vcmask (!%p259_p3), 130048   ;;  %vm1247_vm3 = vcmask (!%p259_p3), 60416  }
   0x8   : > { %1537 = vmatpush3.bf16.msra.mxu0 (!%p259_p3), %v1633_v0  ;;  %v502_v4 = vsel (!%p259_p3), %vm500_vm0, %v1635_v2, 0  ;;  %1574 = vmatprep.subr.bf16.mxu1 (!%p259_p3), %v1652_v20  ;;  %v1792_v21 = vld [vmem:[%s2035_s2] ss:$0 sm:$0xff] (!%p259_p3) }
   0x9   : > { %1538 = vmatprep.subr.bf16.mxu0 (!%p259_p3), %v1634_v1  ;;  %1575 = vmatpush3.bf16.msra.mxu1 (!%p259_p3), %v1652_v20  ;;  %v1797_v23 = vld [vmem:[%s2036_s3] ss:$0 sm:$0xff] (!%p259_p3) }
   0xc   : > { %1539 = vmatpush3.bf16.msra.mxu0 (!%p259_p3), %v1634_v1 }
   0xd   : > { %1608 = vmatprep.subr.msk.bf16.mxu0 (!%p259_p3), %vm500_vm0, %v1635_v2 }
   0xe   : > { %s2046_s24 = smov (!%p299_p4, %s1667_s24), 1 }
   0xf   : > { %s1466_s11 = sshll.u32 %s2046_s24, 7 }
  0x10   : > { %s1752_s14 = scalar_lea.vmem %s2033_s0, %s1466_s11  ;;  %1541 = vmatpush3.bf16.msra.mxu0 %v502_v4  ;;  %s1901_s8 = scalar_lea.vmem %s2040_s7, %s1466_s11 }
  0x11   : > { %v1636_v3 = vld [vmem:[%s1752_s14] sm:$0xff]   ;;  %v1637_v5 = vld [vmem:[%s1752_s14 + $0x8] sm:$0xff]   ;;  %v1638_v6 = vld [vmem:[%s1752_s14 + $0x10] sm:$0xff]  }
  0x12   : > { %1542 = vmatprep.mubr.msk.bf16.mxu0 %vm451_vm1, %v1636_v3  ;;  %v1639_v7 = vld [vmem:[%s1752_s14 + $0x18] sm:$0xff]   ;;  %v1640_v8 = vld [vmem:[%s1752_s14 + $0x20] sm:$0xff]   ;;  %v1641_v9 = vld [vmem:[%s1752_s14 + $0x28] sm:$0xff]  }
  0x13   : > { %1543 = vmatmul.mubr.msk.bf16.vlgmr.msra.gmra.mrb[0].mxu0 %vm451_vm1, %v1637_v5  ;;  %v1642_v10 = vld [vmem:[%s1752_s14 + $0x30] sm:$0xff]   ;;  %v1643_v11 = vld [vmem:[%s1752_s14 + $0x38] sm:$0xff]   ;;  %v1644_v12 = vld [vmem:[%s1752_s14 + $0x40] sm:$0xff]  }
  0x14   : > { %1546 = vmatprep.mubr.msk.bf16.mxu0 %vm451_vm1, %v1638_v6  ;;  %v1645_v13 = vld [vmem:[%s1752_s14 + $0x48] sm:$0xff]   ;;  %v1646_v14 = vld [vmem:[%s1752_s14 + $0x50] sm:$0xff]   ;;  %v1647_v15 = vld [vmem:[%s1752_s14 + $0x58] sm:$0xff]  }
  0x15   : > { %v1648_v16 = vld [vmem:[%s1752_s14 + $0x60] sm:$0xff]   ;;  %v1649_v17 = vld [vmem:[%s1752_s14 + $0x68] sm:$0xff]   ;;  %v1650_v18 = vld [vmem:[%s1752_s14 + $0x70] sm:$0xff]  }
  0x16   : > { %v1651_v19 = vld [vmem:[%s1752_s14 + $0x78] sm:$0xff]  }
  0x1b   : > { %1547 = vmatmul.mubr.msk.bf16.gmra.mrb[4].mxu0 %vm451_vm1, %v1639_v7 }
  0x1c   : > { %1550 = vmatprep.mubr.msk.bf16.mxu0 %vm451_vm1, %v1640_v8 }
  0x23   : > { %1551 = vmatmul.mubr.msk.bf16.gmra.mrb[8].mxu0 %vm451_vm1, %v1641_v9 }
  0x24   : > { %1554 = vmatprep.mubr.msk.bf16.mxu0 %vm451_vm1, %v1642_v10 }
  0x2b   : > { %1555 = vmatmul.mubr.msk.bf16.gmra.mrb[12].mxu0 %vm451_vm1, %v1643_v11 }
  0x2c   : > { %1558 = vmatprep.mubr.msk.bf16.mxu0 %vm451_vm1, %v1644_v12 }
  0x33   : > { %1559 = vmatmul.mubr.msk.bf16.gmra.mrb[16].mxu0 %vm451_vm1, %v1645_v13 }
  0x34   : > { %1562 = vmatprep.mubr.msk.bf16.mxu0 %vm451_vm1, %v1646_v14 }
  0x3b   : > { %1563 = vmatmul.mubr.msk.bf16.gmra.mrb[20].mxu0 %vm451_vm1, %v1647_v15 }
  0x3c   : > { %1566 = vmatprep.mubr.msk.bf16.mxu0 %vm451_vm1, %v1648_v16 }
  0x43   : > { %1567 = vmatmul.mubr.msk.bf16.gmra.mrb[24].mxu0 %vm451_vm1, %v1649_v17 }
  0x44   : > { %1570 = vmatprep.mubr.msk.bf16.mxu0 %vm451_vm1, %v1650_v18 }
  0x4b   : > { %1571 = vmatmul.mubr.msk.bf16.gmra.mrb[28].mxu0 %vm451_vm1, %v1651_v19 }
  0xe6   : > { %v1544_v22 = vpop.f32.mrb[0].mxu0 }
  0xe7   : > { %v674_v24 = vmul.f32 %v1544_v22, %v1792_v21  ;;  %v538_v25 = vpop.f32.mrb[1].mxu0 }
  0xe8   : > { %v672_v26 = vmul.f32 %v1792_v21, %v538_v25  ;;  %v1545_v27 = vpop.f32.mrb[2].mxu0 }
  0xe9   : > { %v713_v28 = vadd.f32 %v1797_v23, %v674_v24  ;;  %v675_v29 = vmul.f32 %v1545_v27, %v1792_v21  ;;  %v541_v30 = vpop.f32.mrb[3].mxu0 }
  0xea   : > { %v711_v31 = vadd.f32 %v1797_v23, %v672_v26  ;;  %v673_v32 = vmul.f32 %v1792_v21, %v541_v30 }
  0xeb   : > { %v714_v33 = vadd.f32 %v1797_v23, %v675_v29  ;;  %v745_v35 = vmax.f32 %v713_v28, 0.0 }
  0xec   : > { %v712_v34 = vadd.f32 %v1797_v23, %v673_v32  ;;  %v743_v37 = vmax.f32 %v711_v31, 0.0 }
  0xed   : > { %v746_v36 = vmax.f32 %v714_v33, 0.0 }
  0xee   : > { %v744_v38 = vmax.f32 %v712_v34, 0.0  ;;  %v1548_v39 = vpop.f32.mrb[4].mxu0 }
  0xef   : > { %v776_v40 = vpack.c.bf16 %v746_v36, %v745_v35  ;;  %v678_v41 = vmul.f32 %v1548_v39, %v1792_v21  ;;  %v554_v42 = vpop.f32.mrb[5].mxu0 }
  0xf0   : > { %v676_v43 = vmul.f32 %v1792_v21, %v554_v42  ;;  %v1549_v44 = vpop.f32.mrb[6].mxu0  ;;  %v775_v45 = vpack.c.bf16 %v744_v38, %v743_v37 }
  0xf1   : > { %v717_v46 = vadd.f32 %v1797_v23, %v678_v41  ;;  %v679_v47 = vmul.f32 %v1549_v44, %v1792_v21  ;;  %v557_v48 = vpop.f32.mrb[7].mxu0 }
  0xf2   : > { %v715_v49 = vadd.f32 %v1797_v23, %v676_v43  ;;  %v677_v50 = vmul.f32 %v1792_v21, %v557_v48  ;;  %1576 = vmatprep.mubr.msk.bf16.mxu1 %vm799_vm2, %v775_v45 }
  0xf3   : > { %v718_v51 = vadd.f32 %v1797_v23, %v679_v47  ;;  %1577 = vmatmul.mubr.msk.bf16.vlgmr.msra.gmra.mrb[0].mxu1 %vm799_vm2, %v776_v40  ;;  %v749_v53 = vmax.f32 %v717_v46, 0.0 }
  0xf4   : > { %v716_v52 = vadd.f32 %v1797_v23, %v677_v50  ;;  %v747_v55 = vmax.f32 %v715_v49, 0.0 }
  0xf5   : > { %v750_v54 = vmax.f32 %v718_v51, 0.0 }
  0xf6   : > { %v748_v56 = vmax.f32 %v716_v52, 0.0  ;;  %v1552_v57 = vpop.f32.mrb[8].mxu0 }
  0xf7   : > { %v778_v58 = vpack.c.bf16 %v750_v54, %v749_v53  ;;  %v682_v59 = vmul.f32 %v1552_v57, %v1792_v21  ;;  %v570_v60 = vpop.f32.mrb[9].mxu0 }
  0xf8   : > { %v777_v61 = vpack.c.bf16 %v748_v56, %v747_v55  ;;  %v680_v62 = vmul.f32 %v1792_v21, %v570_v60  ;;  %v1553_v63 = vpop.f32.mrb[10].mxu0 }
  0xf9   : > { %v721_v0 = vadd.f32 %v1797_v23, %v682_v59  ;;  %v683_v1 = vmul.f32 %v1553_v63, %v1792_v21  ;;  %v573_v2 = vpop.f32.mrb[11].mxu0 }
  0xfa   : > { %v719_v3 = vadd.f32 %v1797_v23, %v680_v62  ;;  %v681_v4 = vmul.f32 %v1792_v21, %v573_v2  ;;  %1580 = vmatprep.mubr.msk.bf16.mxu1 %vm799_vm2, %v777_v61 }
  0xfb   : > { %v722_v5 = vadd.f32 %v1797_v23, %v683_v1  ;;  %1581 = vmatmul.mubr.msk.bf16.gmra.mrb[4].mxu1 %vm799_vm2, %v778_v58  ;;  %v753_v7 = vmax.f32 %v721_v0, 0.0 }
  0xfc   : > { %v720_v6 = vadd.f32 %v1797_v23, %v681_v4  ;;  %v751_v9 = vmax.f32 %v719_v3, 0.0 }
  0xfd   : > { %v754_v8 = vmax.f32 %v722_v5, 0.0 }
  0xfe   : > { %v752_v10 = vmax.f32 %v720_v6, 0.0  ;;  %v1556_v11 = vpop.f32.mrb[12].mxu0 }
  0xff   : > { %v780_v12 = vpack.c.bf16 %v754_v8, %v753_v7  ;;  %v686_v13 = vmul.f32 %v1556_v11, %v1792_v21  ;;  %v586_v14 = vpop.f32.mrb[13].mxu0 }
 0x100   : > { %v779_v15 = vpack.c.bf16 %v752_v10, %v751_v9  ;;  %v684_v16 = vmul.f32 %v1792_v21, %v586_v14  ;;  %v1557_v17 = vpop.f32.mrb[14].mxu0 }
 0x101   : > { %v725_v18 = vadd.f32 %v1797_v23, %v686_v13  ;;  %v687_v19 = vmul.f32 %v1557_v17, %v1792_v21  ;;  %v589_v20 = vpop.f32.mrb[15].mxu0 }
 0x102   : > { %v723_v22 = vadd.f32 %v1797_v23, %v684_v16  ;;  %v685_v24 = vmul.f32 %v1792_v21, %v589_v20  ;;  %1584 = vmatprep.mubr.msk.bf16.mxu1 %vm799_vm2, %v779_v15 }
 0x103   : > { %v726_v25 = vadd.f32 %v1797_v23, %v687_v19  ;;  %1585 = vmatmul.mubr.msk.bf16.gmra.mrb[8].mxu1 %vm799_vm2, %v780_v12  ;;  %v757_v27 = vmax.f32 %v725_v18, 0.0 }
 0x104   : > { %v724_v26 = vadd.f32 %v1797_v23, %v685_v24  ;;  %v755_v29 = vmax.f32 %v723_v22, 0.0 }
 0x105   : > { %v758_v28 = vmax.f32 %v726_v25, 0.0 }
 0x106   : > { %v756_v30 = vmax.f32 %v724_v26, 0.0  ;;  %v1560_v31 = vpop.f32.mrb[16].mxu0 }
 0x107   : > { %v782_v32 = vpack.c.bf16 %v758_v28, %v757_v27  ;;  %v690_v33 = vmul.f32 %v1560_v31, %v1792_v21  ;;  %v602_v34 = vpop.f32.mrb[17].mxu0 }
 0x108   : > { %v781_v35 = vpack.c.bf16 %v756_v30, %v755_v29  ;;  %v688_v36 = vmul.f32 %v1792_v21, %v602_v34  ;;  %v1561_v37 = vpop.f32.mrb[18].mxu0 }
 0x109   : > { %v729_v38 = vadd.f32 %v1797_v23, %v690_v33  ;;  %v691_v39 = vmul.f32 %v1561_v37, %v1792_v21  ;;  %v605_v40 = vpop.f32.mrb[19].mxu0 }
 0x10a   : > { %v727_v41 = vadd.f32 %v1797_v23, %v688_v36  ;;  %v689_v42 = vmul.f32 %v1792_v21, %v605_v40  ;;  %1588 = vmatprep.mubr.msk.bf16.mxu1 %vm799_vm2, %v781_v35 }
 0x10b   : > { %v730_v43 = vadd.f32 %v1797_v23, %v691_v39  ;;  %1589 = vmatmul.mubr.msk.bf16.gmra.mrb[12].mxu1 %vm799_vm2, %v782_v32  ;;  %v761_v45 = vmax.f32 %v729_v38, 0.0 }
 0x10c   : > { %v728_v44 = vadd.f32 %v1797_v23, %v689_v42  ;;  %v759_v47 = vmax.f32 %v727_v41, 0.0 }
 0x10d   : > { %v762_v46 = vmax.f32 %v730_v43, 0.0 }
 0x10e   : > { %v760_v48 = vmax.f32 %v728_v44, 0.0  ;;  %v1564_v49 = vpop.f32.mrb[20].mxu0 }
 0x10f   : > { %v784_v50 = vpack.c.bf16 %v762_v46, %v761_v45  ;;  %v694_v51 = vmul.f32 %v1564_v49, %v1792_v21  ;;  %v618_v52 = vpop.f32.mrb[21].mxu0 }
 0x110   : > { %v783_v53 = vpack.c.bf16 %v760_v48, %v759_v47  ;;  %v692_v54 = vmul.f32 %v1792_v21, %v618_v52  ;;  %v1565_v55 = vpop.f32.mrb[22].mxu0 }
 0x111   : > { %v733_v56 = vadd.f32 %v1797_v23, %v694_v51  ;;  %v695_v57 = vmul.f32 %v1565_v55, %v1792_v21  ;;  %v621_v58 = vpop.f32.mrb[23].mxu0 }
 0x112   : > { %v731_v59 = vadd.f32 %v1797_v23, %v692_v54  ;;  %v693_v60 = vmul.f32 %v1792_v21, %v621_v58  ;;  %1592 = vmatprep.mubr.msk.bf16.mxu1 %vm799_vm2, %v783_v53 }
 0x113   : > { %v734_v61 = vadd.f32 %v1797_v23, %v695_v57  ;;  %1593 = vmatmul.mubr.msk.bf16.gmra.mrb[16].mxu1 %vm799_vm2, %v784_v50  ;;  %v765_v63 = vmax.f32 %v733_v56, 0.0 }
 0x114   : > { %v732_v62 = vadd.f32 %v1797_v23, %v693_v60  ;;  %v763_v1 = vmax.f32 %v731_v59, 0.0 }
 0x115   : > { %v766_v0 = vmax.f32 %v734_v61, 0.0 }
 0x116   : > { %v764_v2 = vmax.f32 %v732_v62, 0.0  ;;  %v1568_v3 = vpop.f32.mrb[24].mxu0 }
 0x117   : > { %v786_v4 = vpack.c.bf16 %v766_v0, %v765_v63  ;;  %v698_v5 = vmul.f32 %v1568_v3, %v1792_v21  ;;  %v634_v6 = vpop.f32.mrb[25].mxu0 }
 0x118   : > { %v785_v7 = vpack.c.bf16 %v764_v2, %v763_v1  ;;  %v696_v8 = vmul.f32 %v1792_v21, %v634_v6  ;;  %v1569_v9 = vpop.f32.mrb[26].mxu0 }
 0x119   : > { %v737_v10 = vadd.f32 %v1797_v23, %v698_v5  ;;  %v699_v11 = vmul.f32 %v1569_v9, %v1792_v21  ;;  %v637_v12 = vpop.f32.mrb[27].mxu0 }
 0x11a   : > { %v735_v13 = vadd.f32 %v1797_v23, %v696_v8  ;;  %v697_v14 = vmul.f32 %v1792_v21, %v637_v12  ;;  %1596 = vmatprep.mubr.msk.bf16.mxu1 %vm799_vm2, %v785_v7 }
 0x11b   : > { %v738_v15 = vadd.f32 %v1797_v23, %v699_v11  ;;  %1597 = vmatmul.mubr.msk.bf16.gmra.mrb[20].mxu1 %vm799_vm2, %v786_v4  ;;  %v769_v17 = vmax.f32 %v737_v10, 0.0 }
 0x11c   : > { %v736_v16 = vadd.f32 %v1797_v23, %v697_v14  ;;  %v767_v19 = vmax.f32 %v735_v13, 0.0 }
 0x11d   : > { %v770_v18 = vmax.f32 %v738_v15, 0.0 }
 0x11e   : > { %v768_v20 = vmax.f32 %v736_v16, 0.0  ;;  %v1572_v22 = vpop.f32.mrb[28].mxu0 }
 0x11f   : > { %v788_v24 = vpack.c.bf16 %v770_v18, %v769_v17  ;;  %v702_v25 = vmul.f32 %v1572_v22, %v1792_v21  ;;  %v650_v26 = vpop.f32.mrb[29].mxu0 }
 0x120   : > { %v787_v27 = vpack.c.bf16 %v768_v20, %v767_v19  ;;  %v700_v28 = vmul.f32 %v1792_v21, %v650_v26  ;;  %v1573_v29 = vpop.f32.mrb[30].mxu0 }
 0x121   : > { %v741_v30 = vadd.f32 %v1797_v23, %v702_v25  ;;  %v703_v31 = vmul.f32 %v1573_v29, %v1792_v21  ;;  %v653_v32 = vpop.f32.mrb[31].mxu0 }
 0x122   : > { %v739_v33 = vadd.f32 %v1797_v23, %v700_v28  ;;  %v701_v34 = vmul.f32 %v1792_v21, %v653_v32  ;;  %1600 = vmatprep.mubr.msk.bf16.mxu1 %vm799_vm2, %v787_v27  ;;  %v1882_v21 = vld [vmem:[%s2038_s5] ss:$0 sm:$0xff] }
 0x123   : > { %v742_v35 = vadd.f32 %v1797_v23, %v703_v31  ;;  %1601 = vmatmul.mubr.msk.bf16.gmra.mrb[24].mxu1 %vm799_vm2, %v788_v24  ;;  %v773_v37 = vmax.f32 %v741_v30, 0.0 }
 0x124   : > { %v740_v36 = vadd.f32 %v1797_v23, %v701_v34  ;;  %v771_v39 = vmax.f32 %v739_v33, 0.0  ;;  %v1887_v23 = vld [vmem:[%s2039_s6] ss:$0 sm:$0xff] }
 0x125   : > { %v774_v38 = vmax.f32 %v742_v35, 0.0 }
 0x126   : > { %v772_v40 = vmax.f32 %v740_v36, 0.0 }
 0x127   : > { %v790_v41 = vpack.c.bf16 %v774_v38, %v773_v37 }
 0x128   : > { %v789_v42 = vpack.c.bf16 %v772_v40, %v771_v39 }
 0x12a   : > { %1604 = vmatprep.mubr.msk.bf16.mxu1 %vm799_vm2, %v789_v42 }
 0x12b   : > { %1605 = vmatmul.mubr.msk.bf16.gmra.mrb[28].mxu1 %vm799_vm2, %v790_v41 }
 0x1c6   : > { %v1578_v43 = vpop.f32.mrb[0].mxu1 }
 0x1c7   : > { %v1018_v44 = vmul.f32 %v1578_v43, %v1882_v21  ;;  %v882_v45 = vpop.f32.mrb[1].mxu1 }
 0x1c8   : > { %v1016_v46 = vmul.f32 %v1882_v21, %v882_v45  ;;  %v1579_v47 = vpop.f32.mrb[2].mxu1 }
 0x1c9   : > { %v1057_v48 = vadd.f32 %v1887_v23, %v1018_v44  ;;  %v1019_v49 = vmul.f32 %v1579_v47, %v1882_v21  ;;  %v885_v50 = vpop.f32.mrb[3].mxu1 }
 0x1ca   : > { %v1055_v51 = vadd.f32 %v1887_v23, %v1016_v46  ;;  %v1017_v52 = vmul.f32 %v1882_v21, %v885_v50 }
 0x1cb   : > { %v1089_v53 = vmax.f32 %v1057_v48, 0.0  ;;  %v1058_v54 = vadd.f32 %v1887_v23, %v1019_v49 }
 0x1cc   : > { %v1087_v55 = vmax.f32 %v1055_v51, 0.0  ;;  %v1056_v56 = vadd.f32 %v1887_v23, %v1017_v52 }
 0x1cd   : > { %v1470_v57 = vpack.c.bf16 %v1089_v53, %v1089_v53  ;;  %v1090_v58 = vmax.f32 %v1058_v54, 0.0 }
 0x1ce   : > { %v1468_v59 = vpack.c.bf16 %v1087_v55, %v1087_v55  ;;  %v1088_v60 = vmax.f32 %v1056_v56, 0.0  ;;  %v1582_v61 = vpop.f32.mrb[4].mxu1 }
 0x1cf   : > { %1250 = vst.msk [vmem:[%s1901_s8 + $0x8] sm:$0xf] %vm1247_vm3, %v1470_v57  ;;  %v1471_v62 = vpack.c.bf16 %v1090_v58, %v1090_v58  ;;  %v1022_v63 = vmul.f32 %v1582_v61, %v1882_v21  ;;  %v898_v0 = vpop.f32.mrb[5].mxu1 }
 0x1d0   : > { %1248 = vst.msk [vmem:[%s1901_s8] sm:$0xf] %vm1247_vm3, %v1468_v59  ;;  %v1469_v1 = vpack.c.bf16 %v1088_v60, %v1088_v60  ;;  %v1020_v2 = vmul.f32 %v1882_v21, %v898_v0  ;;  %v1583_v3 = vpop.f32.mrb[6].mxu1 }
 0x1d1   : > { %1251 = vst.msk [vmem:[%s1901_s8 + $0xc] sm:$0xf] %vm1247_vm3, %v1471_v62  ;;  %v1061_v4 = vadd.f32 %v1887_v23, %v1022_v63  ;;  %v1023_v5 = vmul.f32 %v1583_v3, %v1882_v21  ;;  %v901_v6 = vpop.f32.mrb[7].mxu1 }
 0x1d2   : > { %1249 = vst.msk [vmem:[%s1901_s8 + $0x4] sm:$0xf] %vm1247_vm3, %v1469_v1  ;;  %v1059_v7 = vadd.f32 %v1887_v23, %v1020_v2  ;;  %v1021_v8 = vmul.f32 %v1882_v21, %v901_v6 }
 0x1d3   : > { %v1093_v9 = vmax.f32 %v1061_v4, 0.0  ;;  %v1062_v10 = vadd.f32 %v1887_v23, %v1023_v5 }
 0x1d4   : > { %v1091_v11 = vmax.f32 %v1059_v7, 0.0  ;;  %v1060_v12 = vadd.f32 %v1887_v23, %v1021_v8 }
 0x1d5   : > { %v1474_v13 = vpack.c.bf16 %v1093_v9, %v1093_v9  ;;  %v1094_v14 = vmax.f32 %v1062_v10, 0.0 }
 0x1d6   : > { %v1472_v15 = vpack.c.bf16 %v1091_v11, %v1091_v11  ;;  %v1092_v16 = vmax.f32 %v1060_v12, 0.0  ;;  %v1586_v17 = vpop.f32.mrb[8].mxu1 }
 0x1d7   : > { %1254 = vst.msk [vmem:[%s1901_s8 + $0x18] sm:$0xf] %vm1247_vm3, %v1474_v13  ;;  %v1475_v18 = vpack.c.bf16 %v1094_v14, %v1094_v14  ;;  %v1026_v19 = vmul.f32 %v1586_v17, %v1882_v21  ;;  %v914_v20 = vpop.f32.mrb[9].mxu1 }
 0x1d8   : > { %1252 = vst.msk [vmem:[%s1901_s8 + $0x10] sm:$0xf] %vm1247_vm3, %v1472_v15  ;;  %v1473_v22 = vpack.c.bf16 %v1092_v16, %v1092_v16  ;;  %v1024_v24 = vmul.f32 %v1882_v21, %v914_v20  ;;  %v1587_v25 = vpop.f32.mrb[10].mxu1 }
 0x1d9   : > { %1255 = vst.msk [vmem:[%s1901_s8 + $0x1c] sm:$0xf] %vm1247_vm3, %v1475_v18  ;;  %v1065_v26 = vadd.f32 %v1887_v23, %v1026_v19  ;;  %v1027_v27 = vmul.f32 %v1587_v25, %v1882_v21  ;;  %v917_v28 = vpop.f32.mrb[11].mxu1 }
 0x1da   : > { %1253 = vst.msk [vmem:[%s1901_s8 + $0x14] sm:$0xf] %vm1247_vm3, %v1473_v22  ;;  %v1063_v29 = vadd.f32 %v1887_v23, %v1024_v24  ;;  %v1025_v30 = vmul.f32 %v1882_v21, %v917_v28 }
 0x1db   : > { %v1097_v31 = vmax.f32 %v1065_v26, 0.0  ;;  %v1066_v32 = vadd.f32 %v1887_v23, %v1027_v27 }
 0x1dc   : > { %v1095_v33 = vmax.f32 %v1063_v29, 0.0  ;;  %v1064_v34 = vadd.f32 %v1887_v23, %v1025_v30 }
 0x1dd   : > { %v1478_v35 = vpack.c.bf16 %v1097_v31, %v1097_v31  ;;  %v1098_v36 = vmax.f32 %v1066_v32, 0.0 }
 0x1de   : > { %v1476_v37 = vpack.c.bf16 %v1095_v33, %v1095_v33  ;;  %v1096_v38 = vmax.f32 %v1064_v34, 0.0  ;;  %v1590_v39 = vpop.f32.mrb[12].mxu1 }
 0x1df   : > { %1258 = vst.msk [vmem:[%s1901_s8 + $0x28] sm:$0xf] %vm1247_vm3, %v1478_v35  ;;  %v1479_v40 = vpack.c.bf16 %v1098_v36, %v1098_v36  ;;  %v1030_v41 = vmul.f32 %v1590_v39, %v1882_v21  ;;  %v930_v42 = vpop.f32.mrb[13].mxu1 }
 0x1e0   : > { %1256 = vst.msk [vmem:[%s1901_s8 + $0x20] sm:$0xf] %vm1247_vm3, %v1476_v37  ;;  %v1477_v43 = vpack.c.bf16 %v1096_v38, %v1096_v38  ;;  %v1028_v44 = vmul.f32 %v1882_v21, %v930_v42  ;;  %v1591_v45 = vpop.f32.mrb[14].mxu1 }
 0x1e1   : > { %1259 = vst.msk [vmem:[%s1901_s8 + $0x2c] sm:$0xf] %vm1247_vm3, %v1479_v40  ;;  %v1069_v46 = vadd.f32 %v1887_v23, %v1030_v41  ;;  %v1031_v47 = vmul.f32 %v1591_v45, %v1882_v21  ;;  %v933_v48 = vpop.f32.mrb[15].mxu1 }
 0x1e2   : > { %1257 = vst.msk [vmem:[%s1901_s8 + $0x24] sm:$0xf] %vm1247_vm3, %v1477_v43  ;;  %v1067_v49 = vadd.f32 %v1887_v23, %v1028_v44  ;;  %v1029_v50 = vmul.f32 %v1882_v21, %v933_v48 }
 0x1e3   : > { %v1101_v51 = vmax.f32 %v1069_v46, 0.0  ;;  %v1070_v52 = vadd.f32 %v1887_v23, %v1031_v47 }
 0x1e4   : > { %v1099_v53 = vmax.f32 %v1067_v49, 0.0  ;;  %v1068_v54 = vadd.f32 %v1887_v23, %v1029_v50 }
 0x1e5   : > { %v1482_v55 = vpack.c.bf16 %v1101_v51, %v1101_v51  ;;  %v1102_v56 = vmax.f32 %v1070_v52, 0.0 }
 0x1e6   : > { %v1480_v57 = vpack.c.bf16 %v1099_v53, %v1099_v53  ;;  %v1100_v58 = vmax.f32 %v1068_v54, 0.0  ;;  %v1594_v59 = vpop.f32.mrb[16].mxu1 }
 0x1e7   : > { %1262 = vst.msk [vmem:[%s1901_s8 + $0x38] sm:$0xf] %vm1247_vm3, %v1482_v55  ;;  %v1483_v60 = vpack.c.bf16 %v1102_v56, %v1102_v56  ;;  %v1034_v61 = vmul.f32 %v1594_v59, %v1882_v21  ;;  %v946_v62 = vpop.f32.mrb[17].mxu1 }
 0x1e8   : > { %1260 = vst.msk [vmem:[%s1901_s8 + $0x30] sm:$0xf] %vm1247_vm3, %v1480_v57  ;;  %v1481_v63 = vpack.c.bf16 %v1100_v58, %v1100_v58  ;;  %v1032_v0 = vmul.f32 %v1882_v21, %v946_v62  ;;  %v1595_v1 = vpop.f32.mrb[18].mxu1 }
 0x1e9   : > { %1263 = vst.msk [vmem:[%s1901_s8 + $0x3c] sm:$0xf] %vm1247_vm3, %v1483_v60  ;;  %v1073_v2 = vadd.f32 %v1887_v23, %v1034_v61  ;;  %v1035_v3 = vmul.f32 %v1595_v1, %v1882_v21  ;;  %v949_v4 = vpop.f32.mrb[19].mxu1 }
 0x1ea   : > { %1261 = vst.msk [vmem:[%s1901_s8 + $0x34] sm:$0xf] %vm1247_vm3, %v1481_v63  ;;  %v1071_v5 = vadd.f32 %v1887_v23, %v1032_v0  ;;  %v1033_v6 = vmul.f32 %v1882_v21, %v949_v4 }
 0x1eb   : > { %v1105_v7 = vmax.f32 %v1073_v2, 0.0  ;;  %v1074_v8 = vadd.f32 %v1887_v23, %v1035_v3 }
 0x1ec   : > { %v1103_v9 = vmax.f32 %v1071_v5, 0.0  ;;  %v1072_v10 = vadd.f32 %v1887_v23, %v1033_v6 }
 0x1ed   : > { %v1486_v11 = vpack.c.bf16 %v1105_v7, %v1105_v7  ;;  %v1106_v12 = vmax.f32 %v1074_v8, 0.0 }
 0x1ee   : > { %v1484_v13 = vpack.c.bf16 %v1103_v9, %v1103_v9  ;;  %v1104_v14 = vmax.f32 %v1072_v10, 0.0  ;;  %v1598_v15 = vpop.f32.mrb[20].mxu1 }
 0x1ef   : > { %1266 = vst.msk [vmem:[%s1901_s8 + $0x48] sm:$0xf] %vm1247_vm3, %v1486_v11  ;;  %v1487_v16 = vpack.c.bf16 %v1106_v12, %v1106_v12  ;;  %v1038_v17 = vmul.f32 %v1598_v15, %v1882_v21  ;;  %v962_v18 = vpop.f32.mrb[21].mxu1 }
 0x1f0   : > { %1264 = vst.msk [vmem:[%s1901_s8 + $0x40] sm:$0xf] %vm1247_vm3, %v1484_v13  ;;  %v1485_v19 = vpack.c.bf16 %v1104_v14, %v1104_v14  ;;  %v1036_v20 = vmul.f32 %v1882_v21, %v962_v18  ;;  %v1599_v22 = vpop.f32.mrb[22].mxu1 }
 0x1f1   : > { %1267 = vst.msk [vmem:[%s1901_s8 + $0x4c] sm:$0xf] %vm1247_vm3, %v1487_v16  ;;  %v1077_v24 = vadd.f32 %v1887_v23, %v1038_v17  ;;  %v1039_v25 = vmul.f32 %v1599_v22, %v1882_v21  ;;  %v965_v26 = vpop.f32.mrb[23].mxu1 }
 0x1f2   : > { %1265 = vst.msk [vmem:[%s1901_s8 + $0x44] sm:$0xf] %vm1247_vm3, %v1485_v19  ;;  %v1075_v27 = vadd.f32 %v1887_v23, %v1036_v20  ;;  %v1037_v28 = vmul.f32 %v1882_v21, %v965_v26 }
 0x1f3   : > { %v1109_v29 = vmax.f32 %v1077_v24, 0.0  ;;  %v1078_v30 = vadd.f32 %v1887_v23, %v1039_v25 }
 0x1f4   : > { %v1107_v31 = vmax.f32 %v1075_v27, 0.0  ;;  %v1076_v32 = vadd.f32 %v1887_v23, %v1037_v28 }
 0x1f5   : > { %v1490_v33 = vpack.c.bf16 %v1109_v29, %v1109_v29  ;;  %v1110_v34 = vmax.f32 %v1078_v30, 0.0 }
 0x1f6   : > { %v1488_v35 = vpack.c.bf16 %v1107_v31, %v1107_v31  ;;  %v1108_v36 = vmax.f32 %v1076_v32, 0.0  ;;  %v1602_v37 = vpop.f32.mrb[24].mxu1 }
 0x1f7   : > { %1270 = vst.msk [vmem:[%s1901_s8 + $0x58] sm:$0xf] %vm1247_vm3, %v1490_v33  ;;  %v1491_v38 = vpack.c.bf16 %v1110_v34, %v1110_v34  ;;  %v1042_v39 = vmul.f32 %v1602_v37, %v1882_v21  ;;  %v978_v40 = vpop.f32.mrb[25].mxu1 }
 0x1f8   : > { %1268 = vst.msk [vmem:[%s1901_s8 + $0x50] sm:$0xf] %vm1247_vm3, %v1488_v35  ;;  %v1489_v41 = vpack.c.bf16 %v1108_v36, %v1108_v36  ;;  %v1040_v42 = vmul.f32 %v1882_v21, %v978_v40  ;;  %v1603_v43 = vpop.f32.mrb[26].mxu1 }
 0x1f9   : > { %1271 = vst.msk [vmem:[%s1901_s8 + $0x5c] sm:$0xf] %vm1247_vm3, %v1491_v38  ;;  %v1081_v44 = vadd.f32 %v1887_v23, %v1042_v39  ;;  %v1043_v45 = vmul.f32 %v1603_v43, %v1882_v21  ;;  %v981_v46 = vpop.f32.mrb[27].mxu1 }
 0x1fa   : > { %1269 = vst.msk [vmem:[%s1901_s8 + $0x54] sm:$0xf] %vm1247_vm3, %v1489_v41  ;;  %v1079_v47 = vadd.f32 %v1887_v23, %v1040_v42  ;;  %v1041_v48 = vmul.f32 %v1882_v21, %v981_v46 }
 0x1fb   : > { %v1113_v49 = vmax.f32 %v1081_v44, 0.0  ;;  %v1082_v50 = vadd.f32 %v1887_v23, %v1043_v45 }
 0x1fc   : > { %v1111_v51 = vmax.f32 %v1079_v47, 0.0  ;;  %v1080_v52 = vadd.f32 %v1887_v23, %v1041_v48 }
 0x1fd   : > { %v1494_v53 = vpack.c.bf16 %v1113_v49, %v1113_v49  ;;  %v1114_v54 = vmax.f32 %v1082_v50, 0.0 }
 0x1fe   : > { %v1492_v55 = vpack.c.bf16 %v1111_v51, %v1111_v51  ;;  %v1112_v56 = vmax.f32 %v1080_v52, 0.0  ;;  %v1606_v57 = vpop.f32.mrb[28].mxu1 }
 0x1ff   : > { %1274 = vst.msk [vmem:[%s1901_s8 + $0x68] sm:$0xf] %vm1247_vm3, %v1494_v53  ;;  %v1495_v58 = vpack.c.bf16 %v1114_v54, %v1114_v54  ;;  %v1046_v59 = vmul.f32 %v1606_v57, %v1882_v21  ;;  %v994_v60 = vpop.f32.mrb[29].mxu1 }
 0x200   : > { %1272 = vst.msk [vmem:[%s1901_s8 + $0x60] sm:$0xf] %vm1247_vm3, %v1492_v55  ;;  %v1493_v61 = vpack.c.bf16 %v1112_v56, %v1112_v56  ;;  %v1044_v62 = vmul.f32 %v1882_v21, %v994_v60  ;;  %v1607_v63 = vpop.f32.mrb[30].mxu1 }
 0x201   : > { %1275 = vst.msk [vmem:[%s1901_s8 + $0x6c] sm:$0xf] %vm1247_vm3, %v1495_v58  ;;  %v1085_v0 = vadd.f32 %v1887_v23, %v1046_v59  ;;  %v1047_v1 = vmul.f32 %v1607_v63, %v1882_v21  ;;  %v997_v2 = vpop.f32.mrb[31].mxu1 }
 0x202   : > { %1273 = vst.msk [vmem:[%s1901_s8 + $0x64] sm:$0xf] %vm1247_vm3, %v1493_v61  ;;  %v1083_v3 = vadd.f32 %v1887_v23, %v1044_v62  ;;  %v1045_v4 = vmul.f32 %v1882_v21, %v997_v2 }
 0x203   : > { %v1117_v5 = vmax.f32 %v1085_v0, 0.0  ;;  %v1086_v6 = vadd.f32 %v1887_v23, %v1047_v1 }
 0x204   : > { %v1115_v7 = vmax.f32 %v1083_v3, 0.0  ;;  %v1084_v8 = vadd.f32 %v1887_v23, %v1045_v4 }
 0x205   : > { %v1498_v9 = vpack.c.bf16 %v1117_v5, %v1117_v5  ;;  %v1118_v10 = vmax.f32 %v1086_v6, 0.0 }
 0x206   : > { %v1496_v11 = vpack.c.bf16 %v1115_v7, %v1115_v7  ;;  %v1116_v12 = vmax.f32 %v1084_v8, 0.0 }
 0x207   : > { %1278 = vst.msk [vmem:[%s1901_s8 + $0x78] sm:$0xf] %vm1247_vm3, %v1498_v9  ;;  %v1499_v13 = vpack.c.bf16 %v1118_v10, %v1118_v10 }
 0x208   : > { %1276 = vst.msk [vmem:[%s1901_s8 + $0x70] sm:$0xf] %vm1247_vm3, %v1496_v11  ;;  %v1497_v14 = vpack.c.bf16 %v1116_v12, %v1116_v12 }
 0x209   : > { %1279 = vst.msk [vmem:[%s1901_s8 + $0x7c] sm:$0xf] %vm1247_vm3, %v1499_v13 }
 0x20a   : > { %1277 = vst.msk [vmem:[%s1901_s8 + $0x74] sm:$0xf] %vm1247_vm3, %v1497_v14 }
 0x20b PF: > { %s17_s26 = sadd.s32 1, %s1675_s26   ;;  %s2041_s24 = smov %s1671_s25 }
 0x20c   : > { %p14_p5 = scmp.ge.s32.totalorder %s17_s26, 4   ;;  %s2042_s25 = smov %s2044_s27 }
 0x20e   :  { %16 = sbr.rel (!%p14_p5) target bundleno = 2 (0x2), region = 78 }

// kernel: squeeze.1
= control target key start
LH: loop header
LB: loop body
LE: loop exit
PB: predicated region body
PF: predicated region fallthrough
CT: control target
= control target key end

     0   :  { %s149_s0 = inlined_call_operand.vmem [shape: f32[2,256], index: 0, kind: input, shape index: {}]   ;;  %s150_s1 = inlined_call_operand.hbm [shape: f32[2,1,16,16], index: 1, kind: output, shape index: {}]  }
   0x1   :  { %v71_v0 = vld [vmem:[%s149_s0 + $0x2] sm:$0x3]  ;;  %v9_v1 = vld [vmem:[%s149_s0] sm:$0x3] }
   0x2   :  { %8 = vst [vmem:[#allocation2 + $0x8] sm:$0x3] %v71_v0  ;;  %10 = vst [vmem:[#allocation2] sm:$0x3] %v9_v1 }
   0x3   :  { %2 = vsyncpa [#allocation1], 0  ;;  %vm12_vm0 = vcmask 130048   ;;  %s104_s0 = smov 112   ;;  %s105_s10 = smov 80  }
   0x4   :  { %s106_s11 = smov 96   ;;  %s107_s12 = smov 64  }
   0x5   :  { %s108_s13 = smov 48   ;;  %s109_s14 = smov 32  }
   0x6   :  { %s110_s15 = smov 16   ;;  %s111_s16 = smov [#allocation0]  }
   0x7   :  { %s65_s17 = sshll.u32 %s111_s16, 4  ;;  %s66_s17 = int_to_ptr.vmem [resolvable:$true] %s65_s17 }
   0x8   :  { %s80_s18 = scalar_lea.vmem %s66_s17, 512  ;;  %p85_p1 = scmp.lt.s32.totalorder %s66_s17, %s66_s17 }
   0x9   :  { %v19_v2 = vld.sshfl [vmem:[#allocation2] sm:$0xff pattern:$0x99999180]   ;;  %p81_p0 = scmp.ne.s32.totalorder %s66_s17, %s80_s18  ;;  %p86_p2 = scmp.lt.s32.totalorder %s80_s18, %s80_s18 }
   0xa   :  { %v11_v3 = vld [vmem:[#allocation2] sm:$0x3]   ;;  %20 = vrot.lane.b32.xlu0 %v19_v2, %s104_s0  ;;  %32 = vrot.lane.b32.xlu1 %v19_v2, %s105_s10  ;;  %v15_v4 = vld [vmem:[#allocation2 + $0x8] sm:$0x3]  }
   0xb   :  { %13 = vst.msk [vmem:[#allocation0] ss:$16 sm:$0x3] %vm12_vm0, %v11_v3   ;;  %18 = vst.msk [vmem:[#allocation0 + $0x8] ss:$16 sm:$0x3] %vm12_vm0, %v15_v4   ;;  %p87_p3 = por %p86_p2, %p85_p1 }
   0xd   :  { %p88_p4 = pnand %p87_p3, %p81_p0 }
   0xe   :  { %26 = vrot.lane.b32.xlu0 %v19_v2, %s106_s11  ;;  %38 = vrot.lane.b32.xlu1 %v19_v2, %s107_s12 }
  0x12   :  { %44 = vrot.lane.b32.xlu0 %v19_v2, %s108_s13  ;;  %50 = vrot.lane.b32.xlu1 %v19_v2, %s109_s14 }
  0x16   :  { %56 = vrot.lane.b32.xlu0 %v19_v2, %s110_s15 }
  0x7c   :  { %v21_v5 = vpop.permute.xlu0 %20   ;;  %v33_v6 = vpop.permute.xlu1 %32  }
  0x7d   :  { %24 = vst.msk [vmem:[#allocation0 + $0x1] ss:$8 sm:$0xf] %vm12_vm0, %v21_v5   ;;  %36 = vst.msk [vmem:[#allocation0 + $0x3] ss:$8 sm:$0xf] %vm12_vm0, %v33_v6  }
  0x80   :  { %v27_v7 = vpop.permute.xlu0 %26   ;;  %v39_v8 = vpop.permute.xlu1 %38  }
  0x81   :  { %30 = vst.msk [vmem:[#allocation0 + $0x2] ss:$8 sm:$0xf] %vm12_vm0, %v27_v7   ;;  %42 = vst.msk [vmem:[#allocation0 + $0x4] ss:$8 sm:$0xf] %vm12_vm0, %v39_v8  }
  0x84   :  { %v45_v9 = vpop.permute.xlu0 %44   ;;  %v51_v10 = vpop.permute.xlu1 %50  }
  0x85   :  { %48 = vst.msk [vmem:[#allocation0 + $0x5] ss:$8 sm:$0xf] %vm12_vm0, %v45_v9   ;;  %54 = vst.msk [vmem:[#allocation0 + $0x6] ss:$8 sm:$0xf] %vm12_vm0, %v51_v10  }
  0x88   :  { %v57_v11 = vpop.permute.xlu0 %56  }
  0x89   :  { %60 = vst.msk [vmem:[#allocation0 + $0x7] ss:$8 sm:$0xf] %vm12_vm0, %v57_v11  }
  0x8a   :  { %91 = shalt.err (!%p88_p4)
}
  0x8b   :  { %s92_s21 = scalar_lea.hbm %s150_s1, 512 }
  0x8c   :  { %p93_p5 = scmp.ne.s32.totalorder %s150_s1, %s92_s21  ;;  %p96_p6 = scmp.lt.u32.totalorder %s92_s21, %s150_s1 }
  0x8e   :  { %p98_p7 = pnand %p96_p6, %p93_p5 }
  0x90   :  { %101 = shalt.err (!%p98_p7)
}
  0x91   :  { %68 = dma.vmem_to_hbm [thread:$0]  %s66_s17, 512, %s150_s1, [#allocation1]  }
  0x92   :  { %102 = dma.done.wait [#allocation1], 512  }
  0x93   :  { %103 = vsyncadd [#allocation1], 4294966784 }
  0x94   :  { %70 = vsyncpa [#allocation1], 1 }

// kernel: sparse_and_rgb_guided_depth_forward.23
= control target key start
LH: loop header
LB: loop body
LE: loop exit
PB: predicated region body
PF: predicated region fallthrough
CT: control target
= control target key end

     0   :  { %s5077_s19 = smov 0   ;;  %s5079_s20 = smov 0   ;;  %s6560_s0 = inlined_call_operand.vmem [shape: bf16[2,256,144], index: 0, kind: input, shape index: {}]   ;;  %s6561_s1 = inlined_call_operand.vmem [shape: f32[2,1,144], index: 1, kind: input, shape index: {}]   ;;  %s6562_s2 = inlined_call_operand.vmem [shape: bf16[2,256,16], index: 2, kind: input, shape index: {}]   ;;  %s6563_s3 = inlined_call_operand.vmem [shape: bf16[144,16], index: 3, kind: input, shape index: {}]   ;;  %s6564_s4 = inlined_call_operand.vmem [shape: f32[1,16], index: 4, kind: input, shape index: {}]   ;;  %s6565_s5 = inlined_call_operand.vmem [shape: f32[1,16], index: 5, kind: input, shape index: {}]   ;;  %s6566_s6 = inlined_call_operand.vmem [shape: bf16[16,16], index: 6, kind: input, shape index: {}]   ;;  %s6567_s7 = inlined_call_operand.vmem [shape: f32[1,16], index: 7, kind: input, shape index: {}]   ;;  %s6568_s8 = inlined_call_operand.vmem [shape: f32[1,16], index: 8, kind: input, shape index: {}]   ;;  %s6569_s9 = inlined_call_operand.vmem [shape: f32[1,16], index: 9, kind: input, shape index: {}]   ;;  %s6570_s10 = inlined_call_operand.<no memory space> [shape: f32[1,1], index: 10, kind: input, shape index: {}]   ;;  %s6571_s11 = inlined_call_operand.vmem [shape: f32[2,1,256], index: 11, kind: output, shape index: {}]  }
   0x1   :  { %v16_v0 = vstv %s6570_s10  ;;  %s5081_s21 = smov 0  }
   0x2   :  { %17 = vst [vmem:[#allocation2] sm:$0x1] %v16_v0 }
   0x3 LB: > { %s35_s10 = sadd.s32 1, %s5006_s20  ;;  %p4744_p0 = scmp.ge.s32.totalorder %s5010_s21, 1  ;;  %s5010_s21 = sphi %s5081_s21, %s23_s21   ;;  %s5006_s20 = sphi %s5079_s20, %s6578_s20   ;;  %s5002_s19 = sphi %s5077_s19, %s6577_s19  }
   0x4   : > { %p37_p1 = scmp.ge.s32.totalorder %s35_s10, 2  ;;  %p387_p2 = scmp.lt.s32.totalorder %s5010_s21, 3 }
   0x6   : > { %s6580_s10 = smov (%p37_p1, %s35_s10), 0  ;;  %p388_p3 = pnand %p4744_p0, %p387_p2 }
   0x7   : > { %v4978_v1 = vld [vmem:[%s6563_s3] sm:$0xff] (!%p388_p3)   ;;  %v6572_v2 = vlaneseq (!%p388_p3)  ;;  %v5012_v3 = vmov (!%p388_p3), 0   ;;  %p449_p4 = scmp.lt.s32.totalorder (!%p388_p3), %s5002_s19, 1  ;;  %v4979_v4 = vld [vmem:[%s6563_s3 + $0x8] sm:$0xff] (!%p388_p3)   ;;  %v4980_v6 = vld [vmem:[%s6563_s3 + $0x10] sm:$0xff] (!%p388_p3)   ;;  %vm759_vm0 = vcmask (!%p388_p3), 130048  }
   0x8   : > { %391 = sbr.rel (%p388_p3) target bundleno = 962 (0x3c2), region = 64  ;;  %808 = vmatprep.subr.bf16.mxu0 (!%p388_p3), %v5012_v3  ;;  %4932 = vmatprep.subr.bf16.mxu1 (!%p388_p3), %v5012_v3  ;;  %v4981_v11 = vld [vmem:[%s6563_s3 + $0x18] sm:$0xff] (!%p388_p3)   ;;  %v4982_v17 = vld [vmem:[%s6563_s3 + $0x20] sm:$0xff] (!%p388_p3)   ;;  %v4983_v22 = vld [vmem:[%s6563_s3 + $0x28] sm:$0xff] (!%p388_p3)   ;;  %vm4426_vm1 = vcmask (!%p388_p3), 130112   ;;  %vm4433_vm2 = vcmask (!%p388_p3), 195712  }
   0x9   : > { %809 = vmatpush1.bf16.msra.mxu0 (!%p388_p3), %v4978_v1  ;;  %4941 = vmatpush1.bf16.msra.mxu1 (!%p388_p3), %v4978_v1  ;;  %v5107_v5 = vshrl.u32 (!%p388_p3), %v6572_v2, 7  ;;  %v4984_v32 = vld [vmem:[%s6563_s3 + $0x30] sm:$0xff] (!%p388_p3)   ;;  %v4985_v43 = vld [vmem:[%s6563_s3 + $0x38] sm:$0xff] (!%p388_p3)   ;;  %v4986_v63 = vld [vmem:[%s6563_s3 + $0x40] sm:$0xff] (!%p388_p3)   ;;  %vm4440_vm3 = vcmask (!%p388_p3), 261312   ;;  %vm4447_vm4 = vcmask (!%p388_p3), 326912  }
   0xa   : > { %810 = vmatprep.subr.bf16.mxu0 (!%p388_p3), %v5012_v3  ;;  %4933 = vmatprep.subr.bf16.mxu1 (!%p388_p3), %v5012_v3  ;;  %vm4454_vm5 = vcmask (!%p388_p3), 392512   ;;  %vm4461_vm6 = vcmask (!%p388_p3), 458112   ;;  %vm4468_vm7 = vcmask (!%p388_p3), 523712   ;;  %vm4475_vm8 = vcmask (!%p388_p3), 589312  }
   0xb   : > { %4976 = vset.pattern.permute.xlu1 (!%p388_p3), %v5012_v3  ;;  %4977 = vset.pattern.permute.xlu0 (!%p388_p3), %v5012_v3  ;;  %v5129_v7 = vsub.s32 (!%p388_p3), 1, %v5107_v5  ;;  %v5149_v18 = vsub.s32 (!%p388_p3), 0, %v5107_v5  ;;  %vm4482_vm9 = vcmask (!%p388_p3), 654912   ;;  %vm4489_vm10 = vcmask (!%p388_p3), 720512  }
   0xc   : > { %vm4496_vm11 = vcmask (!%p388_p3), 786112   ;;  %vm4503_vm12 = vcmask (!%p388_p3), 851712   ;;  %vm4510_vm13 = vcmask (!%p388_p3), 917312   ;;  %vm4517_vm14 = vcmask (!%p388_p3), 982912  }
   0xd   : > { %811 = vmatpush1.bf16.msra.mxu0 (!%p388_p3), %v4979_v4  ;;  %4942 = vmatpush1.bf16.msra.mxu1 (!%p388_p3), %v4979_v4  ;;  %vm4524_vm15 = vcmask (!%p388_p3), 1048512  }
   0xe   : > { %812 = vmatprep.subr.bf16.mxu0 (!%p388_p3), %v5012_v3  ;;  %4934 = vmatprep.subr.bf16.mxu1 (!%p388_p3), %v5012_v3 }
   0xf   : > { %s6582_s19 = smov (!%p449_p4, %s5002_s19), 1 }
  0x10   : > { %s4800_s26 = sshll.u32 %s6582_s19, 8  ;;  %s4747_s13 = sshll.u32 %s6582_s19, 1 }
  0x11   : > { %s5119_s12 = scalar_lea.vmem %s6560_s0, %s4800_s26  ;;  %s462_s16 = scalar_lea.vmem %s6561_s1, %s4747_s13  ;;  %813 = vmatpush1.bf16.msra.mxu0 %v4980_v6  ;;  %4943 = vmatpush1.bf16.msra.mxu1 %v4980_v6 }
  0x12   : > { %v483_v8 = vld [vmem:[%s5119_s12] sm:$0xff]  ;;  %v484_v9 = vld [vmem:[%s5119_s12 + $0x8] sm:$0xff]  ;;  %814 = vmatprep.subr.bf16.mxu0 %v5012_v3  ;;  %4935 = vmatprep.subr.bf16.mxu1 %v5012_v3  ;;  %v485_v20 = vld [vmem:[%s5119_s12 + $0x10] sm:$0xff]  ;;  %s4801_s23 = sshll.u32 %s6582_s19, 7  ;;  %s480_s17 = scalar_lea.vmem %s6571_s11, %s4747_s13 }
  0x13   : > { %v579_v10 = vld [vmem:[%s462_s16] sm:$0x3]  ;;  %v516_v12 = vunpack.c.h.bf16 %v483_v8  ;;  %v518_v13 = vunpack.c.h.bf16 %v484_v9  ;;  %v486_v21 = vld [vmem:[%s5119_s12 + $0x18] sm:$0xff]  ;;  %v515_v23 = vunpack.c.l.bf16 %v483_v8  ;;  %v517_v24 = vunpack.c.l.bf16 %v484_v9  ;;  %v5166_v27 = vld [vmem:[%s5119_s12 + $0x28] sm:$0xff]  ;;  %s5535_s26 = scalar_lea.vmem %s6562_s2, %s4801_s23 }
  0x14   : > { %v5139_v14 = vrot.slane %v579_v10, %v5129_v7  ;;  %v5160_v25 = vrot.slane %v579_v10, %v5149_v18  ;;  %v5163_v26 = vld [vmem:[%s5119_s12 + $0x20] sm:$0xff]  ;;  %v520_v28 = vunpack.c.h.bf16 %v485_v20  ;;  %v522_v29 = vunpack.c.h.bf16 %v486_v21  ;;  %v5182_v37 = vld [vmem:[%s5119_s12 + $0x70] sm:$0xff]  ;;  %v5197_v42 = vld [vmem:[%s5119_s12 + $0x78] sm:$0xff] }
  0x15   : > { %815 = vmatpush1.bf16.msra.mxu0 %v4981_v11  ;;  %4944 = vmatpush1.bf16.msra.mxu1 %v4981_v11  ;;  %v519_v30 = vunpack.c.l.bf16 %v485_v20  ;;  %v521_v31 = vunpack.c.l.bf16 %v486_v21  ;;  %v524_v33 = vunpack.c.h.bf16 %v5163_v26  ;;  %v526_v34 = vunpack.c.h.bf16 %v5166_v27  ;;  %v499_v47 = vld [vmem:[%s5119_s12 + $0x80] sm:$0xff]  ;;  %v500_v48 = vld [vmem:[%s5119_s12 + $0x88] sm:$0xff]  ;;  %v5216_v50 = vld [vmem:[%s5119_s12 + $0x30] sm:$0xff] }
  0x16   : > { %v592_v15 = vmul.f32 %v5139_v14, %v516_v12  ;;  %v594_v16 = vmul.f32 %v5139_v14, %v518_v13  ;;  %816 = vmatprep.subr.bf16.mxu0 %v5012_v3  ;;  %4936 = vmatprep.subr.bf16.mxu1 %v5012_v3  ;;  %v5176_v35 = vmul.f32 %v5160_v25, %v515_v23  ;;  %v544_v46 = vunpack.c.h.bf16 %v5182_v37  ;;  %v501_v56 = vld [vmem:[%s5119_s12 + $0x90] sm:$0xff]  ;;  %v5230_v58 = vld [vmem:[%s5119_s12 + $0x38] sm:$0xff]  ;;  %v503_v12 = vld [vmem:[%s5119_s12 + $0xa0] sm:$0xff] }
  0x17   : > { %v5179_v36 = vmul.f32 %v5160_v25, %v517_v24  ;;  %v5185_v38 = vmul.f32 %v5139_v14, %v520_v28  ;;  %v5188_v39 = vmul.f32 %v5139_v14, %v522_v29  ;;  %v5191_v40 = vmul.f32 %v5160_v25, %v519_v30  ;;  %v502_v62 = vld [vmem:[%s5119_s12 + $0x98] sm:$0xff]  ;;  %v504_v13 = vld [vmem:[%s5119_s12 + $0xa8] sm:$0xff]  ;;  %v505_v24 = vld [vmem:[%s5119_s12 + $0xb0] sm:$0xff] }
  0x18   : > { %v656_v19 = vpack.c.bf16 %v594_v16, %v592_v15  ;;  %v5194_v41 = vmul.f32 %v5160_v25, %v521_v31  ;;  %v5204_v44 = vmul.f32 %v5139_v14, %v524_v33  ;;  %v5207_v45 = vmul.f32 %v5139_v14, %v526_v34 }
  0x19   : > { %817 = vmatpush1.bf16.msra.mxu0 %v4982_v17  ;;  %4945 = vmatpush1.bf16.msra.mxu1 %v4982_v17  ;;  %v655_v49 = vpack.c.bf16 %v5179_v36, %v5176_v35  ;;  %v546_v51 = vunpack.c.h.bf16 %v5197_v42  ;;  %v658_v52 = vpack.c.bf16 %v5188_v39, %v5185_v38  ;;  %v523_v54 = vunpack.c.l.bf16 %v5163_v26  ;;  %v507_v36 = vld [vmem:[%s5119_s12 + $0xc0] sm:$0xff] }
  0x1a   : > { %4760 = vmatprep.mubr.msk.bf16.mxu0 %vm759_vm0, %v656_v19  ;;  %818 = vmatprep.subr.bf16.mxu0 %v5012_v3  ;;  %v657_v53 = vpack.c.bf16 %v5194_v41, %v5191_v40  ;;  %v5225_v55 = vmul.f32 %v5139_v14, %v544_v46  ;;  %v525_v57 = vunpack.c.l.bf16 %v5166_v27  ;;  %v548_v60 = vunpack.c.h.bf16 %v499_v47  ;;  %v491_v27 = vld [vmem:[%s5119_s12 + $0x40] sm:$0xff]  ;;  %v492_v40 = vld [vmem:[%s5119_s12 + $0x48] sm:$0xff] }
  0x1b   : > { %4937 = vmatprep.subr.bf16.mxu1 %v5012_v3  ;;  %v5233_v59 = vmul.f32 %v5139_v14, %v546_v51  ;;  %v550_v61 = vunpack.c.h.bf16 %v500_v48  ;;  %v660_v0 = vpack.c.bf16 %v5207_v45, %v5204_v44  ;;  %v528_v1 = vunpack.c.h.bf16 %v5216_v50  ;;  %v514_v44 = vld [vmem:[%s5119_s12 + $0xf8] sm:$0xff] }
  0x1c   : > { %v547_v4 = vunpack.c.l.bf16 %v499_v47  ;;  %v549_v6 = vunpack.c.l.bf16 %v500_v48  ;;  %v5247_v9 = vmul.f32 %v5139_v14, %v548_v60  ;;  %v552_v11 = vunpack.c.h.bf16 %v501_v56  ;;  %v508_v47 = vld [vmem:[%s5119_s12 + $0xc8] sm:$0xff] }
  0x1d   : > { %819 = vmatpush1.bf16.msra.mxu0 %v4983_v22  ;;  %4946 = vmatpush1.bf16.msra.mxu1 %v4983_v22  ;;  %v670_v8 = vpack.c.bf16 %v5233_v59, %v5225_v55  ;;  %v5250_v10 = vmul.f32 %v5139_v14, %v550_v61  ;;  %v530_v15 = vunpack.c.h.bf16 %v5230_v58  ;;  %v554_v19 = vunpack.c.h.bf16 %v502_v62  ;;  %v1653_v55 = vld [vmem:[#allocation2] sm:$0x1] }
  0x1e   : > { %820 = vmatprep.subr.bf16.mxu0 %v5012_v3  ;;  %4938 = vmatprep.subr.bf16.mxu1 %v5012_v3  ;;  %v5256_v16 = vmul.f32 %v5160_v25, %v547_v4  ;;  %v5259_v17 = vmul.f32 %v5160_v25, %v549_v6  ;;  %v5264_v21 = vmul.f32 %v5139_v14, %v552_v11  ;;  %v551_v22 = vunpack.c.l.bf16 %v501_v56  ;;  %v509_v4 = vld [vmem:[%s5119_s12 + $0xd0] sm:$0xff]  ;;  %v5432_v59 = vld [vmem:[%s6564_s4] ss:$0 sm:$0xff] }
  0x1f   : > { %v672_v20 = vpack.c.bf16 %v5250_v10, %v5247_v9  ;;  %v553_v23 = vunpack.c.l.bf16 %v502_v62  ;;  %v5271_v29 = vmul.f32 %v5139_v14, %v554_v19  ;;  %v556_v30 = vunpack.c.h.bf16 %v503_v12  ;;  %1656 = vperm.xlu1 %4976, %v1653_v55   ;;  %v5437_v9 = vld [vmem:[%s6565_s5] ss:$0 sm:$0xff] }
  0x20   : > { %v671_v28 = vpack.c.bf16 %v5259_v17, %v5256_v16  ;;  %v558_v31 = vunpack.c.h.bf16 %v504_v13  ;;  %v5275_v33 = vmul.f32 %v5160_v25, %v551_v22  ;;  %v555_v35 = vunpack.c.l.bf16 %v503_v12 }
  0x21   : > { %821 = vmatpush1.bf16.msra.mxu0 %v4984_v32  ;;  %4947 = vmatpush1.bf16.msra.mxu1 %v4984_v32  ;;  %v506_v32 = vld [vmem:[%s5119_s12 + $0xb8] sm:$0xff]  ;;  %v5278_v34 = vmul.f32 %v5160_v25, %v553_v23  ;;  %v674_v38 = vpack.c.bf16 %v5271_v29, %v5264_v21  ;;  %v5284_v39 = vmul.f32 %v5139_v14, %v556_v30  ;;  %v560_v46 = vunpack.c.h.bf16 %v505_v24 }
  0x22   : > { %822 = vmatprep.subr.bf16.mxu0 %v5012_v3  ;;  %4939 = vmatprep.subr.bf16.mxu1 %v5012_v3  ;;  %v5293_v51 = vmul.f32 %v5160_v25, %v555_v35  ;;  %v562_v60 = vunpack.c.h.bf16 %v506_v32  ;;  %v565_v12 = vunpack.c.l.bf16 %v508_v47  ;;  %v559_v22 = vunpack.c.l.bf16 %v505_v24 }
  0x23   : > { %v673_v48 = vpack.c.bf16 %v5278_v34, %v5275_v33  ;;  %v5302_v62 = vmul.f32 %v5139_v14, %v560_v46  ;;  %v561_v23 = vunpack.c.l.bf16 %v506_v32  ;;  %v511_v46 = vld [vmem:[%s5119_s12 + $0xe0] sm:$0xff]  ;;  %v567_v24 = vunpack.c.l.bf16 %v509_v4  ;;  %v512_v32 = vld [vmem:[%s5119_s12 + $0xe8] sm:$0xff] }
  0x24   : > { %v5308_v11 = vmul.f32 %v5139_v14, %v562_v60  ;;  %v5319_v60 = vmul.f32 %v5160_v25, %v559_v22  ;;  %v572_v6 = vunpack.c.h.bf16 %v511_v46  ;;  %v604_v26 = vmul.f32 %v5139_v14, %v528_v1 }
  0x25   : > { %823 = vmatpush1.bf16.msra.mxu0 %v4985_v43  ;;  %4948 = vmatpush1.bf16.msra.mxu1 %v4985_v43  ;;  %v5287_v43 = vmul.f32 %v5139_v14, %v558_v31 }
  0x26   : > { %824 = vmatprep.subr.bf16.mxu0 %v5012_v3  ;;  %4940 = vmatprep.subr.bf16.mxu1 %v5012_v3  ;;  %v557_v3 = vunpack.c.l.bf16 %v504_v13  ;;  %v566_v13 = vunpack.c.h.bf16 %v508_v47  ;;  %v5322_v47 = vmul.f32 %v5160_v25, %v561_v23  ;;  %v648_v1 = vmul.f32 %v5139_v14, %v572_v6 }
  0x27   : > { %v676_v61 = vpack.c.bf16 %v5287_v43, %v5284_v39 }
  0x28   : > { %v5296_v56 = vmul.f32 %v5160_v25, %v557_v3  ;;  %v642_v35 = vmul.f32 %v5139_v14, %v566_v13  ;;  %v641_v3 = vmul.f32 %v5160_v25, %v565_v12  ;;  %v599_v12 = vmul.f32 %v5160_v25, %v523_v54 }
  0x29   : > { %825 = vmatpush1.bf16.msra.mxu0 %v4986_v63  ;;  %4949 = vmatpush1.bf16.msra.mxu1 %v4986_v63  ;;  %v563_v63 = vunpack.c.l.bf16 %v507_v36  ;;  %v677_v22 = vpack.c.bf16 %v5322_v47, %v5319_v60  ;;  %v606_v54 = vmul.f32 %v5139_v14, %v530_v15 }
  0x2b   : > { %v639_v30 = vmul.f32 %v5160_v25, %v563_v63 }
  0x2c   : > { %841 = vmatmul.mubr.bf16.vlgmr.msra.gmra.mrb[0].mxu0 %v655_v49  ;;  %v564_v49 = vunpack.c.h.bf16 %v507_v36  ;;  %v568_v36 = vunpack.c.h.bf16 %v509_v4  ;;  %v601_v4 = vmul.f32 %v5160_v25, %v525_v57 }
  0x2d   : > { %4761 = vmatprep.mubr.msk.bf16.mxu0 %vm759_vm0, %v658_v52  ;;  %v510_v52 = vld [vmem:[%s5119_s12 + $0xd8] sm:$0xff]  ;;  %v679_v2 = vpack.c.bf16 %v641_v3, %v639_v30  ;;  %v513_v30 = vld [vmem:[%s5119_s12 + $0xf0] sm:$0xff] }
  0x2e   : > { %v640_v19 = vmul.f32 %v5139_v14, %v564_v49  ;;  %v570_v49 = vunpack.c.h.bf16 %v510_v52  ;;  %v644_v31 = vmul.f32 %v5139_v14, %v568_v36  ;;  %v569_v13 = vunpack.c.l.bf16 %v510_v52 }
  0x2f   : > { %v574_v52 = vunpack.c.h.bf16 %v512_v32  ;;  %v659_v45 = vpack.c.bf16 %v601_v4, %v599_v12  ;;  %v571_v36 = vunpack.c.l.bf16 %v511_v46  ;;  %v494_v4 = vld [vmem:[%s5119_s12 + $0x58] sm:$0xff] }
  0x30   : > { %v680_v63 = vpack.c.bf16 %v642_v35, %v640_v19  ;;  %v646_v23 = vmul.f32 %v5139_v14, %v570_v49  ;;  %v645_v57 = vmul.f32 %v5160_v25, %v569_v13  ;;  %v527_v19 = vunpack.c.l.bf16 %v5216_v50 }
  0x31   : > { %v650_v15 = vmul.f32 %v5139_v14, %v574_v52  ;;  %v662_v35 = vpack.c.bf16 %v606_v54, %v604_v26  ;;  %v573_v49 = vunpack.c.l.bf16 %v512_v32  ;;  %v647_v46 = vmul.f32 %v5160_v25, %v571_v36 }
  0x32   : > { %4772 = vmatprep.mubr.msk.bf16.mxu1 %vm759_vm0, %v680_v63  ;;  %v682_v41 = vpack.c.bf16 %v646_v23, %v644_v31  ;;  %v534_v31 = vunpack.c.h.bf16 %v492_v40  ;;  %v578_v63 = vunpack.c.h.bf16 %v514_v44  ;;  %v603_v50 = vmul.f32 %v5160_v25, %v527_v19  ;;  %v493_v23 = vld [vmem:[%s5119_s12 + $0x50] sm:$0xff] }
  0x33   : > { %937 = vmatmul.mubr.bf16.vlgmr.msra.gmra.mrb[0].mxu1 %v679_v2  ;;  %v532_v2 = vunpack.c.h.bf16 %v491_v27  ;;  %v684_v6 = vpack.c.bf16 %v650_v15, %v648_v1  ;;  %v649_v32 = vmul.f32 %v5160_v25, %v573_v49  ;;  %v531_v52 = vunpack.c.l.bf16 %v491_v27  ;;  %v495_v49 = vld [vmem:[%s5119_s12 + $0x60] sm:$0xff] }
  0x34   : > { %849 = vmatmul.mubr.bf16.gmra.mrb[4].mxu0 %v657_v53  ;;  %v643_v53 = vmul.f32 %v5160_v25, %v567_v24  ;;  %4773 = vmatprep.mubr.msk.bf16.mxu1 %vm759_vm0, %v682_v41  ;;  %v576_v24 = vunpack.c.h.bf16 %v513_v30  ;;  %v654_v54 = vmul.f32 %v5139_v14, %v578_v63  ;;  %v538_v1 = vunpack.c.h.bf16 %v494_v4 }
  0x35   : > { %4762 = vmatprep.mubr.msk.bf16.mxu0 %vm759_vm0, %v660_v0  ;;  %v529_v0 = vunpack.c.l.bf16 %v5230_v58  ;;  %v608_v12 = vmul.f32 %v5139_v14, %v532_v2  ;;  %v610_v58 = vmul.f32 %v5139_v14, %v534_v31  ;;  %v683_v19 = vpack.c.bf16 %v649_v32, %v647_v46 }
  0x36   : > { %v681_v3 = vpack.c.bf16 %v645_v57, %v643_v53  ;;  %v652_v26 = vmul.f32 %v5139_v14, %v576_v24  ;;  %v533_v53 = vunpack.c.l.bf16 %v492_v40  ;;  %v536_v57 = vunpack.c.h.bf16 %v493_v23 }
  0x37   : > { %v605_v13 = vmul.f32 %v5160_v25, %v529_v0  ;;  %v664_v15 = vpack.c.bf16 %v610_v58, %v608_v12  ;;  %v577_v0 = vunpack.c.l.bf16 %v514_v44  ;;  %v607_v31 = vmul.f32 %v5160_v25, %v531_v52 }
  0x38   : > { %v686_v2 = vpack.c.bf16 %v654_v54, %v652_v26  ;;  %v614_v27 = vmul.f32 %v5139_v14, %v538_v1  ;;  %v537_v24 = vunpack.c.l.bf16 %v494_v4  ;;  %v539_v52 = vunpack.c.l.bf16 %v495_v49 }
  0x39   : > { %v661_v41 = vpack.c.bf16 %v605_v13, %v603_v50  ;;  %v653_v36 = vmul.f32 %v5160_v25, %v577_v0  ;;  %v540_v50 = vunpack.c.h.bf16 %v495_v49  ;;  %v543_v1 = vunpack.c.l.bf16 %v5182_v37 }
  0x3a   : > { %v613_v46 = vmul.f32 %v5160_v25, %v537_v24  ;;  %v6575_v37 = vpack.c.bf16 %v5308_v11, %v5302_v62 }
  0x3b   : > { %945 = vmatmul.mubr.bf16.gmra.mrb[4].mxu1 %v681_v3  ;;  %v612_v3 = vmul.f32 %v5139_v14, %v536_v57  ;;  %v616_v32 = vmul.f32 %v5139_v14, %v540_v50 }
  0x3c   : > { %857 = vmatmul.mubr.bf16.gmra.mrb[8].mxu0 %v659_v45  ;;  %4774 = vmatprep.mubr.msk.bf16.mxu1 %vm759_vm0, %v684_v6  ;;  %v575_v45 = vunpack.c.l.bf16 %v513_v30  ;;  %v496_v30 = vld [vmem:[%s5119_s12 + $0x68] sm:$0xff]  ;;  %v535_v6 = vunpack.c.l.bf16 %v493_v23 }
  0x3d   : > { %4763 = vmatprep.mubr.msk.bf16.mxu0 %vm759_vm0, %v662_v35  ;;  %v609_v35 = vmul.f32 %v5160_v25, %v533_v53  ;;  %v666_v63 = vpack.c.bf16 %v614_v27, %v612_v3  ;;  %v542_v13 = vunpack.c.h.bf16 %v496_v30  ;;  %v541_v23 = vunpack.c.l.bf16 %v496_v30 }
  0x3e   : > { %v651_v40 = vmul.f32 %v5160_v25, %v575_v45  ;;  %v611_v58 = vmul.f32 %v5160_v25, %v535_v6 }
  0x3f   : > { %v663_v44 = vpack.c.bf16 %v609_v35, %v607_v31  ;;  %v618_v26 = vmul.f32 %v5139_v14, %v542_v13  ;;  %v617_v53 = vmul.f32 %v5160_v25, %v541_v23  ;;  %v619_v14 = vmul.f32 %v5160_v25, %v543_v1 }
  0x40   : > { %v685_v12 = vpack.c.bf16 %v653_v36, %v651_v40  ;;  %v665_v54 = vpack.c.bf16 %v613_v46, %v611_v58 }
  0x41   : > { %v668_v4 = vpack.c.bf16 %v618_v26, %v616_v32 }
  0x43   : > { %953 = vmatmul.mubr.bf16.gmra.mrb[8].mxu1 %v683_v19 }
  0x44   : > { %865 = vmatmul.mubr.bf16.gmra.mrb[12].mxu0 %v661_v41  ;;  %4775 = vmatprep.mubr.msk.bf16.mxu1 %vm759_vm0, %v686_v2  ;;  %v615_v41 = vmul.f32 %v5160_v25, %v539_v52 }
  0x45   : > { %4764 = vmatprep.mubr.msk.bf16.mxu0 %vm759_vm0, %v664_v15  ;;  %v545_v15 = vunpack.c.l.bf16 %v5197_v42  ;;  %v4987_v42 = vld [vmem:[%s6566_s6] sm:$0xff]  }
  0x46   : > { %v667_v57 = vpack.c.bf16 %v617_v53, %v615_v41  ;;  %4898 = vmatprep.subr.bf16.mxu1 %v4987_v42 }
  0x47   : > { %v621_v19 = vmul.f32 %v5160_v25, %v545_v15  ;;  %v6574_v25 = vpack.c.bf16 %v5296_v56, %v5293_v51  ;;  %4899 = vmatpush3.bf16.msra.mxu1 %v4987_v42 }
  0x49   : > { %v669_v45 = vpack.c.bf16 %v621_v19, %v619_v14 }
  0x4b   : > { %961 = vmatmul.mubr.bf16.gmra.mrb[12].mxu1 %v685_v12 }
  0x4c   : > { %873 = vmatmul.mubr.bf16.gmra.mrb[16].mxu0 %v663_v44 }
  0x4d   : > { %4765 = vmatprep.mubr.msk.bf16.mxu0 %vm759_vm0, %v666_v63 }
  0x54   : > { %881 = vmatmul.mubr.bf16.gmra.mrb[20].mxu0 %v665_v54 }
  0x55   : > { %4766 = vmatprep.mubr.msk.bf16.mxu0 %vm759_vm0, %v668_v4 }
  0x5c   : > { %889 = vmatmul.mubr.bf16.gmra.mrb[24].mxu0 %v667_v57 }
  0x5d   : > { %4767 = vmatprep.mubr.msk.bf16.mxu0 %vm759_vm0, %v670_v8 }
  0x64   : > { %897 = vmatmul.mubr.bf16.gmra.mrb[28].mxu0 %v669_v45 }
  0x65   : > { %4768 = vmatprep.mubr.msk.bf16.mxu0 %vm759_vm0, %v672_v20 }
  0x6c   : > { %905 = vmatmul.mubr.bf16.gmra.mrb[32].mxu0 %v671_v28 }
  0x6d   : > { %4769 = vmatprep.mubr.msk.bf16.mxu0 %vm759_vm0, %v674_v38 }
  0x74   : > { %913 = vmatmul.mubr.bf16.gmra.mrb[36].mxu0 %v673_v48 }
  0x75   : > { %4770 = vmatprep.mubr.msk.bf16.mxu0 %vm759_vm0, %v676_v61 }
  0x7c   : > { %921 = vmatmul.mubr.bf16.gmra.mrb[40].mxu0 %v6574_v25 }
  0x7d   : > { %4771 = vmatprep.mubr.msk.bf16.mxu0 %vm759_vm0, %v6575_v37 }
  0x84   : > { %929 = vmatmul.mubr.bf16.gmra.mrb[44].mxu0 %v677_v22 }
  0xff   : > { %v842_v8 = vpop.f32.mrb[0].mxu0 }
 0x100   : > { %v976_v10 = vmul.f32 %v5432_v59, %v842_v8  ;;  %v844_v16 = vpop.f32.mrb[1].mxu0 }
 0x101   : > { %v845_v17 = vpop.f32.mrb[2].mxu0 }
 0x102   : > { %v1015_v20 = vadd.f32 %v5437_v9, %v976_v10  ;;  %v977_v21 = vmul.f32 %v5432_v59, %v845_v17  ;;  %v847_v28 = vpop.f32.mrb[3].mxu0 }
 0x104   : > { %v1016_v29 = vadd.f32 %v5437_v9, %v977_v21  ;;  %v1047_v33 = vmax.f32 %v1015_v20, 0.0 }
 0x106   : > { %v1048_v34 = vmax.f32 %v1016_v29, 0.0  ;;  %v938_v51 = vpop.f32.mrb[0].mxu1 }
 0x107   : > { %v850_v38 = vpop.f32.mrb[4].mxu0  ;;  %v1000_v61 = vmul.f32 %v5432_v59, %v938_v51  ;;  %v940_v62 = vpop.f32.mrb[1].mxu1 }
 0x108   : > { %v1079_v39 = vpack.c.bf16 %v1048_v34, %v1047_v33  ;;  %v978_v43 = vmul.f32 %v5432_v59, %v850_v38  ;;  %v852_v48 = vpop.f32.mrb[5].mxu0  ;;  %v941_v22 = vpop.f32.mrb[2].mxu1 }
 0x109   : > { %v853_v56 = vpop.f32.mrb[6].mxu0  ;;  %v1039_v0 = vadd.f32 %v5437_v9, %v1000_v61  ;;  %v1001_v2 = vmul.f32 %v5432_v59, %v941_v22  ;;  %v943_v31 = vpop.f32.mrb[3].mxu1 }
 0x10a   : > { %v1017_v11 = vadd.f32 %v5437_v9, %v978_v43  ;;  %v979_v60 = vmul.f32 %v5432_v59, %v853_v56  ;;  %v855_v47 = vpop.f32.mrb[7].mxu0  ;;  %4900 = vmatprep.mubr.msk.bf16.mxu1 %vm759_vm0, %v1079_v39 }
 0x10b   : > { %v1071_v3 = vmax.f32 %v1039_v0, 0.0  ;;  %v1040_v27 = vadd.f32 %v5437_v9, %v1001_v2 }
 0x10c   : > { %v1018_v35 = vadd.f32 %v5437_v9, %v979_v60  ;;  %v1049_v40 = vmax.f32 %v1017_v11, 0.0 }
 0x10d   : > { %v1072_v30 = vmax.f32 %v1040_v27, 0.0 }
 0x10e   : > { %v1050_v36 = vmax.f32 %v1018_v35, 0.0  ;;  %v946_v63 = vpop.f32.mrb[4].mxu1 }
 0x10f   : > { %v858_v49 = vpop.f32.mrb[8].mxu0  ;;  %v5453_v13 = vpack.c.bf16 %v1072_v30, %v1071_v3  ;;  %v1002_v12 = vmul.f32 %v5432_v59, %v946_v63  ;;  %v948_v58 = vpop.f32.mrb[5].mxu1 }
 0x110   : > { %v1080_v44 = vpack.c.bf16 %v1050_v36, %v1049_v40  ;;  %v980_v6 = vmul.f32 %v5432_v59, %v858_v49  ;;  %v860_v24 = vpop.f32.mrb[9].mxu0  ;;  %v949_v54 = vpop.f32.mrb[6].mxu1 }
 0x111   : > { %v861_v50 = vpop.f32.mrb[10].mxu0  ;;  %v1041_v52 = vadd.f32 %v5437_v9, %v1002_v12  ;;  %v1003_v23 = vmul.f32 %v5432_v59, %v949_v54  ;;  %v951_v4 = vpop.f32.mrb[7].mxu1 }
 0x112   : > { %v1019_v46 = vadd.f32 %v5437_v9, %v980_v6  ;;  %v981_v32 = vmul.f32 %v5432_v59, %v861_v50  ;;  %v863_v26 = vpop.f32.mrb[11].mxu0  ;;  %4901 = vmatmul.mubr.msk.bf16.vlgmr.msra.gmra.mrb[16].mxu1 %vm759_vm0, %v1080_v44 }
 0x113   : > { %v1073_v53 = vmax.f32 %v1041_v52, 0.0  ;;  %v1042_v57 = vadd.f32 %v5437_v9, %v1003_v23 }
 0x114   : > { %v1020_v41 = vadd.f32 %v5437_v9, %v981_v32  ;;  %v1051_v1 = vmax.f32 %v1019_v46, 0.0 }
 0x115   : > { %v1074_v19 = vmax.f32 %v1042_v57, 0.0 }
 0x116   : > { %v1052_v15 = vmax.f32 %v1020_v41, 0.0  ;;  %v954_v42 = vpop.f32.mrb[8].mxu1 }
 0x117   : > { %v866_v14 = vpop.f32.mrb[12].mxu0  ;;  %v5464_v8 = vpack.c.bf16 %v1074_v19, %v1073_v53  ;;  %v1004_v10 = vmul.f32 %v5432_v59, %v954_v42  ;;  %v956_v16 = vpop.f32.mrb[9].mxu1 }
 0x118   : > { %v1081_v45 = vpack.c.bf16 %v1052_v15, %v1051_v1  ;;  %v982_v25 = vmul.f32 %v5432_v59, %v866_v14  ;;  %v868_v37 = vpop.f32.mrb[13].mxu0  ;;  %v957_v28 = vpop.f32.mrb[10].mxu1 }
 0x119   : > { %v869_v55 = vpop.f32.mrb[14].mxu0  ;;  %v1043_v29 = vadd.f32 %v5437_v9, %v1004_v10  ;;  %v1005_v33 = vmul.f32 %v5432_v59, %v957_v28  ;;  %v959_v34 = vpop.f32.mrb[11].mxu1 }
 0x11a   : > { %v1021_v17 = vadd.f32 %v5437_v9, %v982_v25  ;;  %v983_v20 = vmul.f32 %v5432_v59, %v869_v55  ;;  %v871_v21 = vpop.f32.mrb[15].mxu0  ;;  %4904 = vmatprep.mubr.msk.bf16.mxu1 %vm759_vm0, %v1081_v45 }
 0x11b   : > { %v1075_v39 = vmax.f32 %v1043_v29, 0.0  ;;  %v1044_v43 = vadd.f32 %v5437_v9, %v1005_v33 }
 0x11c   : > { %v1022_v38 = vadd.f32 %v5437_v9, %v983_v20  ;;  %v1053_v48 = vmax.f32 %v1021_v17, 0.0 }
 0x11d   : > { %v1076_v61 = vmax.f32 %v1044_v43, 0.0 }
 0x11e   : > { %v1054_v51 = vmax.f32 %v1022_v38, 0.0  ;;  %v962_v47 = vpop.f32.mrb[12].mxu1 }
 0x11f   : > { %v874_v56 = vpop.f32.mrb[16].mxu0  ;;  %v5475_v0 = vpack.c.bf16 %v1076_v61, %v1075_v39  ;;  %v1006_v2 = vmul.f32 %v5432_v59, %v962_v47  ;;  %v964_v31 = vpop.f32.mrb[13].mxu1 }
 0x120   : > { %v1082_v62 = vpack.c.bf16 %v1054_v51, %v1053_v48  ;;  %v984_v11 = vmul.f32 %v5432_v59, %v874_v56  ;;  %v876_v60 = vpop.f32.mrb[17].mxu0  ;;  %v965_v40 = vpop.f32.mrb[14].mxu1 }
 0x121   : > { %v877_v22 = vpop.f32.mrb[18].mxu0  ;;  %v1045_v36 = vadd.f32 %v5437_v9, %v1006_v2  ;;  %v1007_v49 = vmul.f32 %v5432_v59, %v965_v40  ;;  %v967_v30 = vpop.f32.mrb[15].mxu1 }
 0x122   : > { %v1023_v35 = vadd.f32 %v5437_v9, %v984_v11  ;;  %v985_v3 = vmul.f32 %v5432_v59, %v877_v22  ;;  %v879_v27 = vpop.f32.mrb[19].mxu0  ;;  %4905 = vmatmul.mubr.msk.bf16.gmra.mrb[20].mxu1 %vm759_vm0, %v1082_v62 }
 0x123   : > { %v1077_v6 = vmax.f32 %v1045_v36, 0.0  ;;  %v1046_v24 = vadd.f32 %v5437_v9, %v1007_v49 }
 0x124   : > { %v1024_v44 = vadd.f32 %v5437_v9, %v985_v3  ;;  %v1055_v63 = vmax.f32 %v1023_v35, 0.0 }
 0x125   : > { %v1078_v58 = vmax.f32 %v1046_v24, 0.0 }
 0x126   : > { %v1056_v50 = vmax.f32 %v1024_v44, 0.0 }
 0x127   : > { %v882_v12 = vpop.f32.mrb[20].mxu0  ;;  %v5486_v52 = vpack.c.bf16 %v1078_v58, %v1077_v6 }
 0x128   : > { %v1083_v46 = vpack.c.bf16 %v1056_v50, %v1055_v63  ;;  %v986_v32 = vmul.f32 %v5432_v59, %v882_v12  ;;  %v884_v26 = vpop.f32.mrb[21].mxu0 }
 0x129   : > { %v885_v54 = vpop.f32.mrb[22].mxu0 }
 0x12a   : > { %v1025_v23 = vadd.f32 %v5437_v9, %v986_v32  ;;  %v987_v4 = vmul.f32 %v5432_v59, %v885_v54  ;;  %v887_v41 = vpop.f32.mrb[23].mxu0  ;;  %4908 = vmatprep.mubr.msk.bf16.mxu1 %vm759_vm0, %v1083_v46 }
 0x12c   : > { %v1026_v53 = vadd.f32 %v5437_v9, %v987_v4  ;;  %v1057_v57 = vmax.f32 %v1025_v23, 0.0 }
 0x12e   : > { %v1058_v1 = vmax.f32 %v1026_v53, 0.0 }
 0x12f   : > { %v890_v15 = vpop.f32.mrb[24].mxu0 }
 0x130   : > { %v1084_v14 = vpack.c.bf16 %v1058_v1, %v1057_v57  ;;  %v988_v19 = vmul.f32 %v5432_v59, %v890_v15  ;;  %v892_v45 = vpop.f32.mrb[25].mxu0 }
 0x131   : > { %v893_v25 = vpop.f32.mrb[26].mxu0 }
 0x132   : > { %v1027_v37 = vadd.f32 %v5437_v9, %v988_v19  ;;  %v989_v42 = vmul.f32 %v5432_v59, %v893_v25  ;;  %v895_v55 = vpop.f32.mrb[27].mxu0  ;;  %4909 = vmatmul.mubr.msk.bf16.gmra.mrb[24].mxu1 %vm759_vm0, %v1084_v14 }
 0x134   : > { %v1028_v10 = vadd.f32 %v5437_v9, %v989_v42  ;;  %v1059_v16 = vmax.f32 %v1027_v37, 0.0 }
 0x136   : > { %v1060_v17 = vmax.f32 %v1028_v10, 0.0 }
 0x137   : > { %v898_v20 = vpop.f32.mrb[28].mxu0 }
 0x138   : > { %v1085_v21 = vpack.c.bf16 %v1060_v17, %v1059_v16  ;;  %v990_v28 = vmul.f32 %v5432_v59, %v898_v20  ;;  %v900_v29 = vpop.f32.mrb[29].mxu0 }
 0x139   : > { %v901_v33 = vpop.f32.mrb[30].mxu0 }
 0x13a   : > { %v1029_v34 = vadd.f32 %v5437_v9, %v990_v28  ;;  %v991_v38 = vmul.f32 %v5432_v59, %v901_v33  ;;  %v903_v39 = vpop.f32.mrb[31].mxu0  ;;  %4912 = vmatprep.mubr.msk.bf16.mxu1 %vm759_vm0, %v1085_v21  ;;  %v4803_v21 = vld [vmem:[%s5535_s26] sm:$0xff]  }
 0x13c   : > { %v1030_v43 = vadd.f32 %v5437_v9, %v991_v38  ;;  %v1061_v48 = vmax.f32 %v1029_v34, 0.0 }
 0x13e   : > { %v1062_v51 = vmax.f32 %v1030_v43, 0.0 }
 0x13f   : > { %v906_v56 = vpop.f32.mrb[32].mxu0 }
 0x140   : > { %v1086_v61 = vpack.c.bf16 %v1062_v51, %v1061_v48  ;;  %v992_v62 = vmul.f32 %v5432_v59, %v906_v56  ;;  %v908_v11 = vpop.f32.mrb[33].mxu0  ;;  %v4804_v51 = vunpack.c.l.bf16 %v4803_v21 }
 0x141   : > { %v909_v60 = vpop.f32.mrb[34].mxu0 }
 0x142   : > { %v1031_v47 = vadd.f32 %v5437_v9, %v992_v62  ;;  %v993_v22 = vmul.f32 %v5432_v59, %v909_v60  ;;  %v911_v2 = vpop.f32.mrb[35].mxu0  ;;  %4913 = vmatmul.mubr.msk.bf16.gmra.mrb[28].mxu1 %vm759_vm0, %v1086_v61 }
 0x144   : > { %v1032_v31 = vadd.f32 %v5437_v9, %v993_v22  ;;  %v1063_v35 = vmax.f32 %v1031_v47, 0.0  ;;  %v5560_v47 = vld [vmem:[%s6569_s9] ss:$0 sm:$0xff]  ;;  %v4805_v22 = vunpack.c.h.bf16 %v4803_v21 }
 0x146   : > { %v1064_v3 = vmax.f32 %v1032_v31, 0.0 }
 0x147   : > { %v914_v27 = vpop.f32.mrb[36].mxu0 }
 0x148   : > { %v1087_v40 = vpack.c.bf16 %v1064_v3, %v1063_v35  ;;  %v994_v36 = vmul.f32 %v5432_v59, %v914_v27  ;;  %v916_v49 = vpop.f32.mrb[37].mxu0 }
 0x149   : > { %v917_v30 = vpop.f32.mrb[38].mxu0 }
 0x14a   : > { %v1033_v44 = vadd.f32 %v5437_v9, %v994_v36  ;;  %v995_v6 = vmul.f32 %v5432_v59, %v917_v30  ;;  %v919_v24 = vpop.f32.mrb[39].mxu0  ;;  %4916 = vmatprep.mubr.msk.bf16.mxu1 %vm759_vm0, %v1087_v40 }
 0x14c   : > { %v1034_v63 = vadd.f32 %v5437_v9, %v995_v6  ;;  %v1065_v50 = vmax.f32 %v1033_v44, 0.0 }
 0x14e   : > { %v1066_v12 = vmax.f32 %v1034_v63, 0.0 }
 0x14f   : > { %v922_v58 = vpop.f32.mrb[40].mxu0 }
 0x150   : > { %v1088_v46 = vpack.c.bf16 %v1066_v12, %v1065_v50  ;;  %v996_v32 = vmul.f32 %v5432_v59, %v922_v58  ;;  %v924_v26 = vpop.f32.mrb[41].mxu0  ;;  %v4868_v58 = vld [vmem:[%s5535_s26 + $0x18] sm:$0xff]  }
 0x151   : > { %v925_v54 = vpop.f32.mrb[42].mxu0  ;;  %v4867_v26 = vld [vmem:[%s5535_s26 + $0x10] sm:$0xff]  }
 0x152   : > { %v1035_v23 = vadd.f32 %v5437_v9, %v996_v32  ;;  %v997_v4 = vmul.f32 %v5432_v59, %v925_v54  ;;  %v927_v41 = vpop.f32.mrb[43].mxu0  ;;  %4917 = vmatmul.mubr.msk.bf16.gmra.mrb[32].mxu1 %vm759_vm0, %v1088_v46 }
 0x154   : > { %v1036_v53 = vadd.f32 %v5437_v9, %v997_v4  ;;  %v1067_v57 = vmax.f32 %v1035_v23, 0.0 }
 0x156   : > { %v1068_v1 = vmax.f32 %v1036_v53, 0.0 }
 0x157   : > { %v930_v15 = vpop.f32.mrb[44].mxu0 }
 0x158   : > { %v1089_v14 = vpack.c.bf16 %v1068_v1, %v1067_v57  ;;  %v998_v19 = vmul.f32 %v5432_v59, %v930_v15  ;;  %v932_v45 = vpop.f32.mrb[45].mxu0  ;;  %v4816_v57 = vunpack.c.l.bf16 %v4868_v58 }
 0x159   : > { %v933_v25 = vpop.f32.mrb[46].mxu0 }
 0x15a   : > { %v1037_v37 = vadd.f32 %v5437_v9, %v998_v19  ;;  %v999_v42 = vmul.f32 %v5432_v59, %v933_v25  ;;  %v935_v55 = vpop.f32.mrb[47].mxu0  ;;  %4920 = vmatprep.mubr.msk.bf16.mxu1 %vm759_vm0, %v1089_v14  ;;  %v5540_v59 = vld [vmem:[%s6567_s7] ss:$0 sm:$0xff]  ;;  %v4812_v14 = vunpack.c.l.bf16 %v4867_v26  ;;  %v4817_v25 = vunpack.c.h.bf16 %v4868_v58 }
 0x15b   : > { %v4813_v55 = vunpack.c.h.bf16 %v4867_v26 }
 0x15c   : > { %v1038_v10 = vadd.f32 %v5437_v9, %v999_v42  ;;  %v1069_v16 = vmax.f32 %v1037_v37, 0.0 }
 0x15e   : > { %v1070_v17 = vmax.f32 %v1038_v10, 0.0 }
 0x160   : > { %v1090_v20 = vpack.c.bf16 %v1070_v17, %v1069_v16 }
 0x162   : > { %4921 = vmatmul.mubr.msk.bf16.gmra.mrb[36].mxu1 %vm759_vm0, %v1090_v20 }
 0x163   : > { %4924 = vmatprep.mubr.msk.bf16.mxu1 %vm759_vm0, %v5453_v13  ;;  %v5545_v13 = vld [vmem:[%s6568_s8] ss:$0 sm:$0xff] }
 0x16a   : > { %4925 = vmatmul.mubr.msk.bf16.gmra.mrb[40].mxu1 %vm759_vm0, %v5464_v8  ;;  %v4866_v8 = vld [vmem:[%s5535_s26 + $0x8] sm:$0xff]  }
 0x16b   : > { %4928 = vmatprep.mubr.msk.bf16.mxu1 %vm759_vm0, %v5475_v0  ;;  %v4808_v39 = vunpack.c.l.bf16 %v4866_v8  ;;  %v4809_v62 = vunpack.c.h.bf16 %v4866_v8 }
 0x172   : > { %4929 = vmatmul.mubr.msk.bf16.gmra.mrb[44].mxu1 %vm759_vm0, %v5486_v52 }
 0x1e5   : > { %v4902_v9 = vpop.f32.mrb[16].mxu1 }
 0x1e6   : > { %v1321_v0 = vmul.f32 %v4902_v9, %v5540_v59  ;;  %v1185_v52 = vpop.f32.mrb[17].mxu1 }
 0x1e7   : > { %v1319_v28 = vmul.f32 %v5540_v59, %v1185_v52  ;;  %v4903_v29 = vpop.f32.mrb[18].mxu1 }
 0x1e8   : > { %v1360_v33 = vadd.f32 %v5545_v13, %v1321_v0  ;;  %v1322_v34 = vmul.f32 %v4903_v29, %v5540_v59  ;;  %v1188_v38 = vpop.f32.mrb[19].mxu1 }
 0x1e9   : > { %v1358_v43 = vadd.f32 %v5545_v13, %v1319_v28  ;;  %v1320_v48 = vmul.f32 %v5540_v59, %v1188_v38 }
 0x1ea   : > { %v1392_v56 = vmax.f32 %v1360_v33, 0.0  ;;  %v1361_v61 = vadd.f32 %v5545_v13, %v1322_v34 }
 0x1eb   : > { %v1390_v11 = vmax.f32 %v1358_v43, 0.0  ;;  %v1359_v60 = vadd.f32 %v5545_v13, %v1320_v48 }
 0x1ec   : > { %v1393_v2 = vmax.f32 %v1361_v61, 0.0  ;;  %v1488_v31 = vadd.f32 %v4808_v39, %v1392_v56  ;;  %v4870_v39 = vld [vmem:[%s5535_s26 + $0x28] sm:$0xff]   ;;  %v4869_v56 = vld [vmem:[%s5535_s26 + $0x20] sm:$0xff]  }
 0x1ed   : > { %v1391_v35 = vmax.f32 %v1359_v60, 0.0  ;;  %v1486_v3 = vadd.f32 %v4804_v51, %v1390_v11 }
 0x1ee   : > { %v1527_v27 = vmul.f32 %v5560_v47, %v1488_v31  ;;  %v1489_v40 = vadd.f32 %v4809_v62, %v1393_v2  ;;  %v4824_v2 = vunpack.c.l.bf16 %v4870_v39 }
 0x1ef   : > { %v1525_v36 = vmul.f32 %v5560_v47, %v1486_v3  ;;  %v1487_v49 = vadd.f32 %v4805_v22, %v1391_v35  ;;  %v4820_v3 = vunpack.c.l.bf16 %v4869_v56 }
 0x1f0   : > { %v1563_v30 = vsel %vm759_vm0, %v1527_v27, 0.0  ;;  %v1528_v44 = vmul.f32 %v5560_v47, %v1489_v40 }
 0x1f1   : > { %1564 = vadd.xlane.f32.xlu1 %v1563_v30  ;;  %v1557_v6 = vsel %vm759_vm0, %v1525_v36, 0.0  ;;  %v1526_v24 = vmul.f32 %v5560_v47, %v1487_v49  ;;  %v4825_v36 = vunpack.c.h.bf16 %v4870_v39 }
 0x1f2   : > { %1558 = vadd.xlane.f32.xlu0 %v1557_v6  ;;  %v1566_v63 = vsel %vm759_vm0, %v1528_v44, 0.0  ;;  %v4821_v44 = vunpack.c.h.bf16 %v4869_v56 }
 0x1f3   : > { %v1560_v12 = vsel %vm759_vm0, %v1526_v24, 0.0 }
 0x1f5   : > { %1567 = vadd.xlane.f32.xlu1 %v1566_v63  ;;  %v4906_v50 = vpop.f32.mrb[20].mxu1 }
 0x1f6   : > { %v1325_v46 = vmul.f32 %v4906_v50, %v5540_v59  ;;  %1561 = vadd.xlane.f32.xlu0 %v1560_v12  ;;  %v1201_v32 = vpop.f32.mrb[21].mxu1 }
 0x1f7   : > { %v1323_v54 = vmul.f32 %v5540_v59, %v1201_v32  ;;  %v4907_v23 = vpop.f32.mrb[22].mxu1 }
 0x1f8   : > { %v1364_v4 = vadd.f32 %v5545_v13, %v1325_v46  ;;  %v1326_v41 = vmul.f32 %v4907_v23, %v5540_v59  ;;  %v1204_v53 = vpop.f32.mrb[23].mxu1 }
 0x1f9   : > { %v1362_v1 = vadd.f32 %v5545_v13, %v1323_v54  ;;  %v1324_v15 = vmul.f32 %v5540_v59, %v1204_v53 }
 0x1fa   : > { %v1396_v19 = vmax.f32 %v1364_v4, 0.0  ;;  %v1365_v45 = vadd.f32 %v5545_v13, %v1326_v41 }
 0x1fb   : > { %v1394_v37 = vmax.f32 %v1362_v1, 0.0  ;;  %v1363_v42 = vadd.f32 %v5545_v13, %v1324_v15 }
 0x1fc   : > { %v1397_v10 = vmax.f32 %v1365_v45, 0.0  ;;  %v1492_v16 = vadd.f32 %v4816_v57, %v1396_v19  ;;  %v4872_v57 = vld [vmem:[%s5535_s26 + $0x38] sm:$0xff]   ;;  %v4871_v19 = vld [vmem:[%s5535_s26 + $0x30] sm:$0xff]  }
 0x1fd   : > { %v1395_v17 = vmax.f32 %v1363_v42, 0.0  ;;  %v1490_v20 = vadd.f32 %v4812_v14, %v1394_v37 }
 0x1fe   : > { %v1531_v9 = vmul.f32 %v5560_v47, %v1492_v16  ;;  %v1493_v8 = vadd.f32 %v4817_v25, %v1397_v10  ;;  %v4832_v10 = vunpack.c.l.bf16 %v4872_v57 }
 0x1ff   : > { %v1491_v0 = vadd.f32 %v4813_v55, %v1395_v17  ;;  %v1529_v28 = vmul.f32 %v5560_v47, %v1490_v20  ;;  %v4828_v20 = vunpack.c.l.bf16 %v4871_v19 }
 0x200   : > { %v1575_v52 = vsel %vm759_vm0, %v1531_v9, 0.0  ;;  %v1532_v21 = vmul.f32 %v5560_v47, %v1493_v8 }
 0x201   : > { %1576 = vadd.xlane.f32.xlu0 %v1575_v52  ;;  %v1530_v33 = vmul.f32 %v5560_v47, %v1491_v0  ;;  %v1569_v34 = vsel %vm759_vm0, %v1529_v28, 0.0  ;;  %v4833_v0 = vunpack.c.h.bf16 %v4872_v57  ;;  %v4829_v28 = vunpack.c.h.bf16 %v4871_v19 }
 0x202   : > { %v1578_v29 = vsel %vm759_vm0, %v1532_v21, 0.0 }
 0x203   : > { %1579 = vadd.xlane.f32.xlu1 %v1578_v29  ;;  %v1572_v51 = vsel %vm759_vm0, %v1530_v33, 0.0 }
 0x205   : > { %1570 = vadd.xlane.f32.xlu0 %v1569_v34  ;;  %v4910_v38 = vpop.f32.mrb[24].mxu1 }
 0x206   : > { %v1329_v43 = vmul.f32 %v4910_v38, %v5540_v59  ;;  %v1217_v48 = vpop.f32.mrb[25].mxu1 }
 0x207   : > { %v1327_v61 = vmul.f32 %v5540_v59, %v1217_v48  ;;  %1573 = vadd.xlane.f32.xlu1 %v1572_v51  ;;  %v4911_v62 = vpop.f32.mrb[26].mxu1 }
 0x208   : > { %v1368_v11 = vadd.f32 %v5545_v13, %v1329_v43  ;;  %v1330_v60 = vmul.f32 %v4911_v62, %v5540_v59  ;;  %v1220_v22 = vpop.f32.mrb[27].mxu1 }
 0x209   : > { %v1366_v31 = vadd.f32 %v5545_v13, %v1327_v61  ;;  %v1328_v35 = vmul.f32 %v5540_v59, %v1220_v22 }
 0x20a   : > { %v1400_v27 = vmax.f32 %v1368_v11, 0.0  ;;  %v1369_v40 = vadd.f32 %v5545_v13, %v1330_v60 }
 0x20b   : > { %v1398_v49 = vmax.f32 %v1366_v31, 0.0  ;;  %v1367_v30 = vadd.f32 %v5545_v13, %v1328_v35 }
 0x20c   : > { %v1401_v6 = vmax.f32 %v1369_v40, 0.0  ;;  %v1496_v24 = vadd.f32 %v4824_v2, %v1400_v27  ;;  %v4874_v2 = vld [vmem:[%s5535_s26 + $0x48] sm:$0xff]   ;;  %v4873_v27 = vld [vmem:[%s5535_s26 + $0x40] sm:$0xff]  }
 0x20d   : > { %v1399_v63 = vmax.f32 %v1367_v30, 0.0  ;;  %v1494_v50 = vadd.f32 %v4820_v3, %v1398_v49 }
 0x20e   : > { %v1535_v12 = vmul.f32 %v5560_v47, %v1496_v24  ;;  %v1497_v58 = vadd.f32 %v4825_v36, %v1401_v6  ;;  %v4840_v6 = vunpack.c.l.bf16 %v4874_v2 }
 0x20f   : > { %v1495_v46 = vadd.f32 %v4821_v44, %v1399_v63  ;;  %v1533_v54 = vmul.f32 %v5560_v47, %v1494_v50  ;;  %v4836_v50 = vunpack.c.l.bf16 %v4873_v27 }
 0x210   : > { %v1587_v32 = vsel %vm759_vm0, %v1535_v12, 0.0  ;;  %v1536_v26 = vmul.f32 %v5560_v47, %v1497_v58 }
 0x211   : > { %1588 = vadd.xlane.f32.xlu0 %v1587_v32  ;;  %v1534_v4 = vmul.f32 %v5560_v47, %v1495_v46  ;;  %v1581_v41 = vsel %vm759_vm0, %v1533_v54, 0.0  ;;  %v4841_v46 = vunpack.c.h.bf16 %v4874_v2  ;;  %v4837_v54 = vunpack.c.h.bf16 %v4873_v27 }
 0x212   : > { %v1590_v23 = vsel %vm759_vm0, %v1536_v26, 0.0 }
 0x213   : > { %1591 = vadd.xlane.f32.xlu1 %v1590_v23  ;;  %v1584_v14 = vsel %vm759_vm0, %v1534_v4, 0.0 }
 0x215   : > { %1582 = vadd.xlane.f32.xlu0 %v1581_v41  ;;  %v4914_v53 = vpop.f32.mrb[28].mxu1 }
 0x216   : > { %v1333_v1 = vmul.f32 %v4914_v53, %v5540_v59  ;;  %v1233_v15 = vpop.f32.mrb[29].mxu1 }
 0x217   : > { %v1331_v45 = vmul.f32 %v5540_v59, %v1233_v15  ;;  %1585 = vadd.xlane.f32.xlu1 %v1584_v14  ;;  %v4915_v25 = vpop.f32.mrb[30].mxu1 }
 0x218   : > { %v1372_v37 = vadd.f32 %v5545_v13, %v1333_v1  ;;  %v1334_v42 = vmul.f32 %v4915_v25, %v5540_v59  ;;  %v1236_v55 = vpop.f32.mrb[31].mxu1 }
 0x219   : > { %v1370_v16 = vadd.f32 %v5545_v13, %v1331_v45  ;;  %v1332_v17 = vmul.f32 %v5540_v59, %v1236_v55 }
 0x21a   : > { %v1404_v9 = vmax.f32 %v1372_v37, 0.0  ;;  %v1373_v8 = vadd.f32 %v5545_v13, %v1334_v42 }
 0x21b   : > { %v1402_v52 = vmax.f32 %v1370_v16, 0.0  ;;  %v1371_v21 = vadd.f32 %v5545_v13, %v1332_v17 }
 0x21c   : > { %v1405_v29 = vmax.f32 %v1373_v8, 0.0  ;;  %v1500_v33 = vadd.f32 %v4832_v10, %v1404_v9  ;;  %v4876_v10 = vld [vmem:[%s5535_s26 + $0x58] sm:$0xff]   ;;  %v4875_v9 = vld [vmem:[%s5535_s26 + $0x50] sm:$0xff]  }
 0x21d   : > { %v1403_v34 = vmax.f32 %v1371_v21, 0.0  ;;  %v1498_v38 = vadd.f32 %v4828_v20, %v1402_v52 }
 0x21e   : > { %v1539_v39 = vmul.f32 %v5560_v47, %v1500_v33  ;;  %v1501_v43 = vadd.f32 %v4833_v0, %v1405_v29  ;;  %v4848_v29 = vunpack.c.l.bf16 %v4876_v10 }
 0x21f   : > { %v1499_v48 = vadd.f32 %v4829_v28, %v1403_v34  ;;  %v1537_v61 = vmul.f32 %v5560_v47, %v1498_v38  ;;  %v4844_v38 = vunpack.c.l.bf16 %v4875_v9 }
 0x220   : > { %v1599_v51 = vsel %vm759_vm0, %v1539_v39, 0.0  ;;  %v1540_v56 = vmul.f32 %v5560_v47, %v1501_v43 }
 0x221   : > { %1600 = vadd.xlane.f32.xlu0 %v1599_v51  ;;  %v1538_v11 = vmul.f32 %v5560_v47, %v1499_v48  ;;  %v1593_v60 = vsel %vm759_vm0, %v1537_v61, 0.0  ;;  %v4849_v61 = vunpack.c.h.bf16 %v4876_v10 }
 0x222   : > { %v1602_v62 = vsel %vm759_vm0, %v1540_v56, 0.0  ;;  %v4845_v56 = vunpack.c.h.bf16 %v4875_v9 }
 0x223   : > { %1603 = vadd.xlane.f32.xlu1 %v1602_v62  ;;  %v1596_v3 = vsel %vm759_vm0, %v1538_v11, 0.0 }
 0x225   : > { %1594 = vadd.xlane.f32.xlu0 %v1593_v60  ;;  %v4918_v22 = vpop.f32.mrb[32].mxu1 }
 0x226   : > { %v1337_v31 = vmul.f32 %v4918_v22, %v5540_v59  ;;  %v1249_v35 = vpop.f32.mrb[33].mxu1 }
 0x227   : > { %v1335_v40 = vmul.f32 %v5540_v59, %v1249_v35  ;;  %1597 = vadd.xlane.f32.xlu1 %v1596_v3  ;;  %v4919_v36 = vpop.f32.mrb[34].mxu1 }
 0x228   : > { %v1376_v49 = vadd.f32 %v5545_v13, %v1337_v31  ;;  %v1338_v30 = vmul.f32 %v4919_v36, %v5540_v59  ;;  %v1252_v44 = vpop.f32.mrb[35].mxu1 }
 0x229   : > { %v1374_v24 = vadd.f32 %v5545_v13, %v1335_v40  ;;  %v1336_v63 = vmul.f32 %v5540_v59, %v1252_v44  ;;  %v4878_v44 = vld [vmem:[%s5535_s26 + $0x68] sm:$0xff]  }
 0x22a   : > { %v1408_v12 = vmax.f32 %v1376_v49, 0.0  ;;  %v1377_v58 = vadd.f32 %v5545_v13, %v1338_v30 }
 0x22b   : > { %v1406_v32 = vmax.f32 %v1374_v24, 0.0  ;;  %v1375_v26 = vadd.f32 %v5545_v13, %v1336_v63 }
 0x22c   : > { %v1409_v23 = vmax.f32 %v1377_v58, 0.0  ;;  %v1504_v4 = vadd.f32 %v4840_v6, %v1408_v12  ;;  %v4856_v12 = vunpack.c.l.bf16 %v4878_v44  ;;  %v4877_v58 = vld [vmem:[%s5535_s26 + $0x60] sm:$0xff]  }
 0x22d   : > { %v1407_v41 = vmax.f32 %v1375_v26, 0.0  ;;  %v1502_v53 = vadd.f32 %v4836_v50, %v1406_v32 }
 0x22e   : > { %v1543_v57 = vmul.f32 %v5560_v47, %v1504_v4  ;;  %v1505_v1 = vadd.f32 %v4841_v46, %v1409_v23  ;;  %v4857_v4 = vunpack.c.h.bf16 %v4878_v44 }
 0x22f   : > { %v1503_v15 = vadd.f32 %v4837_v54, %v1407_v41  ;;  %v1541_v45 = vmul.f32 %v5560_v47, %v1502_v53 }
 0x230   : > { %v1611_v14 = vsel %vm759_vm0, %v1543_v57, 0.0  ;;  %v1544_v19 = vmul.f32 %v5560_v47, %v1505_v1  ;;  %v4852_v1 = vunpack.c.l.bf16 %v4877_v58 }
 0x231   : > { %1612 = vadd.xlane.f32.xlu0 %v1611_v14  ;;  %v1542_v37 = vmul.f32 %v5560_v47, %v1503_v15  ;;  %v1605_v42 = vsel %vm759_vm0, %v1541_v45, 0.0 }
 0x232   : > { %v1614_v25 = vsel %vm759_vm0, %v1544_v19, 0.0 }
 0x233   : > { %1615 = vadd.xlane.f32.xlu1 %v1614_v25  ;;  %v1608_v20 = vsel %vm759_vm0, %v1542_v37, 0.0 }
 0x235   : > { %1606 = vadd.xlane.f32.xlu0 %v1605_v42  ;;  %v4922_v55 = vpop.f32.mrb[36].mxu1 }
 0x236   : > { %v1341_v16 = vmul.f32 %v4922_v55, %v5540_v59  ;;  %v1265_v17 = vpop.f32.mrb[37].mxu1 }
 0x237   : > { %v1339_v8 = vmul.f32 %v5540_v59, %v1265_v17  ;;  %1609 = vadd.xlane.f32.xlu1 %v1608_v20  ;;  %v4923_v0 = vpop.f32.mrb[38].mxu1 }
 0x238   : > { %v1380_v52 = vadd.f32 %v5545_v13, %v1341_v16  ;;  %v1342_v21 = vmul.f32 %v4923_v0, %v5540_v59  ;;  %v1268_v28 = vpop.f32.mrb[39].mxu1  ;;  %v4880_v16 = vld [vmem:[%s5535_s26 + $0x78] sm:$0xff]  }
 0x239   : > { %v1378_v33 = vadd.f32 %v5545_v13, %v1339_v8  ;;  %v1340_v34 = vmul.f32 %v5540_v59, %v1268_v28  ;;  %v4853_v8 = vunpack.c.h.bf16 %v4877_v58 }
 0x23a   : > { %v1412_v39 = vmax.f32 %v1380_v52, 0.0  ;;  %v1381_v43 = vadd.f32 %v5545_v13, %v1342_v21 }
 0x23b   : > { %v1410_v48 = vmax.f32 %v1378_v33, 0.0  ;;  %v1379_v51 = vadd.f32 %v5545_v13, %v1340_v34  ;;  %v4864_v33 = vunpack.c.l.bf16 %v4880_v16 }
 0x23c   : > { %v1413_v62 = vmax.f32 %v1381_v43, 0.0  ;;  %v1508_v11 = vadd.f32 %v4848_v29, %v1412_v39 }
 0x23d   : > { %v1411_v60 = vmax.f32 %v1379_v51, 0.0  ;;  %v4926_v22 = vpop.f32.mrb[40].mxu1  ;;  %v1506_v2 = vadd.f32 %v4844_v38, %v1410_v48  ;;  %v4879_v48 = vld [vmem:[%s5535_s26 + $0x70] sm:$0xff]  }
 0x23e   : > { %v1345_v31 = vmul.f32 %v4926_v22, %v5540_v59  ;;  %v1281_v35 = vpop.f32.mrb[41].mxu1  ;;  %v1547_v3 = vmul.f32 %v5560_v47, %v1508_v11  ;;  %v1509_v30 = vadd.f32 %v4849_v61, %v1413_v62 }
 0x23f   : > { %v1343_v27 = vmul.f32 %v5540_v59, %v1281_v35  ;;  %v4927_v40 = vpop.f32.mrb[42].mxu1  ;;  %v1507_v36 = vadd.f32 %v4845_v56, %v1411_v60  ;;  %v1545_v49 = vmul.f32 %v5560_v47, %v1506_v2  ;;  %v4860_v60 = vunpack.c.l.bf16 %v4879_v48 }
 0x240   : > { %v1384_v6 = vadd.f32 %v5545_v13, %v1345_v31  ;;  %v1346_v24 = vmul.f32 %v4927_v40, %v5540_v59  ;;  %v1623_v63 = vsel %vm759_vm0, %v1547_v3, 0.0  ;;  %v1284_v50 = vpop.f32.mrb[43].mxu1  ;;  %v1548_v57 = vmul.f32 %v5560_v47, %v1509_v30 }
 0x241   : > { %v1382_v46 = vadd.f32 %v5545_v13, %v1343_v27  ;;  %1624 = vadd.xlane.f32.xlu0 %v1623_v63  ;;  %v1344_v32 = vmul.f32 %v5540_v59, %v1284_v50  ;;  %v1546_v26 = vmul.f32 %v5560_v47, %v1507_v36  ;;  %v1617_v53 = vsel %vm759_vm0, %v1545_v49, 0.0 }
 0x242   : > { %v1416_v54 = vmax.f32 %v1384_v6, 0.0  ;;  %v1385_v23 = vadd.f32 %v5545_v13, %v1346_v24  ;;  %v1626_v17 = vsel %vm759_vm0, %v1548_v57, 0.0  ;;  %v4861_v30 = vunpack.c.h.bf16 %v4879_v48 }
 0x243   : > { %v1620_v41 = vsel %vm759_vm0, %v1546_v26, 0.0  ;;  %v1414_v15 = vmax.f32 %v1382_v46, 0.0  ;;  %v1383_v19 = vadd.f32 %v5545_v13, %v1344_v32  ;;  %v4865_v63 = vunpack.c.h.bf16 %v4880_v16 }
 0x244   : > { %v1417_v14 = vmax.f32 %v1385_v23, 0.0  ;;  %1621 = vadd.xlane.f32.xlu1 %v1620_v41  ;;  %v1512_v45 = vadd.f32 %v4856_v12, %v1416_v54  ;;  %v5013_v26 = vmov 1966171168   ;;  %v1657_v23 = vpop.permute.xlu1 %1656  ;;  %v5703_v57 = vsub.s32 3, %v5107_v5 }
 0x245   : > { %1618 = vadd.xlane.f32.xlu0 %v1617_v53  ;;  %v4930_v25 = vpop.f32.mrb[44].mxu1  ;;  %v1415_v0 = vmax.f32 %v1383_v19, 0.0  ;;  %v1510_v28 = vadd.f32 %v4852_v1, %v1414_v15  ;;  %v2756_v54 = vunpack.c.l.s4 %v5013_v26  ;;  %v5697_v41 = vrot.slane %v1657_v23, %v5149_v18 }
 0x246   : > { %v1513_v37 = vadd.f32 %v4857_v4, %v1417_v14  ;;  %v1551_v42 = vmul.f32 %v5560_v47, %v1512_v45  ;;  %v1349_v55 = vmul.f32 %v4930_v25, %v5540_v59  ;;  %v1297_v10 = vpop.f32.mrb[45].mxu1  ;;  %v5700_v53 = vsub.s32 2, %v5107_v5 }
 0x247   : > { %v1347_v20 = vmul.f32 %v5540_v59, %v1297_v10  ;;  %v4931_v9 = vpop.f32.mrb[46].mxu1  ;;  %v1549_v51 = vmul.f32 %v5560_v47, %v1510_v28  ;;  %v1511_v61 = vadd.f32 %v4853_v8, %v1415_v0  ;;  %v2757_v4 = vunpack.c.0.s8 %v2756_v54 }
 0x248   : > { %v1552_v52 = vmul.f32 %v5560_v47, %v1513_v37  ;;  %v1388_v21 = vadd.f32 %v5545_v13, %v1349_v55  ;;  %v1300_v29 = vpop.f32.mrb[47].mxu1  ;;  %v1635_v38 = vsel %vm759_vm0, %v1551_v42, 0.0  ;;  %v1350_v2 = vmul.f32 %v4931_v9, %v5540_v59 }
 0x249   : > { %1627 = vadd.xlane.f32.xlu0 %v1626_v17  ;;  %v1386_v43 = vadd.f32 %v5545_v13, %v1347_v20  ;;  %v1348_v56 = vmul.f32 %v5540_v59, %v1300_v29  ;;  %v1629_v22 = vsel %vm759_vm0, %v1549_v51, 0.0  ;;  %v1550_v35 = vmul.f32 %v5560_v47, %v1511_v61 }
 0x24a   : > { %v1638_v34 = vsel %vm759_vm0, %v1552_v52, 0.0  ;;  %v1420_v39 = vmax.f32 %v1388_v21, 0.0  ;;  %v1389_v40 = vadd.f32 %v5545_v13, %v1350_v2  ;;  %v5709_v15 = vsub.s32 5, %v5107_v5 }
 0x24b   : > { %1639 = vadd.xlane.f32.xlu1 %v1638_v34  ;;  %v1418_v62 = vmax.f32 %v1386_v43, 0.0  ;;  %v1387_v31 = vadd.f32 %v5545_v13, %v1348_v56  ;;  %v1632_v49 = vsel %vm759_vm0, %v1550_v35, 0.0  ;;  %v5712_v14 = vsub.s32 6, %v5107_v5 }
 0x24c   : > { %v1516_v11 = vadd.f32 %v4864_v33, %v1420_v39  ;;  %v1421_v59 = vmax.f32 %v1389_v40, 0.0  ;;  %v5715_v19 = vsub.s32 7, %v5107_v5  ;;  %v5720_v42 = vsub.s32 %v2757_v4, %v5107_v5 }
 0x24d   : > { %1636 = vadd.xlane.f32.xlu0 %v1635_v38  ;;  %v1514_v27 = vadd.f32 %v4860_v60, %v1418_v62  ;;  %v1419_v36 = vmax.f32 %v1387_v31, 0.0 }
 0x24e   : > { %v1555_v3 = vmul.f32 %v5560_v47, %v1516_v11  ;;  %v1517_v58 = vadd.f32 %v4865_v63, %v1421_v59 }
 0x24f   : > { %v1553_v6 = vmul.f32 %v5560_v47, %v1514_v27  ;;  %v1515_v24 = vadd.f32 %v4861_v30, %v1419_v36 }
 0x250   : > { %v1647_v44 = vsel %vm759_vm0, %v1555_v3, 0.0  ;;  %v1556_v46 = vmul.f32 %v5560_v47, %v1517_v58 }
 0x251   : > { %1630 = vadd.xlane.f32.xlu0 %v1629_v22  ;;  %v1641_v50 = vsel %vm759_vm0, %v1553_v6, 0.0  ;;  %v1554_v12 = vmul.f32 %v5560_v47, %v1515_v24  ;;  %v5706_v47 = vsub.s32 4, %v5107_v5 }
 0x252   : > { %v1650_v32 = vsel %vm759_vm0, %v1556_v46, 0.0 }
 0x253   : > { %v1644_v13 = vsel %vm759_vm0, %v1554_v12, 0.0 }
 0x255   : > { %1633 = vadd.xlane.f32.xlu0 %v1632_v49 }
 0x259   : > { %1648 = vadd.xlane.f32.xlu0 %v1647_v44 }
 0x25d   : > { %1642 = vadd.xlane.f32.xlu0 %v1641_v50 }
 0x261   : > { %1645 = vadd.xlane.f32.xlu0 %v1644_v13 }
 0x265   : > { %1651 = vadd.xlane.f32.xlu0 %v1650_v32 }
 0x27e   : > { %v1565_v1 = vpop.xlane.xlu1 %1564 }
 0x27f   : > { %v1665_v45 = vadd.f32 %v5697_v41, %v1565_v1  ;;  %v1559_v25 = vpop.xlane.xlu0 %1558 }
 0x280   : > { %v1663_v37 = vadd.f32 %v5697_v41, %v1559_v25 }
 0x281   : > { %v1794_v55 = vrot.slane %v1665_v45, %v5149_v18  ;;  %v1798_v10 = vrot.slane %v1665_v45, %v5129_v7  ;;  %v1802_v16 = vrot.slane %v1665_v45, %v5700_v53  ;;  %v1806_v17 = vrot.slane %v1665_v45, %v5703_v57 }
 0x282   : > { %v1568_v20 = vpop.xlane.xlu1 %1567  ;;  %v1810_v9 = vrot.slane %v1665_v45, %v5706_v47  ;;  %v1814_v8 = vrot.slane %v1665_v45, %v5709_v15  ;;  %v1818_v0 = vrot.slane %v1665_v45, %v5712_v14  ;;  %v1822_v52 = vrot.slane %v1665_v45, %v5715_v19 }
 0x283   : > { %v1666_v21 = vadd.f32 %v5697_v41, %v1568_v20  ;;  %v1562_v28 = vpop.xlane.xlu0 %1561  ;;  %v2849_v29 = vcombine.low %v1794_v55, %v1798_v10  ;;  %v2850_v33 = vcombine.low %v1802_v16, %v1806_v17  ;;  %v1730_v34 = vrot.slane %v1663_v37, %v5149_v18 }
 0x284   : > { %v5733_v38 = vadd.f32 %v5697_v41, %v1562_v28  ;;  %v2851_v39 = vcombine.low %v1810_v9, %v1814_v8  ;;  %v2852_v43 = vcombine.low %v1818_v0, %v1822_v52  ;;  %v1734_v48 = vrot.slane %v1663_v37, %v5129_v7 }
 0x285   : > { %v2859_v51 = vrot.slane %v2849_v29, %v5720_v42  ;;  %v2866_v56 = vrot.slane %v2850_v33, %v5720_v42  ;;  %v1738_v61 = vrot.slane %v1663_v37, %v5700_v53  ;;  %v1742_v62 = vrot.slane %v1663_v37, %v5703_v57 }
 0x286   : > { %v2873_v11 = vrot.slane %v2851_v39, %v5720_v42  ;;  %v2880_v60 = vrot.slane %v2852_v43, %v5720_v42  ;;  %v1746_v22 = vrot.slane %v1663_v37, %v5706_v47  ;;  %v1750_v2 = vrot.slane %v1663_v37, %v5709_v15 }
 0x287   : > { %v2881_v31 = vcombine.low %v2859_v51, %v2866_v56  ;;  %v1754_v35 = vrot.slane %v1663_v37, %v5712_v14  ;;  %v1758_v3 = vrot.slane %v1663_v37, %v5715_v19  ;;  %v2751_v27 = vcombine.low %v1730_v34, %v1734_v48 }
 0x288   : > { %v2882_v40 = vcombine.low %v2873_v11, %v2880_v60  ;;  %v2752_v36 = vcombine.low %v1738_v61, %v1742_v62  ;;  %v2753_v49 = vcombine.low %v1746_v22, %v1750_v2  ;;  %v1826_v30 = vrot.slane %v1666_v21, %v5149_v18 }
 0x289   : > { %v2889_v44 = vrot.slane %v2881_v31, %v5720_v42  ;;  %v2754_v6 = vcombine.low %v1754_v35, %v1758_v3  ;;  %v2761_v59 = vrot.slane %v2751_v27, %v5720_v42  ;;  %v1830_v24 = vrot.slane %v1666_v21, %v5129_v7 }
 0x28a   : > { %v2896_v63 = vrot.slane %v2882_v40, %v5720_v42  ;;  %v2768_v50 = vrot.slane %v2752_v36, %v5720_v42  ;;  %v2775_v12 = vrot.slane %v2753_v49, %v5720_v42  ;;  %v1834_v58 = vrot.slane %v1666_v21, %v5700_v53 }
 0x28b   : > { %v2782_v13 = vrot.slane %v2754_v6, %v5720_v42  ;;  %v1838_v46 = vrot.slane %v1666_v21, %v5703_v57  ;;  %v1842_v32 = vrot.slane %v1666_v21, %v5706_v47  ;;  %v1846_v26 = vrot.slane %v1666_v21, %v5709_v15 }
 0x28c   : > { %v2897_v54 = vcombine.low %v2889_v44, %v2896_v63  ;;  %v2783_v23 = vcombine.low %v2761_v59, %v2768_v50  ;;  %v1850_v4 = vrot.slane %v1666_v21, %v5712_v14  ;;  %v1854_v1 = vrot.slane %v1666_v21, %v5715_v19 }
 0x28d   : > { %v2784_v45 = vcombine.low %v2775_v12, %v2782_v13  ;;  %v2898_v25 = vcombine.low %v1826_v30, %v1830_v24  ;;  %v2899_v37 = vcombine.low %v1834_v58, %v1838_v46  ;;  %v2900_v55 = vcombine.low %v1842_v32, %v1846_v26 }
 0x28e   : > { %4326 = vperm.xlu1 %4976, %v2897_v54   ;;  %v1577_v10 = vpop.xlane.xlu0 %1576  ;;  %v2791_v16 = vrot.slane %v2783_v23, %v5720_v42  ;;  %v2901_v17 = vcombine.low %v1850_v4, %v1854_v1  ;;  %v1762_v20 = vrot.slane %v5733_v38, %v5149_v18  ;;  %v1766_v9 = vrot.slane %v5733_v38, %v5129_v7 }
 0x28f   : > { %v1669_v8 = vadd.f32 %v5697_v41, %v1577_v10  ;;  %v2798_v0 = vrot.slane %v2784_v45, %v5720_v42  ;;  %v2908_v52 = vrot.slane %v2898_v25, %v5720_v42  ;;  %v2915_v21 = vrot.slane %v2899_v37, %v5720_v42 }
 0x290   : > { %v1580_v28 = vpop.xlane.xlu1 %1579  ;;  %v2922_v29 = vrot.slane %v2900_v55, %v5720_v42  ;;  %v2929_v33 = vrot.slane %v2901_v17, %v5720_v42  ;;  %v1770_v34 = vrot.slane %v5733_v38, %v5700_v53  ;;  %v1774_v39 = vrot.slane %v5733_v38, %v5703_v57 }
 0x291   : > { %v2799_v43 = vcombine.low %v2791_v16, %v2798_v0  ;;  %v5776_v48 = vadd.f32 %v5697_v41, %v1580_v28  ;;  %v2930_v51 = vcombine.low %v2908_v52, %v2915_v21  ;;  %v1778_v56 = vrot.slane %v5733_v38, %v5706_v47 }
 0x292   : > { %v2931_v61 = vcombine.low %v2922_v29, %v2929_v33  ;;  %v1571_v62 = vpop.xlane.xlu0 %1570  ;;  %v1782_v11 = vrot.slane %v5733_v38, %v5709_v15  ;;  %v1786_v60 = vrot.slane %v5733_v38, %v5712_v14  ;;  %v1790_v22 = vrot.slane %v5733_v38, %v5715_v19 }
 0x293   : > { %4320 = vperm.xlu0 %4977, %v2799_v43   ;;  %v2938_v2 = vrot.slane %v2930_v51, %v5720_v42  ;;  %v1667_v31 = vadd.f32 %v5697_v41, %v1571_v62  ;;  %v2800_v35 = vcombine.low %v1762_v20, %v1766_v9  ;;  %v2801_v3 = vcombine.low %v1770_v34, %v1774_v39 }
 0x294   : > { %v2945_v27 = vrot.slane %v2931_v61, %v5720_v42  ;;  %v1574_v40 = vpop.xlane.xlu1 %1573  ;;  %v2802_v36 = vcombine.low %v1778_v56, %v1782_v11  ;;  %v2803_v49 = vcombine.low %v1786_v60, %v1790_v22  ;;  %v1922_v30 = vrot.slane %v1669_v8, %v5149_v18 }
 0x295   : > { %v5791_v44 = vadd.f32 %v5697_v41, %v1574_v40  ;;  %v2810_v6 = vrot.slane %v2800_v35, %v5720_v42  ;;  %v2817_v38 = vrot.slane %v2801_v3, %v5720_v42  ;;  %v1926_v59 = vrot.slane %v1669_v8, %v5129_v7 }
 0x296   : > { %v2946_v24 = vcombine.low %v2938_v2, %v2945_v27  ;;  %v2824_v63 = vrot.slane %v2802_v36, %v5720_v42  ;;  %v2831_v50 = vrot.slane %v2803_v49, %v5720_v42  ;;  %v1930_v12 = vrot.slane %v1669_v8, %v5700_v53 }
 0x297   : > { %v2832_v58 = vcombine.low %v2810_v6, %v2817_v38  ;;  %v1934_v13 = vrot.slane %v1669_v8, %v5703_v57  ;;  %v1938_v46 = vrot.slane %v1669_v8, %v5706_v47  ;;  %v1942_v32 = vrot.slane %v1669_v8, %v5709_v15 }
 0x298   : > { %4329 = vperm.xlu1 %4976, %v2946_v24   ;;  %v2833_v26 = vcombine.low %v2824_v63, %v2831_v50  ;;  %v1946_v54 = vrot.slane %v1669_v8, %v5712_v14  ;;  %v1950_v23 = vrot.slane %v1669_v8, %v5715_v19  ;;  %v3045_v4 = vcombine.low %v1922_v30, %v1926_v59 }
 0x299   : > { %v2840_v1 = vrot.slane %v2832_v58, %v5720_v42  ;;  %v3046_v45 = vcombine.low %v1930_v12, %v1934_v13  ;;  %v3047_v25 = vcombine.low %v1938_v46, %v1942_v32  ;;  %v1858_v37 = vrot.slane %v1667_v31, %v5149_v18 }
 0x29a   : > { %v2847_v55 = vrot.slane %v2833_v26, %v5720_v42  ;;  %v3048_v10 = vcombine.low %v1946_v54, %v1950_v23  ;;  %v3055_v16 = vrot.slane %v3045_v4, %v5720_v42  ;;  %v1862_v17 = vrot.slane %v1667_v31, %v5129_v7 }
 0x29b   : > { %v3062_v20 = vrot.slane %v3046_v45, %v5720_v42  ;;  %v3069_v9 = vrot.slane %v3047_v25, %v5720_v42  ;;  %v1866_v8 = vrot.slane %v1667_v31, %v5700_v53  ;;  %v1870_v0 = vrot.slane %v1667_v31, %v5703_v57 }
 0x29c   : > { %v2848_v52 = vcombine.low %v2840_v1, %v2847_v55  ;;  %v3076_v21 = vrot.slane %v3048_v10, %v5720_v42  ;;  %v1874_v28 = vrot.slane %v1667_v31, %v5706_v47  ;;  %v1878_v29 = vrot.slane %v1667_v31, %v5709_v15 }
 0x29d   : > { %v3077_v33 = vcombine.low %v3055_v16, %v3062_v20  ;;  %v1882_v34 = vrot.slane %v1667_v31, %v5712_v14  ;;  %v1886_v39 = vrot.slane %v1667_v31, %v5715_v19  ;;  %v2947_v43 = vcombine.low %v1858_v37, %v1862_v17 }
 0x29e   : > { %4323 = vperm.xlu1 %4976, %v2848_v52   ;;  %v3078_v51 = vcombine.low %v3069_v9, %v3076_v21  ;;  %v1589_v56 = vpop.xlane.xlu0 %1588  ;;  %v2948_v61 = vcombine.low %v1866_v8, %v1870_v0  ;;  %v2949_v62 = vcombine.low %v1874_v28, %v1878_v29  ;;  %v1954_v11 = vrot.slane %v5776_v48, %v5149_v18 }
 0x29f   : > { %v3085_v60 = vrot.slane %v3077_v33, %v5720_v42  ;;  %v5822_v22 = vadd.f32 %v5697_v41, %v1589_v56  ;;  %v2950_v2 = vcombine.low %v1882_v34, %v1886_v39  ;;  %v2957_v35 = vrot.slane %v2947_v43, %v5720_v42 }
 0x2a0   : > { %v3092_v3 = vrot.slane %v3078_v51, %v5720_v42  ;;  %v1592_v31 = vpop.xlane.xlu1 %1591  ;;  %v2964_v27 = vrot.slane %v2948_v61, %v5720_v42  ;;  %v2971_v40 = vrot.slane %v2949_v62, %v5720_v42  ;;  %v1958_v36 = vrot.slane %v5776_v48, %v5129_v7 }
 0x2a1   : > { %v5831_v49 = vadd.f32 %v5697_v41, %v1592_v31  ;;  %v2978_v30 = vrot.slane %v2950_v2, %v5720_v42  ;;  %v1962_v6 = vrot.slane %v5776_v48, %v5700_v53  ;;  %v1966_v38 = vrot.slane %v5776_v48, %v5703_v57 }
 0x2a2   : > { %v3093_v59 = vcombine.low %v3085_v60, %v3092_v3  ;;  %v2979_v24 = vcombine.low %v2957_v35, %v2964_v27  ;;  %v1583_v63 = vpop.xlane.xlu0 %1582  ;;  %v1970_v50 = vrot.slane %v5776_v48, %v5706_v47  ;;  %v1974_v12 = vrot.slane %v5776_v48, %v5709_v15 }
 0x2a3   : > { %v2980_v58 = vcombine.low %v2971_v40, %v2978_v30  ;;  %v5843_v13 = vadd.f32 %v5697_v41, %v1583_v63  ;;  %v1978_v46 = vrot.slane %v5776_v48, %v5712_v14  ;;  %v1982_v32 = vrot.slane %v5776_v48, %v5715_v19 }
 0x2a4   : > { %4338 = vperm.xlu1 %4976, %v3093_v59   ;;  %v2987_v26 = vrot.slane %v2979_v24, %v5720_v42  ;;  %v1586_v54 = vpop.xlane.xlu1 %1585  ;;  %v3094_v23 = vcombine.low %v1954_v11, %v1958_v36  ;;  %v3095_v4 = vcombine.low %v1962_v6, %v1966_v38  ;;  %v3096_v1 = vcombine.low %v1970_v50, %v1974_v12 }
 0x2a5   : > { %v2994_v45 = vrot.slane %v2980_v58, %v5720_v42  ;;  %v5852_v25 = vadd.f32 %v5697_v41, %v1586_v54  ;;  %v3097_v37 = vcombine.low %v1978_v46, %v1982_v32  ;;  %v1890_v55 = vrot.slane %v5791_v44, %v5149_v18 }
 0x2a6   : > { %v3104_v10 = vrot.slane %v3094_v23, %v5720_v42  ;;  %v3111_v48 = vrot.slane %v3095_v4, %v5720_v42  ;;  %v3118_v16 = vrot.slane %v3096_v1, %v5720_v42  ;;  %v1894_v17 = vrot.slane %v5791_v44, %v5129_v7 }
 0x2a7   : > { %v2995_v20 = vcombine.low %v2987_v26, %v2994_v45  ;;  %v3125_v9 = vrot.slane %v3097_v37, %v5720_v42  ;;  %v1898_v8 = vrot.slane %v5791_v44, %v5700_v53  ;;  %v1902_v0 = vrot.slane %v5791_v44, %v5703_v57 }
 0x2a8   : > { %v3126_v52 = vcombine.low %v3104_v10, %v3111_v48  ;;  %v1906_v21 = vrot.slane %v5791_v44, %v5706_v47  ;;  %v1910_v28 = vrot.slane %v5791_v44, %v5709_v15  ;;  %v1914_v29 = vrot.slane %v5791_v44, %v5712_v14 }
 0x2a9   : > { %4332 = vperm.xlu1 %4976, %v2995_v20   ;;  %v3127_v33 = vcombine.low %v3118_v16, %v3125_v9  ;;  %v1918_v34 = vrot.slane %v5791_v44, %v5715_v19  ;;  %v2996_v39 = vcombine.low %v1890_v55, %v1894_v17  ;;  %v2997_v43 = vcombine.low %v1898_v8, %v1902_v0 }
 0x2aa   : > { %v3134_v51 = vrot.slane %v3126_v52, %v5720_v42  ;;  %v2998_v56 = vcombine.low %v1906_v21, %v1910_v28  ;;  %v2050_v61 = vrot.slane %v5822_v22, %v5149_v18  ;;  %v2054_v62 = vrot.slane %v5822_v22, %v5129_v7 }
 0x2ab   : > { %v3141_v11 = vrot.slane %v3127_v33, %v5720_v42  ;;  %v2999_v60 = vcombine.low %v1914_v29, %v1918_v34  ;;  %v3006_v2 = vrot.slane %v2996_v39, %v5720_v42  ;;  %v3013_v35 = vrot.slane %v2997_v43, %v5720_v42 }
 0x2ac   : > { %v3020_v44 = vrot.slane %v2998_v56, %v5720_v42  ;;  %v2058_v3 = vrot.slane %v5822_v22, %v5700_v53  ;;  %v2062_v31 = vrot.slane %v5822_v22, %v5703_v57  ;;  %v2066_v27 = vrot.slane %v5822_v22, %v5706_v47 }
 0x2ad   : > { %v3142_v40 = vcombine.low %v3134_v51, %v3141_v11  ;;  %v3027_v36 = vrot.slane %v2999_v60, %v5720_v42  ;;  %v3028_v30 = vcombine.low %v3006_v2, %v3013_v35  ;;  %v2070_v6 = vrot.slane %v5822_v22, %v5709_v15 }
 0x2ae   : > { %v2074_v38 = vrot.slane %v5822_v22, %v5712_v14  ;;  %v2078_v59 = vrot.slane %v5822_v22, %v5715_v19  ;;  %v3241_v24 = vcombine.low %v2050_v61, %v2054_v62  ;;  %v3242_v63 = vcombine.low %v2058_v3, %v2062_v31  ;;  %v1601_v50 = vpop.xlane.xlu0 %1600 }
 0x2af   : > { %4341 = vperm.xlu1 %4976, %v3142_v40   ;;  %v3029_v12 = vcombine.low %v3020_v44, %v3027_v36  ;;  %v3036_v58 = vrot.slane %v3028_v30, %v5720_v42  ;;  %v3243_v46 = vcombine.low %v2066_v27, %v2070_v6  ;;  %v5898_v32 = vadd.f32 %v5697_v41, %v1601_v50 }
 0x2b0   : > { %v3244_v26 = vcombine.low %v2074_v38, %v2078_v59  ;;  %v3251_v54 = vrot.slane %v3241_v24, %v5720_v42  ;;  %v3258_v23 = vrot.slane %v3242_v63, %v5720_v42  ;;  %v1604_v4 = vpop.xlane.xlu1 %1603  ;;  %v1986_v22 = vrot.slane %v5843_v13, %v5149_v18 }
 0x2b1   : > { %v3043_v1 = vrot.slane %v3029_v12, %v5720_v42  ;;  %v3265_v45 = vrot.slane %v3243_v46, %v5720_v42  ;;  %v5907_v37 = vadd.f32 %v5697_v41, %v1604_v4  ;;  %v1990_v55 = vrot.slane %v5843_v13, %v5129_v7 }
 0x2b2   : > { %v3272_v10 = vrot.slane %v3244_v26, %v5720_v42  ;;  %v3273_v48 = vcombine.low %v3251_v54, %v3258_v23  ;;  %v1994_v16 = vrot.slane %v5843_v13, %v5700_v53  ;;  %v1998_v17 = vrot.slane %v5843_v13, %v5703_v57  ;;  %v1595_v20 = vpop.xlane.xlu0 %1594 }
 0x2b3   : > { %v3044_v9 = vcombine.low %v3036_v58, %v3043_v1  ;;  %v2002_v8 = vrot.slane %v5843_v13, %v5706_v47  ;;  %v2006_v0 = vrot.slane %v5843_v13, %v5709_v15  ;;  %v2010_v52 = vrot.slane %v5843_v13, %v5712_v14 }
 0x2b4   : > { %v3274_v21 = vcombine.low %v3265_v45, %v3272_v10  ;;  %v3281_v28 = vrot.slane %v3273_v48, %v5720_v42  ;;  %v2014_v29 = vrot.slane %v5843_v13, %v5715_v19  ;;  %v3143_v33 = vcombine.low %v1986_v22, %v1990_v55  ;;  %v1598_v34 = vpop.xlane.xlu1 %1597 }
 0x2b5   : > { %4335 = vperm.xlu1 %4976, %v3044_v9   ;;  %v3144_v39 = vcombine.low %v1994_v16, %v1998_v17  ;;  %v3145_v43 = vcombine.low %v2002_v8, %v2006_v0  ;;  %v5926_v51 = vadd.f32 %v5697_v41, %v1595_v20  ;;  %v5929_v56 = vadd.f32 %v5697_v41, %v1598_v34 }
 0x2b6   : > { %v3288_v61 = vrot.slane %v3274_v21, %v5720_v42  ;;  %v3146_v62 = vcombine.low %v2010_v52, %v2014_v29  ;;  %v3153_v11 = vrot.slane %v3143_v33, %v5720_v42  ;;  %v2082_v60 = vrot.slane %v5831_v49, %v5149_v18 }
 0x2b7   : > { %v3160_v13 = vrot.slane %v3144_v39, %v5720_v42  ;;  %v3167_v2 = vrot.slane %v3145_v43, %v5720_v42  ;;  %v2086_v35 = vrot.slane %v5831_v49, %v5129_v7  ;;  %v2090_v44 = vrot.slane %v5831_v49, %v5700_v53 }
 0x2b8   : > { %v3289_v3 = vcombine.low %v3281_v28, %v3288_v61  ;;  %v3174_v31 = vrot.slane %v3146_v62, %v5720_v42  ;;  %v2094_v27 = vrot.slane %v5831_v49, %v5703_v57  ;;  %v2098_v40 = vrot.slane %v5831_v49, %v5706_v47 }
 0x2b9   : > { %v3175_v36 = vcombine.low %v3153_v11, %v3160_v13  ;;  %v2102_v30 = vrot.slane %v5831_v49, %v5709_v15  ;;  %v2106_v6 = vrot.slane %v5831_v49, %v5712_v14  ;;  %v2110_v38 = vrot.slane %v5831_v49, %v5715_v19 }
 0x2ba   : > { %4350 = vperm.xlu1 %4976, %v3289_v3   ;;  %v3176_v59 = vcombine.low %v3167_v2, %v3174_v31  ;;  %v3290_v24 = vcombine.low %v2082_v60, %v2086_v35  ;;  %v3291_v63 = vcombine.low %v2090_v44, %v2094_v27  ;;  %v2018_v50 = vrot.slane %v5852_v25, %v5149_v18 }
 0x2bb   : > { %v3183_v12 = vrot.slane %v3175_v36, %v5720_v42  ;;  %v3292_v58 = vcombine.low %v2098_v40, %v2102_v30  ;;  %v3293_v46 = vcombine.low %v2106_v6, %v2110_v38  ;;  %v2022_v26 = vrot.slane %v5852_v25, %v5129_v7 }
 0x2bc   : > { %v3190_v54 = vrot.slane %v3176_v59, %v5720_v42  ;;  %v3300_v23 = vrot.slane %v3290_v24, %v5720_v42  ;;  %v3307_v49 = vrot.slane %v3291_v63, %v5720_v42  ;;  %v2026_v4 = vrot.slane %v5852_v25, %v5700_v53 }
 0x2bd   : > { %v3314_v22 = vrot.slane %v3292_v58, %v5720_v42  ;;  %v3321_v1 = vrot.slane %v3293_v46, %v5720_v42  ;;  %v2030_v45 = vrot.slane %v5852_v25, %v5703_v57  ;;  %v2034_v55 = vrot.slane %v5852_v25, %v5706_v47 }
 0x2be   : > { %v3191_v10 = vcombine.low %v3183_v12, %v3190_v54  ;;  %v3322_v48 = vcombine.low %v3300_v23, %v3307_v49  ;;  %v2038_v16 = vrot.slane %v5852_v25, %v5709_v15  ;;  %v2042_v17 = vrot.slane %v5852_v25, %v5712_v14  ;;  %v1613_v20 = vpop.xlane.xlu0 %1612 }
 0x2bf   : > { %v3323_v9 = vcombine.low %v3314_v22, %v3321_v1  ;;  %v2046_v8 = vrot.slane %v5852_v25, %v5715_v19  ;;  %v3192_v0 = vcombine.low %v2018_v50, %v2022_v26  ;;  %v3193_v52 = vcombine.low %v2026_v4, %v2030_v45 }
 0x2c0   : > { %4344 = vperm.xlu1 %4976, %v3191_v10   ;;  %v3330_v21 = vrot.slane %v3322_v48, %v5720_v42  ;;  %v3194_v28 = vcombine.low %v2034_v55, %v2038_v16  ;;  %v1681_v29 = vadd.f32 %v5697_v41, %v1613_v20  ;;  %v1616_v33 = vpop.xlane.xlu1 %1615  ;;  %v2114_v34 = vrot.slane %v5926_v51, %v5149_v18 }
 0x2c1   : > { %v3337_v39 = vrot.slane %v3323_v9, %v5720_v42  ;;  %v3195_v43 = vcombine.low %v2042_v17, %v2046_v8  ;;  %v3202_v61 = vrot.slane %v3192_v0, %v5720_v42  ;;  %v3209_v62 = vrot.slane %v3193_v52, %v5720_v42 }
 0x2c2   : > { %v3216_v25 = vrot.slane %v3194_v28, %v5720_v42  ;;  %v5983_v11 = vadd.f32 %v5697_v41, %v1616_v33  ;;  %v1607_v60 = vpop.xlane.xlu0 %1606  ;;  %v2306_v13 = vrot.slane %v1681_v29, %v5149_v18  ;;  %v2310_v2 = vrot.slane %v1681_v29, %v5129_v7 }
 0x2c3   : > { %v3338_v35 = vcombine.low %v3330_v21, %v3337_v39  ;;  %v3223_v44 = vrot.slane %v3195_v43, %v5720_v42  ;;  %v3224_v3 = vcombine.low %v3202_v61, %v3209_v62  ;;  %v1679_v31 = vadd.f32 %v5697_v41, %v1607_v60 }
 0x2c4   : > { %v1610_v27 = vpop.xlane.xlu1 %1609  ;;  %v2314_v40 = vrot.slane %v1681_v29, %v5700_v53  ;;  %v2318_v36 = vrot.slane %v1681_v29, %v5703_v57  ;;  %v2322_v30 = vrot.slane %v1681_v29, %v5706_v47  ;;  %v2326_v6 = vrot.slane %v1681_v29, %v5709_v15 }
 0x2c5   : > { %4353 = vperm.xlu1 %4976, %v3338_v35   ;;  %v3225_v38 = vcombine.low %v3216_v25, %v3223_v44  ;;  %v3232_v59 = vrot.slane %v3224_v3, %v5720_v42  ;;  %v5995_v24 = vadd.f32 %v5697_v41, %v1610_v27  ;;  %v2330_v63 = vrot.slane %v1681_v29, %v5712_v14 }
 0x2c6   : > { %v2334_v50 = vrot.slane %v1681_v29, %v5715_v19  ;;  %v3633_v12 = vcombine.low %v2306_v13, %v2310_v2  ;;  %v3634_v58 = vcombine.low %v2314_v40, %v2318_v36  ;;  %v3635_v46 = vcombine.low %v2322_v30, %v2326_v6 }
 0x2c7   : > { %v3239_v26 = vrot.slane %v3225_v38, %v5720_v42  ;;  %v2242_v54 = vrot.slane %v1679_v31, %v5149_v18  ;;  %v2246_v23 = vrot.slane %v1679_v31, %v5129_v7  ;;  %v2250_v49 = vrot.slane %v1679_v31, %v5700_v53 }
 0x2c8   : > { %v3636_v4 = vcombine.low %v2330_v63, %v2334_v50  ;;  %v3643_v22 = vrot.slane %v3633_v12, %v5720_v42  ;;  %v3650_v1 = vrot.slane %v3634_v58, %v5720_v42  ;;  %v3657_v45 = vrot.slane %v3635_v46, %v5720_v42 }
 0x2c9   : > { %v3240_v55 = vcombine.low %v3232_v59, %v3239_v26  ;;  %v2254_v10 = vrot.slane %v1679_v31, %v5703_v57  ;;  %v2258_v48 = vrot.slane %v1679_v31, %v5706_v47  ;;  %v2262_v16 = vrot.slane %v1679_v31, %v5709_v15 }
 0x2ca   : > { %v3664_v17 = vrot.slane %v3636_v4, %v5720_v42  ;;  %v3665_v20 = vcombine.low %v3643_v22, %v3650_v1  ;;  %v2266_v9 = vrot.slane %v1679_v31, %v5712_v14  ;;  %v2270_v8 = vrot.slane %v1679_v31, %v5715_v19 }
 0x2cb   : > { %4347 = vperm.xlu1 %4976, %v3240_v55   ;;  %v3535_v0 = vcombine.low %v2242_v54, %v2246_v23  ;;  %v3536_v52 = vcombine.low %v2250_v49, %v2254_v10  ;;  %v3537_v21 = vcombine.low %v2258_v48, %v2262_v16  ;;  %v2338_v28 = vrot.slane %v5983_v11, %v5149_v18 }
 0x2cc   : > { %v3666_v29 = vcombine.low %v3657_v45, %v3664_v17  ;;  %v3673_v33 = vrot.slane %v3665_v20, %v5720_v42  ;;  %v3538_v39 = vcombine.low %v2266_v9, %v2270_v8  ;;  %v2342_v43 = vrot.slane %v5983_v11, %v5129_v7 }
 0x2cd   : > { %v3545_v61 = vrot.slane %v3535_v0, %v5720_v42  ;;  %v3552_v62 = vrot.slane %v3536_v52, %v5720_v42  ;;  %v3559_v25 = vrot.slane %v3537_v21, %v5720_v42  ;;  %v2346_v60 = vrot.slane %v5983_v11, %v5700_v53 }
 0x2ce   : > { %v3680_v13 = vrot.slane %v3666_v29, %v5720_v42  ;;  %v1625_v2 = vpop.xlane.xlu0 %1624  ;;  %v3566_v35 = vrot.slane %v3538_v39, %v5720_v42  ;;  %v2350_v44 = vrot.slane %v5983_v11, %v5703_v57  ;;  %v2354_v3 = vrot.slane %v5983_v11, %v5706_v47 }
 0x2cf   : > { %v6029_v31 = vadd.f32 %v5697_v41, %v1625_v2  ;;  %v3567_v27 = vcombine.low %v3545_v61, %v3552_v62  ;;  %v2358_v40 = vrot.slane %v5983_v11, %v5709_v15  ;;  %v2362_v36 = vrot.slane %v5983_v11, %v5712_v14 }
 0x2d0   : > { %v3681_v30 = vcombine.low %v3673_v33, %v3680_v13  ;;  %v3568_v6 = vcombine.low %v3559_v25, %v3566_v35  ;;  %v2366_v38 = vrot.slane %v5983_v11, %v5715_v19  ;;  %v3682_v59 = vcombine.low %v2338_v28, %v2342_v43 }
 0x2d1   : > { %v1622_v63 = vpop.xlane.xlu1 %1621  ;;  %v3575_v50 = vrot.slane %v3567_v27, %v5720_v42  ;;  %v3683_v12 = vcombine.low %v2346_v60, %v2350_v44  ;;  %v3684_v58 = vcombine.low %v2354_v3, %v2358_v40  ;;  %v2274_v46 = vrot.slane %v5995_v24, %v5149_v18 }
 0x2d2   : > { %4374 = vperm.xlu0 %4977, %v3681_v30   ;;  %v6041_v26 = vadd.f32 %v5697_v41, %v1622_v63  ;;  %v3582_v54 = vrot.slane %v3568_v6, %v5720_v42  ;;  %v3685_v23 = vcombine.low %v2362_v36, %v2366_v38  ;;  %v3692_v49 = vrot.slane %v3682_v59, %v5720_v42  ;;  %v1619_v4 = vpop.xlane.xlu0 %1618 }
 0x2d3   : > { %v3699_v11 = vrot.slane %v3683_v12, %v5720_v42  ;;  %v3706_v22 = vrot.slane %v3684_v58, %v5720_v42  ;;  %v6048_v1 = vadd.f32 %v5697_v41, %v1619_v4  ;;  %v2278_v45 = vrot.slane %v5995_v24, %v5129_v7 }
 0x2d4   : > { %v3583_v55 = vcombine.low %v3575_v50, %v3582_v54  ;;  %v3713_v10 = vrot.slane %v3685_v23, %v5720_v42  ;;  %v2282_v48 = vrot.slane %v5995_v24, %v5700_v53  ;;  %v2286_v16 = vrot.slane %v5995_v24, %v5703_v57 }
 0x2d5   : > { %v3714_v17 = vcombine.low %v3692_v49, %v3699_v11  ;;  %v2290_v20 = vrot.slane %v5995_v24, %v5706_v47  ;;  %v2294_v9 = vrot.slane %v5995_v24, %v5709_v15  ;;  %v2298_v8 = vrot.slane %v5995_v24, %v5712_v14 }
 0x2d6   : > { %4368 = vperm.xlu1 %4976, %v3583_v55   ;;  %v3715_v0 = vcombine.low %v3706_v22, %v3713_v10  ;;  %v2302_v52 = vrot.slane %v5995_v24, %v5715_v19  ;;  %v3584_v21 = vcombine.low %v2274_v46, %v2278_v45  ;;  %v3585_v28 = vcombine.low %v2282_v48, %v2286_v16  ;;  %v1628_v29 = vpop.xlane.xlu0 %1627 }
 0x2d7   : > { %v3722_v33 = vrot.slane %v3714_v17, %v5720_v42  ;;  %v3586_v39 = vcombine.low %v2290_v20, %v2294_v9  ;;  %v6067_v43 = vadd.f32 %v5697_v41, %v1628_v29  ;;  %v2118_v61 = vrot.slane %v5926_v51, %v5129_v7 }
 0x2d8   : > { %v3729_v62 = vrot.slane %v3715_v0, %v5720_v42  ;;  %v3587_v25 = vcombine.low %v2298_v8, %v2302_v52  ;;  %v3594_v60 = vrot.slane %v3584_v21, %v5720_v42  ;;  %v3601_v13 = vrot.slane %v3585_v28, %v5720_v42  ;;  %v1640_v24 = vpop.xlane.xlu1 %1639 }
 0x2d9   : > { %v3608_v2 = vrot.slane %v3586_v39, %v5720_v42  ;;  %v6076_v35 = vadd.f32 %v5697_v41, %v1640_v24  ;;  %v2122_v44 = vrot.slane %v5926_v51, %v5700_v53  ;;  %v2126_v3 = vrot.slane %v5926_v51, %v5703_v57 }
 0x2da   : > { %v3730_v27 = vcombine.low %v3722_v33, %v3729_v62  ;;  %v3615_v40 = vrot.slane %v3587_v25, %v5720_v42  ;;  %v3616_v36 = vcombine.low %v3594_v60, %v3601_v13  ;;  %v2130_v30 = vrot.slane %v5926_v51, %v5706_v47  ;;  %v1637_v6 = vpop.xlane.xlu0 %1636 }
 0x2db   : > { %v2134_v38 = vrot.slane %v5926_v51, %v5709_v15  ;;  %v2138_v59 = vrot.slane %v5926_v51, %v5712_v14  ;;  %v2142_v63 = vrot.slane %v5926_v51, %v5715_v19  ;;  %v3339_v50 = vcombine.low %v2114_v34, %v2118_v61 }
 0x2dc   : > { %4377 = vperm.xlu0 %4977, %v3730_v27   ;;  %v3617_v12 = vcombine.low %v3608_v2, %v3615_v40  ;;  %v3624_v58 = vrot.slane %v3616_v36, %v5720_v42  ;;  %v3340_v46 = vcombine.low %v2122_v44, %v2126_v3  ;;  %v6096_v54 = vadd.f32 %v5697_v41, %v1637_v6 }
 0x2dd   : > { %v3341_v23 = vcombine.low %v2130_v30, %v2134_v38  ;;  %v3342_v49 = vcombine.low %v2138_v59, %v2142_v63  ;;  %v3349_v4 = vrot.slane %v3339_v50, %v5720_v42  ;;  %v2146_v11 = vrot.slane %v5929_v56, %v5149_v18 }
 0x2de   : > { %v3631_v22 = vrot.slane %v3617_v12, %v5720_v42  ;;  %v3356_v51 = vrot.slane %v3340_v46, %v5720_v42  ;;  %v2150_v34 = vrot.slane %v5929_v56, %v5129_v7  ;;  %v2154_v45 = vrot.slane %v5929_v56, %v5700_v53  ;;  %v1631_v3 = vpop.xlane.xlu0 %1630 }
 0x2df   : > { %v3363_v55 = vrot.slane %v3341_v23, %v5720_v42  ;;  %v3370_v10 = vrot.slane %v3342_v49, %v5720_v42  ;;  %v2158_v48 = vrot.slane %v5929_v56, %v5703_v57  ;;  %v2162_v16 = vrot.slane %v5929_v56, %v5706_v47 }
 0x2e0   : > { %v3632_v17 = vcombine.low %v3624_v58, %v3631_v22  ;;  %v3371_v20 = vcombine.low %v3349_v4, %v3356_v51  ;;  %v2166_v9 = vrot.slane %v5929_v56, %v5709_v15  ;;  %v2170_v8 = vrot.slane %v5929_v56, %v5712_v14 }
 0x2e1   : > { %v3372_v0 = vcombine.low %v3363_v55, %v3370_v10  ;;  %v2174_v52 = vrot.slane %v5929_v56, %v5715_v19  ;;  %v3388_v21 = vcombine.low %v2146_v11, %v2150_v34  ;;  %v3389_v28 = vcombine.low %v2154_v45, %v2158_v48 }
 0x2e2   : > { %4371 = vperm.xlu1 %4976, %v3632_v17   ;;  %v3379_v29 = vrot.slane %v3371_v20, %v5720_v42  ;;  %v3390_v33 = vcombine.low %v2162_v16, %v2166_v9  ;;  %v2434_v39 = vrot.slane %v6029_v31, %v5149_v18  ;;  %v2438_v61 = vrot.slane %v6029_v31, %v5129_v7 }
 0x2e3   : > { %v3386_v62 = vrot.slane %v3372_v0, %v5720_v42  ;;  %v3391_v25 = vcombine.low %v2170_v8, %v2174_v52  ;;  %v3398_v60 = vrot.slane %v3388_v21, %v5720_v42  ;;  %v3405_v13 = vrot.slane %v3389_v28, %v5720_v42 }
 0x2e4   : > { %v3412_v56 = vrot.slane %v3390_v33, %v5720_v42  ;;  %v2442_v24 = vrot.slane %v6029_v31, %v5700_v53  ;;  %v2446_v2 = vrot.slane %v6029_v31, %v5703_v57  ;;  %v2450_v44 = vrot.slane %v6029_v31, %v5706_v47 }
 0x2e5   : > { %v3387_v27 = vcombine.low %v3379_v29, %v3386_v62  ;;  %v3419_v40 = vrot.slane %v3391_v25, %v5720_v42  ;;  %v3420_v36 = vcombine.low %v3398_v60, %v3405_v13  ;;  %v2454_v30 = vrot.slane %v6029_v31, %v5709_v15 }
 0x2e6   : > { %v2458_v6 = vrot.slane %v6029_v31, %v5712_v14  ;;  %v2462_v38 = vrot.slane %v6029_v31, %v5715_v19  ;;  %v3829_v59 = vcombine.low %v2434_v39, %v2438_v61  ;;  %v3830_v63 = vcombine.low %v2442_v24, %v2446_v2  ;;  %v1634_v2 = vpop.xlane.xlu0 %1633 }
 0x2e7   : > { %4356 = vperm.xlu1 %4976, %v3387_v27   ;;  %v3421_v50 = vcombine.low %v3412_v56, %v3419_v40  ;;  %v3428_v12 = vrot.slane %v3420_v36, %v5720_v42  ;;  %v3831_v58 = vcombine.low %v2450_v44, %v2454_v30  ;;  %v6143_v46 = vadd.f32 %v5697_v41, %v1631_v3 }
 0x2e8   : > { %v3832_v23 = vcombine.low %v2458_v6, %v2462_v38  ;;  %v3839_v49 = vrot.slane %v3829_v59, %v5720_v42  ;;  %v3846_v4 = vrot.slane %v3830_v63, %v5720_v42  ;;  %v2178_v11 = vrot.slane %v5898_v32, %v5149_v18 }
 0x2e9   : > { %v3435_v31 = vrot.slane %v3421_v50, %v5720_v42  ;;  %v3853_v22 = vrot.slane %v3831_v58, %v5720_v42  ;;  %v2182_v51 = vrot.slane %v5898_v32, %v5129_v7  ;;  %v2186_v34 = vrot.slane %v5898_v32, %v5700_v53 }
 0x2ea   : > { %v3860_v45 = vrot.slane %v3832_v23, %v5720_v42  ;;  %v3861_v55 = vcombine.low %v3839_v49, %v3846_v4  ;;  %v2190_v10 = vrot.slane %v5898_v32, %v5703_v57  ;;  %v2194_v48 = vrot.slane %v5898_v32, %v5706_v47 }
 0x2eb   : > { %v3436_v16 = vcombine.low %v3428_v12, %v3435_v31  ;;  %v2198_v17 = vrot.slane %v5898_v32, %v5709_v15  ;;  %v2202_v20 = vrot.slane %v5898_v32, %v5712_v14  ;;  %v2206_v9 = vrot.slane %v5898_v32, %v5715_v19 }
 0x2ec   : > { %v3862_v8 = vcombine.low %v3853_v22, %v3860_v45  ;;  %v3869_v0 = vrot.slane %v3861_v55, %v5720_v42  ;;  %v3437_v52 = vcombine.low %v2178_v11, %v2182_v51  ;;  %v3438_v21 = vcombine.low %v2186_v34, %v2190_v10 }
 0x2ed   : > { %4359 = vperm.xlu1 %4976, %v3436_v16   ;;  %v3439_v28 = vcombine.low %v2194_v48, %v2198_v17  ;;  %v3440_v29 = vcombine.low %v2202_v20, %v2206_v9  ;;  %v2370_v33 = vrot.slane %v6048_v1, %v5149_v18  ;;  %v2374_v39 = vrot.slane %v6048_v1, %v5129_v7 }
 0x2ee   : > { %v3876_v61 = vrot.slane %v3862_v8, %v5720_v42  ;;  %v3447_v62 = vrot.slane %v3437_v52, %v5720_v42  ;;  %v3454_v32 = vrot.slane %v3438_v21, %v5720_v42  ;;  %v2378_v25 = vrot.slane %v6048_v1, %v5700_v53 }
 0x2ef   : > { %v3461_v60 = vrot.slane %v3439_v28, %v5720_v42  ;;  %v3468_v13 = vrot.slane %v3440_v29, %v5720_v42  ;;  %v2382_v56 = vrot.slane %v6048_v1, %v5703_v57  ;;  %v2386_v24 = vrot.slane %v6048_v1, %v5706_v47 }
 0x2f0   : > { %v3877_v44 = vcombine.low %v3869_v0, %v3876_v61  ;;  %v3469_v3 = vcombine.low %v3447_v62, %v3454_v32  ;;  %v2390_v27 = vrot.slane %v6048_v1, %v5709_v15  ;;  %v2394_v40 = vrot.slane %v6048_v1, %v5712_v14 }
 0x2f1   : > { %v3470_v36 = vcombine.low %v3461_v60, %v3468_v13  ;;  %v2398_v30 = vrot.slane %v6048_v1, %v5715_v19  ;;  %v3731_v6 = vcombine.low %v2370_v33, %v2374_v39  ;;  %v3732_v38 = vcombine.low %v2378_v25, %v2382_v56  ;;  %v1649_v33 = vpop.xlane.xlu0 %1648 }
 0x2f2   : > { %4386 = vperm.xlu0 %4977, %v3877_v44   ;;  %v3477_v59 = vrot.slane %v3469_v3, %v5720_v42  ;;  %v3733_v63 = vcombine.low %v2386_v24, %v2390_v27  ;;  %v6190_v50 = vadd.f32 %v5697_v41, %v1634_v2  ;;  %v2210_v12 = vrot.slane %v5907_v37, %v5149_v18 }
 0x2f3   : > { %v3484_v58 = vrot.slane %v3470_v36, %v5720_v42  ;;  %v3734_v23 = vcombine.low %v2394_v40, %v2398_v30  ;;  %v3741_v49 = vrot.slane %v3731_v6, %v5720_v42  ;;  %v3748_v4 = vrot.slane %v3732_v38, %v5720_v42 }
 0x2f4   : > { %v3755_v1 = vrot.slane %v3733_v63, %v5720_v42  ;;  %v2214_v11 = vrot.slane %v5907_v37, %v5129_v7  ;;  %v2218_v31 = vrot.slane %v5907_v37, %v5700_v53  ;;  %v2222_v22 = vrot.slane %v5907_v37, %v5703_v57 }
 0x2f5   : > { %v3485_v51 = vcombine.low %v3477_v59, %v3484_v58  ;;  %v3762_v34 = vrot.slane %v3734_v23, %v5720_v42  ;;  %v3763_v45 = vcombine.low %v3741_v49, %v3748_v4  ;;  %v2226_v55 = vrot.slane %v5907_v37, %v5706_v47  ;;  %v1643_v23 = vpop.xlane.xlu0 %1642 }
 0x2f6   : > { %v2230_v10 = vrot.slane %v5907_v37, %v5709_v15  ;;  %v2234_v48 = vrot.slane %v5907_v37, %v5712_v14  ;;  %v2238_v16 = vrot.slane %v5907_v37, %v5715_v19  ;;  %v3486_v17 = vcombine.low %v2210_v12, %v2214_v11 }
 0x2f7   : > { %4362 = vperm.xlu1 %4976, %v3485_v51   ;;  %v3764_v20 = vcombine.low %v3755_v1, %v3762_v34  ;;  %v3771_v9 = vrot.slane %v3763_v45, %v5720_v42  ;;  %v3487_v8 = vcombine.low %v2218_v31, %v2222_v22  ;;  %v2466_v0 = vrot.slane %v6067_v43, %v5149_v18 }
 0x2f8   : > { %v3488_v52 = vcombine.low %v2226_v55, %v2230_v10  ;;  %v3489_v21 = vcombine.low %v2234_v48, %v2238_v16  ;;  %v3496_v28 = vrot.slane %v3486_v17, %v5720_v42  ;;  %v2470_v29 = vrot.slane %v6067_v43, %v5129_v7 }
 0x2f9   : > { %v3778_v39 = vrot.slane %v3764_v20, %v5720_v42  ;;  %v3503_v37 = vrot.slane %v3487_v8, %v5720_v42  ;;  %v2474_v61 = vrot.slane %v6067_v43, %v5700_v53  ;;  %v2478_v62 = vrot.slane %v6067_v43, %v5703_v57 }
 0x2fa   : > { %v3510_v32 = vrot.slane %v3488_v52, %v5720_v42  ;;  %v3517_v25 = vrot.slane %v3489_v21, %v5720_v42  ;;  %v2482_v60 = vrot.slane %v6067_v43, %v5706_v47  ;;  %v2486_v13 = vrot.slane %v6067_v43, %v5709_v15 }
 0x2fb   : > { %v3779_v56 = vcombine.low %v3771_v9, %v3778_v39  ;;  %v3518_v24 = vcombine.low %v3496_v28, %v3503_v37  ;;  %v2490_v2 = vrot.slane %v6067_v43, %v5712_v14  ;;  %v2494_v44 = vrot.slane %v6067_v43, %v5715_v19  ;;  %v1646_v39 = vpop.xlane.xlu0 %1645 }
 0x2fc   : > { %v3519_v3 = vcombine.low %v3510_v32, %v3517_v25  ;;  %v3878_v27 = vcombine.low %v2466_v0, %v2470_v29  ;;  %v3879_v40 = vcombine.low %v2474_v61, %v2478_v62  ;;  %v3880_v36 = vcombine.low %v2482_v60, %v2486_v13 }
 0x2fd   : > { %4380 = vperm.xlu0 %4977, %v3779_v56   ;;  %v3526_v30 = vrot.slane %v3518_v24, %v5720_v42  ;;  %v3881_v6 = vcombine.low %v2490_v2, %v2494_v44  ;;  %v6237_v38 = vadd.f32 %v5697_v41, %v1649_v33  ;;  %v2402_v59 = vrot.slane %v6041_v26, %v5149_v18 }
 0x2fe   : > { %v3533_v63 = vrot.slane %v3519_v3, %v5720_v42  ;;  %v3888_v12 = vrot.slane %v3878_v27, %v5720_v42  ;;  %v3895_v43 = vrot.slane %v3879_v40, %v5720_v42  ;;  %v3902_v58 = vrot.slane %v3880_v36, %v5720_v42 }
 0x2ff   : > { %v3909_v49 = vrot.slane %v3881_v6, %v5720_v42  ;;  %v2406_v4 = vrot.slane %v6041_v26, %v5129_v7  ;;  %v2410_v1 = vrot.slane %v6041_v26, %v5700_v53  ;;  %v2414_v11 = vrot.slane %v6041_v26, %v5703_v57 }
 0x300   : > { %v3534_v31 = vcombine.low %v3526_v30, %v3533_v63  ;;  %v3910_v22 = vcombine.low %v3888_v12, %v3895_v43  ;;  %v2418_v51 = vrot.slane %v6041_v26, %v5706_v47  ;;  %v2422_v34 = vrot.slane %v6041_v26, %v5709_v15 }
 0x301   : > { %v3911_v45 = vcombine.low %v3902_v58, %v3909_v49  ;;  %v2426_v55 = vrot.slane %v6041_v26, %v5712_v14  ;;  %v2430_v10 = vrot.slane %v6041_v26, %v5715_v19  ;;  %v3780_v48 = vcombine.low %v2402_v59, %v2406_v4  ;;  %v1652_v49 = vpop.xlane.xlu0 %1651 }
 0x302   : > { %4365 = vperm.xlu1 %4976, %v3534_v31   ;;  %v3918_v16 = vrot.slane %v3910_v22, %v5720_v42  ;;  %v3781_v17 = vcombine.low %v2410_v1, %v2414_v11  ;;  %v3782_v20 = vcombine.low %v2418_v51, %v2422_v34  ;;  %v6262_v9 = vadd.f32 %v5697_v41, %v1643_v23 }
 0x303   : > { %v3925_v8 = vrot.slane %v3911_v45, %v5720_v42  ;;  %v3783_v0 = vcombine.low %v2426_v55, %v2430_v10  ;;  %v3790_v52 = vrot.slane %v3780_v48, %v5720_v42  ;;  %v2562_v21 = vrot.slane %v6096_v54, %v5149_v18 }
 0x304   : > { %v3797_v28 = vrot.slane %v3781_v17, %v5720_v42  ;;  %v3804_v26 = vrot.slane %v3782_v20, %v5720_v42  ;;  %v2566_v29 = vrot.slane %v6096_v54, %v5129_v7  ;;  %v2570_v33 = vrot.slane %v6096_v54, %v5700_v53 }
 0x305   : > { %v3926_v37 = vcombine.low %v3918_v16, %v3925_v8  ;;  %v3811_v61 = vrot.slane %v3783_v0, %v5720_v42  ;;  %v2574_v62 = vrot.slane %v6096_v54, %v5703_v57  ;;  %v2578_v32 = vrot.slane %v6096_v54, %v5706_v47 }
 0x306   : > { %v3812_v25 = vcombine.low %v3790_v52, %v3797_v28  ;;  %v2582_v60 = vrot.slane %v6096_v54, %v5709_v15  ;;  %v2586_v13 = vrot.slane %v6096_v54, %v5712_v14  ;;  %v2590_v56 = vrot.slane %v6096_v54, %v5715_v19 }
 0x307   : > { %4389 = vperm.xlu0 %4977, %v3926_v37   ;;  %v3813_v24 = vcombine.low %v3804_v26, %v3811_v61  ;;  %v4025_v2 = vcombine.low %v2562_v21, %v2566_v29  ;;  %v4026_v44 = vcombine.low %v2570_v33, %v2574_v62  ;;  %v6286_v3 = vadd.f32 %v5697_v41, %v1646_v39 }
 0x308   : > { %v3820_v27 = vrot.slane %v3812_v25, %v5720_v42  ;;  %v4027_v40 = vcombine.low %v2578_v32, %v2582_v60  ;;  %v4028_v36 = vcombine.low %v2586_v13, %v2590_v56  ;;  %v2498_v30 = vrot.slane %v6143_v46, %v5149_v18 }
 0x309   : > { %v3827_v6 = vrot.slane %v3813_v24, %v5720_v42  ;;  %v4035_v59 = vrot.slane %v4025_v2, %v5720_v42  ;;  %v4042_v54 = vrot.slane %v4026_v44, %v5720_v42  ;;  %v2502_v63 = vrot.slane %v6143_v46, %v5129_v7 }
 0x30a   : > { %v4049_v12 = vrot.slane %v4027_v40, %v5720_v42  ;;  %v4056_v43 = vrot.slane %v4028_v36, %v5720_v42  ;;  %v2506_v58 = vrot.slane %v6143_v46, %v5700_v53  ;;  %v2510_v23 = vrot.slane %v6143_v46, %v5703_v57 }
 0x30b   : > { %v3828_v4 = vcombine.low %v3820_v27, %v3827_v6  ;;  %v4057_v1 = vcombine.low %v4035_v59, %v4042_v54  ;;  %v2514_v11 = vrot.slane %v6143_v46, %v5706_v47  ;;  %v2518_v31 = vrot.slane %v6143_v46, %v5709_v15 }
 0x30c   : > { %v4058_v22 = vcombine.low %v4049_v12, %v4056_v43  ;;  %v2522_v51 = vrot.slane %v6143_v46, %v5712_v14  ;;  %v2526_v34 = vrot.slane %v6143_v46, %v5715_v19  ;;  %v3927_v45 = vcombine.low %v2498_v30, %v2502_v63 }
 0x30d   : > { %4383 = vperm.xlu0 %4977, %v3828_v4   ;;  %v4065_v55 = vrot.slane %v4057_v1, %v5720_v42  ;;  %v3928_v10 = vcombine.low %v2506_v58, %v2510_v23  ;;  %v3929_v48 = vcombine.low %v2514_v11, %v2518_v31  ;;  %v6312_v16 = vadd.f32 %v5697_v41, %v1652_v49 }
 0x30e   : > { %v4072_v17 = vrot.slane %v4058_v22, %v5720_v42  ;;  %v3930_v20 = vcombine.low %v2522_v51, %v2526_v34  ;;  %v3937_v8 = vrot.slane %v3927_v45, %v5720_v42  ;;  %v2594_v0 = vrot.slane %v6076_v35, %v5149_v18 }
 0x30f   : > { %v3944_v52 = vrot.slane %v3928_v10, %v5720_v42  ;;  %v3951_v46 = vrot.slane %v3929_v48, %v5720_v42  ;;  %v2598_v21 = vrot.slane %v6076_v35, %v5129_v7  ;;  %v2602_v28 = vrot.slane %v6076_v35, %v5700_v53 }
 0x310   : > { %v4073_v41 = vcombine.low %v4065_v55, %v4072_v17  ;;  %v3958_v26 = vrot.slane %v3930_v20, %v5720_v42  ;;  %v2606_v29 = vrot.slane %v6076_v35, %v5703_v57  ;;  %v2610_v33 = vrot.slane %v6076_v35, %v5706_v47 }
 0x311   : > { %v3959_v39 = vcombine.low %v3937_v8, %v3944_v52  ;;  %v2614_v37 = vrot.slane %v6076_v35, %v5709_v15  ;;  %v2618_v61 = vrot.slane %v6076_v35, %v5712_v14  ;;  %v2622_v62 = vrot.slane %v6076_v35, %v5715_v19 }
 0x312   : > { %4398 = vperm.xlu0 %4977, %v4073_v41   ;;  %v3960_v32 = vcombine.low %v3951_v46, %v3958_v26  ;;  %v4074_v25 = vcombine.low %v2594_v0, %v2598_v21  ;;  %v4075_v60 = vcombine.low %v2602_v28, %v2606_v29  ;;  %v2530_v13 = vrot.slane %v6190_v50, %v5149_v18 }
 0x313   : > { %v3967_v56 = vrot.slane %v3959_v39, %v5720_v42  ;;  %v4076_v24 = vcombine.low %v2610_v33, %v2614_v37  ;;  %v4077_v2 = vcombine.low %v2618_v61, %v2622_v62  ;;  %v2534_v44 = vrot.slane %v6190_v50, %v5129_v7 }
 0x314   : > { %v3974_v27 = vrot.slane %v3960_v32, %v5720_v42  ;;  %v4084_v40 = vrot.slane %v4074_v25, %v5720_v42  ;;  %v4091_v35 = vrot.slane %v4075_v60, %v5720_v42  ;;  %v2538_v36 = vrot.slane %v6190_v50, %v5700_v53 }
 0x315   : > { %v4098_v30 = vrot.slane %v4076_v24, %v5720_v42  ;;  %v4105_v6 = vrot.slane %v4077_v2, %v5720_v42  ;;  %v2542_v59 = vrot.slane %v6190_v50, %v5703_v57  ;;  %v2546_v54 = vrot.slane %v6190_v50, %v5706_v47 }
 0x316   : > { %v3975_v63 = vcombine.low %v3967_v56, %v3974_v27  ;;  %v4106_v12 = vcombine.low %v4084_v40, %v4091_v35  ;;  %v2550_v43 = vrot.slane %v6190_v50, %v5709_v15  ;;  %v2554_v58 = vrot.slane %v6190_v50, %v5712_v14 }
 0x317   : > { %v4107_v23 = vcombine.low %v4098_v30, %v4105_v6  ;;  %v2558_v49 = vrot.slane %v6190_v50, %v5715_v19  ;;  %v3976_v4 = vcombine.low %v2530_v13, %v2534_v44  ;;  %v3977_v1 = vcombine.low %v2538_v36, %v2542_v59 }
 0x318   : > { %4392 = vperm.xlu0 %4977, %v3975_v63   ;;  %v4114_v11 = vrot.slane %v4106_v12, %v5720_v42  ;;  %v3978_v31 = vcombine.low %v2546_v54, %v2550_v43  ;;  %v2690_v22 = vrot.slane %v6237_v38, %v5149_v18  ;;  %v2694_v51 = vrot.slane %v6237_v38, %v5129_v7 }
 0x319   : > { %v4121_v34 = vrot.slane %v4107_v23, %v5720_v42  ;;  %v3979_v45 = vcombine.low %v2554_v58, %v2558_v49  ;;  %v3986_v55 = vrot.slane %v3976_v4, %v5720_v42  ;;  %v3993_v10 = vrot.slane %v3977_v1, %v5720_v42 }
 0x31a   : > { %v4000_v50 = vrot.slane %v3978_v31, %v5720_v42  ;;  %v2698_v48 = vrot.slane %v6237_v38, %v5700_v53  ;;  %v2702_v17 = vrot.slane %v6237_v38, %v5703_v57  ;;  %v2706_v20 = vrot.slane %v6237_v38, %v5706_v47 }
 0x31b   : > { %v4122_v8 = vcombine.low %v4114_v11, %v4121_v34  ;;  %v4007_v0 = vrot.slane %v3979_v45, %v5720_v42  ;;  %v4008_v52 = vcombine.low %v3986_v55, %v3993_v10  ;;  %v2710_v46 = vrot.slane %v6237_v38, %v5709_v15 }
 0x31c   : > { %v2714_v21 = vrot.slane %v6237_v38, %v5712_v14  ;;  %v2718_v28 = vrot.slane %v6237_v38, %v5715_v19  ;;  %v4221_v41 = vcombine.low %v2690_v22, %v2694_v51  ;;  %v4222_v26 = vcombine.low %v2698_v48, %v2702_v17 }
 0x31d   : > { %4401 = vperm.xlu0 %4977, %v4122_v8   ;;  %v4009_v29 = vcombine.low %v4000_v50, %v4007_v0  ;;  %v4016_v33 = vrot.slane %v4008_v52, %v5720_v42  ;;  %v4223_v39 = vcombine.low %v2706_v20, %v2710_v46  ;;  %v2626_v37 = vrot.slane %v6262_v9, %v5149_v18 }
 0x31e   : > { %v4224_v61 = vcombine.low %v2714_v21, %v2718_v28  ;;  %v4231_v62 = vrot.slane %v4221_v41, %v5720_v42  ;;  %v4238_v32 = vrot.slane %v4222_v26, %v5720_v42  ;;  %v2630_v25 = vrot.slane %v6262_v9, %v5129_v7 }
 0x31f   : > { %v4023_v38 = vrot.slane %v4009_v29, %v5720_v42  ;;  %v4245_v60 = vrot.slane %v4223_v39, %v5720_v42  ;;  %v2634_v13 = vrot.slane %v6262_v9, %v5700_v53  ;;  %v2638_v56 = vrot.slane %v6262_v9, %v5703_v57 }
 0x320   : > { %v4252_v24 = vrot.slane %v4224_v61, %v5720_v42  ;;  %v4253_v2 = vcombine.low %v4231_v62, %v4238_v32  ;;  %v2642_v44 = vrot.slane %v6262_v9, %v5706_v47  ;;  %v2646_v27 = vrot.slane %v6262_v9, %v5709_v15 }
 0x321   : > { %v4024_v40 = vcombine.low %v4016_v33, %v4023_v38  ;;  %v2650_v35 = vrot.slane %v6262_v9, %v5712_v14  ;;  %v2654_v36 = vrot.slane %v6262_v9, %v5715_v19  ;;  %v4123_v30 = vcombine.low %v2626_v37, %v2630_v25 }
 0x322   : > { %v4254_v6 = vcombine.low %v4245_v60, %v4252_v24  ;;  %v4261_v59 = vrot.slane %v4253_v2, %v5720_v42  ;;  %v4124_v54 = vcombine.low %v2634_v13, %v2638_v56  ;;  %v4125_v63 = vcombine.low %v2642_v44, %v2646_v27 }
 0x323   : > { %4395 = vperm.xlu0 %4977, %v4024_v40   ;;  %v4126_v12 = vcombine.low %v2650_v35, %v2654_v36  ;;  %v4133_v43 = vrot.slane %v4123_v30, %v5720_v42  ;;  %v2658_v58 = vrot.slane %v6286_v3, %v5149_v18  ;;  %v2662_v23 = vrot.slane %v6286_v3, %v5129_v7  ;;  %v4327_v40 = vpop.permute.xlu1 %4326 }
 0x324   : > { %v4268_v49 = vrot.slane %v4254_v6, %v5720_v42  ;;  %v4140_v9 = vrot.slane %v4124_v54, %v5720_v42  ;;  %v4147_v4 = vrot.slane %v4125_v63, %v5720_v42  ;;  %v2666_v1 = vrot.slane %v6286_v3, %v5700_v53 }
 0x325   : > { %v4154_v11 = vrot.slane %v4126_v12, %v5720_v42  ;;  %v2670_v31 = vrot.slane %v6286_v3, %v5703_v57  ;;  %v2674_v22 = vrot.slane %v6286_v3, %v5706_v47  ;;  %v2678_v51 = vrot.slane %v6286_v3, %v5709_v15 }
 0x326   : > { %v4269_v34 = vcombine.low %v4261_v59, %v4268_v49  ;;  %v4155_v45 = vcombine.low %v4133_v43, %v4140_v9  ;;  %v2682_v55 = vrot.slane %v6286_v3, %v5712_v14  ;;  %v2686_v10 = vrot.slane %v6286_v3, %v5715_v19  ;;  %v4321_v59 = vpop.permute.xlu0 %4320 }
 0x327   : > { %v4156_v50 = vcombine.low %v4147_v4, %v4154_v11  ;;  %v4172_v48 = vcombine.low %v2658_v58, %v2662_v23  ;;  %v4173_v17 = vcombine.low %v2666_v1, %v2670_v31  ;;  %v4174_v20 = vcombine.low %v2674_v22, %v2678_v51  ;;  %v6453_v35 = vpop.permute.xlu1 %4329 }
 0x328   : > { %4410 = vperm.xlu0 %4977, %v4269_v34   ;;  %v4163_v8 = vrot.slane %v4155_v45, %v5720_v42  ;;  %v4175_v0 = vcombine.low %v2682_v55, %v2686_v10  ;;  %v2722_v52 = vrot.slane %v6312_v16, %v5149_v18  ;;  %v2726_v46 = vrot.slane %v6312_v16, %v5129_v7 }
 0x329   : > { %v4170_v21 = vrot.slane %v4156_v50, %v5720_v42  ;;  %v4182_v28 = vrot.slane %v4172_v48, %v5720_v42  ;;  %v4189_v3 = vrot.slane %v4173_v17, %v5720_v42  ;;  %v4196_v41 = vrot.slane %v4174_v20, %v5720_v42 }
 0x32a   : > { %v4203_v26 = vrot.slane %v4175_v0, %v5720_v42  ;;  %v2730_v29 = vrot.slane %v6312_v16, %v5700_v53  ;;  %v2734_v33 = vrot.slane %v6312_v16, %v5703_v57  ;;  %v2738_v18 = vrot.slane %v6312_v16, %v5706_v47 }
 0x32b   : > { %v4171_v7 = vcombine.low %v4163_v8, %v4170_v21  ;;  %v4204_v39 = vcombine.low %v4182_v28, %v4189_v3  ;;  %v2742_v37 = vrot.slane %v6312_v16, %v5709_v15  ;;  %v2746_v61 = vrot.slane %v6312_v16, %v5712_v14  ;;  %v4324_v36 = vpop.permute.xlu1 %4323 }
 0x32c   : > { %v4205_v62 = vcombine.low %v4196_v41, %v4203_v26  ;;  %v2750_v32 = vrot.slane %v6312_v16, %v5715_v19  ;;  %v4270_v25 = vcombine.low %v2722_v52, %v2726_v46  ;;  %v4271_v53 = vcombine.low %v2730_v29, %v2734_v33 }
 0x32d   : > { %4404 = vperm.xlu0 %4977, %v4171_v7   ;;  %v4212_v57 = vrot.slane %v4204_v39, %v5720_v42  ;;  %v4272_v38 = vcombine.low %v2738_v18, %v2742_v37  ;;  %v6576_v34 = vlaneseq }
 0x32e   : > { %v4219_v47 = vrot.slane %v4205_v62, %v5720_v42  ;;  %v4273_v60 = vcombine.low %v2746_v61, %v2750_v32  ;;  %v4280_v13 = vrot.slane %v4270_v25, %v5720_v42  ;;  %v4287_v15 = vrot.slane %v4271_v53, %v5720_v42 }
 0x32f   : > { %v4294_v56 = vrot.slane %v4272_v38, %v5720_v42  ;;  %v6455_v30 = vpop.permute.xlu1 %4338  ;;  %v6478_v45 = vand.u32 127, %v6576_v34  ;;  %vm4623_vm0 = vcmp.lt.s32.totalorder %v6576_v34, 256 }
 0x330   : > { %v4220_v14 = vcombine.low %v4212_v57, %v4219_v47  ;;  %v4301_v24 = vrot.slane %v4273_v60, %v5720_v42  ;;  %v4302_v2 = vcombine.low %v4280_v13, %v4287_v15 }
 0x331   : > { %v4421_v55 = vadd.s32 4294967288, %v6478_v45  ;;  %v4428_v17 = vadd.s32 4294967280, %v6478_v45  ;;  %v4419_v20 = vsub.s32 %v6478_v45, %v5107_v5  ;;  %v4435_v8 = vadd.s32 4294967272, %v6478_v45 }
 0x332   : > { %4407 = vperm.xlu0 %4977, %v4220_v14   ;;  %v4303_v19 = vcombine.low %v4294_v56, %v4301_v24  ;;  %v4310_v16 = vrot.slane %v4302_v2, %v5720_v42  ;;  %v4442_v52 = vadd.s32 4294967264, %v6478_v45  ;;  %v4449_v21 = vadd.s32 4294967256, %v6478_v45 }
 0x333   : > { %v6457_v6 = vpop.permute.xlu1 %4332  ;;  %v4424_v48 = vsub.s32 %v4421_v55, %v5107_v5  ;;  %v4431_v41 = vsub.s32 %v4428_v17, %v5107_v5  ;;  %v4420_v26 = vrot.slane %v4321_v59, %v4419_v20  ;;  %v4438_v29 = vsub.s32 %v4435_v8, %v5107_v5 }
 0x334   : > { %v4317_v44 = vrot.slane %v4303_v19, %v5720_v42  ;;  %v4445_v18 = vsub.s32 %v4442_v52, %v5107_v5  ;;  %v4452_v37 = vsub.s32 %v4449_v21, %v5107_v5  ;;  %v4456_v62 = vadd.s32 4294967248, %v6478_v45 }
 0x335   : > { %v4425_v46 = vrot.slane %v4324_v36, %v4424_v48  ;;  %v4432_v61 = vrot.slane %v4327_v40, %v4431_v41  ;;  %v4439_v57 = vrot.slane %v6453_v35, %v4438_v29  ;;  %v4463_v38 = vadd.s32 4294967240, %v6478_v45 }
 0x336   : > { %v4318_v27 = vcombine.low %v4310_v16, %v4317_v44  ;;  %v4446_v56 = vrot.slane %v6457_v6, %v4445_v18  ;;  %v4470_v14 = vadd.s32 4294967232, %v6478_v45  ;;  %v4477_v2 = vadd.s32 4294967224, %v6478_v45 }
 0x337   : > { %v6459_v54 = vpop.permute.xlu1 %4341  ;;  %v4427_v39 = vsel %vm4426_vm1, %v4425_v46, %v4420_v26  ;;  %v4459_v16 = vsub.s32 %v4456_v62, %v5107_v5  ;;  %v4466_v40 = vsub.s32 %v4463_v38, %v5107_v5  ;;  %v4491_v52 = vadd.s32 4294967208, %v6478_v45 }
 0x338   : > { %4413 = vperm.xlu0 %4977, %v4318_v27   ;;  %v4434_v15 = vsel %vm4433_vm2, %v4432_v61, %v4427_v39  ;;  %v4473_v59 = vsub.s32 %v4470_v14, %v5107_v5  ;;  %v4505_v46 = vadd.s32 4294967192, %v6478_v45  ;;  %v4519_v26 = vadd.s32 4294967176, %v6478_v45 }
 0x339   : > { %v4441_v27 = vsel %vm4440_vm3, %v4439_v57, %v4434_v15 }
 0x33a   : > { %v4448_v36 = vsel %vm4447_vm4, %v4446_v56, %v4441_v27  ;;  %v4522_v57 = vsub.s32 %v4519_v26, %v5107_v5 }
 0x33b   : > { %v6461_v12 = vpop.permute.xlu1 %4335 }
 0x33c   : > { %v4453_v24 = vrot.slane %v6461_v12, %v4452_v37 }
 0x33e   : > { %v4455_v12 = vsel %vm4454_vm5, %v4453_v24, %v4448_v36 }
 0x33f   : > { %v6465_v23 = vpop.permute.xlu1 %4350 }
 0x343   : > { %v6467_v9 = vpop.permute.xlu1 %4344 }
 0x344   : > { %v4474_v8 = vrot.slane %v6467_v9, %v4473_v59 }
 0x347   : > { %v6471_v1 = vpop.permute.xlu1 %4353 }
 0x34b   : > { %v6473_v31 = vpop.permute.xlu1 %4347 }
 0x351   : > { %v4375_v63 = vpop.permute.xlu0 %4374 }
 0x352   : > { %v4538_v7 = vrot.slane %v4375_v63, %v4431_v41 }
 0x355   : > { %v4369_v22 = vpop.permute.xlu1 %4368 }
 0x356   : > { %v4529_v28 = vrot.slane %v4369_v22, %v4419_v20  ;;  %v4484_v22 = vadd.s32 4294967216, %v6478_v45 }
 0x35b   : > { %v4378_v43 = vpop.permute.xlu0 %4377 }
 0x35c   : > { %v4543_v47 = vrot.slane %v4378_v43, %v4438_v29 }
 0x361   : > { %v4372_v10 = vpop.permute.xlu1 %4371 }
 0x362   : > { %v4533_v0 = vrot.slane %v4372_v10, %v4424_v48  ;;  %v4467_v48 = vrot.slane %v6459_v54, %v4466_v40  ;;  %v4487_v54 = vsub.s32 %v4484_v22, %v5107_v5 }
 0x364   : > { %v4534_v33 = vsel %vm4426_vm1, %v4533_v0, %v4529_v28  ;;  %v4498_v0 = vadd.s32 4294967200, %v6478_v45  ;;  %v4488_v61 = vrot.slane %v6465_v23, %v4487_v54 }
 0x365   : > { %v4539_v32 = vsel %vm4433_vm2, %v4538_v7, %v4534_v33  ;;  %v4494_v7 = vsub.s32 %v4491_v52, %v5107_v5 }
 0x366   : > { %v6497_v25 = vpop.permute.xlu1 %4356  ;;  %v4544_v19 = vsel %vm4440_vm3, %v4543_v47, %v4539_v32  ;;  %v4501_v33 = vsub.s32 %v4498_v0, %v5107_v5 }
 0x367   : > { %v4495_v15 = vrot.slane %v6471_v1, %v4494_v7 }
 0x36c   : > { %v6508_v6 = vpop.permute.xlu1 %4359 }
 0x371   : > { %v6463_v58 = vpop.permute.xlu0 %4386 }
 0x372   : > { %v4558_v63 = vrot.slane %v6463_v58, %v4459_v16 }
 0x376   : > { %v4363_v28 = vpop.permute.xlu1 %4362 }
 0x37c   : > { %v4381_v49 = vpop.permute.xlu0 %4380 }
 0x37d   : > { %v4548_v53 = vrot.slane %v4381_v49, %v4445_v18  ;;  %v4480_v49 = vsub.s32 %v4477_v2, %v5107_v5 }
 0x37f   : > { %v4549_v44 = vsel %vm4447_vm4, %v4548_v53, %v4544_v19 }
 0x386   : > { %v6469_v4 = vpop.permute.xlu0 %4389 }
 0x387   : > { %v4563_v17 = vrot.slane %v6469_v4, %v4466_v40  ;;  %v4512_v4 = vadd.s32 4294967184, %v6478_v45 }
 0x389   : > { %v4515_v62 = vsub.s32 %v4512_v4, %v5107_v5 }
 0x38b   : > { %v4516_v14 = vrot.slane %v4363_v28, %v4515_v62 }
 0x38c   : > { %v4384_v11 = vpop.permute.xlu0 %4383 }
 0x38d   : > { %v4553_v60 = vrot.slane %v4384_v11, %v4452_v37  ;;  %v4460_v11 = vrot.slane %v6455_v30, %v4459_v16  ;;  %v4481_v30 = vrot.slane %v6473_v31, %v4480_v49  ;;  %v4508_v37 = vsub.s32 %v4505_v46, %v5107_v5 }
 0x38f   : > { %v4554_v35 = vsel %vm4454_vm5, %v4553_v60, %v4549_v44  ;;  %v4462_v58 = vsel %vm4461_vm6, %v4460_v11, %v4455_v12  ;;  %v4509_v23 = vrot.slane %v6508_v6, %v4508_v37 }
 0x390   : > { %v4559_v55 = vsel %vm4461_vm6, %v4558_v63, %v4554_v35  ;;  %v4469_v9 = vsel %vm4468_vm7, %v4467_v48, %v4462_v58 }
 0x391   : > { %v6475_v51 = vpop.permute.xlu0 %4398  ;;  %v4476_v31 = vsel %vm4475_vm8, %v4474_v8, %v4469_v9 }
 0x392   : > { %v4578_v18 = vrot.slane %v6475_v51, %v4487_v54  ;;  %v4483_v39 = vsel %vm4482_vm9, %v4481_v30, %v4476_v31  ;;  %v4502_v51 = vrot.slane %v6497_v25, %v4501_v33 }
 0x393   : > { %v4490_v60 = vsel %vm4489_vm10, %v4488_v61, %v4483_v39 }
 0x394   : > { %v4497_v2 = vsel %vm4496_vm11, %v4495_v15, %v4490_v60 }
 0x395   : > { %v4504_v19 = vsel %vm4503_vm12, %v4502_v51, %v4497_v2 }
 0x396   : > { %v4511_v44 = vsel %vm4510_vm13, %v4509_v23, %v4504_v19 }
 0x397   : > { %v6481_v50 = vpop.permute.xlu0 %4392  ;;  %v4518_v1 = vsel %vm4517_vm14, %v4516_v14, %v4511_v44 }
 0x398   : > { %v4568_v10 = vrot.slane %v6481_v50, %v4473_v59  ;;  %v4564_v50 = vsel %vm4468_vm7, %v4563_v17, %v4559_v55 }
 0x39a   : > { %v4569_v41 = vsel %vm4475_vm8, %v4568_v10, %v4564_v50 }
 0x39c   : > { %v6490_v3 = vpop.permute.xlu0 %4401 }
 0x39d   : > { %v4583_v38 = vrot.slane %v6490_v3, %v4494_v7 }
 0x3a2   : > { %v4396_v13 = vpop.permute.xlu0 %4395 }
 0x3a3   : > { %v4573_v20 = vrot.slane %v4396_v13, %v4480_v49  ;;  %v4366_v13 = vpop.permute.xlu1 %4365 }
 0x3a4   : > { %v4523_v5 = vrot.slane %v4366_v13, %v4522_v57 }
 0x3a5   : > { %v4574_v29 = vsel %vm4482_vm9, %v4573_v20, %v4569_v41 }
 0x3a6   : > { %v4579_v32 = vsel %vm4489_vm10, %v4578_v18, %v4574_v29  ;;  %v4525_v35 = vsel %vm4524_vm15, %v4523_v5, %v4518_v1 }
 0x3a7   : > { %v6511_v43 = vpop.permute.xlu0 %4410  ;;  %v4584_v56 = vsel %vm4496_vm11, %v4583_v38, %v4579_v32 }
 0x3a8   : > { %v4598_v16 = vrot.slane %v6511_v43, %v4515_v62 }
 0x3ac   : > { %v4405_v21 = vpop.permute.xlu0 %4404 }
 0x3ad   : > { %v4588_v53 = vrot.slane %v4405_v21, %v4501_v33 }
 0x3af   : > { %v4589_v24 = vsel %vm4503_vm12, %v4588_v53, %v4584_v56 }
 0x3b1   : > { %v4408_v45 = vpop.permute.xlu0 %4407 }
 0x3b2   : > { %v4593_v47 = vrot.slane %v4408_v45, %v4508_v37 }
 0x3b4   : > { %v4594_v3 = vsel %vm4510_vm13, %v4593_v47, %v4589_v24 }
 0x3b5   : > { %v4599_v40 = vsel %vm4517_vm14, %v4598_v16, %v4594_v3 }
 0x3b7   : > { %v4414_v25 = vpop.permute.xlu0 %4413 }
 0x3b8   : > { %v4603_v27 = vrot.slane %v4414_v25, %v4522_v57 }
 0x3ba   : > { %v4604_v36 = vsel %vm4524_vm15, %v4603_v27, %v4599_v40 }
 0x3bb   : > { %v4605_v59 = vcombine.low %v4525_v35, %v4604_v36 }
 0x3bd   : > { %v4612_v6 = vrot.slane %v4605_v59, %v5720_v42 }
 0x3bf   : > { %v4619_v63 = vrot.slane %v4612_v6, %v5720_v42 }
 0x3c1   : > { %4625 = vst.msk [vmem:[%s480_s17] sm:$0x3] %vm4623_vm0, %v4619_v63 }
 0x3c2 PF: > { %s23_s21 = sadd.s32 1, %s5010_s21   ;;  %s6577_s19 = smov %s5006_s20 }
 0x3c3   : > { %p20_p5 = scmp.ge.s32.totalorder %s23_s21, 4   ;;  %s6578_s20 = smov %s6580_s10 }
 0x3c5   :  { %22 = sbr.rel (!%p20_p5) target bundleno = 3 (0x3), region = 100 }

</bundles_post_ra>
